<compile_context>
chip_gen: v7x
topology: tpu7x:2x2x1
jax: 0.10.0
libtpu: 0.0.40
codegen_flags: <defaults>
</compile_context>

<pallas_src>
import functools

import numpy as np
import jax
import jax.numpy as jnp
from jax.experimental import pallas as pl
from jax.experimental.pallas import tpu as pltpu

FRAME_STACK = 4
NUM_HEADS = 8
EMBED = 512
DISCRETE_ACTION_DIMS = {"fire": 2}
HEAD_OUT_WIDTH = 128  # packed output: [fire logits (2) | value (1) | zero pad]


def _out_hw(h, k, s, p):
    return (h + 2 * p - k) // s + 1


# ---------------------------------------------------------------------------
# The single fused kernel
# ---------------------------------------------------------------------------
def _fortnite_fused_kernel(x_ref, s1_ref, s2_ref, s3_ref,
                           w1_ref, w2_ref, w3_ref, wfc_ref,
                           wvop_ref, wp2_ref, whead_ref, bias_ref,
                           o_ref, x3_ref, *, batch, p_count):
    bf16 = jnp.bfloat16

    def dot32(a, b):
        return jnp.dot(a, b, preferred_element_type=jnp.float32)

    # conv = relu( sum_t (S_t @ x) @ W_t + b ); S_t gathers rows (and zero-pads).
    def conv(x, s_ref, w_ref, brow, width):
        acc = dot32(dot32(s_ref[0], x).astype(bf16), w_ref[0])
        for t in range(1, 9):
            acc = acc + dot32(dot32(s_ref[t], x).astype(bf16), w_ref[t])
        acc = acc + bias_ref[brow:brow + 1, 0:width]
        return jnp.maximum(acc, 0.0).astype(bf16)

    x = x_ref[...]                                  # (B*H*W, Cin) bf16, NHWC row order
    h1 = conv(x, s1_ref, w1_ref, 0, 32)             # (B*H1*W1, 32)
    h2 = conv(h1, s2_ref, w2_ref, 1, 64)            # (B*H2*W2, 64)
    x3_ref[...] = conv(h2, s3_ref, w3_ref, 2, 64)   # (P*B, 64), rows ordered (p, b)

    # fc over the PyTorch (C,H,W)-flattened conv features: loop over spatial p.
    fc = dot32(x3_ref[pl.ds(0, batch), :], wfc_ref[0])
    for p in range(1, p_count):
        fc = fc + dot32(x3_ref[pl.ds(p * batch, batch), :], wfc_ref[p])
    fc = fc + bias_ref[3:4, :]                       # (B, 512) f32

    # length-1 MHA: softmax over the single key == 1.0 -> context == V projection.
    E = EMBED
    wv = wvop_ref[:, 0:E]
    wo = wvop_ref[:, E:2 * E]
    wp1 = wvop_ref[:, 2 * E:2 * E + 256]
    v = dot32(fc.astype(bf16), wv) + bias_ref[4:5, :]
    feats = dot32(v.astype(bf16), wo) + bias_ref[5:6, :]

    # ReactivePolicy common layers
    p1 = jnp.maximum(dot32(feats.astype(bf16), wp1) + bias_ref[6:7, 0:256], 0.0)
    p2 = jnp.maximum(dot32(p1.astype(bf16), wp2_ref[...]) + bias_ref[7:8, 0:256], 0.0)

    # packed lane-dense heads: cols 0:2 = fire logits, col 2 = value
    comb = (dot32(p2.astype(bf16), whead_ref[0:256, :])
            + dot32(feats.astype(bf16), whead_ref[256:768, :])
            + bias_ref[8:9, 0:HEAD_OUT_WIDTH])
    o_ref[...] = comb.astype(o_ref.dtype)


def _vspec(shape):
    nd = len(shape)
    return pl.BlockSpec(tuple(shape), lambda *_args, _nd=nd: (0,) * _nd)


# ---------------------------------------------------------------------------
# FortniteAgent.forward  (kernel path)
# ---------------------------------------------------------------------------
def fortnite_agent_forward(kp, state):
    """state: (B, in_ch*FRAME_STACK, H, W) NCHW f32 -> ({'fire': (B,2)}, (B,1))."""
    B, C, H, W = state.shape
    H1, W1 = _out_hw(H, 3, 2, 1), _out_hw(W, 3, 2, 1)
    H2, W2 = _out_hw(H1, 3, 2, 1), _out_hw(W1, 3, 2, 1)
    H3, W3 = _out_hw(H2, 3, 1, 1), _out_hw(W2, 3, 1, 1)
    P = H3 * W3
    C3 = 64

    # NCHW -> NHWC-flattened rows (b, h, w), channels in lanes; bf16 (tiny, exact-ish).
    x = jnp.transpose(state.astype(jnp.float32), (0, 2, 3, 1))
    x = x.reshape(B * H * W, C).astype(jnp.bfloat16)

    inputs = (x, kp["s1"], kp["s2"], kp["s3"],
              kp["conv1_w"], kp["conv2_w"], kp["conv3_w"], kp["fc_w"],
              kp["w_vop"], kp["w_p2"], kp["w_head"], kp["bias"])
    in_specs = [_vspec(a.shape) for a in inputs]
    bytes_accessed = int(sum(int(a.size) * a.dtype.itemsize for a in inputs)
                         + B * HEAD_OUT_WIDTH * 4)
    # rough MAC count * 2 (purely advisory)
    flops = 2 * (9 * (B * H1 * W1) * (B * H * W * C + C * 32)
                 + 9 * (B * H2 * W2) * (B * H1 * W1 * 32 + 32 * 64)
                 + 9 * (B * H3 * W3) * (B * H2 * W2 * 64 + 64 * 64)
                 + B * (P * 64 * EMBED + 2 * EMBED * EMBED
                        + EMBED * 256 + 256 * 256 + 768 * 128))

    comb = pl.pallas_call(
        functools.partial(_fortnite_fused_kernel, batch=B, p_count=P),
        out_shape=jax.ShapeDtypeStruct((B, HEAD_OUT_WIDTH), jnp.float32),
        grid=(1,),
        in_specs=in_specs,
        out_specs=pl.BlockSpec((B, HEAD_OUT_WIDTH), lambda i: (0, 0)),
        scratch_shapes=[pltpu.VMEM((P * B, C3), jnp.bfloat16)],
        compiler_params=pltpu.CompilerParams(
            dimension_semantics=("arbitrary",),
            vmem_limit_bytes=32 * 1024 * 1024),
        cost_estimate=pl.CostEstimate(flops=int(flops), transcendentals=0,
                                      bytes_accessed=bytes_accessed),
    )(*inputs)

    nf = DISCRETE_ACTION_DIMS["fire"]
    logits = {"fire": comb[:, :nf]}
    value = comb[:, nf:nf + 1]
    return logits, value


# ---------------------------------------------------------------------------
# Parameter init (PyTorch-layout shapes, deterministic)
# ---------------------------------------------------------------------------
def init_params(key, in_ch, H, W):
    C = in_ch * FRAME_STACK
    H1, W1 = _out_hw(H, 3, 2, 1), _out_hw(W, 3, 2, 1)
    H2, W2 = _out_hw(H1, 3, 2, 1), _out_hw(W1, 3, 2, 1)
    H3, W3 = _out_hw(H2, 3, 1, 1), _out_hw(W2, 3, 1, 1)
    feature_size = 64 * H3 * W3

    keys = iter(jax.random.split(key, 32))

    def nrm(shape, scale=0.05):
        return scale * jax.random.normal(next(keys), shape, dtype=jnp.float32)

    return {
        # PerceptionComponent
        "conv1_w": nrm((32, C, 3, 3)),  "conv1_b": nrm((32,)),
        "conv2_w": nrm((64, 32, 3, 3)), "conv2_b": nrm((64,)),
        "conv3_w": nrm((64, 64, 3, 3)), "conv3_b": nrm((64,)),
        "fc_w": nrm((EMBED, feature_size)), "fc_b": nrm((EMBED,)),
        "attn_in_w": nrm((3 * EMBED, EMBED)), "attn_in_b": nrm((3 * EMBED,)),
        "attn_out_w": nrm((EMBED, EMBED)),    "attn_out_b": nrm((EMBED,)),
        # ReactivePolicy
        "pol1_w": nrm((256, EMBED)), "pol1_b": nrm((256,)),
        "pol2_w": nrm((256, 256)),   "pol2_b": nrm((256,)),
        "head_fire_w": nrm((DISCRETE_ACTION_DIMS["fire"], 256)),
        "head_fire_b": nrm((DISCRETE_ACTION_DIMS["fire"],)),
        # ValueFunction
        "val_w": nrm((1, EMBED)), "val_b": nrm((1,)),
    }


# ---------------------------------------------------------------------------
# One-time conversion: PyTorch-layout params -> kernel layout
# ---------------------------------------------------------------------------
def _build_selection(B, Hi, Wi, Ho, Wo, stride, out_order):
    """0/1 tap-selection matrices (9, B*Ho*Wo, B*Hi*Wi); also encode zero padding."""
    S = np.zeros((9, B * Ho * Wo, B * Hi * Wi), np.float32)
    for ki in range(3):
        for kj in range(3):
            t = ki * 3 + kj
            for b in range(B):
                for ho in range(Ho):
                    for wo in range(Wo):
                        hi = stride * ho + ki - 1
                        wi = stride * wo + kj - 1
                        if 0 <= hi < Hi and 0 <= wi < Wi:
                            if out_order == "pb":
                                mo = (ho * Wo + wo) * B + b
                            else:  # "bhw"
                                mo = b * Ho * Wo + ho * Wo + wo
                            S[t, mo, b * Hi * Wi + hi * Wi + wi] = 1.0
    return S


def prepare_params(tp, input_shape):
    B, C, H, W = input_shape
    f32, bf16 = jnp.float32, jnp.bfloat16
    H1, W1 = _out_hw(H, 3, 2, 1), _out_hw(W, 3, 2, 1)
    H2, W2 = _out_hw(H1, 3, 2, 1), _out_hw(W1, 3, 2, 1)
    H3, W3 = _out_hw(H2, 3, 1, 1), _out_hw(W2, 3, 1, 1)
    P = H3 * W3
    C3 = tp["conv3_w"].shape[0]
    nf = DISCRETE_ACTION_DIMS["fire"]

    kp = {}

    # conv tap weights: (9, Cin, Cout), t = ki*3 + kj  (matches the S builder)
    for name in ("conv1", "conv2", "conv3"):
        w = tp[name + "_w"]                                   # (OC, IC, 3, 3)
        oc, ic = w.shape[0], w.shape[1]
        kp[name + "_w"] = jnp.transpose(w, (2, 3, 1, 0)).reshape(9, ic, oc).astype(bf16)

    # selection (gather) matrices, bf16 (exact 0/1)
    kp["s1"] = jnp.asarray(_build_selection(B, H, W, H1, W1, 2, "bhw")).astype(bf16)
    kp["s2"] = jnp.asarray(_build_selection(B, H1, W1, H2, W2, 2, "bhw")).astype(bf16)
    kp["s3"] = jnp.asarray(_build_selection(B, H2, W2, H3, W3, 1, "pb")).astype(bf16)

    # fc weight regrouped by conv3 spatial position p: (P, C3, 512)
    # PyTorch flatten feature index = c*P + p
    kp["fc_w"] = jnp.transpose(tp["fc_w"].reshape(EMBED, C3, P), (2, 1, 0)).astype(bf16)

    # MHA length-1: only the V in-proj + out-proj survive; pack [Wv | Wo | Wp1]
    wv = tp["attn_in_w"][2 * EMBED:3 * EMBED].T
    wo = tp["attn_out_w"].T
    wp1 = tp["pol1_w"].T
    kp["w_vop"] = jnp.concatenate([wv, wo, wp1], axis=1).astype(bf16)   # (512, 1280)
    kp["w_p2"] = tp["pol2_w"].T.astype(bf16)                            # (256, 256)

    # packed heads: rows 0:256 = fire head (cols 0:2), rows 256:768 = value head (col 2)
    whead = jnp.zeros((256 + EMBED, HEAD_OUT_WIDTH), f32)
    whead = whead.at[:256, :nf].set(tp["head_fire_w"].T)
    whead = whead.at[256:, nf].set(tp["val_w"][0])
    kp["w_head"] = whead.astype(bf16)

    # all biases packed into one (9, 512) f32 block
    bias = jnp.zeros((9, 512), f32)
    bias = bias.at[0, :32].set(tp["conv1_b"])
    bias = bias.at[1, :64].set(tp["conv2_b"])
    bias = bias.at[2, :64].set(tp["conv3_b"])
    bias = bias.at[3, :].set(tp["fc_b"])
    bias = bias.at[4, :].set(tp["attn_in_b"][2 * EMBED:3 * EMBED])
    bias = bias.at[5, :].set(tp["attn_out_b"])
    bias = bias.at[6, :256].set(tp["pol1_b"])
    bias = bias.at[7, :256].set(tp["pol2_b"])
    bias = bias.at[8, :nf].set(tp["head_fire_b"])
    bias = bias.at[8, nf].set(tp["val_b"][0])
    kp["bias"] = bias
    return kp


# ---------------------------------------------------------------------------
# Pure-JAX reference of the original PyTorch module (full per-head MHA math, f32)
# ---------------------------------------------------------------------------
def reference_forward(tp, state):
    with jax.default_matmul_precision("float32"):
        def conv(x, w, b, stride, pad):
            out = jax.lax.conv_general_dilated(
                x, w, window_strides=(stride, stride),
                padding=[(pad, pad), (pad, pad)],
                dimension_numbers=("NCHW", "OIHW", "NCHW"))
            return jax.nn.relu(out + b[None, :, None, None])

        x = conv(state, tp["conv1_w"], tp["conv1_b"], 2, 1)
        x = conv(x, tp["conv2_w"], tp["conv2_b"], 2, 1)
        x = conv(x, tp["conv3_w"], tp["conv3_b"], 1, 1)
        B = x.shape[0]
        x = x.reshape(B, -1)                                   # PyTorch (C,H,W) flatten
        x = x @ tp["fc_w"].T + tp["fc_b"]
        E, H = EMBED, NUM_HEADS
        Dh = E // H
        qkv = x @ tp["attn_in_w"].T + tp["attn_in_b"]
        q, k, v = qkv[:, :E], qkv[:, E:2 * E], qkv[:, 2 * E:]
        qh, kh, vh = (t.reshape(B, H, Dh) for t in (q, k, v))
        scores = jnp.sum(qh * kh, -1, keepdims=True) / jnp.sqrt(jnp.float32(Dh))
        attn = jax.nn.softmax(scores, axis=-1)                 # single key -> exactly 1.0
        feats = (attn * vh).reshape(B, E) @ tp["attn_out_w"].T + tp["attn_out_b"]
        h1 = jax.nn.relu(feats @ tp["pol1_w"].T + tp["pol1_b"])
        h2 = jax.nn.relu(h1 @ tp["pol2_w"].T + tp["pol2_b"])
        logits = h2 @ tp["head_fire_w"].T + tp["head_fire_b"]
        value = feats @ tp["val_w"].T + tp["val_b"]
        return logits, value


if __name__ == "__main__":
    # per-frame obs shape (1, 16, 16); frame-stacked state has 1*4 = 4 channels
    B, in_ch, H, W = 2, 1, 16, 16
    key = jax.random.PRNGKey(0)
    k_state, k_params = jax.random.split(key)

    state = jax.random.normal(k_state, (B, in_ch * FRAME_STACK, H, W), dtype=jnp.float32)
    torch_params = init_params(k_params, in_ch, H, W)
    kernel_params = prepare_params(torch_params, state.shape)

    fwd = jax.jit(fortnite_agent_forward)
    logits, value = fwd(kernel_params, state)
    jax.block_until_ready((logits, value))

    assert logits["fire"].shape == (B, DISCRETE_ACTION_DIMS["fire"])
    assert value.shape == (B, 1)

    # validate against the pure-JAX reference of the original module (bf16 weights in
    # the kernel path, f32 accumulation everywhere)
    ref_logits, ref_value = reference_forward(torch_params, state)
    assert jnp.allclose(logits["fire"], ref_logits, atol=3e-2, rtol=3e-2)
    assert jnp.allclose(value, ref_value, atol=3e-2, rtol=3e-2)

    print("KERNEL_OK")
</pallas_src>

<mosaic_0001>
module attributes {stable_mosaic.version = 11 : i64} {
  func.func @_fortnite_fused_kernel(%arg0: i32, %arg1: memref<512x4xbf16, #tpu.memory_space<vmem>>, %arg2: memref<9x128x512xbf16, #tpu.memory_space<vmem>>, %arg3: memref<9x32x128xbf16, #tpu.memory_space<vmem>>, %arg4: memref<9x32x32xbf16, #tpu.memory_space<vmem>>, %arg5: memref<9x4x32xbf16, #tpu.memory_space<vmem>>, %arg6: memref<9x32x64xbf16, #tpu.memory_space<vmem>>, %arg7: memref<9x64x64xbf16, #tpu.memory_space<vmem>>, %arg8: memref<16x64x512xbf16, #tpu.memory_space<vmem>>, %arg9: memref<512x1280xbf16, #tpu.memory_space<vmem>>, %arg10: memref<256x256xbf16, #tpu.memory_space<vmem>>, %arg11: memref<768x128xbf16, #tpu.memory_space<vmem>>, %arg12: memref<9x512xf32, #tpu.memory_space<vmem>>, %arg13: memref<2x128xf32, #tpu.memory_space<vmem>>, %arg14: memref<32x64xbf16, #tpu.memory_space<vmem>>) attributes {dimension_semantics = [#tpu.dimension_semantics<arbitrary>], iteration_bounds = array<i64: 1>, scalar_prefetch = 0 : i64, scratch_operands = 1 : i64, tpu.core_type = #tpu.core_type<tc>, window_params = [{pipeline_mode = #tpu.pipeline_mode<synchronous>, transform_indices = @transform_0, window_bounds = array<i64: 512, 4>}, {pipeline_mode = #tpu.pipeline_mode<synchronous>, transform_indices = @transform_1, window_bounds = array<i64: 9, 128, 512>}, {pipeline_mode = #tpu.pipeline_mode<synchronous>, transform_indices = @transform_2, window_bounds = array<i64: 9, 32, 128>}, {pipeline_mode = #tpu.pipeline_mode<synchronous>, transform_indices = @transform_3, window_bounds = array<i64: 9, 32, 32>}, {pipeline_mode = #tpu.pipeline_mode<synchronous>, transform_indices = @transform_4, window_bounds = array<i64: 9, 4, 32>}, {pipeline_mode = #tpu.pipeline_mode<synchronous>, transform_indices = @transform_5, window_bounds = array<i64: 9, 32, 64>}, {pipeline_mode = #tpu.pipeline_mode<synchronous>, transform_indices = @transform_6, window_bounds = array<i64: 9, 64, 64>}, {pipeline_mode = #tpu.pipeline_mode<synchronous>, transform_indices = @transform_7, window_bounds = array<i64: 16, 64, 512>}, {pipeline_mode = #tpu.pipeline_mode<synchronous>, transform_indices = @transform_8, window_bounds = array<i64: 512, 1280>}, {pipeline_mode = #tpu.pipeline_mode<synchronous>, transform_indices = @transform_9, window_bounds = array<i64: 256, 256>}, {pipeline_mode = #tpu.pipeline_mode<synchronous>, transform_indices = @transform_10, window_bounds = array<i64: 768, 128>}, {pipeline_mode = #tpu.pipeline_mode<synchronous>, transform_indices = @transform_11, window_bounds = array<i64: 9, 512>}, {pipeline_mode = #tpu.pipeline_mode<synchronous>, transform_indices = @transform_12, window_bounds = array<i64: 2, 128>}]} {
    %c0 = arith.constant 0 : index
    %c0_0 = arith.constant 0 : index
    %0 = vector.load %arg1[%c0, %c0_0] : memref<512x4xbf16, #tpu.memory_space<vmem>>, vector<512x4xbf16>
    %c0_1 = arith.constant 0 : index
    %c0_2 = arith.constant 0 : index
    %c0_3 = arith.constant 0 : index
    %1 = vector.load %arg2[%c0_1, %c0_2, %c0_3] : memref<9x128x512xbf16, #tpu.memory_space<vmem>>, vector<1x128x512xbf16>
    %2 = vector.shape_cast %1 : vector<1x128x512xbf16> to vector<128x512xbf16>
    %cst = arith.constant dense<0.000000e+00> : vector<128x4xf32>
    %3 = tpu.matmul %2, %0, %cst {dimension_numbers = #tpu.dot_dimension_numbers<[1], [0], [0], [1], [0, 0, 1, 1], [], []>} : vector<128x512xbf16>, vector<512x4xbf16>, vector<128x4xf32> -> vector<128x4xf32>
    %4 = arith.truncf %3 : vector<128x4xf32> to vector<128x4xbf16>
    %c0_4 = arith.constant 0 : index
    %c0_5 = arith.constant 0 : index
    %c0_6 = arith.constant 0 : index
    %5 = vector.load %arg5[%c0_4, %c0_5, %c0_6] : memref<9x4x32xbf16, #tpu.memory_space<vmem>>, vector<1x4x32xbf16>
    %6 = vector.shape_cast %5 : vector<1x4x32xbf16> to vector<4x32xbf16>
    %cst_7 = arith.constant dense<0.000000e+00> : vector<128x32xf32>
    %7 = tpu.matmul %4, %6, %cst_7 {dimension_numbers = #tpu.dot_dimension_numbers<[1], [0], [0], [1], [0, 0, 1, 1], [], []>} : vector<128x4xbf16>, vector<4x32xbf16>, vector<128x32xf32> -> vector<128x32xf32>
    %c1 = arith.constant 1 : index
    %c0_8 = arith.constant 0 : index
    %c0_9 = arith.constant 0 : index
    %8 = vector.load %arg2[%c1, %c0_8, %c0_9] : memref<9x128x512xbf16, #tpu.memory_space<vmem>>, vector<1x128x512xbf16>
    %9 = vector.shape_cast %8 : vector<1x128x512xbf16> to vector<128x512xbf16>
    %cst_10 = arith.constant dense<0.000000e+00> : vector<128x4xf32>
    %10 = tpu.matmul %9, %0, %cst_10 {dimension_numbers = #tpu.dot_dimension_numbers<[1], [0], [0], [1], [0, 0, 1, 1], [], []>} : vector<128x512xbf16>, vector<512x4xbf16>, vector<128x4xf32> -> vector<128x4xf32>
    %11 = arith.truncf %10 : vector<128x4xf32> to vector<128x4xbf16>
    %c1_11 = arith.constant 1 : index
    %c0_12 = arith.constant 0 : index
    %c0_13 = arith.constant 0 : index
    %12 = vector.load %arg5[%c1_11, %c0_12, %c0_13] : memref<9x4x32xbf16, #tpu.memory_space<vmem>>, vector<1x4x32xbf16>
    %13 = vector.shape_cast %12 : vector<1x4x32xbf16> to vector<4x32xbf16>
    %cst_14 = arith.constant dense<0.000000e+00> : vector<128x32xf32>
    %14 = tpu.matmul %11, %13, %cst_14 {dimension_numbers = #tpu.dot_dimension_numbers<[1], [0], [0], [1], [0, 0, 1, 1], [], []>} : vector<128x4xbf16>, vector<4x32xbf16>, vector<128x32xf32> -> vector<128x32xf32>
    %15 = arith.addf %7, %14 : vector<128x32xf32>
    %c2 = arith.constant 2 : index
    %c0_15 = arith.constant 0 : index
    %c0_16 = arith.constant 0 : index
    %16 = vector.load %arg2[%c2, %c0_15, %c0_16] : memref<9x128x512xbf16, #tpu.memory_space<vmem>>, vector<1x128x512xbf16>
    %17 = vector.shape_cast %16 : vector<1x128x512xbf16> to vector<128x512xbf16>
    %cst_17 = arith.constant dense<0.000000e+00> : vector<128x4xf32>
    %18 = tpu.matmul %17, %0, %cst_17 {dimension_numbers = #tpu.dot_dimension_numbers<[1], [0], [0], [1], [0, 0, 1, 1], [], []>} : vector<128x512xbf16>, vector<512x4xbf16>, vector<128x4xf32> -> vector<128x4xf32>
    %19 = arith.truncf %18 : vector<128x4xf32> to vector<128x4xbf16>
    %c2_18 = arith.constant 2 : index
    %c0_19 = arith.constant 0 : index
    %c0_20 = arith.constant 0 : index
    %20 = vector.load %arg5[%c2_18, %c0_19, %c0_20] : memref<9x4x32xbf16, #tpu.memory_space<vmem>>, vector<1x4x32xbf16>
    %21 = vector.shape_cast %20 : vector<1x4x32xbf16> to vector<4x32xbf16>
    %cst_21 = arith.constant dense<0.000000e+00> : vector<128x32xf32>
    %22 = tpu.matmul %19, %21, %cst_21 {dimension_numbers = #tpu.dot_dimension_numbers<[1], [0], [0], [1], [0, 0, 1, 1], [], []>} : vector<128x4xbf16>, vector<4x32xbf16>, vector<128x32xf32> -> vector<128x32xf32>
    %23 = arith.addf %15, %22 : vector<128x32xf32>
    %c3 = arith.constant 3 : index
    %c0_22 = arith.constant 0 : index
    %c0_23 = arith.constant 0 : index
    %24 = vector.load %arg2[%c3, %c0_22, %c0_23] : memref<9x128x512xbf16, #tpu.memory_space<vmem>>, vector<1x128x512xbf16>
    %25 = vector.shape_cast %24 : vector<1x128x512xbf16> to vector<128x512xbf16>
    %cst_24 = arith.constant dense<0.000000e+00> : vector<128x4xf32>
    %26 = tpu.matmul %25, %0, %cst_24 {dimension_numbers = #tpu.dot_dimension_numbers<[1], [0], [0], [1], [0, 0, 1, 1], [], []>} : vector<128x512xbf16>, vector<512x4xbf16>, vector<128x4xf32> -> vector<128x4xf32>
    %27 = arith.truncf %26 : vector<128x4xf32> to vector<128x4xbf16>
    %c3_25 = arith.constant 3 : index
    %c0_26 = arith.constant 0 : index
    %c0_27 = arith.constant 0 : index
    %28 = vector.load %arg5[%c3_25, %c0_26, %c0_27] : memref<9x4x32xbf16, #tpu.memory_space<vmem>>, vector<1x4x32xbf16>
    %29 = vector.shape_cast %28 : vector<1x4x32xbf16> to vector<4x32xbf16>
    %cst_28 = arith.constant dense<0.000000e+00> : vector<128x32xf32>
    %30 = tpu.matmul %27, %29, %cst_28 {dimension_numbers = #tpu.dot_dimension_numbers<[1], [0], [0], [1], [0, 0, 1, 1], [], []>} : vector<128x4xbf16>, vector<4x32xbf16>, vector<128x32xf32> -> vector<128x32xf32>
    %31 = arith.addf %23, %30 : vector<128x32xf32>
    %c4 = arith.constant 4 : index
    %c0_29 = arith.constant 0 : index
    %c0_30 = arith.constant 0 : index
    %32 = vector.load %arg2[%c4, %c0_29, %c0_30] : memref<9x128x512xbf16, #tpu.memory_space<vmem>>, vector<1x128x512xbf16>
    %33 = vector.shape_cast %32 : vector<1x128x512xbf16> to vector<128x512xbf16>
    %cst_31 = arith.constant dense<0.000000e+00> : vector<128x4xf32>
    %34 = tpu.matmul %33, %0, %cst_31 {dimension_numbers = #tpu.dot_dimension_numbers<[1], [0], [0], [1], [0, 0, 1, 1], [], []>} : vector<128x512xbf16>, vector<512x4xbf16>, vector<128x4xf32> -> vector<128x4xf32>
    %35 = arith.truncf %34 : vector<128x4xf32> to vector<128x4xbf16>
    %c4_32 = arith.constant 4 : index
    %c0_33 = arith.constant 0 : index
    %c0_34 = arith.constant 0 : index
    %36 = vector.load %arg5[%c4_32, %c0_33, %c0_34] : memref<9x4x32xbf16, #tpu.memory_space<vmem>>, vector<1x4x32xbf16>
    %37 = vector.shape_cast %36 : vector<1x4x32xbf16> to vector<4x32xbf16>
    %cst_35 = arith.constant dense<0.000000e+00> : vector<128x32xf32>
    %38 = tpu.matmul %35, %37, %cst_35 {dimension_numbers = #tpu.dot_dimension_numbers<[1], [0], [0], [1], [0, 0, 1, 1], [], []>} : vector<128x4xbf16>, vector<4x32xbf16>, vector<128x32xf32> -> vector<128x32xf32>
    %39 = arith.addf %31, %38 : vector<128x32xf32>
    %c5 = arith.constant 5 : index
    %c0_36 = arith.constant 0 : index
    %c0_37 = arith.constant 0 : index
    %40 = vector.load %arg2[%c5, %c0_36, %c0_37] : memref<9x128x512xbf16, #tpu.memory_space<vmem>>, vector<1x128x512xbf16>
    %41 = vector.shape_cast %40 : vector<1x128x512xbf16> to vector<128x512xbf16>
    %cst_38 = arith.constant dense<0.000000e+00> : vector<128x4xf32>
    %42 = tpu.matmul %41, %0, %cst_38 {dimension_numbers = #tpu.dot_dimension_numbers<[1], [0], [0], [1], [0, 0, 1, 1], [], []>} : vector<128x512xbf16>, vector<512x4xbf16>, vector<128x4xf32> -> vector<128x4xf32>
    %43 = arith.truncf %42 : vector<128x4xf32> to vector<128x4xbf16>
    %c5_39 = arith.constant 5 : index
    %c0_40 = arith.constant 0 : index
    %c0_41 = arith.constant 0 : index
    %44 = vector.load %arg5[%c5_39, %c0_40, %c0_41] : memref<9x4x32xbf16, #tpu.memory_space<vmem>>, vector<1x4x32xbf16>
    %45 = vector.shape_cast %44 : vector<1x4x32xbf16> to vector<4x32xbf16>
    %cst_42 = arith.constant dense<0.000000e+00> : vector<128x32xf32>
    %46 = tpu.matmul %43, %45, %cst_42 {dimension_numbers = #tpu.dot_dimension_numbers<[1], [0], [0], [1], [0, 0, 1, 1], [], []>} : vector<128x4xbf16>, vector<4x32xbf16>, vector<128x32xf32> -> vector<128x32xf32>
    %47 = arith.addf %39, %46 : vector<128x32xf32>
    %c6 = arith.constant 6 : index
    %c0_43 = arith.constant 0 : index
    %c0_44 = arith.constant 0 : index
    %48 = vector.load %arg2[%c6, %c0_43, %c0_44] : memref<9x128x512xbf16, #tpu.memory_space<vmem>>, vector<1x128x512xbf16>
    %49 = vector.shape_cast %48 : vector<1x128x512xbf16> to vector<128x512xbf16>
    %cst_45 = arith.constant dense<0.000000e+00> : vector<128x4xf32>
    %50 = tpu.matmul %49, %0, %cst_45 {dimension_numbers = #tpu.dot_dimension_numbers<[1], [0], [0], [1], [0, 0, 1, 1], [], []>} : vector<128x512xbf16>, vector<512x4xbf16>, vector<128x4xf32> -> vector<128x4xf32>
    %51 = arith.truncf %50 : vector<128x4xf32> to vector<128x4xbf16>
    %c6_46 = arith.constant 6 : index
    %c0_47 = arith.constant 0 : index
    %c0_48 = arith.constant 0 : index
    %52 = vector.load %arg5[%c6_46, %c0_47, %c0_48] : memref<9x4x32xbf16, #tpu.memory_space<vmem>>, vector<1x4x32xbf16>
    %53 = vector.shape_cast %52 : vector<1x4x32xbf16> to vector<4x32xbf16>
    %cst_49 = arith.constant dense<0.000000e+00> : vector<128x32xf32>
    %54 = tpu.matmul %51, %53, %cst_49 {dimension_numbers = #tpu.dot_dimension_numbers<[1], [0], [0], [1], [0, 0, 1, 1], [], []>} : vector<128x4xbf16>, vector<4x32xbf16>, vector<128x32xf32> -> vector<128x32xf32>
    %55 = arith.addf %47, %54 : vector<128x32xf32>
    %c7 = arith.constant 7 : index
    %c0_50 = arith.constant 0 : index
    %c0_51 = arith.constant 0 : index
    %56 = vector.load %arg2[%c7, %c0_50, %c0_51] : memref<9x128x512xbf16, #tpu.memory_space<vmem>>, vector<1x128x512xbf16>
    %57 = vector.shape_cast %56 : vector<1x128x512xbf16> to vector<128x512xbf16>
    %cst_52 = arith.constant dense<0.000000e+00> : vector<128x4xf32>
    %58 = tpu.matmul %57, %0, %cst_52 {dimension_numbers = #tpu.dot_dimension_numbers<[1], [0], [0], [1], [0, 0, 1, 1], [], []>} : vector<128x512xbf16>, vector<512x4xbf16>, vector<128x4xf32> -> vector<128x4xf32>
    %59 = arith.truncf %58 : vector<128x4xf32> to vector<128x4xbf16>
    %c7_53 = arith.constant 7 : index
    %c0_54 = arith.constant 0 : index
    %c0_55 = arith.constant 0 : index
    %60 = vector.load %arg5[%c7_53, %c0_54, %c0_55] : memref<9x4x32xbf16, #tpu.memory_space<vmem>>, vector<1x4x32xbf16>
    %61 = vector.shape_cast %60 : vector<1x4x32xbf16> to vector<4x32xbf16>
    %cst_56 = arith.constant dense<0.000000e+00> : vector<128x32xf32>
    %62 = tpu.matmul %59, %61, %cst_56 {dimension_numbers = #tpu.dot_dimension_numbers<[1], [0], [0], [1], [0, 0, 1, 1], [], []>} : vector<128x4xbf16>, vector<4x32xbf16>, vector<128x32xf32> -> vector<128x32xf32>
    %63 = arith.addf %55, %62 : vector<128x32xf32>
    %c8 = arith.constant 8 : index
    %c0_57 = arith.constant 0 : index
    %c0_58 = arith.constant 0 : index
    %64 = vector.load %arg2[%c8, %c0_57, %c0_58] : memref<9x128x512xbf16, #tpu.memory_space<vmem>>, vector<1x128x512xbf16>
    %65 = vector.shape_cast %64 : vector<1x128x512xbf16> to vector<128x512xbf16>
    %cst_59 = arith.constant dense<0.000000e+00> : vector<128x4xf32>
    %66 = tpu.matmul %65, %0, %cst_59 {dimension_numbers = #tpu.dot_dimension_numbers<[1], [0], [0], [1], [0, 0, 1, 1], [], []>} : vector<128x512xbf16>, vector<512x4xbf16>, vector<128x4xf32> -> vector<128x4xf32>
    %67 = arith.truncf %66 : vector<128x4xf32> to vector<128x4xbf16>
    %c8_60 = arith.constant 8 : index
    %c0_61 = arith.constant 0 : index
    %c0_62 = arith.constant 0 : index
    %68 = vector.load %arg5[%c8_60, %c0_61, %c0_62] : memref<9x4x32xbf16, #tpu.memory_space<vmem>>, vector<1x4x32xbf16>
    %69 = vector.shape_cast %68 : vector<1x4x32xbf16> to vector<4x32xbf16>
    %cst_63 = arith.constant dense<0.000000e+00> : vector<128x32xf32>
    %70 = tpu.matmul %67, %69, %cst_63 {dimension_numbers = #tpu.dot_dimension_numbers<[1], [0], [0], [1], [0, 0, 1, 1], [], []>} : vector<128x4xbf16>, vector<4x32xbf16>, vector<128x32xf32> -> vector<128x32xf32>
    %71 = arith.addf %63, %70 : vector<128x32xf32>
    %c0_64 = arith.constant 0 : index
    %c0_65 = arith.constant 0 : index
    %72 = vector.load %arg12[%c0_64, %c0_65] : memref<9x512xf32, #tpu.memory_space<vmem>>, vector<1x32xf32>
    %73 = vector.broadcast %72 : vector<1x32xf32> to vector<128x32xf32>
    %74 = arith.addf %71, %73 : vector<128x32xf32>
    %cst_66 = arith.constant 0.000000e+00 : f32
    %75 = vector.broadcast %cst_66 : f32 to vector<128x32xf32>
    %76 = arith.maximumf %74, %75 : vector<128x32xf32>
    %77 = arith.truncf %76 : vector<128x32xf32> to vector<128x32xbf16>
    %c0_67 = arith.constant 0 : index
    %c0_68 = arith.constant 0 : index
    %c0_69 = arith.constant 0 : index
    %78 = vector.load %arg3[%c0_67, %c0_68, %c0_69] : memref<9x32x128xbf16, #tpu.memory_space<vmem>>, vector<1x32x128xbf16>
    %79 = vector.shape_cast %78 : vector<1x32x128xbf16> to vector<32x128xbf16>
    %cst_70 = arith.constant dense<0.000000e+00> : vector<32x32xf32>
    %80 = tpu.matmul %79, %77, %cst_70 {dimension_numbers = #tpu.dot_dimension_numbers<[1], [0], [0], [1], [0, 0, 1, 1], [], []>} : vector<32x128xbf16>, vector<128x32xbf16>, vector<32x32xf32> -> vector<32x32xf32>
    %81 = arith.truncf %80 : vector<32x32xf32> to vector<32x32xbf16>
    %c0_71 = arith.constant 0 : index
    %c0_72 = arith.constant 0 : index
    %c0_73 = arith.constant 0 : index
    %82 = vector.load %arg6[%c0_71, %c0_72, %c0_73] : memref<9x32x64xbf16, #tpu.memory_space<vmem>>, vector<1x32x64xbf16>
    %83 = vector.shape_cast %82 : vector<1x32x64xbf16> to vector<32x64xbf16>
    %cst_74 = arith.constant dense<0.000000e+00> : vector<32x64xf32>
    %84 = tpu.matmul %81, %83, %cst_74 {dimension_numbers = #tpu.dot_dimension_numbers<[1], [0], [0], [1], [0, 0, 1, 1], [], []>} : vector<32x32xbf16>, vector<32x64xbf16>, vector<32x64xf32> -> vector<32x64xf32>
    %c1_75 = arith.constant 1 : index
    %c0_76 = arith.constant 0 : index
    %c0_77 = arith.constant 0 : index
    %85 = vector.load %arg3[%c1_75, %c0_76, %c0_77] : memref<9x32x128xbf16, #tpu.memory_space<vmem>>, vector<1x32x128xbf16>
    %86 = vector.shape_cast %85 : vector<1x32x128xbf16> to vector<32x128xbf16>
    %cst_78 = arith.constant dense<0.000000e+00> : vector<32x32xf32>
    %87 = tpu.matmul %86, %77, %cst_78 {dimension_numbers = #tpu.dot_dimension_numbers<[1], [0], [0], [1], [0, 0, 1, 1], [], []>} : vector<32x128xbf16>, vector<128x32xbf16>, vector<32x32xf32> -> vector<32x32xf32>
    %88 = arith.truncf %87 : vector<32x32xf32> to vector<32x32xbf16>
    %c1_79 = arith.constant 1 : index
    %c0_80 = arith.constant 0 : index
    %c0_81 = arith.constant 0 : index
    %89 = vector.load %arg6[%c1_79, %c0_80, %c0_81] : memref<9x32x64xbf16, #tpu.memory_space<vmem>>, vector<1x32x64xbf16>
    %90 = vector.shape_cast %89 : vector<1x32x64xbf16> to vector<32x64xbf16>
    %cst_82 = arith.constant dense<0.000000e+00> : vector<32x64xf32>
    %91 = tpu.matmul %88, %90, %cst_82 {dimension_numbers = #tpu.dot_dimension_numbers<[1], [0], [0], [1], [0, 0, 1, 1], [], []>} : vector<32x32xbf16>, vector<32x64xbf16>, vector<32x64xf32> -> vector<32x64xf32>
    %92 = arith.addf %84, %91 : vector<32x64xf32>
    %c2_83 = arith.constant 2 : index
    %c0_84 = arith.constant 0 : index
    %c0_85 = arith.constant 0 : index
    %93 = vector.load %arg3[%c2_83, %c0_84, %c0_85] : memref<9x32x128xbf16, #tpu.memory_space<vmem>>, vector<1x32x128xbf16>
    %94 = vector.shape_cast %93 : vector<1x32x128xbf16> to vector<32x128xbf16>
    %cst_86 = arith.constant dense<0.000000e+00> : vector<32x32xf32>
    %95 = tpu.matmul %94, %77, %cst_86 {dimension_numbers = #tpu.dot_dimension_numbers<[1], [0], [0], [1], [0, 0, 1, 1], [], []>} : vector<32x128xbf16>, vector<128x32xbf16>, vector<32x32xf32> -> vector<32x32xf32>
    %96 = arith.truncf %95 : vector<32x32xf32> to vector<32x32xbf16>
    %c2_87 = arith.constant 2 : index
    %c0_88 = arith.constant 0 : index
    %c0_89 = arith.constant 0 : index
    %97 = vector.load %arg6[%c2_87, %c0_88, %c0_89] : memref<9x32x64xbf16, #tpu.memory_space<vmem>>, vector<1x32x64xbf16>
    %98 = vector.shape_cast %97 : vector<1x32x64xbf16> to vector<32x64xbf16>
    %cst_90 = arith.constant dense<0.000000e+00> : vector<32x64xf32>
    %99 = tpu.matmul %96, %98, %cst_90 {dimension_numbers = #tpu.dot_dimension_numbers<[1], [0], [0], [1], [0, 0, 1, 1], [], []>} : vector<32x32xbf16>, vector<32x64xbf16>, vector<32x64xf32> -> vector<32x64xf32>
    %100 = arith.addf %92, %99 : vector<32x64xf32>
    %c3_91 = arith.constant 3 : index
    %c0_92 = arith.constant 0 : index
    %c0_93 = arith.constant 0 : index
    %101 = vector.load %arg3[%c3_91, %c0_92, %c0_93] : memref<9x32x128xbf16, #tpu.memory_space<vmem>>, vector<1x32x128xbf16>
    %102 = vector.shape_cast %101 : vector<1x32x128xbf16> to vector<32x128xbf16>
    %cst_94 = arith.constant dense<0.000000e+00> : vector<32x32xf32>
    %103 = tpu.matmul %102, %77, %cst_94 {dimension_numbers = #tpu.dot_dimension_numbers<[1], [0], [0], [1], [0, 0, 1, 1], [], []>} : vector<32x128xbf16>, vector<128x32xbf16>, vector<32x32xf32> -> vector<32x32xf32>
    %104 = arith.truncf %103 : vector<32x32xf32> to vector<32x32xbf16>
    %c3_95 = arith.constant 3 : index
    %c0_96 = arith.constant 0 : index
    %c0_97 = arith.constant 0 : index
    %105 = vector.load %arg6[%c3_95, %c0_96, %c0_97] : memref<9x32x64xbf16, #tpu.memory_space<vmem>>, vector<1x32x64xbf16>
    %106 = vector.shape_cast %105 : vector<1x32x64xbf16> to vector<32x64xbf16>
    %cst_98 = arith.constant dense<0.000000e+00> : vector<32x64xf32>
    %107 = tpu.matmul %104, %106, %cst_98 {dimension_numbers = #tpu.dot_dimension_numbers<[1], [0], [0], [1], [0, 0, 1, 1], [], []>} : vector<32x32xbf16>, vector<32x64xbf16>, vector<32x64xf32> -> vector<32x64xf32>
    %108 = arith.addf %100, %107 : vector<32x64xf32>
    %c4_99 = arith.constant 4 : index
    %c0_100 = arith.constant 0 : index
    %c0_101 = arith.constant 0 : index
    %109 = vector.load %arg3[%c4_99, %c0_100, %c0_101] : memref<9x32x128xbf16, #tpu.memory_space<vmem>>, vector<1x32x128xbf16>
    %110 = vector.shape_cast %109 : vector<1x32x128xbf16> to vector<32x128xbf16>
    %cst_102 = arith.constant dense<0.000000e+00> : vector<32x32xf32>
    %111 = tpu.matmul %110, %77, %cst_102 {dimension_numbers = #tpu.dot_dimension_numbers<[1], [0], [0], [1], [0, 0, 1, 1], [], []>} : vector<32x128xbf16>, vector<128x32xbf16>, vector<32x32xf32> -> vector<32x32xf32>
    %112 = arith.truncf %111 : vector<32x32xf32> to vector<32x32xbf16>
    %c4_103 = arith.constant 4 : index
    %c0_104 = arith.constant 0 : index
    %c0_105 = arith.constant 0 : index
    %113 = vector.load %arg6[%c4_103, %c0_104, %c0_105] : memref<9x32x64xbf16, #tpu.memory_space<vmem>>, vector<1x32x64xbf16>
    %114 = vector.shape_cast %113 : vector<1x32x64xbf16> to vector<32x64xbf16>
    %cst_106 = arith.constant dense<0.000000e+00> : vector<32x64xf32>
    %115 = tpu.matmul %112, %114, %cst_106 {dimension_numbers = #tpu.dot_dimension_numbers<[1], [0], [0], [1], [0, 0, 1, 1], [], []>} : vector<32x32xbf16>, vector<32x64xbf16>, vector<32x64xf32> -> vector<32x64xf32>
    %116 = arith.addf %108, %115 : vector<32x64xf32>
    %c5_107 = arith.constant 5 : index
    %c0_108 = arith.constant 0 : index
    %c0_109 = arith.constant 0 : index
    %117 = vector.load %arg3[%c5_107, %c0_108, %c0_109] : memref<9x32x128xbf16, #tpu.memory_space<vmem>>, vector<1x32x128xbf16>
    %118 = vector.shape_cast %117 : vector<1x32x128xbf16> to vector<32x128xbf16>
    %cst_110 = arith.constant dense<0.000000e+00> : vector<32x32xf32>
    %119 = tpu.matmul %118, %77, %cst_110 {dimension_numbers = #tpu.dot_dimension_numbers<[1], [0], [0], [1], [0, 0, 1, 1], [], []>} : vector<32x128xbf16>, vector<128x32xbf16>, vector<32x32xf32> -> vector<32x32xf32>
    %120 = arith.truncf %119 : vector<32x32xf32> to vector<32x32xbf16>
    %c5_111 = arith.constant 5 : index
    %c0_112 = arith.constant 0 : index
    %c0_113 = arith.constant 0 : index
    %121 = vector.load %arg6[%c5_111, %c0_112, %c0_113] : memref<9x32x64xbf16, #tpu.memory_space<vmem>>, vector<1x32x64xbf16>
    %122 = vector.shape_cast %121 : vector<1x32x64xbf16> to vector<32x64xbf16>
    %cst_114 = arith.constant dense<0.000000e+00> : vector<32x64xf32>
    %123 = tpu.matmul %120, %122, %cst_114 {dimension_numbers = #tpu.dot_dimension_numbers<[1], [0], [0], [1], [0, 0, 1, 1], [], []>} : vector<32x32xbf16>, vector<32x64xbf16>, vector<32x64xf32> -> vector<32x64xf32>
    %124 = arith.addf %116, %123 : vector<32x64xf32>
    %c6_115 = arith.constant 6 : index
    %c0_116 = arith.constant 0 : index
    %c0_117 = arith.constant 0 : index
    %125 = vector.load %arg3[%c6_115, %c0_116, %c0_117] : memref<9x32x128xbf16, #tpu.memory_space<vmem>>, vector<1x32x128xbf16>
    %126 = vector.shape_cast %125 : vector<1x32x128xbf16> to vector<32x128xbf16>
    %cst_118 = arith.constant dense<0.000000e+00> : vector<32x32xf32>
    %127 = tpu.matmul %126, %77, %cst_118 {dimension_numbers = #tpu.dot_dimension_numbers<[1], [0], [0], [1], [0, 0, 1, 1], [], []>} : vector<32x128xbf16>, vector<128x32xbf16>, vector<32x32xf32> -> vector<32x32xf32>
    %128 = arith.truncf %127 : vector<32x32xf32> to vector<32x32xbf16>
    %c6_119 = arith.constant 6 : index
    %c0_120 = arith.constant 0 : index
    %c0_121 = arith.constant 0 : index
    %129 = vector.load %arg6[%c6_119, %c0_120, %c0_121] : memref<9x32x64xbf16, #tpu.memory_space<vmem>>, vector<1x32x64xbf16>
    %130 = vector.shape_cast %129 : vector<1x32x64xbf16> to vector<32x64xbf16>
    %cst_122 = arith.constant dense<0.000000e+00> : vector<32x64xf32>
    %131 = tpu.matmul %128, %130, %cst_122 {dimension_numbers = #tpu.dot_dimension_numbers<[1], [0], [0], [1], [0, 0, 1, 1], [], []>} : vector<32x32xbf16>, vector<32x64xbf16>, vector<32x64xf32> -> vector<32x64xf32>
    %132 = arith.addf %124, %131 : vector<32x64xf32>
    %c7_123 = arith.constant 7 : index
    %c0_124 = arith.constant 0 : index
    %c0_125 = arith.constant 0 : index
    %133 = vector.load %arg3[%c7_123, %c0_124, %c0_125] : memref<9x32x128xbf16, #tpu.memory_space<vmem>>, vector<1x32x128xbf16>
    %134 = vector.shape_cast %133 : vector<1x32x128xbf16> to vector<32x128xbf16>
    %cst_126 = arith.constant dense<0.000000e+00> : vector<32x32xf32>
    %135 = tpu.matmul %134, %77, %cst_126 {dimension_numbers = #tpu.dot_dimension_numbers<[1], [0], [0], [1], [0, 0, 1, 1], [], []>} : vector<32x128xbf16>, vector<128x32xbf16>, vector<32x32xf32> -> vector<32x32xf32>
    %136 = arith.truncf %135 : vector<32x32xf32> to vector<32x32xbf16>
    %c7_127 = arith.constant 7 : index
    %c0_128 = arith.constant 0 : index
    %c0_129 = arith.constant 0 : index
    %137 = vector.load %arg6[%c7_127, %c0_128, %c0_129] : memref<9x32x64xbf16, #tpu.memory_space<vmem>>, vector<1x32x64xbf16>
    %138 = vector.shape_cast %137 : vector<1x32x64xbf16> to vector<32x64xbf16>
    %cst_130 = arith.constant dense<0.000000e+00> : vector<32x64xf32>
    %139 = tpu.matmul %136, %138, %cst_130 {dimension_numbers = #tpu.dot_dimension_numbers<[1], [0], [0], [1], [0, 0, 1, 1], [], []>} : vector<32x32xbf16>, vector<32x64xbf16>, vector<32x64xf32> -> vector<32x64xf32>
    %140 = arith.addf %132, %139 : vector<32x64xf32>
    %c8_131 = arith.constant 8 : index
    %c0_132 = arith.constant 0 : index
    %c0_133 = arith.constant 0 : index
    %141 = vector.load %arg3[%c8_131, %c0_132, %c0_133] : memref<9x32x128xbf16, #tpu.memory_space<vmem>>, vector<1x32x128xbf16>
    %142 = vector.shape_cast %141 : vector<1x32x128xbf16> to vector<32x128xbf16>
    %cst_134 = arith.constant dense<0.000000e+00> : vector<32x32xf32>
    %143 = tpu.matmul %142, %77, %cst_134 {dimension_numbers = #tpu.dot_dimension_numbers<[1], [0], [0], [1], [0, 0, 1, 1], [], []>} : vector<32x128xbf16>, vector<128x32xbf16>, vector<32x32xf32> -> vector<32x32xf32>
    %144 = arith.truncf %143 : vector<32x32xf32> to vector<32x32xbf16>
    %c8_135 = arith.constant 8 : index
    %c0_136 = arith.constant 0 : index
    %c0_137 = arith.constant 0 : index
    %145 = vector.load %arg6[%c8_135, %c0_136, %c0_137] : memref<9x32x64xbf16, #tpu.memory_space<vmem>>, vector<1x32x64xbf16>
    %146 = vector.shape_cast %145 : vector<1x32x64xbf16> to vector<32x64xbf16>
    %cst_138 = arith.constant dense<0.000000e+00> : vector<32x64xf32>
    %147 = tpu.matmul %144, %146, %cst_138 {dimension_numbers = #tpu.dot_dimension_numbers<[1], [0], [0], [1], [0, 0, 1, 1], [], []>} : vector<32x32xbf16>, vector<32x64xbf16>, vector<32x64xf32> -> vector<32x64xf32>
    %148 = arith.addf %140, %147 : vector<32x64xf32>
    %c1_139 = arith.constant 1 : index
    %c0_140 = arith.constant 0 : index
    %149 = vector.load %arg12[%c1_139, %c0_140] : memref<9x512xf32, #tpu.memory_space<vmem>>, vector<1x64xf32>
    %150 = vector.broadcast %149 : vector<1x64xf32> to vector<32x64xf32>
    %151 = arith.addf %148, %150 : vector<32x64xf32>
    %cst_141 = arith.constant 0.000000e+00 : f32
    %152 = vector.broadcast %cst_141 : f32 to vector<32x64xf32>
    %153 = arith.maximumf %151, %152 : vector<32x64xf32>
    %154 = arith.truncf %153 : vector<32x64xf32> to vector<32x64xbf16>
    %c0_142 = arith.constant 0 : index
    %c0_143 = arith.constant 0 : index
    %c0_144 = arith.constant 0 : index
    %155 = vector.load %arg4[%c0_142, %c0_143, %c0_144] : memref<9x32x32xbf16, #tpu.memory_space<vmem>>, vector<1x32x32xbf16>
    %156 = vector.shape_cast %155 : vector<1x32x32xbf16> to vector<32x32xbf16>
    %cst_145 = arith.constant dense<0.000000e+00> : vector<32x64xf32>
    %157 = tpu.matmul %156, %154, %cst_145 {dimension_numbers = #tpu.dot_dimension_numbers<[1], [0], [0], [1], [0, 0, 1, 1], [], []>} : vector<32x32xbf16>, vector<32x64xbf16>, vector<32x64xf32> -> vector<32x64xf32>
    %158 = arith.truncf %157 : vector<32x64xf32> to vector<32x64xbf16>
    %c0_146 = arith.constant 0 : index
    %c0_147 = arith.constant 0 : index
    %c0_148 = arith.constant 0 : index
    %159 = vector.load %arg7[%c0_146, %c0_147, %c0_148] : memref<9x64x64xbf16, #tpu.memory_space<vmem>>, vector<1x64x64xbf16>
    %160 = vector.shape_cast %159 : vector<1x64x64xbf16> to vector<64x64xbf16>
    %cst_149 = arith.constant dense<0.000000e+00> : vector<32x64xf32>
    %161 = tpu.matmul %158, %160, %cst_149 {dimension_numbers = #tpu.dot_dimension_numbers<[1], [0], [0], [1], [0, 0, 1, 1], [], []>} : vector<32x64xbf16>, vector<64x64xbf16>, vector<32x64xf32> -> vector<32x64xf32>
    %c1_150 = arith.constant 1 : index
    %c0_151 = arith.constant 0 : index
    %c0_152 = arith.constant 0 : index
    %162 = vector.load %arg4[%c1_150, %c0_151, %c0_152] : memref<9x32x32xbf16, #tpu.memory_space<vmem>>, vector<1x32x32xbf16>
    %163 = vector.shape_cast %162 : vector<1x32x32xbf16> to vector<32x32xbf16>
    %cst_153 = arith.constant dense<0.000000e+00> : vector<32x64xf32>
    %164 = tpu.matmul %163, %154, %cst_153 {dimension_numbers = #tpu.dot_dimension_numbers<[1], [0], [0], [1], [0, 0, 1, 1], [], []>} : vector<32x32xbf16>, vector<32x64xbf16>, vector<32x64xf32> -> vector<32x64xf32>
    %165 = arith.truncf %164 : vector<32x64xf32> to vector<32x64xbf16>
    %c1_154 = arith.constant 1 : index
    %c0_155 = arith.constant 0 : index
    %c0_156 = arith.constant 0 : index
    %166 = vector.load %arg7[%c1_154, %c0_155, %c0_156] : memref<9x64x64xbf16, #tpu.memory_space<vmem>>, vector<1x64x64xbf16>
    %167 = vector.shape_cast %166 : vector<1x64x64xbf16> to vector<64x64xbf16>
    %cst_157 = arith.constant dense<0.000000e+00> : vector<32x64xf32>
    %168 = tpu.matmul %165, %167, %cst_157 {dimension_numbers = #tpu.dot_dimension_numbers<[1], [0], [0], [1], [0, 0, 1, 1], [], []>} : vector<32x64xbf16>, vector<64x64xbf16>, vector<32x64xf32> -> vector<32x64xf32>
    %169 = arith.addf %161, %168 : vector<32x64xf32>
    %c2_158 = arith.constant 2 : index
    %c0_159 = arith.constant 0 : index
    %c0_160 = arith.constant 0 : index
    %170 = vector.load %arg4[%c2_158, %c0_159, %c0_160] : memref<9x32x32xbf16, #tpu.memory_space<vmem>>, vector<1x32x32xbf16>
    %171 = vector.shape_cast %170 : vector<1x32x32xbf16> to vector<32x32xbf16>
    %cst_161 = arith.constant dense<0.000000e+00> : vector<32x64xf32>
    %172 = tpu.matmul %171, %154, %cst_161 {dimension_numbers = #tpu.dot_dimension_numbers<[1], [0], [0], [1], [0, 0, 1, 1], [], []>} : vector<32x32xbf16>, vector<32x64xbf16>, vector<32x64xf32> -> vector<32x64xf32>
    %173 = arith.truncf %172 : vector<32x64xf32> to vector<32x64xbf16>
    %c2_162 = arith.constant 2 : index
    %c0_163 = arith.constant 0 : index
    %c0_164 = arith.constant 0 : index
    %174 = vector.load %arg7[%c2_162, %c0_163, %c0_164] : memref<9x64x64xbf16, #tpu.memory_space<vmem>>, vector<1x64x64xbf16>
    %175 = vector.shape_cast %174 : vector<1x64x64xbf16> to vector<64x64xbf16>
    %cst_165 = arith.constant dense<0.000000e+00> : vector<32x64xf32>
    %176 = tpu.matmul %173, %175, %cst_165 {dimension_numbers = #tpu.dot_dimension_numbers<[1], [0], [0], [1], [0, 0, 1, 1], [], []>} : vector<32x64xbf16>, vector<64x64xbf16>, vector<32x64xf32> -> vector<32x64xf32>
    %177 = arith.addf %169, %176 : vector<32x64xf32>
    %c3_166 = arith.constant 3 : index
    %c0_167 = arith.constant 0 : index
    %c0_168 = arith.constant 0 : index
    %178 = vector.load %arg4[%c3_166, %c0_167, %c0_168] : memref<9x32x32xbf16, #tpu.memory_space<vmem>>, vector<1x32x32xbf16>
    %179 = vector.shape_cast %178 : vector<1x32x32xbf16> to vector<32x32xbf16>
    %cst_169 = arith.constant dense<0.000000e+00> : vector<32x64xf32>
    %180 = tpu.matmul %179, %154, %cst_169 {dimension_numbers = #tpu.dot_dimension_numbers<[1], [0], [0], [1], [0, 0, 1, 1], [], []>} : vector<32x32xbf16>, vector<32x64xbf16>, vector<32x64xf32> -> vector<32x64xf32>
    %181 = arith.truncf %180 : vector<32x64xf32> to vector<32x64xbf16>
    %c3_170 = arith.constant 3 : index
    %c0_171 = arith.constant 0 : index
    %c0_172 = arith.constant 0 : index
    %182 = vector.load %arg7[%c3_170, %c0_171, %c0_172] : memref<9x64x64xbf16, #tpu.memory_space<vmem>>, vector<1x64x64xbf16>
    %183 = vector.shape_cast %182 : vector<1x64x64xbf16> to vector<64x64xbf16>
    %cst_173 = arith.constant dense<0.000000e+00> : vector<32x64xf32>
    %184 = tpu.matmul %181, %183, %cst_173 {dimension_numbers = #tpu.dot_dimension_numbers<[1], [0], [0], [1], [0, 0, 1, 1], [], []>} : vector<32x64xbf16>, vector<64x64xbf16>, vector<32x64xf32> -> vector<32x64xf32>
    %185 = arith.addf %177, %184 : vector<32x64xf32>
    %c4_174 = arith.constant 4 : index
    %c0_175 = arith.constant 0 : index
    %c0_176 = arith.constant 0 : index
    %186 = vector.load %arg4[%c4_174, %c0_175, %c0_176] : memref<9x32x32xbf16, #tpu.memory_space<vmem>>, vector<1x32x32xbf16>
    %187 = vector.shape_cast %186 : vector<1x32x32xbf16> to vector<32x32xbf16>
    %cst_177 = arith.constant dense<0.000000e+00> : vector<32x64xf32>
    %188 = tpu.matmul %187, %154, %cst_177 {dimension_numbers = #tpu.dot_dimension_numbers<[1], [0], [0], [1], [0, 0, 1, 1], [], []>} : vector<32x32xbf16>, vector<32x64xbf16>, vector<32x64xf32> -> vector<32x64xf32>
    %189 = arith.truncf %188 : vector<32x64xf32> to vector<32x64xbf16>
    %c4_178 = arith.constant 4 : index
    %c0_179 = arith.constant 0 : index
    %c0_180 = arith.constant 0 : index
    %190 = vector.load %arg7[%c4_178, %c0_179, %c0_180] : memref<9x64x64xbf16, #tpu.memory_space<vmem>>, vector<1x64x64xbf16>
    %191 = vector.shape_cast %190 : vector<1x64x64xbf16> to vector<64x64xbf16>
    %cst_181 = arith.constant dense<0.000000e+00> : vector<32x64xf32>
    %192 = tpu.matmul %189, %191, %cst_181 {dimension_numbers = #tpu.dot_dimension_numbers<[1], [0], [0], [1], [0, 0, 1, 1], [], []>} : vector<32x64xbf16>, vector<64x64xbf16>, vector<32x64xf32> -> vector<32x64xf32>
    %193 = arith.addf %185, %192 : vector<32x64xf32>
    %c5_182 = arith.constant 5 : index
    %c0_183 = arith.constant 0 : index
    %c0_184 = arith.constant 0 : index
    %194 = vector.load %arg4[%c5_182, %c0_183, %c0_184] : memref<9x32x32xbf16, #tpu.memory_space<vmem>>, vector<1x32x32xbf16>
    %195 = vector.shape_cast %194 : vector<1x32x32xbf16> to vector<32x32xbf16>
    %cst_185 = arith.constant dense<0.000000e+00> : vector<32x64xf32>
    %196 = tpu.matmul %195, %154, %cst_185 {dimension_numbers = #tpu.dot_dimension_numbers<[1], [0], [0], [1], [0, 0, 1, 1], [], []>} : vector<32x32xbf16>, vector<32x64xbf16>, vector<32x64xf32> -> vector<32x64xf32>
    %197 = arith.truncf %196 : vector<32x64xf32> to vector<32x64xbf16>
    %c5_186 = arith.constant 5 : index
    %c0_187 = arith.constant 0 : index
    %c0_188 = arith.constant 0 : index
    %198 = vector.load %arg7[%c5_186, %c0_187, %c0_188] : memref<9x64x64xbf16, #tpu.memory_space<vmem>>, vector<1x64x64xbf16>
    %199 = vector.shape_cast %198 : vector<1x64x64xbf16> to vector<64x64xbf16>
    %cst_189 = arith.constant dense<0.000000e+00> : vector<32x64xf32>
    %200 = tpu.matmul %197, %199, %cst_189 {dimension_numbers = #tpu.dot_dimension_numbers<[1], [0], [0], [1], [0, 0, 1, 1], [], []>} : vector<32x64xbf16>, vector<64x64xbf16>, vector<32x64xf32> -> vector<32x64xf32>
    %201 = arith.addf %193, %200 : vector<32x64xf32>
    %c6_190 = arith.constant 6 : index
    %c0_191 = arith.constant 0 : index
    %c0_192 = arith.constant 0 : index
    %202 = vector.load %arg4[%c6_190, %c0_191, %c0_192] : memref<9x32x32xbf16, #tpu.memory_space<vmem>>, vector<1x32x32xbf16>
    %203 = vector.shape_cast %202 : vector<1x32x32xbf16> to vector<32x32xbf16>
    %cst_193 = arith.constant dense<0.000000e+00> : vector<32x64xf32>
    %204 = tpu.matmul %203, %154, %cst_193 {dimension_numbers = #tpu.dot_dimension_numbers<[1], [0], [0], [1], [0, 0, 1, 1], [], []>} : vector<32x32xbf16>, vector<32x64xbf16>, vector<32x64xf32> -> vector<32x64xf32>
    %205 = arith.truncf %204 : vector<32x64xf32> to vector<32x64xbf16>
    %c6_194 = arith.constant 6 : index
    %c0_195 = arith.constant 0 : index
    %c0_196 = arith.constant 0 : index
    %206 = vector.load %arg7[%c6_194, %c0_195, %c0_196] : memref<9x64x64xbf16, #tpu.memory_space<vmem>>, vector<1x64x64xbf16>
    %207 = vector.shape_cast %206 : vector<1x64x64xbf16> to vector<64x64xbf16>
    %cst_197 = arith.constant dense<0.000000e+00> : vector<32x64xf32>
    %208 = tpu.matmul %205, %207, %cst_197 {dimension_numbers = #tpu.dot_dimension_numbers<[1], [0], [0], [1], [0, 0, 1, 1], [], []>} : vector<32x64xbf16>, vector<64x64xbf16>, vector<32x64xf32> -> vector<32x64xf32>
    %209 = arith.addf %201, %208 : vector<32x64xf32>
    %c7_198 = arith.constant 7 : index
    %c0_199 = arith.constant 0 : index
    %c0_200 = arith.constant 0 : index
    %210 = vector.load %arg4[%c7_198, %c0_199, %c0_200] : memref<9x32x32xbf16, #tpu.memory_space<vmem>>, vector<1x32x32xbf16>
    %211 = vector.shape_cast %210 : vector<1x32x32xbf16> to vector<32x32xbf16>
    %cst_201 = arith.constant dense<0.000000e+00> : vector<32x64xf32>
    %212 = tpu.matmul %211, %154, %cst_201 {dimension_numbers = #tpu.dot_dimension_numbers<[1], [0], [0], [1], [0, 0, 1, 1], [], []>} : vector<32x32xbf16>, vector<32x64xbf16>, vector<32x64xf32> -> vector<32x64xf32>
    %213 = arith.truncf %212 : vector<32x64xf32> to vector<32x64xbf16>
    %c7_202 = arith.constant 7 : index
    %c0_203 = arith.constant 0 : index
    %c0_204 = arith.constant 0 : index
    %214 = vector.load %arg7[%c7_202, %c0_203, %c0_204] : memref<9x64x64xbf16, #tpu.memory_space<vmem>>, vector<1x64x64xbf16>
    %215 = vector.shape_cast %214 : vector<1x64x64xbf16> to vector<64x64xbf16>
    %cst_205 = arith.constant dense<0.000000e+00> : vector<32x64xf32>
    %216 = tpu.matmul %213, %215, %cst_205 {dimension_numbers = #tpu.dot_dimension_numbers<[1], [0], [0], [1], [0, 0, 1, 1], [], []>} : vector<32x64xbf16>, vector<64x64xbf16>, vector<32x64xf32> -> vector<32x64xf32>
    %217 = arith.addf %209, %216 : vector<32x64xf32>
    %c8_206 = arith.constant 8 : index
    %c0_207 = arith.constant 0 : index
    %c0_208 = arith.constant 0 : index
    %218 = vector.load %arg4[%c8_206, %c0_207, %c0_208] : memref<9x32x32xbf16, #tpu.memory_space<vmem>>, vector<1x32x32xbf16>
    %219 = vector.shape_cast %218 : vector<1x32x32xbf16> to vector<32x32xbf16>
    %cst_209 = arith.constant dense<0.000000e+00> : vector<32x64xf32>
    %220 = tpu.matmul %219, %154, %cst_209 {dimension_numbers = #tpu.dot_dimension_numbers<[1], [0], [0], [1], [0, 0, 1, 1], [], []>} : vector<32x32xbf16>, vector<32x64xbf16>, vector<32x64xf32> -> vector<32x64xf32>
    %221 = arith.truncf %220 : vector<32x64xf32> to vector<32x64xbf16>
    %c8_210 = arith.constant 8 : index
    %c0_211 = arith.constant 0 : index
    %c0_212 = arith.constant 0 : index
    %222 = vector.load %arg7[%c8_210, %c0_211, %c0_212] : memref<9x64x64xbf16, #tpu.memory_space<vmem>>, vector<1x64x64xbf16>
    %223 = vector.shape_cast %222 : vector<1x64x64xbf16> to vector<64x64xbf16>
    %cst_213 = arith.constant dense<0.000000e+00> : vector<32x64xf32>
    %224 = tpu.matmul %221, %223, %cst_213 {dimension_numbers = #tpu.dot_dimension_numbers<[1], [0], [0], [1], [0, 0, 1, 1], [], []>} : vector<32x64xbf16>, vector<64x64xbf16>, vector<32x64xf32> -> vector<32x64xf32>
    %225 = arith.addf %217, %224 : vector<32x64xf32>
    %c2_214 = arith.constant 2 : index
    %c0_215 = arith.constant 0 : index
    %226 = vector.load %arg12[%c2_214, %c0_215] : memref<9x512xf32, #tpu.memory_space<vmem>>, vector<1x64xf32>
    %227 = vector.broadcast %226 : vector<1x64xf32> to vector<32x64xf32>
    %228 = arith.addf %225, %227 : vector<32x64xf32>
    %cst_216 = arith.constant 0.000000e+00 : f32
    %229 = vector.broadcast %cst_216 : f32 to vector<32x64xf32>
    %230 = arith.maximumf %228, %229 : vector<32x64xf32>
    %231 = arith.truncf %230 : vector<32x64xf32> to vector<32x64xbf16>
    %c0_217 = arith.constant 0 : index
    %c0_218 = arith.constant 0 : index
    %232 = vector.load %arg14[%c0_217, %c0_218] : memref<32x64xbf16, #tpu.memory_space<vmem>>, vector<32x64xbf16>
    tpu.vector_store %arg14[%c0_217, %c0_218], %231 {strides = array<i32>} : memref<32x64xbf16, #tpu.memory_space<vmem>>, vector<32x64xbf16>,
    %c0_219 = arith.constant 0 : index
    %c0_220 = arith.constant 0 : index
    %233 = vector.load %arg14[%c0_219, %c0_220] : memref<32x64xbf16, #tpu.memory_space<vmem>>, vector<2x64xbf16>
    %c0_221 = arith.constant 0 : index
    %c0_222 = arith.constant 0 : index
    %c0_223 = arith.constant 0 : index
    %234 = vector.load %arg8[%c0_221, %c0_222, %c0_223] : memref<16x64x512xbf16, #tpu.memory_space<vmem>>, vector<1x64x512xbf16>
    %235 = vector.shape_cast %234 : vector<1x64x512xbf16> to vector<64x512xbf16>
    %cst_224 = arith.constant dense<0.000000e+00> : vector<2x512xf32>
    %236 = tpu.matmul %233, %235, %cst_224 {dimension_numbers = #tpu.dot_dimension_numbers<[1], [0], [0], [1], [0, 0, 1, 1], [], []>} : vector<2x64xbf16>, vector<64x512xbf16>, vector<2x512xf32> -> vector<2x512xf32>
    %c2_225 = arith.constant 2 : index
    %c0_226 = arith.constant 0 : index
    %237 = vector.load %arg14[%c2_225, %c0_226] : memref<32x64xbf16, #tpu.memory_space<vmem>>, vector<2x64xbf16>
    %c1_227 = arith.constant 1 : index
    %c0_228 = arith.constant 0 : index
    %c0_229 = arith.constant 0 : index
    %238 = vector.load %arg8[%c1_227, %c0_228, %c0_229] : memref<16x64x512xbf16, #tpu.memory_space<vmem>>, vector<1x64x512xbf16>
    %239 = vector.shape_cast %238 : vector<1x64x512xbf16> to vector<64x512xbf16>
    %cst_230 = arith.constant dense<0.000000e+00> : vector<2x512xf32>
    %240 = tpu.matmul %237, %239, %cst_230 {dimension_numbers = #tpu.dot_dimension_numbers<[1], [0], [0], [1], [0, 0, 1, 1], [], []>} : vector<2x64xbf16>, vector<64x512xbf16>, vector<2x512xf32> -> vector<2x512xf32>
    %241 = arith.addf %236, %240 : vector<2x512xf32>
    %c4_231 = arith.constant 4 : index
    %c0_232 = arith.constant 0 : index
    %242 = vector.load %arg14[%c4_231, %c0_232] : memref<32x64xbf16, #tpu.memory_space<vmem>>, vector<2x64xbf16>
    %c2_233 = arith.constant 2 : index
    %c0_234 = arith.constant 0 : index
    %c0_235 = arith.constant 0 : index
    %243 = vector.load %arg8[%c2_233, %c0_234, %c0_235] : memref<16x64x512xbf16, #tpu.memory_space<vmem>>, vector<1x64x512xbf16>
    %244 = vector.shape_cast %243 : vector<1x64x512xbf16> to vector<64x512xbf16>
    %cst_236 = arith.constant dense<0.000000e+00> : vector<2x512xf32>
    %245 = tpu.matmul %242, %244, %cst_236 {dimension_numbers = #tpu.dot_dimension_numbers<[1], [0], [0], [1], [0, 0, 1, 1], [], []>} : vector<2x64xbf16>, vector<64x512xbf16>, vector<2x512xf32> -> vector<2x512xf32>
    %246 = arith.addf %241, %245 : vector<2x512xf32>
    %c6_237 = arith.constant 6 : index
    %c0_238 = arith.constant 0 : index
    %247 = vector.load %arg14[%c6_237, %c0_238] : memref<32x64xbf16, #tpu.memory_space<vmem>>, vector<2x64xbf16>
    %c3_239 = arith.constant 3 : index
    %c0_240 = arith.constant 0 : index
    %c0_241 = arith.constant 0 : index
    %248 = vector.load %arg8[%c3_239, %c0_240, %c0_241] : memref<16x64x512xbf16, #tpu.memory_space<vmem>>, vector<1x64x512xbf16>
    %249 = vector.shape_cast %248 : vector<1x64x512xbf16> to vector<64x512xbf16>
    %cst_242 = arith.constant dense<0.000000e+00> : vector<2x512xf32>
    %250 = tpu.matmul %247, %249, %cst_242 {dimension_numbers = #tpu.dot_dimension_numbers<[1], [0], [0], [1], [0, 0, 1, 1], [], []>} : vector<2x64xbf16>, vector<64x512xbf16>, vector<2x512xf32> -> vector<2x512xf32>
    %251 = arith.addf %246, %250 : vector<2x512xf32>
    %c8_243 = arith.constant 8 : index
    %c0_244 = arith.constant 0 : index
    %252 = vector.load %arg14[%c8_243, %c0_244] : memref<32x64xbf16, #tpu.memory_space<vmem>>, vector<2x64xbf16>
    %c4_245 = arith.constant 4 : index
    %c0_246 = arith.constant 0 : index
    %c0_247 = arith.constant 0 : index
    %253 = vector.load %arg8[%c4_245, %c0_246, %c0_247] : memref<16x64x512xbf16, #tpu.memory_space<vmem>>, vector<1x64x512xbf16>
    %254 = vector.shape_cast %253 : vector<1x64x512xbf16> to vector<64x512xbf16>
    %cst_248 = arith.constant dense<0.000000e+00> : vector<2x512xf32>
    %255 = tpu.matmul %252, %254, %cst_248 {dimension_numbers = #tpu.dot_dimension_numbers<[1], [0], [0], [1], [0, 0, 1, 1], [], []>} : vector<2x64xbf16>, vector<64x512xbf16>, vector<2x512xf32> -> vector<2x512xf32>
    %256 = arith.addf %251, %255 : vector<2x512xf32>
    %c10 = arith.constant 10 : index
    %c0_249 = arith.constant 0 : index
    %257 = vector.load %arg14[%c10, %c0_249] : memref<32x64xbf16, #tpu.memory_space<vmem>>, vector<2x64xbf16>
    %c5_250 = arith.constant 5 : index
    %c0_251 = arith.constant 0 : index
    %c0_252 = arith.constant 0 : index
    %258 = vector.load %arg8[%c5_250, %c0_251, %c0_252] : memref<16x64x512xbf16, #tpu.memory_space<vmem>>, vector<1x64x512xbf16>
    %259 = vector.shape_cast %258 : vector<1x64x512xbf16> to vector<64x512xbf16>
    %cst_253 = arith.constant dense<0.000000e+00> : vector<2x512xf32>
    %260 = tpu.matmul %257, %259, %cst_253 {dimension_numbers = #tpu.dot_dimension_numbers<[1], [0], [0], [1], [0, 0, 1, 1], [], []>} : vector<2x64xbf16>, vector<64x512xbf16>, vector<2x512xf32> -> vector<2x512xf32>
    %261 = arith.addf %256, %260 : vector<2x512xf32>
    %c12 = arith.constant 12 : index
    %c0_254 = arith.constant 0 : index
    %262 = vector.load %arg14[%c12, %c0_254] : memref<32x64xbf16, #tpu.memory_space<vmem>>, vector<2x64xbf16>
    %c6_255 = arith.constant 6 : index
    %c0_256 = arith.constant 0 : index
    %c0_257 = arith.constant 0 : index
    %263 = vector.load %arg8[%c6_255, %c0_256, %c0_257] : memref<16x64x512xbf16, #tpu.memory_space<vmem>>, vector<1x64x512xbf16>
    %264 = vector.shape_cast %263 : vector<1x64x512xbf16> to vector<64x512xbf16>
    %cst_258 = arith.constant dense<0.000000e+00> : vector<2x512xf32>
    %265 = tpu.matmul %262, %264, %cst_258 {dimension_numbers = #tpu.dot_dimension_numbers<[1], [0], [0], [1], [0, 0, 1, 1], [], []>} : vector<2x64xbf16>, vector<64x512xbf16>, vector<2x512xf32> -> vector<2x512xf32>
    %266 = arith.addf %261, %265 : vector<2x512xf32>
    %c14 = arith.constant 14 : index
    %c0_259 = arith.constant 0 : index
    %267 = vector.load %arg14[%c14, %c0_259] : memref<32x64xbf16, #tpu.memory_space<vmem>>, vector<2x64xbf16>
    %c7_260 = arith.constant 7 : index
    %c0_261 = arith.constant 0 : index
    %c0_262 = arith.constant 0 : index
    %268 = vector.load %arg8[%c7_260, %c0_261, %c0_262] : memref<16x64x512xbf16, #tpu.memory_space<vmem>>, vector<1x64x512xbf16>
    %269 = vector.shape_cast %268 : vector<1x64x512xbf16> to vector<64x512xbf16>
    %cst_263 = arith.constant dense<0.000000e+00> : vector<2x512xf32>
    %270 = tpu.matmul %267, %269, %cst_263 {dimension_numbers = #tpu.dot_dimension_numbers<[1], [0], [0], [1], [0, 0, 1, 1], [], []>} : vector<2x64xbf16>, vector<64x512xbf16>, vector<2x512xf32> -> vector<2x512xf32>
    %271 = arith.addf %266, %270 : vector<2x512xf32>
    %c16 = arith.constant 16 : index
    %c0_264 = arith.constant 0 : index
    %272 = vector.load %arg14[%c16, %c0_264] : memref<32x64xbf16, #tpu.memory_space<vmem>>, vector<2x64xbf16>
    %c8_265 = arith.constant 8 : index
    %c0_266 = arith.constant 0 : index
    %c0_267 = arith.constant 0 : index
    %273 = vector.load %arg8[%c8_265, %c0_266, %c0_267] : memref<16x64x512xbf16, #tpu.memory_space<vmem>>, vector<1x64x512xbf16>
    %274 = vector.shape_cast %273 : vector<1x64x512xbf16> to vector<64x512xbf16>
    %cst_268 = arith.constant dense<0.000000e+00> : vector<2x512xf32>
    %275 = tpu.matmul %272, %274, %cst_268 {dimension_numbers = #tpu.dot_dimension_numbers<[1], [0], [0], [1], [0, 0, 1, 1], [], []>} : vector<2x64xbf16>, vector<64x512xbf16>, vector<2x512xf32> -> vector<2x512xf32>
    %276 = arith.addf %271, %275 : vector<2x512xf32>
    %c18 = arith.constant 18 : index
    %c0_269 = arith.constant 0 : index
    %277 = vector.load %arg14[%c18, %c0_269] : memref<32x64xbf16, #tpu.memory_space<vmem>>, vector<2x64xbf16>
    %c9 = arith.constant 9 : index
    %c0_270 = arith.constant 0 : index
    %c0_271 = arith.constant 0 : index
    %278 = vector.load %arg8[%c9, %c0_270, %c0_271] : memref<16x64x512xbf16, #tpu.memory_space<vmem>>, vector<1x64x512xbf16>
    %279 = vector.shape_cast %278 : vector<1x64x512xbf16> to vector<64x512xbf16>
    %cst_272 = arith.constant dense<0.000000e+00> : vector<2x512xf32>
    %280 = tpu.matmul %277, %279, %cst_272 {dimension_numbers = #tpu.dot_dimension_numbers<[1], [0], [0], [1], [0, 0, 1, 1], [], []>} : vector<2x64xbf16>, vector<64x512xbf16>, vector<2x512xf32> -> vector<2x512xf32>
    %281 = arith.addf %276, %280 : vector<2x512xf32>
    %c20 = arith.constant 20 : index
    %c0_273 = arith.constant 0 : index
    %282 = vector.load %arg14[%c20, %c0_273] : memref<32x64xbf16, #tpu.memory_space<vmem>>, vector<2x64xbf16>
    %c10_274 = arith.constant 10 : index
    %c0_275 = arith.constant 0 : index
    %c0_276 = arith.constant 0 : index
    %283 = vector.load %arg8[%c10_274, %c0_275, %c0_276] : memref<16x64x512xbf16, #tpu.memory_space<vmem>>, vector<1x64x512xbf16>
    %284 = vector.shape_cast %283 : vector<1x64x512xbf16> to vector<64x512xbf16>
    %cst_277 = arith.constant dense<0.000000e+00> : vector<2x512xf32>
    %285 = tpu.matmul %282, %284, %cst_277 {dimension_numbers = #tpu.dot_dimension_numbers<[1], [0], [0], [1], [0, 0, 1, 1], [], []>} : vector<2x64xbf16>, vector<64x512xbf16>, vector<2x512xf32> -> vector<2x512xf32>
    %286 = arith.addf %281, %285 : vector<2x512xf32>
    %c22 = arith.constant 22 : index
    %c0_278 = arith.constant 0 : index
    %287 = vector.load %arg14[%c22, %c0_278] : memref<32x64xbf16, #tpu.memory_space<vmem>>, vector<2x64xbf16>
    %c11 = arith.constant 11 : index
    %c0_279 = arith.constant 0 : index
    %c0_280 = arith.constant 0 : index
    %288 = vector.load %arg8[%c11, %c0_279, %c0_280] : memref<16x64x512xbf16, #tpu.memory_space<vmem>>, vector<1x64x512xbf16>
    %289 = vector.shape_cast %288 : vector<1x64x512xbf16> to vector<64x512xbf16>
    %cst_281 = arith.constant dense<0.000000e+00> : vector<2x512xf32>
    %290 = tpu.matmul %287, %289, %cst_281 {dimension_numbers = #tpu.dot_dimension_numbers<[1], [0], [0], [1], [0, 0, 1, 1], [], []>} : vector<2x64xbf16>, vector<64x512xbf16>, vector<2x512xf32> -> vector<2x512xf32>
    %291 = arith.addf %286, %290 : vector<2x512xf32>
    %c24 = arith.constant 24 : index
    %c0_282 = arith.constant 0 : index
    %292 = vector.load %arg14[%c24, %c0_282] : memref<32x64xbf16, #tpu.memory_space<vmem>>, vector<2x64xbf16>
    %c12_283 = arith.constant 12 : index
    %c0_284 = arith.constant 0 : index
    %c0_285 = arith.constant 0 : index
    %293 = vector.load %arg8[%c12_283, %c0_284, %c0_285] : memref<16x64x512xbf16, #tpu.memory_space<vmem>>, vector<1x64x512xbf16>
    %294 = vector.shape_cast %293 : vector<1x64x512xbf16> to vector<64x512xbf16>
    %cst_286 = arith.constant dense<0.000000e+00> : vector<2x512xf32>
    %295 = tpu.matmul %292, %294, %cst_286 {dimension_numbers = #tpu.dot_dimension_numbers<[1], [0], [0], [1], [0, 0, 1, 1], [], []>} : vector<2x64xbf16>, vector<64x512xbf16>, vector<2x512xf32> -> vector<2x512xf32>
    %296 = arith.addf %291, %295 : vector<2x512xf32>
    %c26 = arith.constant 26 : index
    %c0_287 = arith.constant 0 : index
    %297 = vector.load %arg14[%c26, %c0_287] : memref<32x64xbf16, #tpu.memory_space<vmem>>, vector<2x64xbf16>
    %c13 = arith.constant 13 : index
    %c0_288 = arith.constant 0 : index
    %c0_289 = arith.constant 0 : index
    %298 = vector.load %arg8[%c13, %c0_288, %c0_289] : memref<16x64x512xbf16, #tpu.memory_space<vmem>>, vector<1x64x512xbf16>
    %299 = vector.shape_cast %298 : vector<1x64x512xbf16> to vector<64x512xbf16>
    %cst_290 = arith.constant dense<0.000000e+00> : vector<2x512xf32>
    %300 = tpu.matmul %297, %299, %cst_290 {dimension_numbers = #tpu.dot_dimension_numbers<[1], [0], [0], [1], [0, 0, 1, 1], [], []>} : vector<2x64xbf16>, vector<64x512xbf16>, vector<2x512xf32> -> vector<2x512xf32>
    %301 = arith.addf %296, %300 : vector<2x512xf32>
    %c28 = arith.constant 28 : index
    %c0_291 = arith.constant 0 : index
    %302 = vector.load %arg14[%c28, %c0_291] : memref<32x64xbf16, #tpu.memory_space<vmem>>, vector<2x64xbf16>
    %c14_292 = arith.constant 14 : index
    %c0_293 = arith.constant 0 : index
    %c0_294 = arith.constant 0 : index
    %303 = vector.load %arg8[%c14_292, %c0_293, %c0_294] : memref<16x64x512xbf16, #tpu.memory_space<vmem>>, vector<1x64x512xbf16>
    %304 = vector.shape_cast %303 : vector<1x64x512xbf16> to vector<64x512xbf16>
    %cst_295 = arith.constant dense<0.000000e+00> : vector<2x512xf32>
    %305 = tpu.matmul %302, %304, %cst_295 {dimension_numbers = #tpu.dot_dimension_numbers<[1], [0], [0], [1], [0, 0, 1, 1], [], []>} : vector<2x64xbf16>, vector<64x512xbf16>, vector<2x512xf32> -> vector<2x512xf32>
    %306 = arith.addf %301, %305 : vector<2x512xf32>
    %c30 = arith.constant 30 : index
    %c0_296 = arith.constant 0 : index
    %307 = vector.load %arg14[%c30, %c0_296] : memref<32x64xbf16, #tpu.memory_space<vmem>>, vector<2x64xbf16>
    %c15 = arith.constant 15 : index
    %c0_297 = arith.constant 0 : index
    %c0_298 = arith.constant 0 : index
    %308 = vector.load %arg8[%c15, %c0_297, %c0_298] : memref<16x64x512xbf16, #tpu.memory_space<vmem>>, vector<1x64x512xbf16>
    %309 = vector.shape_cast %308 : vector<1x64x512xbf16> to vector<64x512xbf16>
    %cst_299 = arith.constant dense<0.000000e+00> : vector<2x512xf32>
    %310 = tpu.matmul %307, %309, %cst_299 {dimension_numbers = #tpu.dot_dimension_numbers<[1], [0], [0], [1], [0, 0, 1, 1], [], []>} : vector<2x64xbf16>, vector<64x512xbf16>, vector<2x512xf32> -> vector<2x512xf32>
    %311 = arith.addf %306, %310 : vector<2x512xf32>
    %c3_300 = arith.constant 3 : index
    %c0_301 = arith.constant 0 : index
    %312 = vector.load %arg12[%c3_300, %c0_301] : memref<9x512xf32, #tpu.memory_space<vmem>>, vector<1x512xf32>
    %313 = vector.broadcast %312 : vector<1x512xf32> to vector<2x512xf32>
    %314 = arith.addf %311, %313 : vector<2x512xf32>
    %c0_302 = arith.constant 0 : index
    %c0_303 = arith.constant 0 : index
    %315 = vector.load %arg9[%c0_302, %c0_303] : memref<512x1280xbf16, #tpu.memory_space<vmem>>, vector<512x512xbf16>
    %c0_304 = arith.constant 0 : index
    %c512 = arith.constant 512 : index
    %316 = vector.load %arg9[%c0_304, %c512] : memref<512x1280xbf16, #tpu.memory_space<vmem>>, vector<512x512xbf16>
    %c0_305 = arith.constant 0 : index
    %c1024 = arith.constant 1024 : index
    %317 = vector.load %arg9[%c0_305, %c1024] : memref<512x1280xbf16, #tpu.memory_space<vmem>>, vector<512x256xbf16>
    %318 = arith.truncf %314 : vector<2x512xf32> to vector<2x512xbf16>
    %cst_306 = arith.constant dense<0.000000e+00> : vector<2x512xf32>
    %319 = tpu.matmul %318, %315, %cst_306 {dimension_numbers = #tpu.dot_dimension_numbers<[1], [0], [0], [1], [0, 0, 1, 1], [], []>} : vector<2x512xbf16>, vector<512x512xbf16>, vector<2x512xf32> -> vector<2x512xf32>
    %c4_307 = arith.constant 4 : index
    %c0_308 = arith.constant 0 : index
    %320 = vector.load %arg12[%c4_307, %c0_308] : memref<9x512xf32, #tpu.memory_space<vmem>>, vector<1x512xf32>
    %321 = vector.broadcast %320 : vector<1x512xf32> to vector<2x512xf32>
    %322 = arith.addf %319, %321 : vector<2x512xf32>
    %323 = arith.truncf %322 : vector<2x512xf32> to vector<2x512xbf16>
    %cst_309 = arith.constant dense<0.000000e+00> : vector<2x512xf32>
    %324 = tpu.matmul %323, %316, %cst_309 {dimension_numbers = #tpu.dot_dimension_numbers<[1], [0], [0], [1], [0, 0, 1, 1], [], []>} : vector<2x512xbf16>, vector<512x512xbf16>, vector<2x512xf32> -> vector<2x512xf32>
    %c5_310 = arith.constant 5 : index
    %c0_311 = arith.constant 0 : index
    %325 = vector.load %arg12[%c5_310, %c0_311] : memref<9x512xf32, #tpu.memory_space<vmem>>, vector<1x512xf32>
    %326 = vector.broadcast %325 : vector<1x512xf32> to vector<2x512xf32>
    %327 = arith.addf %324, %326 : vector<2x512xf32>
    %328 = arith.truncf %327 : vector<2x512xf32> to vector<2x512xbf16>
    %cst_312 = arith.constant dense<0.000000e+00> : vector<2x256xf32>
    %329 = tpu.matmul %328, %317, %cst_312 {dimension_numbers = #tpu.dot_dimension_numbers<[1], [0], [0], [1], [0, 0, 1, 1], [], []>} : vector<2x512xbf16>, vector<512x256xbf16>, vector<2x256xf32> -> vector<2x256xf32>
    %c6_313 = arith.constant 6 : index
    %c0_314 = arith.constant 0 : index
    %330 = vector.load %arg12[%c6_313, %c0_314] : memref<9x512xf32, #tpu.memory_space<vmem>>, vector<1x256xf32>
    %331 = vector.broadcast %330 : vector<1x256xf32> to vector<2x256xf32>
    %332 = arith.addf %329, %331 : vector<2x256xf32>
    %cst_315 = arith.constant 0.000000e+00 : f32
    %333 = vector.broadcast %cst_315 : f32 to vector<2x256xf32>
    %334 = arith.maximumf %332, %333 : vector<2x256xf32>
    %335 = arith.truncf %334 : vector<2x256xf32> to vector<2x256xbf16>
    %c0_316 = arith.constant 0 : index
    %c0_317 = arith.constant 0 : index
    %336 = vector.load %arg10[%c0_316, %c0_317] : memref<256x256xbf16, #tpu.memory_space<vmem>>, vector<256x256xbf16>
    %cst_318 = arith.constant dense<0.000000e+00> : vector<2x256xf32>
    %337 = tpu.matmul %335, %336, %cst_318 {dimension_numbers = #tpu.dot_dimension_numbers<[1], [0], [0], [1], [0, 0, 1, 1], [], []>} : vector<2x256xbf16>, vector<256x256xbf16>, vector<2x256xf32> -> vector<2x256xf32>
    %c7_319 = arith.constant 7 : index
    %c0_320 = arith.constant 0 : index
    %338 = vector.load %arg12[%c7_319, %c0_320] : memref<9x512xf32, #tpu.memory_space<vmem>>, vector<1x256xf32>
    %339 = vector.broadcast %338 : vector<1x256xf32> to vector<2x256xf32>
    %340 = arith.addf %337, %339 : vector<2x256xf32>
    %cst_321 = arith.constant 0.000000e+00 : f32
    %341 = vector.broadcast %cst_321 : f32 to vector<2x256xf32>
    %342 = arith.maximumf %340, %341 : vector<2x256xf32>
    %343 = arith.truncf %342 : vector<2x256xf32> to vector<2x256xbf16>
    %c0_322 = arith.constant 0 : index
    %c0_323 = arith.constant 0 : index
    %344 = vector.load %arg11[%c0_322, %c0_323] : memref<768x128xbf16, #tpu.memory_space<vmem>>, vector<256x128xbf16>
    %cst_324 = arith.constant dense<0.000000e+00> : vector<2x128xf32>
    %345 = tpu.matmul %343, %344, %cst_324 {dimension_numbers = #tpu.dot_dimension_numbers<[1], [0], [0], [1], [0, 0, 1, 1], [], []>} : vector<2x256xbf16>, vector<256x128xbf16>, vector<2x128xf32> -> vector<2x128xf32>
    %346 = arith.truncf %327 : vector<2x512xf32> to vector<2x512xbf16>
    %c256 = arith.constant 256 : index
    %c0_325 = arith.constant 0 : index
    %347 = vector.load %arg11[%c256, %c0_325] : memref<768x128xbf16, #tpu.memory_space<vmem>>, vector<512x128xbf16>
    %cst_326 = arith.constant dense<0.000000e+00> : vector<2x128xf32>
    %348 = tpu.matmul %346, %347, %cst_326 {dimension_numbers = #tpu.dot_dimension_numbers<[1], [0], [0], [1], [0, 0, 1, 1], [], []>} : vector<2x512xbf16>, vector<512x128xbf16>, vector<2x128xf32> -> vector<2x128xf32>
    %349 = arith.addf %345, %348 : vector<2x128xf32>
    %c8_327 = arith.constant 8 : index
    %c0_328 = arith.constant 0 : index
    %350 = vector.load %arg12[%c8_327, %c0_328] : memref<9x512xf32, #tpu.memory_space<vmem>>, vector<1x128xf32>
    %351 = vector.broadcast %350 : vector<1x128xf32> to vector<2x128xf32>
    %352 = arith.addf %349, %351 : vector<2x128xf32>
    %c0_329 = arith.constant 0 : index
    %c0_330 = arith.constant 0 : index
    %353 = vector.load %arg13[%c0_329, %c0_330] : memref<2x128xf32, #tpu.memory_space<vmem>>, vector<2x128xf32>
    tpu.vector_store %arg13[%c0_329, %c0_330], %352 {strides = array<i32>} : memref<2x128xf32, #tpu.memory_space<vmem>>, vector<2x128xf32>,
    return
  }
  func.func @transform_0(%arg0: i32) -> (i32, i32) {
    %c0_i32 = arith.constant 0 : i32
    %c0_i32_0 = arith.constant 0 : i32
    %c0_i32_1 = arith.constant 0 : i32
    return %c0_i32, %c0_i32_0 : i32, i32
  }
  func.func @transform_1(%arg0: i32) -> (i32, i32, i32) {
    %c0_i32 = arith.constant 0 : i32
    %c0_i32_0 = arith.constant 0 : i32
    %c0_i32_1 = arith.constant 0 : i32
    %c0_i32_2 = arith.constant 0 : i32
    return %c0_i32, %c0_i32_0, %c0_i32_1 : i32, i32, i32
  }
  func.func @transform_2(%arg0: i32) -> (i32, i32, i32) {
    %c0_i32 = arith.constant 0 : i32
    %c0_i32_0 = arith.constant 0 : i32
    %c0_i32_1 = arith.constant 0 : i32
    %c0_i32_2 = arith.constant 0 : i32
    return %c0_i32, %c0_i32_0, %c0_i32_1 : i32, i32, i32
  }
  func.func @transform_3(%arg0: i32) -> (i32, i32, i32) {
    %c0_i32 = arith.constant 0 : i32
    %c0_i32_0 = arith.constant 0 : i32
    %c0_i32_1 = arith.constant 0 : i32
    %c0_i32_2 = arith.constant 0 : i32
    return %c0_i32, %c0_i32_0, %c0_i32_1 : i32, i32, i32
  }
  func.func @transform_4(%arg0: i32) -> (i32, i32, i32) {
    %c0_i32 = arith.constant 0 : i32
    %c0_i32_0 = arith.constant 0 : i32
    %c0_i32_1 = arith.constant 0 : i32
    %c0_i32_2 = arith.constant 0 : i32
    return %c0_i32, %c0_i32_0, %c0_i32_1 : i32, i32, i32
  }
  func.func @transform_5(%arg0: i32) -> (i32, i32, i32) {
    %c0_i32 = arith.constant 0 : i32
    %c0_i32_0 = arith.constant 0 : i32
    %c0_i32_1 = arith.constant 0 : i32
    %c0_i32_2 = arith.constant 0 : i32
    return %c0_i32, %c0_i32_0, %c0_i32_1 : i32, i32, i32
  }
  func.func @transform_6(%arg0: i32) -> (i32, i32, i32) {
    %c0_i32 = arith.constant 0 : i32
    %c0_i32_0 = arith.constant 0 : i32
    %c0_i32_1 = arith.constant 0 : i32
    %c0_i32_2 = arith.constant 0 : i32
    return %c0_i32, %c0_i32_0, %c0_i32_1 : i32, i32, i32
  }
  func.func @transform_7(%arg0: i32) -> (i32, i32, i32) {
    %c0_i32 = arith.constant 0 : i32
    %c0_i32_0 = arith.constant 0 : i32
    %c0_i32_1 = arith.constant 0 : i32
    %c0_i32_2 = arith.constant 0 : i32
    return %c0_i32, %c0_i32_0, %c0_i32_1 : i32, i32, i32
  }
  func.func @transform_8(%arg0: i32) -> (i32, i32) {
    %c0_i32 = arith.constant 0 : i32
    %c0_i32_0 = arith.constant 0 : i32
    %c0_i32_1 = arith.constant 0 : i32
    return %c0_i32, %c0_i32_0 : i32, i32
  }
  func.func @transform_9(%arg0: i32) -> (i32, i32) {
    %c0_i32 = arith.constant 0 : i32
    %c0_i32_0 = arith.constant 0 : i32
    %c0_i32_1 = arith.constant 0 : i32
    return %c0_i32, %c0_i32_0 : i32, i32
  }
  func.func @transform_10(%arg0: i32) -> (i32, i32) {
    %c0_i32 = arith.constant 0 : i32
    %c0_i32_0 = arith.constant 0 : i32
    %c0_i32_1 = arith.constant 0 : i32
    return %c0_i32, %c0_i32_0 : i32, i32
  }
  func.func @transform_11(%arg0: i32) -> (i32, i32) {
    %c0_i32 = arith.constant 0 : i32
    %c0_i32_0 = arith.constant 0 : i32
    %c0_i32_1 = arith.constant 0 : i32
    return %c0_i32, %c0_i32_0 : i32, i32
  }
  func.func @transform_12(%arg0: i32) -> (i32, i32) {
    %c0_i32 = arith.constant 0 : i32
    %c0_i32_0 = arith.constant 0 : i32
    %c0_i32_1 = arith.constant 0 : i32
    return %c0_i32, %c0_i32_0 : i32, i32
  }
}

</mosaic_0001>

<bundles_post_ra>
// kernel: fortnite_agent_forward.1
= control target key start
LH: loop header
LB: loop body
LE: loop exit
PB: predicated region body
PF: predicated region fallthrough
CT: control target
= control target key end

     0   :  { %17 = vsyncpa [#allocation4], 0  ;;  %s22100_s0 = inlined_call_operand.vmem [shape: bf16[512,4], index: 0, kind: input, shape index: {}]   ;;  %s22101_s1 = inlined_call_operand.hbm [shape: bf16[9,128,512], index: 1, kind: input, shape index: {}]   ;;  %s22102_s2 = inlined_call_operand.hbm [shape: bf16[9,32,128], index: 2, kind: input, shape index: {}]   ;;  %s22103_s3 = inlined_call_operand.hbm [shape: bf16[9,32,32], index: 3, kind: input, shape index: {}]   ;;  %s22104_s4 = inlined_call_operand.hbm [shape: bf16[9,4,32], index: 4, kind: input, shape index: {}]   ;;  %s22105_s5 = inlined_call_operand.hbm [shape: bf16[9,32,64], index: 5, kind: input, shape index: {}]   ;;  %s22106_s6 = inlined_call_operand.hbm [shape: bf16[9,64,64], index: 6, kind: input, shape index: {}]   ;;  %s22107_s7 = inlined_call_operand.hbm [shape: bf16[16,64,512], index: 7, kind: input, shape index: {}]   ;;  %s22108_s8 = inlined_call_operand.hbm [shape: bf16[512,1280], index: 8, kind: input, shape index: {}]   ;;  %s22109_s9 = inlined_call_operand.hbm [shape: bf16[256,256], index: 9, kind: input, shape index: {}]   ;;  %s22110_s10 = inlined_call_operand.hbm [shape: bf16[768,128], index: 10, kind: input, shape index: {}]   ;;  %s22111_s11 = inlined_call_operand.hbm [shape: f32[9,512], index: 11, kind: input, shape index: {}]   ;;  %s22112_s12 = inlined_call_operand.vmem [shape: f32[2,128], index: 12, kind: output, shape index: {}]  }
   0x1   :  { %18 = vsyncpa [#allocation6], 0 }
   0x2   :  { %19 = vsyncpa [#allocation9], 0 }
   0x3   :  { %20 = vsyncpa [#allocation12], 0 }
   0x4   :  { %21 = vsyncpa [#allocation15], 0 }
   0x5   :  { %22 = vsyncpa [#allocation18], 0  ;;  %s19746_s21 = smov [#allocation5]   ;;  %s19492_s25 = scalar_lea.hbm %s22102_s2, 2304 }
   0x6   :  { %s42_s22 = sshll.u32 %s19746_s21, 4  ;;  %p19493_p0 = scmp.ne.s32.totalorder %s22102_s2, %s19492_s25  ;;  %s43_s22 = int_to_ptr.vmem [resolvable:$true] %s42_s22 }
   0x7   :  { %p19496_p1 = scmp.lt.u32.totalorder %s19492_s25, %s22102_s2 }
   0x9   :  { %p19498_p2 = pnand %p19496_p1, %p19493_p0 }
   0xb   :  { %19501 = shalt.err (!%p19498_p2)
}
   0xc   :  { %s19502_s30 = scalar_lea.vmem %s43_s22, 2304  ;;  %p19507_p4 = scmp.lt.s32.totalorder %s43_s22, %s43_s22 }
   0xd   :  { %p19503_p3 = scmp.ne.s32.totalorder %s43_s22, %s19502_s30  ;;  %p19508_p5 = scmp.lt.s32.totalorder %s19502_s30, %s19502_s30 }
   0xf   :  { %p19509_p6 = por %p19508_p5, %p19507_p4 }
  0x11   :  { %p19510_p7 = pnand %p19509_p6, %p19503_p3 }
  0x13   :  { %19513 = shalt.err (!%p19510_p7)
}
  0x14   :  { %s19747_s13 = smov 64   ;;  %s19748_s14 = smov 4  }
  0x15   :  { %48 = dma.hbm_to_vmem [thread:$0]  %s22102_s2, 2304, %s43_s22, [#allocation6], %s19747_s13, %s19747_s13, %s19748_s14  }
  0x16   :  { %s19749_s17 = smov [#allocation8]   ;;  %s19514_s21 = scalar_lea.hbm %s22104_s4, 288 }
  0x17   :  { %s66_s18 = sshll.u32 %s19749_s17, 4  ;;  %p19515_p8 = scmp.ne.s32.totalorder %s22104_s4, %s19514_s21  ;;  %s67_s18 = int_to_ptr.vmem [resolvable:$true] %s66_s18 }
  0x18   :  { %p19518_p9 = scmp.lt.u32.totalorder %s19514_s21, %s22104_s4 }
  0x1a   :  { %p19520_p10 = pnand %p19518_p9, %p19515_p8 }
  0x1c   :  { %19523 = shalt.err (!%p19520_p10)
}
  0x1d   :  { %s19524_s27 = scalar_lea.vmem %s67_s18, 288  ;;  %p19529_p12 = scmp.lt.s32.totalorder %s67_s18, %s67_s18 }
  0x1e   :  { %p19525_p11 = scmp.ne.s32.totalorder %s67_s18, %s19524_s27  ;;  %p19530_p13 = scmp.lt.s32.totalorder %s19524_s27, %s19524_s27 }
  0x20   :  { %p19531_p0 = por %p19530_p13, %p19529_p12 }
  0x22   :  { %p19532_p1 = pnand %p19531_p0, %p19525_p11 }
  0x24   :  { %19535 = shalt.err (!%p19532_p1)
}
  0x25   :  { %s19750_s2 = smov 32   ;;  %s19751_s22 = smov 2  }
  0x26   :  { %72 = dma.hbm_to_vmem [thread:$0]  %s22104_s4, 288, %s67_s18, [#allocation9], %s19750_s2, %s19750_s2, %s19751_s22  }
  0x27   :  { %s19752_s30 = smov [#allocation11]   ;;  %s19753_s16 = smov [#allocation14]  }
  0x28   :  { %s90_s15 = sshll.u32 %s19752_s30, 4  ;;  %s114_s17 = sshll.u32 %s19753_s16, 4  ;;  %s91_s15 = int_to_ptr.vmem [resolvable:$true] %s90_s15  ;;  %s19863_s17 = int_to_ptr.vmem [resolvable:$true] %s114_s17 }
  0x29   :  { %s19536_s21 = scalar_lea.hbm %s22106_s6, 4608 }
  0x2a   :  { %p19537_p2 = scmp.ne.s32.totalorder %s22106_s6, %s19536_s21  ;;  %p19540_p3 = scmp.lt.u32.totalorder %s19536_s21, %s22106_s6 }
  0x2c   :  { %p19542_p4 = pnand %p19540_p3, %p19537_p2 }
  0x2e   :  { %19545 = shalt.err (!%p19542_p4)
}
  0x2f   :  { %s19546_s4 = scalar_lea.vmem %s91_s15, 4608  ;;  %p19551_p6 = scmp.lt.s32.totalorder %s91_s15, %s91_s15 }
  0x30   :  { %p19547_p5 = scmp.ne.s32.totalorder %s91_s15, %s19546_s4  ;;  %p19552_p7 = scmp.lt.s32.totalorder %s19546_s4, %s19546_s4 }
  0x32   :  { %p19553_p8 = por %p19552_p7, %p19551_p6 }
  0x34   :  { %p19554_p9 = pnand %p19553_p8, %p19547_p5 }
  0x36   :  { %19557 = shalt.err (!%p19554_p9)
}
  0x37   :  { %96 = dma.hbm_to_vmem [thread:$0]  %s22106_s6, 4608, %s91_s15, [#allocation12], %s19747_s13, %s19747_s13, %s19748_s14  }
  0x38   :  { %s19558_s29 = scalar_lea.hbm %s22108_s8, 40960 }
  0x39   :  { %p19559_p10 = scmp.ne.s32.totalorder %s22108_s8, %s19558_s29  ;;  %p19562_p11 = scmp.lt.u32.totalorder %s19558_s29, %s22108_s8 }
  0x3b   :  { %p19564_p12 = pnand %p19562_p11, %p19559_p10 }
  0x3d   :  { %19567 = shalt.err (!%p19564_p12)
}
  0x3e   :  { %s19568_s21 = scalar_lea.vmem %s19863_s17, 40960  ;;  %p19573_p0 = scmp.lt.s32.totalorder %s19863_s17, %s19863_s17 }
  0x3f   :  { %p19569_p13 = scmp.ne.s32.totalorder %s19863_s17, %s19568_s21  ;;  %p19574_p1 = scmp.lt.s32.totalorder %s19568_s21, %s19568_s21 }
  0x41   :  { %p19575_p2 = por %p19574_p1, %p19573_p0 }
  0x43   :  { %p19576_p3 = pnand %p19575_p2, %p19569_p13 }
  0x45   :  { %19579 = shalt.err (!%p19576_p3)
}
  0x46   :  { %s19754_s6 = smov 640   ;;  %s19755_s15 = smov 40  }
  0x47   :  { %120 = dma.hbm_to_vmem [thread:$0]  %s22108_s8, 40960, %s19863_s17, [#allocation15], %s19754_s6, %s19754_s6, %s19755_s15  }
  0x48   :  { %s19756_s25 = smov [#allocation17]   ;;  %s19757_s4 = smov [#allocation3]  }
  0x49   :  { %s138_s26 = sshll.u32 %s19756_s25, 4  ;;  %s30_s18 = sshll.u32 %s19757_s4, 4  ;;  %s139_s26 = int_to_ptr.vmem [resolvable:$true] %s138_s26  ;;  %s19897_s18 = int_to_ptr.vmem [resolvable:$true] %s30_s18 }
  0x4a   :  { %s19580_s28 = scalar_lea.hbm %s22110_s10, 6144 }
  0x4b   :  { %p19581_p4 = scmp.ne.s32.totalorder %s22110_s10, %s19580_s28  ;;  %p19584_p5 = scmp.lt.u32.totalorder %s19580_s28, %s22110_s10 }
  0x4d   :  { %p19586_p6 = pnand %p19584_p5, %p19581_p4 }
  0x4f   :  { %19589 = shalt.err (!%p19586_p6)
}
  0x50   :  { %s19590_s8 = scalar_lea.vmem %s139_s26, 6144  ;;  %p19595_p8 = scmp.lt.s32.totalorder %s139_s26, %s139_s26 }
  0x51   :  { %p19591_p7 = scmp.ne.s32.totalorder %s139_s26, %s19590_s8  ;;  %p19596_p9 = scmp.lt.s32.totalorder %s19590_s8, %s19590_s8 }
  0x53   :  { %p19597_p10 = por %p19596_p9, %p19595_p8 }
  0x55   :  { %p19598_p11 = pnand %p19597_p10, %p19591_p7 }
  0x57   :  { %19601 = shalt.err (!%p19598_p11)
}
  0x58   :  { %144 = dma.hbm_to_vmem [thread:$0]  %s22110_s10, 6144, %s139_s26, [#allocation18], %s19747_s13, %s19747_s13, %s19748_s14  }
  0x59   :  { %s19602_s15 = scalar_lea.hbm %s22101_s1, 36864 }
  0x5a   :  { %p19603_p12 = scmp.ne.s32.totalorder %s22101_s1, %s19602_s15  ;;  %p19606_p13 = scmp.lt.u32.totalorder %s19602_s15, %s22101_s1 }
  0x5c   :  { %p19608_p0 = pnand %p19606_p13, %p19603_p12 }
  0x5e   :  { %19611 = shalt.err (!%p19608_p0)
}
  0x5f   :  { %s19612_s27 = scalar_lea.vmem %s19897_s18, 36864  ;;  %p19617_p2 = scmp.lt.s32.totalorder %s19897_s18, %s19897_s18 }
  0x60   :  { %p19613_p1 = scmp.ne.s32.totalorder %s19897_s18, %s19612_s27  ;;  %p19618_p3 = scmp.lt.s32.totalorder %s19612_s27, %s19612_s27 }
  0x62   :  { %p19619_p4 = por %p19618_p3, %p19617_p2 }
  0x64   :  { %p19620_p5 = pnand %p19619_p4, %p19613_p1 }
  0x66   :  { %19623 = shalt.err (!%p19620_p5)
}
  0x67   :  { %s19758_s10 = smov 256   ;;  %s19759_s26 = smov 16  }
  0x68   :  { %36 = dma.hbm_to_vmem [thread:$0]  %s22101_s1, 36864, %s19897_s18, [#allocation4], %s19758_s10, %s19758_s10, %s19759_s26  }
  0x69   :  { %s19760_s29 = smov [#allocation7]   ;;  %s19761_s16 = smov [#allocation10]  }
  0x6a   :  { %s54_s30 = sshll.u32 %s19760_s29, 4  ;;  %s78_s19 = sshll.u32 %s19761_s16, 4  ;;  %s55_s30 = int_to_ptr.vmem [resolvable:$true] %s54_s30  ;;  %s19934_s19 = int_to_ptr.vmem [resolvable:$true] %s78_s19 }
  0x6b   :  { %s19624_s20 = scalar_lea.hbm %s22103_s3, 2304 }
  0x6c   :  { %p19625_p6 = scmp.ne.s32.totalorder %s22103_s3, %s19624_s20  ;;  %p19628_p7 = scmp.lt.u32.totalorder %s19624_s20, %s22103_s3 }
  0x6e   :  { %p19630_p8 = pnand %p19628_p7, %p19625_p6 }
  0x70   :  { %19633 = shalt.err (!%p19630_p8)
}
  0x71   :  { %s19634_s1 = scalar_lea.vmem %s55_s30, 2304  ;;  %p19639_p10 = scmp.lt.s32.totalorder %s55_s30, %s55_s30 }
  0x72   :  { %p19635_p9 = scmp.ne.s32.totalorder %s55_s30, %s19634_s1  ;;  %p19640_p11 = scmp.lt.s32.totalorder %s19634_s1, %s19634_s1 }
  0x74   :  { %p19641_p12 = por %p19640_p11, %p19639_p10 }
  0x76   :  { %p19642_p13 = pnand %p19641_p12, %p19635_p9 }
  0x78   :  { %19645 = shalt.err (!%p19642_p13)
}
  0x79   :  { %60 = dma.hbm_to_vmem [thread:$0]  %s22103_s3, 2304, %s55_s30, [#allocation6], %s19747_s13, %s19747_s13, %s19748_s14  }
  0x7a   :  { %s19646_s27 = scalar_lea.hbm %s22105_s5, 2304 }
  0x7b   :  { %p19647_p0 = scmp.ne.s32.totalorder %s22105_s5, %s19646_s27  ;;  %p19650_p1 = scmp.lt.u32.totalorder %s19646_s27, %s22105_s5 }
  0x7d   :  { %p19652_p2 = pnand %p19650_p1, %p19647_p0 }
  0x7f   :  { %19655 = shalt.err (!%p19652_p2)
}
  0x80   :  { %s19656_s8 = scalar_lea.vmem %s19934_s19, 2304  ;;  %p19661_p4 = scmp.lt.s32.totalorder %s19934_s19, %s19934_s19 }
  0x81   :  { %p19657_p3 = scmp.ne.s32.totalorder %s19934_s19, %s19656_s8  ;;  %p19662_p5 = scmp.lt.s32.totalorder %s19656_s8, %s19656_s8 }
  0x83   :  { %p19663_p6 = por %p19662_p5, %p19661_p4 }
  0x85   :  { %p19664_p7 = pnand %p19663_p6, %p19657_p3 }
  0x87   :  { %19667 = shalt.err (!%p19664_p7)
}
  0x88   :  { %84 = dma.hbm_to_vmem [thread:$0]  %s22105_s5, 2304, %s19934_s19, [#allocation9], %s19747_s13, %s19747_s13, %s19748_s14  }
  0x89   :  { %s19762_s17 = smov [#allocation13]   ;;  %s19763_s21 = smov [#allocation16]  }
  0x8a   :  { %s102_s20 = sshll.u32 %s19762_s17, 4  ;;  %s126_s6 = sshll.u32 %s19763_s21, 4  ;;  %s103_s20 = int_to_ptr.vmem [resolvable:$true] %s102_s20  ;;  %s19971_s6 = int_to_ptr.vmem [resolvable:$true] %s126_s6 }
  0x8b   :  { %s19668_s1 = scalar_lea.hbm %s22107_s7, 32768 }
  0x8c   :  { %p19669_p8 = scmp.ne.s32.totalorder %s22107_s7, %s19668_s1  ;;  %p19672_p9 = scmp.lt.u32.totalorder %s19668_s1, %s22107_s7 }
  0x8e   :  { %p19674_p10 = pnand %p19672_p9, %p19669_p8 }
  0x90   :  { %19677 = shalt.err (!%p19674_p10)
}
  0x91   :  { %s19678_s5 = scalar_lea.vmem %s103_s20, 32768  ;;  %p19683_p12 = scmp.lt.s32.totalorder %s103_s20, %s103_s20 }
  0x92   :  { %p19679_p11 = scmp.ne.s32.totalorder %s103_s20, %s19678_s5  ;;  %p19684_p13 = scmp.lt.s32.totalorder %s19678_s5, %s19678_s5 }
  0x94   :  { %p19685_p0 = por %p19684_p13, %p19683_p12 }
  0x96   :  { %p19686_p1 = pnand %p19685_p0, %p19679_p11 }
  0x98   :  { %19689 = shalt.err (!%p19686_p1)
}
  0x99   :  { %108 = dma.hbm_to_vmem [thread:$0]  %s22107_s7, 32768, %s103_s20, [#allocation12], %s19758_s10, %s19758_s10, %s19759_s26  }
  0x9a   :  { %s19690_s22 = scalar_lea.hbm %s22109_s9, 4096 }
  0x9b   :  { %p19691_p2 = scmp.ne.s32.totalorder %s22109_s9, %s19690_s22  ;;  %p19694_p3 = scmp.lt.u32.totalorder %s19690_s22, %s22109_s9 }
  0x9d   :  { %p19696_p4 = pnand %p19694_p3, %p19691_p2 }
  0x9f   :  { %19699 = shalt.err (!%p19696_p4)
}
  0xa0   :  { %s19700_s3 = scalar_lea.vmem %s19971_s6, 4096  ;;  %p19705_p6 = scmp.lt.s32.totalorder %s19971_s6, %s19971_s6 }
  0xa1   :  { %p19701_p5 = scmp.ne.s32.totalorder %s19971_s6, %s19700_s3  ;;  %p19706_p7 = scmp.lt.s32.totalorder %s19700_s3, %s19700_s3 }
  0xa3   :  { %p19707_p8 = por %p19706_p7, %p19705_p6 }
  0xa5   :  { %p19708_p9 = pnand %p19707_p8, %p19701_p5 }
  0xa7   :  { %19711 = shalt.err (!%p19708_p9)
}
  0xa8   :  { %s19764_s7 = smov 128   ;;  %s19765_s10 = smov 8  }
  0xa9   :  { %132 = dma.hbm_to_vmem [thread:$0]  %s22109_s9, 4096, %s19971_s6, [#allocation15], %s19764_s7, %s19764_s7, %s19765_s10  }
  0xaa   :  { %s19766_s17 = smov [#allocation19]   ;;  %s19712_s23 = scalar_lea.hbm %s22111_s11, 1024 }
  0xab   :  { %s150_s20 = sshll.u32 %s19766_s17, 4  ;;  %p19713_p10 = scmp.ne.s32.totalorder %s22111_s11, %s19712_s23  ;;  %s151_s20 = int_to_ptr.vmem [resolvable:$true] %s150_s20 }
  0xac   :  { %p19716_p11 = scmp.lt.u32.totalorder %s19712_s23, %s22111_s11 }
  0xae   :  { %p19718_p12 = pnand %p19716_p11, %p19713_p10 }
  0xb0   :  { %19721 = shalt.err (!%p19718_p12)
}
  0xb1   :  { %s19722_s4 = scalar_lea.vmem %s151_s20, 1024  ;;  %p19727_p0 = scmp.lt.s32.totalorder %s151_s20, %s151_s20 }
  0xb2   :  { %p19723_p13 = scmp.ne.s32.totalorder %s151_s20, %s19722_s4  ;;  %p19728_p1 = scmp.lt.s32.totalorder %s19722_s4, %s19722_s4 }
  0xb4   :  { %p19729_p2 = por %p19728_p1, %p19727_p0 }
  0xb6   :  { %p19730_p3 = pnand %p19729_p2, %p19723_p13 }
  0xb8   :  { %19733 = shalt.err (!%p19730_p3)
}
  0xb9   :  { %s19767_s9 = smov 512  }
  0xba   :  { %156 = dma.hbm_to_vmem [thread:$0]  %s22111_s11, 1024, %s151_s20, [#allocation18], %s19767_s9, %s19767_s9, %s19750_s2  }
  0xbb   :  { %19734 = dma.done.wait [#allocation4], 36864  }
  0xbc   :  { %19735 = vsyncadd [#allocation4], 4294930432 }
  0xbd   :  { %19736 = dma.done.wait [#allocation6], 4608  }
  0xbe   :  { %19737 = vsyncadd [#allocation6], 4294962688 }
  0xbf   :  { %19738 = dma.done.wait [#allocation9], 2592  }
  0xc0   :  { %19739 = vsyncadd [#allocation9], 4294964704 }
  0xc1   :  { %19740 = dma.done.wait [#allocation12], 37376  }
  0xc2   :  { %19741 = vsyncadd [#allocation12], 4294929920 }
  0xc3   :  { %19742 = dma.done.wait [#allocation15], 45056  }
  0xc4   :  { %19743 = vsyncadd [#allocation15], 4294922240 }
  0xc5   :  { %19744 = dma.done.wait [#allocation18], 7168  }
  0xc6   :  { %19745 = vsyncadd [#allocation18], 4294960128  ;;  %v20021_v0 = vld [vmem:[%s22100_s0 + $0x40] sm:$0xff]   ;;  %v20044_v4 = vld [vmem:[%s22100_s0 + $0x48] sm:$0xff]   ;;  %vm1264_vm0 = vcmask 1041408   ;;  %vm1239_vm1 = vcmask 31744  }
  0xc7   :  { %v20026_v1 = vld [vmem:[%s22100_s0 + $0xc0] sm:$0xff]   ;;  %15501 = vmatprep.subr.bf16.mxu0 %v20021_v0  ;;  %v20050_v5 = vld [vmem:[%s22100_s0 + $0xc8] sm:$0xff]   ;;  %v20068_v8 = vld [vmem:[%s22100_s0 + $0x50] sm:$0xff]   ;;  %vm5445_vm2 = vcmask 261120   ;;  %vm6771_vm3 = vcmask 523264  }
  0xc8   :  { %v20032_v2 = vld [vmem:[%s22100_s0] sm:$0xff]   ;;  %15565 = vmatprep.subr.bf16.mxu1 %v20026_v1  ;;  %v20056_v6 = vld [vmem:[%s22100_s0 + $0x8] sm:$0xff]   ;;  %v20074_v9 = vld [vmem:[%s22100_s0 + $0xd0] sm:$0xff]  }
  0xc9   :  { %v20038_v3 = vld [vmem:[%s22100_s0 + $0x80] sm:$0xff]   ;;  %15502 = vmatpush3.bf16.msra.mxu0 %v20032_v2  ;;  %v20062_v7 = vld [vmem:[%s22100_s0 + $0x88] sm:$0xff]   ;;  %v20080_v10 = vld [vmem:[%s22100_s0 + $0x10] sm:$0xff]  }
  0xca   :  { %15566 = vmatpush3.bf16.msra.mxu1 %v20038_v3  ;;  %15503 = vmatprep.subr.bf16.mxu0 %v20044_v4  ;;  %v20086_v11 = vld [vmem:[%s22100_s0 + $0x90] sm:$0xff]   ;;  %v20092_v12 = vld [vmem:[%s22100_s0 + $0x58] sm:$0xff]   ;;  %v20116_v16 = vld [vmem:[%s22100_s0 + $0x60] sm:$0xff]  }
  0xcb   :  { %15567 = vmatprep.subr.bf16.mxu1 %v20050_v5  ;;  %v20098_v13 = vld [vmem:[%s22100_s0 + $0xd8] sm:$0xff]   ;;  %v20122_v17 = vld [vmem:[%s22100_s0 + $0xe0] sm:$0xff]   ;;  %v20140_v20 = vld [vmem:[%s22100_s0 + $0x68] sm:$0xff]  }
  0xcc   :  { %v20104_v14 = vld [vmem:[%s22100_s0 + $0x18] sm:$0xff]   ;;  %v20128_v18 = vld [vmem:[%s22100_s0 + $0x20] sm:$0xff]   ;;  %v20146_v21 = vld [vmem:[%s22100_s0 + $0xe8] sm:$0xff]  }
  0xcd   :  { %15504 = vmatpush3.bf16.msra.mxu0 %v20056_v6  ;;  %v20110_v15 = vld [vmem:[%s22100_s0 + $0x98] sm:$0xff]   ;;  %v20134_v19 = vld [vmem:[%s22100_s0 + $0xa0] sm:$0xff]   ;;  %v20152_v22 = vld [vmem:[%s22100_s0 + $0x28] sm:$0xff]  }
  0xce   :  { %15568 = vmatpush3.bf16.msra.mxu1 %v20062_v7  ;;  %15505 = vmatprep.subr.bf16.mxu0 %v20068_v8  ;;  %v20158_v23 = vld [vmem:[%s22100_s0 + $0xa8] sm:$0xff]   ;;  %v20164_v24 = vld [vmem:[%s22100_s0 + $0x70] sm:$0xff]   ;;  %v20188_v28 = vld [vmem:[%s22100_s0 + $0x78] sm:$0xff]  }
  0xcf   :  { %15569 = vmatprep.subr.bf16.mxu1 %v20074_v9  ;;  %v20170_v25 = vld [vmem:[%s22100_s0 + $0xf0] sm:$0xff]   ;;  %v20194_v29 = vld [vmem:[%s22100_s0 + $0xf8] sm:$0xff]  }
  0xd0   :  { %v20176_v26 = vld [vmem:[%s22100_s0 + $0x30] sm:$0xff]   ;;  %v20200_v30 = vld [vmem:[%s22100_s0 + $0x38] sm:$0xff]  }
  0xd1   :  { %15506 = vmatpush3.bf16.msra.mxu0 %v20080_v10  ;;  %v20182_v27 = vld [vmem:[%s22100_s0 + $0xb0] sm:$0xff]   ;;  %v20206_v31 = vld [vmem:[%s22100_s0 + $0xb8] sm:$0xff]  }
  0xd2   :  { %15570 = vmatpush3.bf16.msra.mxu1 %v20086_v11  ;;  %15507 = vmatprep.subr.bf16.mxu0 %v20092_v12  ;;  %v17912_v32 = vld [vmem:[#allocation3] ss:$16 sps:$4 sm:$0xff]   ;;  %v17914_v33 = vld [vmem:[#allocation3 + $0x4] ss:$16 sps:$4 sm:$0xff]   ;;  %v17915_v34 = vld [vmem:[#allocation3 + $0x8] ss:$16 sps:$4 sm:$0xff]  }
  0xd3   :  { %15571 = vmatprep.subr.bf16.mxu1 %v20098_v13  ;;  %v17917_v35 = vld [vmem:[#allocation3 + $0xc] ss:$16 sps:$4 sm:$0xff]   ;;  %671 = vmatprep.mubr.bf16.mxu0 %v17914_v33  ;;  %v17918_v36 = vld [vmem:[#allocation3 + $0x24] ss:$16 sps:$4 sm:$0xff]   ;;  %v17922_v38 = vld [vmem:[#allocation3 + $0x20] ss:$16 sps:$4 sm:$0xff]  }
  0xd4   :  { %768 = vmatprep.mubr.bf16.mxu1 %v17917_v35  ;;  %v17920_v37 = vld [vmem:[#allocation3 + $0x2c] ss:$16 sps:$4 sm:$0xff]   ;;  %v17923_v39 = vld [vmem:[#allocation3 + $0x28] ss:$16 sps:$4 sm:$0xff]   ;;  %v17924_v40 = vld [vmem:[#allocation3 + $0x44] ss:$16 sps:$4 sm:$0xff]  }
  0xd5   :  { %15508 = vmatpush3.bf16.msra.mxu0 %v20104_v14  ;;  %v17926_v41 = vld [vmem:[#allocation3 + $0x4c] ss:$16 sps:$4 sm:$0xff]   ;;  %v17928_v42 = vld [vmem:[#allocation3 + $0x40] ss:$16 sps:$4 sm:$0xff]   ;;  %v17929_v43 = vld [vmem:[#allocation3 + $0x48] ss:$16 sps:$4 sm:$0xff]  }
  0xd6   :  { %15572 = vmatpush3.bf16.msra.mxu1 %v20110_v15  ;;  %15509 = vmatprep.subr.bf16.mxu0 %v20116_v16  ;;  %v17930_v44 = vld [vmem:[#allocation3 + $0x64] ss:$16 sps:$4 sm:$0xff]   ;;  %v17932_v45 = vld [vmem:[#allocation3 + $0x6c] ss:$16 sps:$4 sm:$0xff]   ;;  %v17934_v46 = vld [vmem:[#allocation3 + $0x60] ss:$16 sps:$4 sm:$0xff]  }
  0xd7   :  { %15573 = vmatprep.subr.bf16.mxu1 %v20122_v17  ;;  %v17935_v47 = vld [vmem:[#allocation3 + $0x68] ss:$16 sps:$4 sm:$0xff]   ;;  %v17936_v48 = vld [vmem:[#allocation3 + $0x84] ss:$16 sps:$4 sm:$0xff]   ;;  %v17938_v49 = vld [vmem:[#allocation3 + $0x8c] ss:$16 sps:$4 sm:$0xff]  }
  0xd8   :  { %v17940_v50 = vld [vmem:[#allocation3 + $0x80] ss:$16 sps:$4 sm:$0xff]   ;;  %v17941_v51 = vld [vmem:[#allocation3 + $0x88] ss:$16 sps:$4 sm:$0xff]   ;;  %v17942_v52 = vld [vmem:[#allocation3 + $0xa4] ss:$16 sps:$4 sm:$0xff]  }
  0xd9   :  { %15510 = vmatpush3.bf16.msra.mxu0 %v20128_v18  ;;  %v17944_v53 = vld [vmem:[#allocation3 + $0xac] ss:$16 sps:$4 sm:$0xff]   ;;  %v17946_v54 = vld [vmem:[#allocation3 + $0xa0] ss:$16 sps:$4 sm:$0xff]   ;;  %v17947_v55 = vld [vmem:[#allocation3 + $0xa8] ss:$16 sps:$4 sm:$0xff]  }
  0xda   :  { %15574 = vmatpush3.bf16.msra.mxu1 %v20134_v19  ;;  %15511 = vmatprep.subr.bf16.mxu0 %v20140_v20  ;;  %v17948_v56 = vld [vmem:[#allocation3 + $0xc4] ss:$16 sps:$4 sm:$0xff]   ;;  %v17950_v57 = vld [vmem:[#allocation3 + $0xcc] ss:$16 sps:$4 sm:$0xff]   ;;  %v17952_v58 = vld [vmem:[#allocation3 + $0xc0] ss:$16 sps:$4 sm:$0xff]  }
  0xdb   :  { %15575 = vmatprep.subr.bf16.mxu1 %v20146_v21  ;;  %v17953_v59 = vld [vmem:[#allocation3 + $0xc8] ss:$16 sps:$4 sm:$0xff]   ;;  %v17954_v60 = vld [vmem:[#allocation3 + $0xe4] ss:$16 sps:$4 sm:$0xff]   ;;  %v17956_v61 = vld [vmem:[#allocation3 + $0xec] ss:$16 sps:$4 sm:$0xff]  }
  0xdc   :  { %v17958_v62 = vld [vmem:[#allocation3 + $0xe0] ss:$16 sps:$4 sm:$0xff]   ;;  %v17959_v63 = vld [vmem:[#allocation3 + $0xe8] ss:$16 sps:$4 sm:$0xff]   ;;  %v17963_v33 = vld [vmem:[#allocation3 + $0x124] ss:$16 sps:$4 sm:$0xff]  }
  0xdd   :  { %15512 = vmatpush3.bf16.msra.mxu0 %v20152_v22  ;;  %v17971_v35 = vld [vmem:[#allocation3 + $0x14c] ss:$16 sps:$4 sm:$0xff]  }
  0xde   :  { %15576 = vmatpush3.bf16.msra.mxu1 %v20158_v23  ;;  %15513 = vmatprep.subr.bf16.mxu0 %v20164_v24 }
  0xdf   :  { %15577 = vmatprep.subr.bf16.mxu1 %v20170_v25 }
  0xe1   :  { %15514 = vmatpush3.bf16.msra.mxu0 %v20176_v26 }
  0xe2   :  { %15578 = vmatpush3.bf16.msra.mxu1 %v20182_v27  ;;  %15515 = vmatprep.subr.bf16.mxu0 %v20188_v28 }
  0xe3   :  { %15579 = vmatprep.subr.bf16.mxu1 %v20194_v29 }
  0xe5   :  { %15516 = vmatpush3.bf16.msra.mxu0 %v20200_v30 }
  0xe6   :  { %15580 = vmatpush3.bf16.msra.mxu1 %v20206_v31  ;;  %15629 = vmatprep.subr.bf16.mxu0 %v20021_v0 }
  0xe7   :  { %17610 = vmatprep.subr.bf16.mxu1 %v20026_v1 }
  0xe8   :  { %672 = vmatmul.mubr.bf16.vlgmr.msra.gmra.mrb[0].mxu0 %v17912_v32  ;;  %v17960_v32 = vld [vmem:[#allocation3 + $0x100] ss:$16 sps:$4 sm:$0xff]  }
  0xe9   :  { %769 = vmatmul.mubr.bf16.vlgmr.msra.gmra.mrb[0].mxu1 %v17915_v34  ;;  %15630 = vmatpush3.bf16.msra.mxu0 %v20032_v2  ;;  %v17965_v34 = vld [vmem:[#allocation3 + $0x128] ss:$16 sps:$4 sm:$0xff]  }
  0xea   :  { %679 = vmatprep.mubr.bf16.mxu0 %v17918_v36  ;;  %776 = vmatprep.mubr.bf16.mxu1 %v17920_v37  ;;  %v17968_v36 = vld [vmem:[#allocation3 + $0x120] ss:$16 sps:$4 sm:$0xff]   ;;  %v17969_v37 = vld [vmem:[#allocation3 + $0x144] ss:$16 sps:$4 sm:$0xff]  }
  0xeb   :  { %15631 = vmatprep.subr.bf16.mxu0 %v20044_v4  ;;  %17618 = vmatpush3.bf16.msra.mxu1 %v20038_v3 }
  0xec   :  { %17611 = vmatprep.subr.bf16.mxu1 %v20050_v5 }
  0xed   :  { %15632 = vmatpush3.bf16.msra.mxu0 %v20056_v6 }
  0xee   :  { %15633 = vmatprep.subr.bf16.mxu0 %v20068_v8 }
  0xef   :  { %17619 = vmatpush3.bf16.msra.mxu1 %v20062_v7 }
  0xf0   :  { %680 = vmatmul.mubr.bf16.gmra.mrb[4].mxu0 %v17922_v38  ;;  %17612 = vmatprep.subr.bf16.mxu1 %v20074_v9  ;;  %v17974_v38 = vld [vmem:[#allocation3 + $0x148] ss:$16 sps:$4 sm:$0xff]  }
  0xf1   :  { %777 = vmatmul.mubr.bf16.gmra.mrb[4].mxu1 %v17923_v39  ;;  %687 = vmatprep.mubr.bf16.mxu0 %v17924_v40  ;;  %v17977_v39 = vld [vmem:[#allocation3 + $0x16c] ss:$16 sps:$4 sm:$0xff]   ;;  %v19398_v40 = vld [vmem:[%s22100_s0 + $0x50] sm:$0xff]  }
  0xf2   :  { %784 = vmatprep.mubr.bf16.mxu1 %v17926_v41  ;;  %15634 = vmatpush3.bf16.msra.mxu0 %v20080_v10  ;;  %v19399_v41 = vld [vmem:[%s22100_s0 + $0x10] sm:$0xff]  }
  0xf3   :  { %15635 = vmatprep.subr.bf16.mxu0 %v20092_v12  ;;  %17620 = vmatpush3.bf16.msra.mxu1 %v20086_v11 }
  0xf4   :  { %17613 = vmatprep.subr.bf16.mxu1 %v20098_v13 }
  0xf6   :  { %15636 = vmatpush3.bf16.msra.mxu0 %v20104_v14 }
  0xf7   :  { %15637 = vmatprep.subr.bf16.mxu0 %v20116_v16  ;;  %17621 = vmatpush3.bf16.msra.mxu1 %v20110_v15 }
  0xf8   :  { %688 = vmatmul.mubr.bf16.gmra.mrb[8].mxu0 %v17928_v42  ;;  %17614 = vmatprep.subr.bf16.mxu1 %v20122_v17  ;;  %v19400_v42 = vld [vmem:[%s22100_s0 + $0x58] sm:$0xff]  }
  0xf9   :  { %785 = vmatmul.mubr.bf16.gmra.mrb[8].mxu1 %v17929_v43  ;;  %695 = vmatprep.mubr.bf16.mxu0 %v17930_v44  ;;  %v18014_v43 = vld [vmem:[#allocation3 + $0x244] ss:$16 sps:$4 sm:$0xff]   ;;  %v19401_v44 = vld [vmem:[%s22100_s0 + $0x18] sm:$0xff]  }
  0xfa   :  { %792 = vmatprep.mubr.bf16.mxu1 %v17932_v45  ;;  %15638 = vmatpush3.bf16.msra.mxu0 %v20128_v18  ;;  %v18016_v45 = vld [vmem:[#allocation3 + $0x240] ss:$16 sps:$4 sm:$0xff]  }
  0xfb   :  { %15639 = vmatprep.subr.bf16.mxu0 %v20140_v20  ;;  %17622 = vmatpush3.bf16.msra.mxu1 %v20134_v19 }
  0xfc   :  { %17615 = vmatprep.subr.bf16.mxu1 %v20146_v21 }
  0xfe   :  { %15640 = vmatpush3.bf16.msra.mxu0 %v20152_v22 }
  0xff   :  { %15641 = vmatprep.subr.bf16.mxu0 %v20164_v24  ;;  %17623 = vmatpush3.bf16.msra.mxu1 %v20158_v23 }
 0x100   :  { %696 = vmatmul.mubr.bf16.gmra.mrb[12].mxu0 %v17934_v46  ;;  %17616 = vmatprep.subr.bf16.mxu1 %v20170_v25  ;;  %v19402_v46 = vld [vmem:[%s22100_s0 + $0x60] sm:$0xff]  }
 0x101   :  { %793 = vmatmul.mubr.bf16.gmra.mrb[12].mxu1 %v17935_v47  ;;  %703 = vmatprep.mubr.bf16.mxu0 %v17936_v48  ;;  %v19403_v47 = vld [vmem:[%s22100_s0 + $0x20] sm:$0xff]   ;;  %v19404_v48 = vld [vmem:[%s22100_s0 + $0x68] sm:$0xff]  }
 0x102   :  { %800 = vmatprep.mubr.bf16.mxu1 %v17938_v49  ;;  %15642 = vmatpush3.bf16.msra.mxu0 %v20176_v26  ;;  %v18017_v49 = vld [vmem:[#allocation3 + $0x264] ss:$16 sps:$4 sm:$0xff]  }
 0x103   :  { %15643 = vmatprep.subr.bf16.mxu0 %v20188_v28  ;;  %17624 = vmatpush3.bf16.msra.mxu1 %v20182_v27 }
 0x104   :  { %17617 = vmatprep.subr.bf16.mxu1 %v20194_v29 }
 0x106   :  { %15644 = vmatpush3.bf16.msra.mxu0 %v20200_v30 }
 0x107   :  { %15693 = vmatprep.subr.bf16.mxu0 %v20026_v1  ;;  %17625 = vmatpush3.bf16.msra.mxu1 %v20206_v31  ;;  %v17967_v1 = vld [vmem:[#allocation3 + $0x12c] ss:$16 sps:$4 sm:$0xff]  }
 0x108   :  { %704 = vmatmul.mubr.bf16.gmra.mrb[16].mxu0 %v17940_v50  ;;  %15775 = vmatprep.subr.bf16.mxu1 %v20021_v0  ;;  %v17962_v0 = vld [vmem:[#allocation3 + $0x104] ss:$16 sps:$4 sm:$0xff]   ;;  %v19405_v50 = vld [vmem:[%s22100_s0 + $0x28] sm:$0xff]  }
 0x109   :  { %801 = vmatmul.mubr.bf16.gmra.mrb[16].mxu1 %v17941_v51  ;;  %711 = vmatprep.mubr.bf16.mxu0 %v17942_v52  ;;  %v18019_v51 = vld [vmem:[#allocation3 + $0x260] ss:$16 sps:$4 sm:$0xff]  }
 0x10a   :  { %808 = vmatprep.mubr.bf16.mxu1 %v17944_v53  ;;  %v19406_v52 = vld [vmem:[%s22100_s0 + $0x70] sm:$0xff]  }
 0x10b   :  { %v19407_v53 = vld [vmem:[%s22100_s0 + $0x30] sm:$0xff]  }
 0x110   :  { %712 = vmatmul.mubr.bf16.gmra.mrb[20].mxu0 %v17946_v54  ;;  %v19408_v54 = vld [vmem:[%s22100_s0 + $0x78] sm:$0xff]  }
 0x111   :  { %809 = vmatmul.mubr.bf16.gmra.mrb[20].mxu1 %v17947_v55  ;;  %719 = vmatprep.mubr.bf16.mxu0 %v17948_v56  ;;  %v18020_v55 = vld [vmem:[#allocation3 + $0x284] ss:$16 sps:$4 sm:$0xff]   ;;  %v19409_v56 = vld [vmem:[%s22100_s0 + $0x38] sm:$0xff]  }
 0x112   :  { %816 = vmatprep.mubr.bf16.mxu1 %v17950_v57  ;;  %v18022_v57 = vld [vmem:[#allocation3 + $0x280] ss:$16 sps:$4 sm:$0xff]  }
 0x118   :  { %720 = vmatmul.mubr.bf16.gmra.mrb[24].mxu0 %v17952_v58  ;;  %v20325_v58 = vld [vmem:[%s22100_s0 + $0xc0] sm:$0xff]  }
 0x119   :  { %817 = vmatmul.mubr.bf16.gmra.mrb[24].mxu1 %v17953_v59  ;;  %727 = vmatprep.mubr.bf16.mxu0 %v17954_v60  ;;  %v18023_v59 = vld [vmem:[#allocation3 + $0x2a4] ss:$16 sps:$4 sm:$0xff]   ;;  %v18025_v60 = vld [vmem:[#allocation3 + $0x2a0] ss:$16 sps:$4 sm:$0xff]  }
 0x11a   :  { %824 = vmatprep.mubr.bf16.mxu1 %v17956_v61  ;;  %v18026_v61 = vld [vmem:[#allocation3 + $0x2c4] ss:$16 sps:$4 sm:$0xff]  }
 0x120   :  { %728 = vmatmul.mubr.bf16.gmra.mrb[28].mxu0 %v17958_v62  ;;  %v18028_v62 = vld [vmem:[#allocation3 + $0x2c0] ss:$16 sps:$4 sm:$0xff]  }
 0x121   :  { %825 = vmatmul.mubr.bf16.gmra.mrb[28].mxu1 %v17959_v63  ;;  %1067 = vmatprep.mubr.bf16.mxu0 %v17962_v0  ;;  %v18029_v63 = vld [vmem:[#allocation3 + $0x2e4] ss:$16 sps:$4 sm:$0xff]   ;;  %v18031_v0 = vld [vmem:[#allocation3 + $0x2e0] ss:$16 sps:$4 sm:$0xff]  }
 0x122   :  { %1172 = vmatprep.mubr.bf16.mxu1 %v17967_v1  ;;  %v18032_v1 = vld [vmem:[#allocation3 + $0x300] ss:$16 sps:$4 sm:$0xff]  }
 0x128   :  { %1068 = vmatmul.mubr.bf16.vlgmr.msra.gmra.mrb[32].mxu0 %v17960_v32  ;;  %v18034_v32 = vld [vmem:[#allocation3 + $0x304] ss:$16 sps:$4 sm:$0xff]  }
 0x129   :  { %15694 = vmatpush3.bf16.msra.mxu0 %v20038_v3  ;;  %1075 = vmatprep.mubr.bf16.mxu0 %v17963_v33  ;;  %v17973_v3 = vld [vmem:[#allocation3 + $0x140] ss:$16 sps:$4 sm:$0xff]  }
 0x12a   :  { %15695 = vmatprep.subr.bf16.mxu0 %v20050_v5  ;;  %1173 = vmatmul.mubr.bf16.vlgmr.msra.gmra.mrb[32].mxu1 %v17965_v34  ;;  %v17983_v5 = vld [vmem:[#allocation3 + $0x18c] ss:$16 sps:$4 sm:$0xff]   ;;  %v20331_v33 = vld [vmem:[%s22100_s0 + $0x80] sm:$0xff]  }
 0x12b   :  { %1180 = vmatprep.mubr.bf16.mxu1 %v17971_v35  ;;  %15776 = vmatpush3.bf16.msra.mxu1 %v20032_v2  ;;  %v17975_v2 = vld [vmem:[#allocation3 + $0x164] ss:$16 sps:$4 sm:$0xff]   ;;  %v20337_v34 = vld [vmem:[%s22100_s0 + $0xc8] sm:$0xff]  }
 0x12c   :  { %15777 = vmatprep.subr.bf16.mxu1 %v20044_v4  ;;  %v17980_v4 = vld [vmem:[#allocation3 + $0x168] ss:$16 sps:$4 sm:$0xff]   ;;  %v18035_v35 = vld [vmem:[#allocation3 + $0x324] ss:$16 sps:$4 sm:$0xff]  }
 0x12d   :  { %15696 = vmatpush3.bf16.msra.mxu0 %v20062_v7  ;;  %v17981_v7 = vld [vmem:[#allocation3 + $0x184] ss:$16 sps:$4 sm:$0xff]  }
 0x12e   :  { %15697 = vmatprep.subr.bf16.mxu0 %v20074_v9  ;;  %v17989_v9 = vld [vmem:[#allocation3 + $0x1ac] ss:$16 sps:$4 sm:$0xff]  }
 0x12f   :  { %15778 = vmatpush3.bf16.msra.mxu1 %v20056_v6  ;;  %v17979_v6 = vld [vmem:[#allocation3 + $0x160] ss:$16 sps:$4 sm:$0xff]  }
 0x130   :  { %1076 = vmatmul.mubr.bf16.gmra.mrb[36].mxu0 %v17968_v36  ;;  %15779 = vmatprep.subr.bf16.mxu1 %v20068_v8  ;;  %v17986_v8 = vld [vmem:[#allocation3 + $0x188] ss:$16 sps:$4 sm:$0xff]  }
 0x131   :  { %1083 = vmatprep.mubr.bf16.mxu0 %v17969_v37  ;;  %15698 = vmatpush3.bf16.msra.mxu0 %v20086_v11  ;;  %v17987_v11 = vld [vmem:[#allocation3 + $0x1a4] ss:$16 sps:$4 sm:$0xff]   ;;  %v20343_v36 = vld [vmem:[%s22100_s0 + $0x88] sm:$0xff]   ;;  %v18037_v37 = vld [vmem:[#allocation3 + $0x320] ss:$16 sps:$4 sm:$0xff]  }
 0x132   :  { %1181 = vmatmul.mubr.bf16.gmra.mrb[36].mxu1 %v17974_v38  ;;  %15699 = vmatprep.subr.bf16.mxu0 %v20098_v13  ;;  %v17995_v13 = vld [vmem:[#allocation3 + $0x1cc] ss:$16 sps:$4 sm:$0xff]   ;;  %v20349_v38 = vld [vmem:[%s22100_s0 + $0xd0] sm:$0xff]  }
 0x133   :  { %1188 = vmatprep.mubr.bf16.mxu1 %v17977_v39  ;;  %15780 = vmatpush3.bf16.msra.mxu1 %v20080_v10  ;;  %v17985_v10 = vld [vmem:[#allocation3 + $0x180] ss:$16 sps:$4 sm:$0xff]  }
 0x134   :  { %15781 = vmatprep.subr.bf16.mxu1 %v20092_v12  ;;  %v17992_v12 = vld [vmem:[#allocation3 + $0x1a8] ss:$16 sps:$4 sm:$0xff]   ;;  %v20355_v39 = vld [vmem:[%s22100_s0 + $0x90] sm:$0xff]  }
 0x135   :  { %15700 = vmatpush3.bf16.msra.mxu0 %v20110_v15  ;;  %v17991_v15 = vld [vmem:[#allocation3 + $0x1a0] ss:$16 sps:$4 sm:$0xff]  }
 0x136   :  { %15701 = vmatprep.subr.bf16.mxu0 %v20122_v17  ;;  %v17998_v17 = vld [vmem:[#allocation3 + $0x1c8] ss:$16 sps:$4 sm:$0xff]  }
 0x137   :  { %15782 = vmatpush3.bf16.msra.mxu1 %v20104_v14  ;;  %v19394_v14 = vld [vmem:[%s22100_s0 + $0x40] sm:$0xff]  }
 0x138   :  { %1084 = vmatmul.mubr.bf16.gmra.mrb[40].mxu0 %v17973_v3  ;;  %15783 = vmatprep.subr.bf16.mxu1 %v20116_v16  ;;  %v17993_v16 = vld [vmem:[#allocation3 + $0x1c4] ss:$16 sps:$4 sm:$0xff]   ;;  %v20361_v3 = vld [vmem:[%s22100_s0 + $0xd8] sm:$0xff]  }
 0x139   :  { %1091 = vmatprep.mubr.bf16.mxu0 %v17975_v2  ;;  %15702 = vmatpush3.bf16.msra.mxu0 %v20134_v19  ;;  %v17997_v19 = vld [vmem:[#allocation3 + $0x1c0] ss:$16 sps:$4 sm:$0xff]   ;;  %v18038_v2 = vld [vmem:[#allocation3 + $0x344] ss:$16 sps:$4 sm:$0xff]  }
 0x13a   :  { %1189 = vmatmul.mubr.bf16.gmra.mrb[40].mxu1 %v17980_v4  ;;  %15703 = vmatprep.subr.bf16.mxu0 %v20146_v21  ;;  %v18004_v21 = vld [vmem:[#allocation3 + $0x1e8] ss:$16 sps:$4 sm:$0xff]  }
 0x13b   :  { %1196 = vmatprep.mubr.bf16.mxu1 %v17983_v5  ;;  %15784 = vmatpush3.bf16.msra.mxu1 %v20128_v18  ;;  %v18001_v18 = vld [vmem:[#allocation3 + $0x1ec] ss:$16 sps:$4 sm:$0xff]   ;;  %v18040_v5 = vld [vmem:[#allocation3 + $0x340] ss:$16 sps:$4 sm:$0xff]  }
 0x13c   :  { %15785 = vmatprep.subr.bf16.mxu1 %v20140_v20  ;;  %v17999_v20 = vld [vmem:[#allocation3 + $0x1e4] ss:$16 sps:$4 sm:$0xff]   ;;  %v20367_v4 = vld [vmem:[%s22100_s0 + $0x98] sm:$0xff]  }
 0x13d   :  { %15704 = vmatpush3.bf16.msra.mxu0 %v20158_v23  ;;  %v18007_v23 = vld [vmem:[#allocation3 + $0x10c] ss:$16 sps:$4 sm:$0xff]  }
 0x13e   :  { %15705 = vmatprep.subr.bf16.mxu0 %v20170_v25  ;;  %v18005_v25 = vld [vmem:[#allocation3 + $0x108] ss:$16 sps:$4 sm:$0xff]  }
 0x13f   :  { %15786 = vmatpush3.bf16.msra.mxu1 %v20152_v22  ;;  %v18003_v22 = vld [vmem:[#allocation3 + $0x1e0] ss:$16 sps:$4 sm:$0xff]  }
 0x140   :  { %1092 = vmatmul.mubr.bf16.gmra.mrb[44].mxu0 %v17979_v6  ;;  %15787 = vmatprep.subr.bf16.mxu1 %v20164_v24  ;;  %v18010_v24 = vld [vmem:[#allocation3 + $0x204] ss:$16 sps:$4 sm:$0xff]  }
 0x141   :  { %1099 = vmatprep.mubr.bf16.mxu0 %v17981_v7  ;;  %15706 = vmatpush3.bf16.msra.mxu0 %v20182_v27  ;;  %v19395_v27 = vld [vmem:[%s22100_s0] sm:$0xff]  }
 0x142   :  { %1197 = vmatmul.mubr.bf16.gmra.mrb[44].mxu1 %v17986_v8  ;;  %15707 = vmatprep.subr.bf16.mxu0 %v20194_v29  ;;  %v18011_v29 = vld [vmem:[#allocation3 + $0x224] ss:$16 sps:$4 sm:$0xff]   ;;  %v20385_v8 = vld [vmem:[%s22100_s0 + $0xe8] sm:$0xff]  }
 0x143   :  { %1204 = vmatprep.mubr.bf16.mxu1 %v17989_v9  ;;  %15788 = vmatpush3.bf16.msra.mxu1 %v20176_v26  ;;  %v18008_v26 = vld [vmem:[#allocation3 + $0x200] ss:$16 sps:$4 sm:$0xff]   ;;  %v18041_v9 = vld [vmem:[#allocation3 + $0x364] ss:$16 sps:$4 sm:$0xff]  }
 0x144   :  { %15789 = vmatprep.subr.bf16.mxu1 %v20188_v28  ;;  %v19396_v28 = vld [vmem:[%s22100_s0 + $0x48] sm:$0xff]   ;;  %v20373_v6 = vld [vmem:[%s22100_s0 + $0xe0] sm:$0xff]  }
 0x145   :  { %15708 = vmatpush3.bf16.msra.mxu0 %v20206_v31  ;;  %v18013_v31 = vld [vmem:[#allocation3 + $0x220] ss:$16 sps:$4 sm:$0xff]  }
 0x146   :  { %v20379_v7 = vld [vmem:[%s22100_s0 + $0xa0] sm:$0xff]  }
 0x147   :  { %15790 = vmatpush3.bf16.msra.mxu1 %v20200_v30  ;;  %v19397_v30 = vld [vmem:[%s22100_s0 + $0x8] sm:$0xff]  }
 0x148   :  { %1100 = vmatmul.mubr.bf16.gmra.mrb[48].mxu0 %v17985_v10  ;;  %15912 = vmatprep.subr.bf16.mxu1 %v19394_v14  ;;  %v20391_v10 = vld [vmem:[%s22100_s0 + $0xa8] sm:$0xff]  }
 0x149   :  { %1107 = vmatprep.mubr.bf16.mxu0 %v17987_v11  ;;  %v18043_v11 = vld [vmem:[#allocation3 + $0x360] ss:$16 sps:$4 sm:$0xff]  }
 0x14a   :  { %1205 = vmatmul.mubr.bf16.gmra.mrb[48].mxu1 %v17992_v12  ;;  %v20397_v12 = vld [vmem:[%s22100_s0 + $0xf0] sm:$0xff]  }
 0x14b   :  { %1212 = vmatprep.mubr.bf16.mxu1 %v17995_v13 }
 0x150   :  { %1108 = vmatmul.mubr.bf16.gmra.mrb[52].mxu0 %v17991_v15 }
 0x151   :  { %1115 = vmatprep.mubr.bf16.mxu0 %v17993_v16 }
 0x152   :  { %1213 = vmatmul.mubr.bf16.gmra.mrb[52].mxu1 %v17998_v17 }
 0x153   :  { %1220 = vmatprep.mubr.bf16.mxu1 %v18001_v18 }
 0x158   :  { %1116 = vmatmul.mubr.bf16.gmra.mrb[56].mxu0 %v17997_v19  ;;  %v20403_v19 = vld [vmem:[%s22100_s0 + $0xb0] sm:$0xff]  }
 0x159   :  { %1123 = vmatprep.mubr.bf16.mxu0 %v17999_v20 }
 0x15a   :  { %1221 = vmatmul.mubr.bf16.gmra.mrb[56].mxu1 %v18004_v21 }
 0x15b   :  { %1714 = vmatprep.mubr.bf16.mxu1 %v18010_v24 }
 0x160   :  { %1124 = vmatmul.mubr.bf16.gmra.mrb[60].mxu0 %v18003_v22 }
 0x161   :  { %1164 = vmatprep.mubr.bf16.mxu0 %v18007_v23  ;;  %v20409_v23 = vld [vmem:[%s22100_s0 + $0xf8] sm:$0xff]  }
 0x162   :  { %1715 = vmatmul.mubr.bf16.vlgmr.msra.gmra.mrb[60].mxu1 %v18008_v26 }
 0x163   :  { %15913 = vmatpush3.bf16.msra.mxu1 %v19395_v27  ;;  %1722 = vmatprep.mubr.bf16.mxu1 %v18011_v29  ;;  %v18044_v29 = vld [vmem:[#allocation3 + $0x384] ss:$16 sps:$4 sm:$0xff]  }
 0x164   :  { %15914 = vmatprep.subr.bf16.mxu1 %v19396_v28  ;;  %v1238_v28 = vld [vmem:[#allocation8 + $0x2] sm:$0x3] }
 0x165   :  { %17848 = vmatprep.subr.msk.bf16.mxu0 %vm1264_vm0, %v1238_v28 }
 0x167   :  { %15915 = vmatpush3.bf16.msra.mxu1 %v19397_v30  ;;  %v20417_v30 = vld [vmem:[%s22100_s0 + $0xb8] sm:$0xff]  }
 0x168   :  { %1165 = vmatmul.mubr.bf16.vlgmr.msra.gmra.mrb[64].mxu0 %v18005_v25  ;;  %15916 = vmatprep.subr.bf16.mxu1 %v19398_v40  ;;  %v1266_v40 = vsel %vm1264_vm0, %v1238_v28, 0 }
 0x169   :  { %17017 = vmatpush3.bf16.msra.mxu0 %v1266_v40 }
 0x16a   :  { %1723 = vmatmul.mubr.bf16.gmra.mrb[64].mxu1 %v18013_v31 }
 0x16b   :  { %15917 = vmatpush3.bf16.msra.mxu1 %v19399_v41  ;;  %1730 = vmatprep.mubr.bf16.mxu1 %v18014_v43  ;;  %v18046_v41 = vld [vmem:[#allocation3 + $0x380] ss:$16 sps:$4 sm:$0xff]  }
 0x16c   :  { %15918 = vmatprep.subr.bf16.mxu1 %v19400_v42 }
 0x16f   :  { %15919 = vmatpush3.bf16.msra.mxu1 %v19401_v44 }
 0x170   :  { %15920 = vmatprep.subr.bf16.mxu1 %v19402_v46 }
 0x172   :  { %1731 = vmatmul.mubr.bf16.gmra.mrb[68].mxu1 %v18016_v45 }
 0x173   :  { %15921 = vmatpush3.bf16.msra.mxu1 %v19403_v47  ;;  %1738 = vmatprep.mubr.bf16.mxu1 %v18017_v49 }
 0x174   :  { %15922 = vmatprep.subr.bf16.mxu1 %v19404_v48 }
 0x177   :  { %15923 = vmatpush3.bf16.msra.mxu1 %v19405_v50 }
 0x178   :  { %15924 = vmatprep.subr.bf16.mxu1 %v19406_v52  ;;  %v841_v52 = vld [vmem:[#allocation8] sm:$0x3] }
 0x179   :  { %17849 = vmatprep.subr.msk.bf16.mxu0 %vm1264_vm0, %v841_v52 }
 0x17a   :  { %1739 = vmatmul.mubr.bf16.gmra.mrb[72].mxu1 %v18019_v51 }
 0x17b   :  { %15925 = vmatpush3.bf16.msra.mxu1 %v19407_v53  ;;  %1746 = vmatprep.mubr.bf16.mxu1 %v18020_v55  ;;  %v18047_v55 = vld [vmem:[#allocation3 + $0x3a4] ss:$16 sps:$4 sm:$0xff]  }
 0x17c   :  { %15926 = vmatprep.subr.bf16.mxu1 %v19408_v54 }
 0x17f   :  { %15927 = vmatpush3.bf16.msra.mxu1 %v19409_v56  ;;  %v18049_v56 = vld [vmem:[#allocation3 + $0x3a0] ss:$16 sps:$4 sm:$0xff]  }
 0x180   :  { %15976 = vmatprep.subr.bf16.mxu1 %v20325_v58 }
 0x182   :  { %1747 = vmatmul.mubr.bf16.gmra.mrb[76].mxu1 %v18022_v57 }
 0x183   :  { %1754 = vmatprep.mubr.bf16.mxu1 %v18023_v59 }
 0x18a   :  { %1755 = vmatmul.mubr.bf16.gmra.mrb[80].mxu1 %v18025_v60 }
 0x18b   :  { %1762 = vmatprep.mubr.bf16.mxu1 %v18026_v61 }
 0x192   :  { %1763 = vmatmul.mubr.bf16.gmra.mrb[84].mxu1 %v18028_v62 }
 0x193   :  { %1770 = vmatprep.mubr.bf16.mxu1 %v18029_v63 }
 0x19a   :  { %1771 = vmatmul.mubr.bf16.gmra.mrb[88].mxu1 %v18031_v0 }
 0x19b   :  { %2251 = vmatprep.mubr.bf16.mxu1 %v18034_v32 }
 0x1a2   :  { %2252 = vmatmul.mubr.bf16.vlgmr.msra.gmra.mrb[92].mxu1 %v18032_v1 }
 0x1a3   :  { %15977 = vmatpush3.bf16.msra.mxu1 %v20331_v33  ;;  %2259 = vmatprep.mubr.bf16.mxu1 %v18035_v35 }
 0x1a4   :  { %15978 = vmatprep.subr.bf16.mxu1 %v20337_v34 }
 0x1a7   :  { %15979 = vmatpush3.bf16.msra.mxu1 %v20343_v36 }
 0x1a8   :  { %15980 = vmatprep.subr.bf16.mxu1 %v20349_v38 }
 0x1aa   :  { %2260 = vmatmul.mubr.bf16.gmra.mrb[96].mxu1 %v18037_v37 }
 0x1ab   :  { %15981 = vmatpush3.bf16.msra.mxu1 %v20355_v39  ;;  %2267 = vmatprep.mubr.bf16.mxu1 %v18038_v2 }
 0x1ac   :  { %15982 = vmatprep.subr.bf16.mxu1 %v20361_v3 }
 0x1af   :  { %15983 = vmatpush3.bf16.msra.mxu1 %v20367_v4 }
 0x1b0   :  { %15984 = vmatprep.subr.bf16.mxu1 %v20373_v6 }
 0x1b2   :  { %2268 = vmatmul.mubr.bf16.gmra.mrb[100].mxu1 %v18040_v5 }
 0x1b3   :  { %15985 = vmatpush3.bf16.msra.mxu1 %v20379_v7  ;;  %2275 = vmatprep.mubr.bf16.mxu1 %v18041_v9 }
 0x1b4   :  { %15986 = vmatprep.subr.bf16.mxu1 %v20385_v8 }
 0x1b7   :  { %15987 = vmatpush3.bf16.msra.mxu1 %v20391_v10 }
 0x1b8   :  { %15988 = vmatprep.subr.bf16.mxu1 %v20397_v12 }
 0x1ba   :  { %2276 = vmatmul.mubr.bf16.gmra.mrb[104].mxu1 %v18043_v11  ;;  %v18050_v11 = vld [vmem:[#allocation3 + $0x3c4] ss:$16 sps:$4 sm:$0xff]  }
 0x1bb   :  { %v15517_v13 = vpop.f32.mrb[0].mxu0  ;;  %15989 = vmatpush3.bf16.msra.mxu1 %v20403_v19  ;;  %2283 = vmatprep.mubr.bf16.mxu1 %v18044_v29 }
 0x1bc   :  { %v15581_v14 = vpop.f32.mrb[0].mxu1  ;;  %v15518_v15 = vpop.f32.mrb[1].mxu0  ;;  %15990 = vmatprep.subr.bf16.mxu1 %v20409_v23 }
 0x1bd   :  { %v15519_v16 = vadd.f32 %v15518_v15, %v15517_v13  ;;  %v15582_v17 = vpop.f32.mrb[1].mxu1  ;;  %v15520_v18 = vpop.f32.mrb[2].mxu0  ;;  %v18052_v13 = vld [vmem:[#allocation3 + $0x3c0] ss:$16 sps:$4 sm:$0xff]  }
 0x1be   :  { %v15583_v20 = vadd.f32 %v15582_v17, %v15581_v14  ;;  %v15584_v21 = vpop.f32.mrb[2].mxu1  ;;  %v15521_v22 = vpop.f32.mrb[3].mxu0 }
 0x1bf   :  { %v15522_v24 = vadd.f32 %v15521_v22, %v15520_v18  ;;  %v15585_v25 = vpop.f32.mrb[3].mxu1  ;;  %15991 = vmatpush3.bf16.msra.mxu1 %v20417_v30 }
 0x1c0   :  { %v20412_v26 = vadd.f32 %v15583_v20, %v15519_v16  ;;  %v15586_v27 = vadd.f32 %v15585_v25, %v15584_v21  ;;  %16113 = vmatprep.subr.bf16.mxu1 %v20325_v58 }
 0x1c2   :  { %v20420_v31 = vadd.f32 %v15586_v27, %v15522_v24  ;;  %2284 = vmatmul.mubr.bf16.gmra.mrb[108].mxu1 %v18046_v41 }
 0x1c3   :  { %v15523_v42 = vpop.f32.mrb[4].mxu0  ;;  %2291 = vmatprep.mubr.bf16.mxu1 %v18047_v55 }
 0x1c4   :  { %v15587_v43 = vpop.f32.mrb[4].mxu1  ;;  %v15524_v44 = vpop.f32.mrb[5].mxu0  ;;  %v833_v45 = vpack.c.bf16 %v20420_v31, %v20412_v26  ;;  %v19429_v26 = vld [vmem:[%s22100_s0 + $0x80] sm:$0xff]  }
 0x1c5   :  { %v15525_v46 = vadd.f32 %v15524_v44, %v15523_v42  ;;  %v15588_v47 = vpop.f32.mrb[5].mxu1  ;;  %v15526_v48 = vpop.f32.mrb[6].mxu0  ;;  %v18053_v42 = vld [vmem:[#allocation3 + $0x3e4] ss:$16 sps:$4 sm:$0xff]  }
 0x1c6   :  { %v15589_v49 = vadd.f32 %v15588_v47, %v15587_v43  ;;  %v15590_v50 = vpop.f32.mrb[6].mxu1  ;;  %v15527_v51 = vpop.f32.mrb[7].mxu0  ;;  %v18055_v43 = vld [vmem:[#allocation3 + $0x3e0] ss:$16 sps:$4 sm:$0xff]  }
 0x1c7   :  { %v15528_v53 = vadd.f32 %v15527_v51, %v15526_v48  ;;  %v15591_v54 = vpop.f32.mrb[7].mxu1 }
 0x1c8   :  { %v20428_v57 = vadd.f32 %v15589_v49, %v15525_v46  ;;  %v15592_v58 = vadd.f32 %v15591_v54, %v15590_v50 }
 0x1ca   :  { %v20430_v59 = vadd.f32 %v15592_v58, %v15528_v53  ;;  %2292 = vmatmul.mubr.bf16.gmra.mrb[112].mxu1 %v18049_v56 }
 0x1cb   :  { %v15529_v60 = vpop.f32.mrb[8].mxu0  ;;  %2299 = vmatprep.mubr.bf16.mxu1 %v18050_v11 }
 0x1cc   :  { %v834_v61 = vpack.c.bf16 %v20430_v59, %v20428_v57  ;;  %v15593_v62 = vpop.f32.mrb[8].mxu1  ;;  %v15530_v63 = vpop.f32.mrb[9].mxu0 }
 0x1cd   :  { %v15531_v0 = vadd.f32 %v15530_v63, %v15529_v60  ;;  %v15594_v1 = vpop.f32.mrb[9].mxu1  ;;  %v15532_v32 = vpop.f32.mrb[10].mxu0  ;;  %v18056_v63 = vld [vmem:[#allocation3 + $0x308] ss:$16 sps:$4 sm:$0xff]  }
 0x1ce   :  { %v15595_v35 = vadd.f32 %v15594_v1, %v15593_v62  ;;  %v15596_v37 = vpop.f32.mrb[10].mxu1  ;;  %v15533_v2 = vpop.f32.mrb[11].mxu0 }
 0x1cf   :  { %v15534_v5 = vadd.f32 %v15533_v2, %v15532_v32  ;;  %v15597_v9 = vpop.f32.mrb[11].mxu1 }
 0x1d0   :  { %v20434_v14 = vadd.f32 %v15595_v35, %v15531_v0  ;;  %v15598_v15 = vadd.f32 %v15597_v9, %v15596_v37  ;;  %v18058_v0 = vld [vmem:[#allocation3 + $0x30c] ss:$16 sps:$4 sm:$0xff]  }
 0x1d2   :  { %v20436_v16 = vadd.f32 %v15598_v15, %v15534_v5  ;;  %2300 = vmatmul.mubr.bf16.gmra.mrb[116].mxu1 %v18052_v13 }
 0x1d3   :  { %v15535_v17 = vpop.f32.mrb[12].mxu0  ;;  %2307 = vmatprep.mubr.bf16.mxu1 %v18053_v42 }
 0x1d4   :  { %v15599_v18 = vpop.f32.mrb[12].mxu1  ;;  %v15536_v20 = vpop.f32.mrb[13].mxu0  ;;  %v835_v21 = vpack.c.bf16 %v20436_v16, %v20434_v14  ;;  %v19431_v14 = vld [vmem:[%s22100_s0 + $0x88] sm:$0xff]  }
 0x1d5   :  { %v15537_v22 = vadd.f32 %v15536_v20, %v15535_v17  ;;  %v15600_v24 = vpop.f32.mrb[13].mxu1  ;;  %v15538_v25 = vpop.f32.mrb[14].mxu0 }
 0x1d6   :  { %v15601_v27 = vadd.f32 %v15600_v24, %v15599_v18  ;;  %v15602_v28 = vpop.f32.mrb[14].mxu1  ;;  %v15539_v29 = vpop.f32.mrb[15].mxu0 }
 0x1d7   :  { %v15540_v40 = vadd.f32 %v15539_v29, %v15538_v25  ;;  %v15603_v41 = vpop.f32.mrb[15].mxu1 }
 0x1d8   :  { %v20440_v44 = vadd.f32 %v15601_v27, %v15537_v22  ;;  %v15604_v46 = vadd.f32 %v15603_v41, %v15602_v28  ;;  %v18059_v28 = vld [vmem:[#allocation3 + $0x32c] ss:$16 sps:$4 sm:$0xff]  }
 0x1da   :  { %v20442_v47 = vadd.f32 %v15604_v46, %v15540_v40  ;;  %2308 = vmatmul.mubr.bf16.gmra.mrb[120].mxu1 %v18055_v43  ;;  %v18061_v40 = vld [vmem:[#allocation3 + $0x328] ss:$16 sps:$4 sm:$0xff]  }
 0x1db   :  { %v15541_v48 = vpop.f32.mrb[16].mxu0  ;;  %2348 = vmatprep.mubr.bf16.mxu1 %v18058_v0 }
 0x1dc   :  { %v15605_v49 = vpop.f32.mrb[16].mxu1  ;;  %v15542_v50 = vpop.f32.mrb[17].mxu0  ;;  %v836_v51 = vpack.c.bf16 %v20442_v47, %v20440_v44 }
 0x1dd   :  { %v15543_v52 = vadd.f32 %v15542_v50, %v15541_v48  ;;  %v15606_v53 = vpop.f32.mrb[17].mxu1  ;;  %v15544_v54 = vpop.f32.mrb[18].mxu0 }
 0x1de   :  { %v15607_v55 = vadd.f32 %v15606_v53, %v15605_v49  ;;  %v15608_v56 = vpop.f32.mrb[18].mxu1  ;;  %v15545_v58 = vpop.f32.mrb[19].mxu0 }
 0x1df   :  { %v15546_v60 = vadd.f32 %v15545_v58, %v15544_v54  ;;  %v15609_v62 = vpop.f32.mrb[19].mxu1  ;;  %v18064_v58 = vld [vmem:[#allocation3 + $0x348] ss:$16 sps:$4 sm:$0xff]  }
 0x1e0   :  { %v20446_v1 = vadd.f32 %v15607_v55, %v15543_v52  ;;  %v15610_v32 = vadd.f32 %v15609_v62, %v15608_v56  ;;  %v18062_v55 = vld [vmem:[#allocation3 + $0x34c] ss:$16 sps:$4 sm:$0xff]  }
 0x1e2   :  { %v20448_v35 = vadd.f32 %v15610_v32, %v15546_v60  ;;  %2349 = vmatmul.mubr.bf16.vlgmr.msra.gmra.mrb[124].mxu1 %v18056_v63 }
 0x1e3   :  { %v15547_v37 = vpop.f32.mrb[20].mxu0  ;;  %16114 = vmatpush3.bf16.msra.mxu1 %v20331_v33  ;;  %2356 = vmatprep.mubr.bf16.mxu1 %v18059_v28 }
 0x1e4   :  { %v15611_v2 = vpop.f32.mrb[20].mxu1  ;;  %v15548_v5 = vpop.f32.mrb[21].mxu0  ;;  %v837_v9 = vpack.c.bf16 %v20448_v35, %v20446_v1  ;;  %16115 = vmatprep.subr.bf16.mxu1 %v20337_v34  ;;  %v19435_v1 = vld [vmem:[%s22100_s0 + $0x98] sm:$0xff]  }
 0x1e5   :  { %v15549_v11 = vadd.f32 %v15548_v5, %v15547_v37  ;;  %v15612_v13 = vpop.f32.mrb[21].mxu1  ;;  %v15550_v15 = vpop.f32.mrb[22].mxu0 }
 0x1e6   :  { %v15613_v17 = vadd.f32 %v15612_v13, %v15611_v2  ;;  %v15614_v18 = vpop.f32.mrb[22].mxu1  ;;  %v15551_v20 = vpop.f32.mrb[23].mxu0 }
 0x1e7   :  { %v15552_v22 = vadd.f32 %v15551_v20, %v15550_v15  ;;  %v15615_v24 = vpop.f32.mrb[23].mxu1  ;;  %16116 = vmatpush3.bf16.msra.mxu1 %v20343_v36  ;;  %v18065_v15 = vld [vmem:[#allocation3 + $0x36c] ss:$16 sps:$4 sm:$0xff]  }
 0x1e8   :  { %v20454_v25 = vadd.f32 %v15613_v17, %v15549_v11  ;;  %v15616_v27 = vadd.f32 %v15615_v24, %v15614_v18  ;;  %16117 = vmatprep.subr.bf16.mxu1 %v20349_v38  ;;  %v18067_v18 = vld [vmem:[#allocation3 + $0x368] ss:$16 sps:$4 sm:$0xff]  }
 0x1ea   :  { %v20457_v29 = vadd.f32 %v15616_v27, %v15552_v22  ;;  %2357 = vmatmul.mubr.bf16.gmra.mrb[128].mxu1 %v18061_v40 }
 0x1eb   :  { %v15553_v33 = vpop.f32.mrb[24].mxu0  ;;  %16118 = vmatpush3.bf16.msra.mxu1 %v20355_v39  ;;  %2364 = vmatprep.mubr.bf16.mxu1 %v18062_v55 }
 0x1ec   :  { %v15617_v41 = vpop.f32.mrb[24].mxu1  ;;  %v15554_v42 = vpop.f32.mrb[25].mxu0  ;;  %v838_v34 = vpack.c.bf16 %v20457_v29, %v20454_v25  ;;  %16119 = vmatprep.subr.bf16.mxu1 %v20361_v3  ;;  %v18073_v25 = vld [vmem:[#allocation3 + $0x20c] ss:$16 sps:$4 sm:$0xff]  }
 0x1ed   :  { %v15555_v43 = vadd.f32 %v15554_v42, %v15553_v33  ;;  %v15618_v46 = vpop.f32.mrb[25].mxu1  ;;  %v15556_v48 = vpop.f32.mrb[26].mxu0  ;;  %v18068_v42 = vld [vmem:[#allocation3 + $0x38c] ss:$16 sps:$4 sm:$0xff]  }
 0x1ee   :  { %v15619_v49 = vadd.f32 %v15618_v46, %v15617_v41  ;;  %v15620_v36 = vpop.f32.mrb[26].mxu1  ;;  %v15557_v50 = vpop.f32.mrb[27].mxu0  ;;  %v18070_v46 = vld [vmem:[#allocation3 + $0x388] ss:$16 sps:$4 sm:$0xff]  }
 0x1ef   :  { %v15558_v52 = vadd.f32 %v15557_v50, %v15556_v48  ;;  %v15621_v53 = vpop.f32.mrb[27].mxu1  ;;  %16120 = vmatpush3.bf16.msra.mxu1 %v20367_v4  ;;  %v19426_v48 = vld [vmem:[%s22100_s0 + $0x40] sm:$0xff]  }
 0x1f0   :  { %v20464_v38 = vadd.f32 %v15619_v49, %v15555_v43  ;;  %v15622_v54 = vadd.f32 %v15621_v53, %v15620_v36  ;;  %16121 = vmatprep.subr.bf16.mxu1 %v20373_v6 }
 0x1f2   :  { %v20467_v56 = vadd.f32 %v15622_v54, %v15558_v52  ;;  %2365 = vmatmul.mubr.bf16.gmra.mrb[132].mxu1 %v18064_v58  ;;  %v18074_v54 = vld [vmem:[#allocation3 + $0x3ac] ss:$16 sps:$4 sm:$0xff]  }
 0x1f3   :  { %v15559_v39 = vpop.f32.mrb[28].mxu0  ;;  %16122 = vmatpush3.bf16.msra.mxu1 %v20379_v7  ;;  %2372 = vmatprep.mubr.bf16.mxu1 %v18065_v15 }
 0x1f4   :  { %v15623_v60 = vpop.f32.mrb[28].mxu1  ;;  %v15560_v62 = vpop.f32.mrb[29].mxu0  ;;  %16123 = vmatprep.subr.bf16.mxu1 %v20385_v8 }
 0x1f5   :  { %v15561_v63 = vadd.f32 %v15560_v62, %v15559_v39  ;;  %v15624_v0 = vpop.f32.mrb[29].mxu1  ;;  %v15562_v32 = vpop.f32.mrb[30].mxu0 }
 0x1f6   :  { %v15625_v37 = vadd.f32 %v15624_v0, %v15623_v60  ;;  %v15626_v4 = vpop.f32.mrb[30].mxu1  ;;  %v15563_v2 = vpop.f32.mrb[31].mxu0  ;;  %v18076_v60 = vld [vmem:[#allocation3 + $0x3a8] ss:$16 sps:$4 sm:$0xff]  }
 0x1f7   :  { %v15564_v5 = vadd.f32 %v15563_v2, %v15562_v32  ;;  %v15627_v11 = vpop.f32.mrb[31].mxu1  ;;  %16124 = vmatpush3.bf16.msra.mxu1 %v20391_v10 }
 0x1f8   :  { %v20474_v6 = vadd.f32 %v15625_v37, %v15561_v63  ;;  %v15628_v13 = vadd.f32 %v15627_v11, %v15626_v4  ;;  %16125 = vmatprep.subr.bf16.mxu1 %v20397_v12 }
 0x1fa   :  { %v20477_v17 = vadd.f32 %v15628_v13, %v15564_v5  ;;  %2373 = vmatmul.mubr.bf16.gmra.mrb[136].mxu1 %v18067_v18  ;;  %v18080_v18 = vld [vmem:[#allocation3 + $0x3cc] ss:$16 sps:$4 sm:$0xff]  }
 0x1fb   :  { %v15645_v7 = vpop.f32.mrb[32].mxu0  ;;  %16126 = vmatpush3.bf16.msra.mxu1 %v20403_v19  ;;  %2380 = vmatprep.mubr.bf16.mxu1 %v18068_v42 }
 0x1fc   :  { %v15646_v20 = vpop.f32.mrb[33].mxu0  ;;  %16127 = vmatprep.subr.bf16.mxu1 %v20409_v23 }
 0x1fd   :  { %v20482_v22 = vadd.f32 %v15646_v20, %v15645_v7  ;;  %v15648_v24 = vpop.f32.mrb[34].mxu0  ;;  %v15715_v27 = vpop.f32.mrb[32].mxu1 }
 0x1fe   :  { %v15649_v28 = vpop.f32.mrb[35].mxu0  ;;  %v15716_v10 = vpop.f32.mrb[33].mxu1 }
 0x1ff   :  { %v20486_v40 = vadd.f32 %v15649_v28, %v15648_v24  ;;  %v15717_v33 = vadd.f32 %v15716_v10, %v15715_v27  ;;  %v15718_v12 = vpop.f32.mrb[34].mxu1  ;;  %16128 = vmatpush3.bf16.msra.mxu1 %v20417_v30  ;;  %v18082_v28 = vld [vmem:[#allocation3 + $0x3c8] ss:$16 sps:$4 sm:$0xff]  }
 0x200   :  { %v15719_v41 = vpop.f32.mrb[35].mxu1  ;;  %16186 = vmatprep.subr.bf16.mxu1 %v19426_v48 }
 0x201   :  { %v15720_v43 = vadd.f32 %v15719_v41, %v15718_v12 }
 0x202   :  { %2381 = vmatmul.mubr.bf16.gmra.mrb[140].mxu1 %v18070_v46 }
 0x203   :  { %v15651_v19 = vpop.f32.mrb[36].mxu0  ;;  %2388 = vmatprep.mubr.bf16.mxu1 %v18074_v54 }
 0x204   :  { %v15652_v49 = vpop.f32.mrb[37].mxu0 }
 0x205   :  { %v15653_v23 = vadd.f32 %v15652_v49, %v15651_v19  ;;  %v15654_v36 = vpop.f32.mrb[38].mxu0  ;;  %v15721_v50 = vpop.f32.mrb[36].mxu1 }
 0x206   :  { %v15655_v52 = vpop.f32.mrb[39].mxu0  ;;  %v15722_v53 = vpop.f32.mrb[37].mxu1 }
 0x207   :  { %v20492_v55 = vadd.f32 %v15717_v33, %v15653_v23  ;;  %v15656_v58 = vadd.f32 %v15655_v52, %v15654_v36  ;;  %v15723_v30 = vadd.f32 %v15722_v53, %v15721_v50  ;;  %v15724_v39 = vpop.f32.mrb[38].mxu1  ;;  %v18086_v36 = vld [vmem:[#allocation3 + $0x3ec] ss:$16 sps:$4 sm:$0xff]  }
 0x208   :  { %v15725_v62 = vpop.f32.mrb[39].mxu1 }
 0x209   :  { %v20494_v63 = vadd.f32 %v15720_v43, %v15656_v58  ;;  %v15726_v0 = vadd.f32 %v15725_v62, %v15724_v39  ;;  %v18088_v58 = vld [vmem:[#allocation3 + $0x3e8] ss:$16 sps:$4 sm:$0xff]  }
 0x20a   :  { %2389 = vmatmul.mubr.bf16.gmra.mrb[144].mxu1 %v18076_v60 }
 0x20b   :  { %v1230_v32 = vpack.c.bf16 %v20494_v63, %v20492_v55  ;;  %v15657_v37 = vpop.f32.mrb[40].mxu0  ;;  %2396 = vmatprep.mubr.bf16.mxu1 %v18080_v18 }
 0x20c   :  { %v15658_v4 = vpop.f32.mrb[41].mxu0 }
 0x20d   :  { %v15659_v2 = vadd.f32 %v15658_v4, %v15657_v37  ;;  %v15660_v5 = vpop.f32.mrb[42].mxu0  ;;  %v15727_v11 = vpop.f32.mrb[40].mxu1 }
 0x20e   :  { %v15661_v13 = vpop.f32.mrb[43].mxu0  ;;  %v15728_v15 = vpop.f32.mrb[41].mxu1 }
 0x20f   :  { %v20498_v7 = vadd.f32 %v15723_v30, %v15659_v2  ;;  %v15662_v20 = vadd.f32 %v15661_v13, %v15660_v5  ;;  %v15729_v24 = vadd.f32 %v15728_v15, %v15727_v11  ;;  %v15730_v27 = vpop.f32.mrb[42].mxu1 }
 0x210   :  { %v15731_v10 = vpop.f32.mrb[43].mxu1 }
 0x211   :  { %v20500_v33 = vadd.f32 %v15726_v0, %v15662_v20  ;;  %v15732_v12 = vadd.f32 %v15731_v10, %v15730_v27 }
 0x212   :  { %2397 = vmatmul.mubr.bf16.gmra.mrb[148].mxu1 %v18082_v28 }
 0x213   :  { %v15663_v41 = vpop.f32.mrb[44].mxu0  ;;  %v1231_v42 = vpack.c.bf16 %v20500_v33, %v20498_v7  ;;  %2404 = vmatprep.mubr.bf16.mxu1 %v18086_v36 }
 0x214   :  { %v15664_v43 = vpop.f32.mrb[45].mxu0 }
 0x215   :  { %v15665_v46 = vadd.f32 %v15664_v43, %v15663_v41  ;;  %v15666_v48 = vpop.f32.mrb[46].mxu0  ;;  %v15733_v19 = vpop.f32.mrb[44].mxu1 }
 0x216   :  { %v15667_v49 = vpop.f32.mrb[47].mxu0  ;;  %v15734_v23 = vpop.f32.mrb[45].mxu1 }
 0x217   :  { %v20504_v50 = vadd.f32 %v15729_v24, %v15665_v46  ;;  %v15668_v52 = vadd.f32 %v15667_v49, %v15666_v48  ;;  %v15735_v53 = vadd.f32 %v15734_v23, %v15733_v19  ;;  %v15736_v54 = vpop.f32.mrb[46].mxu1 }
 0x218   :  { %v15737_v30 = vpop.f32.mrb[47].mxu1 }
 0x219   :  { %v20506_v39 = vadd.f32 %v15732_v12, %v15668_v52  ;;  %v15738_v60 = vadd.f32 %v15737_v30, %v15736_v54 }
 0x21a   :  { %2405 = vmatmul.mubr.bf16.gmra.mrb[152].mxu1 %v18088_v58 }
 0x21b   :  { %v15669_v62 = vpop.f32.mrb[48].mxu0  ;;  %v1232_v0 = vpack.c.bf16 %v20506_v39, %v20504_v50 }
 0x21c   :  { %v15670_v37 = vpop.f32.mrb[49].mxu0 }
 0x21d   :  { %v15671_v4 = vadd.f32 %v15670_v37, %v15669_v62  ;;  %v15672_v2 = vpop.f32.mrb[50].mxu0  ;;  %v15739_v5 = vpop.f32.mrb[48].mxu1 }
 0x21e   :  { %v15673_v11 = vpop.f32.mrb[51].mxu0  ;;  %v15740_v13 = vpop.f32.mrb[49].mxu1 }
 0x21f   :  { %v20510_v15 = vadd.f32 %v15735_v53, %v15671_v4  ;;  %v15674_v18 = vadd.f32 %v15673_v11, %v15672_v2  ;;  %v15741_v20 = vadd.f32 %v15740_v13, %v15739_v5  ;;  %v15742_v24 = vpop.f32.mrb[50].mxu1 }
 0x220   :  { %v15743_v27 = vpop.f32.mrb[51].mxu1 }
 0x221   :  { %v20512_v28 = vadd.f32 %v15738_v60, %v15674_v18  ;;  %v15744_v10 = vadd.f32 %v15743_v27, %v15742_v24 }
 0x223   :  { %v15675_v12 = vpop.f32.mrb[52].mxu0  ;;  %v1233_v41 = vpack.c.bf16 %v20512_v28, %v20510_v15 }
 0x224   :  { %v15676_v43 = vpop.f32.mrb[53].mxu0 }
 0x225   :  { %v15677_v46 = vadd.f32 %v15676_v43, %v15675_v12  ;;  %v15678_v48 = vpop.f32.mrb[54].mxu0  ;;  %v15745_v19 = vpop.f32.mrb[52].mxu1 }
 0x226   :  { %v15679_v49 = vpop.f32.mrb[55].mxu0  ;;  %v15746_v23 = vpop.f32.mrb[53].mxu1 }
 0x227   :  { %v20516_v36 = vadd.f32 %v15741_v20, %v15677_v46  ;;  %v15680_v52 = vadd.f32 %v15679_v49, %v15678_v48  ;;  %v15747_v53 = vadd.f32 %v15746_v23, %v15745_v19  ;;  %v15748_v54 = vpop.f32.mrb[54].mxu1 }
 0x228   :  { %v15749_v58 = vpop.f32.mrb[55].mxu1 }
 0x229   :  { %v20518_v30 = vadd.f32 %v15744_v10, %v15680_v52  ;;  %v15750_v60 = vadd.f32 %v15749_v58, %v15748_v54 }
 0x22b   :  { %v15681_v62 = vpop.f32.mrb[56].mxu0  ;;  %v1234_v37 = vpack.c.bf16 %v20518_v30, %v20516_v36 }
 0x22c   :  { %v15682_v4 = vpop.f32.mrb[57].mxu0 }
 0x22d   :  { %v15683_v2 = vadd.f32 %v15682_v4, %v15681_v62  ;;  %v15684_v5 = vpop.f32.mrb[58].mxu0  ;;  %v15751_v11 = vpop.f32.mrb[56].mxu1 }
 0x22e   :  { %v15685_v13 = vpop.f32.mrb[59].mxu0  ;;  %v15752_v18 = vpop.f32.mrb[57].mxu1 }
 0x22f   :  { %v20522_v24 = vadd.f32 %v15747_v53, %v15683_v2  ;;  %v15686_v20 = vadd.f32 %v15685_v13, %v15684_v5  ;;  %v15753_v27 = vadd.f32 %v15752_v18, %v15751_v11  ;;  %v15754_v12 = vpop.f32.mrb[58].mxu1 }
 0x230   :  { %v15755_v43 = vpop.f32.mrb[59].mxu1 }
 0x231   :  { %v1218_v46 = vadd.f32 %v15750_v60, %v15686_v20  ;;  %v15756_v10 = vadd.f32 %v15755_v43, %v15754_v12 }
 0x233   :  { %v15687_v48 = vpop.f32.mrb[60].mxu0  ;;  %v1235_v19 = vpack.c.bf16 %v1218_v46, %v20522_v24 }
 0x234   :  { %v15688_v49 = vpop.f32.mrb[61].mxu0 }
 0x235   :  { %v15689_v23 = vadd.f32 %v15688_v49, %v15687_v48  ;;  %v15690_v52 = vpop.f32.mrb[62].mxu0  ;;  %v15791_v13 = vpop.f32.mrb[60].mxu1 }
 0x236   :  { %v15691_v54 = vpop.f32.mrb[63].mxu0  ;;  %v15792_v20 = vpop.f32.mrb[61].mxu1 }
 0x237   :  { %v1223_v58 = vadd.f32 %v15753_v27, %v15689_v23  ;;  %v15692_v62 = vadd.f32 %v15691_v54, %v15690_v52  ;;  %v20526_v12 = vadd.f32 %v15792_v20, %v15791_v13  ;;  %v15794_v24 = vpop.f32.mrb[62].mxu1 }
 0x238   :  { %v15795_v46 = vpop.f32.mrb[63].mxu1 }
 0x239   :  { %v1226_v4 = vadd.f32 %v15756_v10, %v15692_v62  ;;  %v20529_v27 = vadd.f32 %v15795_v46, %v15794_v24  ;;  %v19428_v62 = vld [vmem:[%s22100_s0 + $0xc0] sm:$0xff]   ;;  %v19434_v24 = vld [vmem:[%s22100_s0 + $0xd8] sm:$0xff]   ;;  %v22113_v46 = vpack.c.bf16 %v20467_v56, %v20464_v38  ;;  %v19439_v38 = vld [vmem:[%s22100_s0 + $0xa8] sm:$0xff]  }
 0x23b   :  { %v15709_v8 = vpop.f32.mrb[64].mxu0  ;;  %v1236_v3 = vpack.c.bf16 %v1226_v4, %v1223_v58 }
 0x23c   :  { %v15710_v53 = vpop.f32.mrb[65].mxu0 }
 0x23d   :  { %v15711_v2 = vadd.f32 %v15710_v53, %v15709_v8  ;;  %v15712_v5 = vpop.f32.mrb[66].mxu0  ;;  %v15797_v10 = vpop.f32.mrb[64].mxu1  ;;  %v19427_v8 = vld [vmem:[#allocation8] sm:$0x3] }
 0x23e   :  { %v15713_v11 = vpop.f32.mrb[67].mxu0  ;;  %v15798_v49 = vpop.f32.mrb[65].mxu1  ;;  %v1390_v23 = vsel %vm1264_vm0, %v19427_v8, 0 }
 0x23f   :  { %v1167_v60 = vadd.f32 %v15711_v2, %v20482_v22  ;;  %v15714_v18 = vadd.f32 %v15713_v11, %v15712_v5  ;;  %v20532_v52 = vadd.f32 %v15798_v49, %v15797_v10  ;;  %v15800_v22 = vpop.f32.mrb[66].mxu1  ;;  %v19437_v10 = vld [vmem:[%s22100_s0 + $0xa0] sm:$0xff]   ;;  %v19438_v49 = vld [vmem:[%s22100_s0 + $0xe8] sm:$0xff]  }
 0x240   :  { %v15801_v54 = vpop.f32.mrb[67].mxu1 }
 0x241   :  { %v1170_v43 = vadd.f32 %v15714_v18, %v20486_v40  ;;  %v20539_v40 = vadd.f32 %v15801_v54, %v15800_v22  ;;  %v19433_v18 = vld [vmem:[%s22100_s0 + $0x90] sm:$0xff]  }
 0x242   :  { %v19440_v22 = vld [vmem:[%s22100_s0 + $0xf0] sm:$0xff]  }
 0x243   :  { %v1229_v48 = vpack.c.bf16 %v1170_v43, %v1167_v60  ;;  %v1885_v54 = vld [vmem:[#allocation8 + $0x4] sm:$0x3] }
 0x245   :  { %17018 = vmatprep.mubr.msk.bf16.mxu0 %vm1239_vm1, %v1229_v48  ;;  %v15803_v58 = vpop.f32.mrb[68].mxu1 }
 0x246   :  { %17019 = vmatmul.mubr.msk.bf16.vlgmr.msra.gmra.mrb[68].mxu0 %vm1239_vm1, %v1230_v32  ;;  %v15804_v4 = vpop.f32.mrb[69].mxu1 }
 0x247   :  { %17022 = vmatprep.mubr.msk.bf16.mxu0 %vm1239_vm1, %v1231_v42  ;;  %17035 = vmatpush3.bf16.msra.mxu0 %v1390_v23  ;;  %v20548_v53 = vadd.f32 %v15804_v4, %v15803_v58  ;;  %v15806_v55 = vpop.f32.mrb[70].mxu1  ;;  %v22114_v58 = vpack.c.bf16 %v20477_v17, %v20474_v6  ;;  %v1911_v17 = vsel %vm1264_vm0, %v1885_v54, 0 }
 0x248   :  { %15839 = vmatprep.subr.bf16.mxu0 %v19428_v62  ;;  %v15807_v63 = vpop.f32.mrb[71].mxu1  ;;  %v19441_v62 = vld [vmem:[%s22100_s0 + $0xb0] sm:$0xff]  }
 0x249   :  { %v20550_v32 = vadd.f32 %v15807_v63, %v15806_v55  ;;  %v19442_v55 = vld [vmem:[%s22100_s0 + $0xf8] sm:$0xff]  }
 0x24a   :  { %v18071_v63 = vld [vmem:[#allocation3 + $0x208] ss:$16 sps:$4 sm:$0xff]  }
 0x24d   :  { %v15809_v7 = vpop.f32.mrb[72].mxu1 }
 0x24e   :  { %17023 = vmatmul.mubr.msk.bf16.gmra.mrb[72].mxu0 %vm1239_vm1, %v1232_v0  ;;  %v15810_v33 = vpop.f32.mrb[73].mxu1 }
 0x24f   :  { %17026 = vmatprep.mubr.msk.bf16.mxu0 %vm1239_vm1, %v1233_v41  ;;  %v20560_v42 = vadd.f32 %v15810_v33, %v15809_v7  ;;  %v15812_v2 = vpop.f32.mrb[74].mxu1  ;;  %v18077_v33 = vld [vmem:[#allocation3 + $0x22c] ss:$16 sps:$4 sm:$0xff]  }
 0x250   :  { %v15813_v5 = vpop.f32.mrb[75].mxu1 }
 0x251   :  { %v20562_v11 = vadd.f32 %v15813_v5, %v15812_v2 }
 0x255   :  { %v15815_v50 = vpop.f32.mrb[76].mxu1 }
 0x256   :  { %17027 = vmatmul.mubr.msk.bf16.gmra.mrb[76].mxu0 %vm1239_vm1, %v1234_v37  ;;  %v15816_v39 = vpop.f32.mrb[77].mxu1 }
 0x257   :  { %17030 = vmatprep.mubr.msk.bf16.mxu0 %vm1239_vm1, %v1235_v19  ;;  %v20569_v0 = vadd.f32 %v15816_v39, %v15815_v50  ;;  %v15818_v15 = vpop.f32.mrb[78].mxu1  ;;  %v19443_v50 = vld [vmem:[%s22100_s0 + $0xb8] sm:$0xff]  }
 0x258   :  { %v15819_v28 = vpop.f32.mrb[79].mxu1 }
 0x259   :  { %v20571_v41 = vadd.f32 %v15819_v28, %v15818_v15  ;;  %v18079_v28 = vld [vmem:[#allocation3 + $0x228] ss:$16 sps:$4 sm:$0xff]  }
 0x25d   :  { %v15821_v36 = vpop.f32.mrb[80].mxu1 }
 0x25e   :  { %17031 = vmatmul.mubr.msk.bf16.gmra.mrb[80].mxu0 %vm1239_vm1, %v1236_v3  ;;  %v15822_v30 = vpop.f32.mrb[81].mxu1 }
 0x25f   :  { %17036 = vmatprep.mubr.msk.bf16.mxu0 %vm1239_vm1, %v833_v45  ;;  %v20578_v37 = vadd.f32 %v15822_v30, %v15821_v36  ;;  %v15824_v19 = vpop.f32.mrb[82].mxu1  ;;  %v19430_v45 = vld [vmem:[%s22100_s0 + $0xc8] sm:$0xff]  }
 0x260   :  { %v15825_v13 = vpop.f32.mrb[83].mxu1  ;;  %v18083_v30 = vld [vmem:[#allocation3 + $0x24c] ss:$16 sps:$4 sm:$0xff]  }
 0x261   :  { %v20580_v60 = vadd.f32 %v15825_v13, %v15824_v19 }
 0x265   :  { %v15827_v31 = vpop.f32.mrb[84].mxu1 }
 0x266   :  { %17037 = vmatmul.mubr.msk.bf16.vlgmr.msra.gmra.mrb[68].mxu0 %vm1239_vm1, %v834_v61  ;;  %v15828_v3 = vpop.f32.mrb[85].mxu1 }
 0x267   :  { %17040 = vmatprep.mubr.msk.bf16.mxu0 %vm1239_vm1, %v835_v21  ;;  %15840 = vmatpush3.bf16.msra.mxu0 %v19429_v26  ;;  %v20596_v57 = vadd.f32 %v15828_v3, %v15827_v31  ;;  %v15830_v59 = vpop.f32.mrb[86].mxu1  ;;  %v19432_v21 = vld [vmem:[%s22100_s0 + $0xd0] sm:$0xff]   ;;  %v18085_v3 = vld [vmem:[#allocation3 + $0x248] ss:$16 sps:$4 sm:$0xff]  }
 0x268   :  { %15841 = vmatprep.subr.bf16.mxu0 %v19430_v45  ;;  %v15831_v61 = vpop.f32.mrb[87].mxu1 }
 0x269   :  { %v20601_v16 = vadd.f32 %v15831_v61, %v15830_v59  ;;  %v18089_v61 = vld [vmem:[#allocation3 + $0x26c] ss:$16 sps:$4 sm:$0xff]  }
 0x26b   :  { %15842 = vmatpush3.bf16.msra.mxu0 %v19431_v14 }
 0x26c   :  { %15843 = vmatprep.subr.bf16.mxu0 %v19432_v21 }
 0x26d   :  { %v15833_v20 = vpop.f32.mrb[88].mxu1 }
 0x26e   :  { %17041 = vmatmul.mubr.msk.bf16.gmra.mrb[72].mxu0 %vm1239_vm1, %v836_v51  ;;  %v15834_v43 = vpop.f32.mrb[89].mxu1 }
 0x26f   :  { %17044 = vmatprep.mubr.msk.bf16.mxu0 %vm1239_vm1, %v837_v9  ;;  %15844 = vmatpush3.bf16.msra.mxu0 %v19433_v18  ;;  %v20620_v44 = vadd.f32 %v15834_v43, %v15833_v20  ;;  %v15836_v47 = vpop.f32.mrb[90].mxu1  ;;  %v19436_v9 = vld [vmem:[%s22100_s0 + $0xe0] sm:$0xff]   ;;  %v18091_v43 = vld [vmem:[#allocation3 + $0x268] ss:$16 sps:$4 sm:$0xff]  }
 0x270   :  { %15845 = vmatprep.subr.bf16.mxu0 %v19434_v24  ;;  %v15837_v51 = vpop.f32.mrb[91].mxu1 }
 0x271   :  { %v20625_v35 = vadd.f32 %v15837_v51, %v15836_v47  ;;  %v18092_v51 = vld [vmem:[#allocation3 + $0x28c] ss:$16 sps:$4 sm:$0xff]  }
 0x273   :  { %15846 = vmatpush3.bf16.msra.mxu0 %v19435_v1 }
 0x274   :  { %15847 = vmatprep.subr.bf16.mxu0 %v19436_v9 }
 0x275   :  { %v15928_v48 = vpop.f32.mrb[92].mxu1 }
 0x276   :  { %17045 = vmatmul.mubr.msk.bf16.gmra.mrb[76].mxu0 %vm1239_vm1, %v838_v34  ;;  %v15929_v8 = vpop.f32.mrb[93].mxu1 }
 0x277   :  { %17048 = vmatprep.mubr.msk.bf16.mxu0 %vm1239_vm1, %v22113_v46  ;;  %15848 = vmatpush3.bf16.msra.mxu0 %v19437_v10  ;;  %v20644_v29 = vadd.f32 %v15929_v8, %v15928_v48  ;;  %v15931_v34 = vpop.f32.mrb[94].mxu1 }
 0x278   :  { %15849 = vmatprep.subr.bf16.mxu0 %v19438_v49  ;;  %v15932_v23 = vpop.f32.mrb[95].mxu1 }
 0x279   :  { %v20649_v56 = vadd.f32 %v15932_v23, %v15931_v34  ;;  %v18095_v23 = vld [vmem:[#allocation3 + $0x2ac] ss:$16 sps:$4 sm:$0xff]  }
 0x27b   :  { %15850 = vmatpush3.bf16.msra.mxu0 %v19439_v38 }
 0x27c   :  { %15851 = vmatprep.subr.bf16.mxu0 %v19440_v22 }
 0x27d   :  { %v15934_v4 = vpop.f32.mrb[96].mxu1 }
 0x27e   :  { %17049 = vmatmul.mubr.msk.bf16.gmra.mrb[80].mxu0 %vm1239_vm1, %v22114_v58  ;;  %v15935_v7 = vpop.f32.mrb[97].mxu1 }
 0x27f   :  { %15852 = vmatpush3.bf16.msra.mxu0 %v19441_v62  ;;  %1811 = vmatprep.mubr.bf16.mxu0 %v18073_v25  ;;  %v15937_v2 = vpop.f32.mrb[98].mxu1  ;;  %v20664_v5 = vadd.f32 %v15935_v7, %v15934_v4  ;;  %v18094_v25 = vld [vmem:[#allocation3 + $0x288] ss:$16 sps:$4 sm:$0xff]  }
 0x280   :  { %15853 = vmatprep.subr.bf16.mxu0 %v19442_v55  ;;  %v15938_v6 = vpop.f32.mrb[99].mxu1  ;;  %v18097_v62 = vld [vmem:[#allocation3 + $0x2a8] ss:$16 sps:$4 sm:$0xff]   ;;  %v18098_v55 = vld [vmem:[#allocation3 + $0x2cc] ss:$16 sps:$4 sm:$0xff]  }
 0x281   :  { %v20670_v39 = vadd.f32 %v15938_v6, %v15937_v2 }
 0x283   :  { %15854 = vmatpush3.bf16.msra.mxu0 %v19443_v50 }
 0x284   :  { %17850 = vmatprep.subr.msk.bf16.mxu0 %vm1264_vm0, %v1885_v54 }
 0x285   :  { %v15940_v15 = vpop.f32.mrb[100].mxu1 }
 0x286   :  { %1812 = vmatmul.mubr.bf16.vlgmr.msra.gmra.mrb[84].mxu0 %v18071_v63  ;;  %v15941_v36 = vpop.f32.mrb[101].mxu1 }
 0x287   :  { %1819 = vmatprep.mubr.bf16.mxu0 %v18077_v33  ;;  %17053 = vmatpush3.bf16.msra.mxu0 %v1911_v17  ;;  %v20673_v19 = vadd.f32 %v15941_v36, %v15940_v15  ;;  %v15943_v13 = vpop.f32.mrb[102].mxu1  ;;  %v18100_v17 = vld [vmem:[#allocation3 + $0x2c8] ss:$16 sps:$4 sm:$0xff]   ;;  %v18101_v15 = vld [vmem:[#allocation3 + $0x2ec] ss:$16 sps:$4 sm:$0xff]  }
 0x288   :  { %v15944_v26 = vpop.f32.mrb[103].mxu1 }
 0x289   :  { %v20675_v31 = vadd.f32 %v15944_v26, %v15943_v13 }
 0x28d   :  { %v15946_v45 = vpop.f32.mrb[104].mxu1 }
 0x28e   :  { %1820 = vmatmul.mubr.bf16.gmra.mrb[88].mxu0 %v18079_v28  ;;  %v15947_v59 = vpop.f32.mrb[105].mxu1 }
 0x28f   :  { %1827 = vmatprep.mubr.bf16.mxu0 %v18083_v30  ;;  %v20677_v14 = vadd.f32 %v15947_v59, %v15946_v45  ;;  %v15949_v21 = vpop.f32.mrb[106].mxu1  ;;  %v18103_v45 = vld [vmem:[#allocation3 + $0x2e8] ss:$16 sps:$4 sm:$0xff]  }
 0x290   :  { %v15950_v18 = vpop.f32.mrb[107].mxu1 }
 0x291   :  { %v20679_v20 = vadd.f32 %v15950_v18, %v15949_v21 }
 0x295   :  { %v15952_v24 = vpop.f32.mrb[108].mxu1 }
 0x296   :  { %1828 = vmatmul.mubr.bf16.gmra.mrb[92].mxu0 %v18085_v3  ;;  %v15953_v47 = vpop.f32.mrb[109].mxu1 }
 0x297   :  { %1835 = vmatprep.mubr.bf16.mxu0 %v18089_v61  ;;  %v20681_v1 = vadd.f32 %v15953_v47, %v15952_v24  ;;  %v15955_v9 = vpop.f32.mrb[110].mxu1 }
 0x298   :  { %v15956_v46 = vpop.f32.mrb[111].mxu1 }
 0x299   :  { %v20683_v10 = vadd.f32 %v15956_v46, %v15955_v9 }
 0x29d   :  { %v20685_v48 = vpop.f32.mrb[112].mxu1 }
 0x29e   :  { %1836 = vmatmul.mubr.bf16.gmra.mrb[96].mxu0 %v18091_v43  ;;  %v20687_v49 = vpop.f32.mrb[113].mxu1 }
 0x29f   :  { %1843 = vmatprep.mubr.bf16.mxu0 %v18092_v51  ;;  %v20689_v8 = vpop.f32.mrb[114].mxu1 }
 0x2a0   :  { %v20691_v34 = vpop.f32.mrb[115].mxu1 }
 0x2a5   :  { %v15964_v38 = vpop.f32.mrb[116].mxu1 }
 0x2a6   :  { %1844 = vmatmul.mubr.bf16.gmra.mrb[100].mxu0 %v18094_v25  ;;  %v15965_v22 = vpop.f32.mrb[117].mxu1 }
 0x2a7   :  { %1851 = vmatprep.mubr.bf16.mxu0 %v18095_v23  ;;  %v20693_v54 = vadd.f32 %v15965_v22, %v15964_v38  ;;  %v15967_v58 = vpop.f32.mrb[118].mxu1 }
 0x2a8   :  { %v15968_v4 = vpop.f32.mrb[119].mxu1 }
 0x2a9   :  { %v20695_v63 = vadd.f32 %v15968_v4, %v15967_v58 }
 0x2ad   :  { %v15970_v7 = vpop.f32.mrb[120].mxu1 }
 0x2ae   :  { %1852 = vmatmul.mubr.bf16.gmra.mrb[104].mxu0 %v18097_v62  ;;  %v15971_v33 = vpop.f32.mrb[121].mxu1 }
 0x2af   :  { %1859 = vmatprep.mubr.bf16.mxu0 %v18098_v55  ;;  %v20697_v2 = vadd.f32 %v15971_v33, %v15970_v7  ;;  %v15973_v6 = vpop.f32.mrb[122].mxu1 }
 0x2b0   :  { %v15974_v50 = vpop.f32.mrb[123].mxu1 }
 0x2b1   :  { %v20699_v28 = vadd.f32 %v15974_v50, %v15973_v6 }
 0x2b5   :  { %v15992_v36 = vpop.f32.mrb[124].mxu1 }
 0x2b6   :  { %1860 = vmatmul.mubr.bf16.gmra.mrb[108].mxu0 %v18100_v17  ;;  %v15993_v30 = vpop.f32.mrb[125].mxu1 }
 0x2b7   :  { %1867 = vmatprep.mubr.bf16.mxu0 %v18101_v15  ;;  %v15994_v13 = vadd.f32 %v15993_v30, %v15992_v36  ;;  %v15995_v26 = vpop.f32.mrb[126].mxu1 }
 0x2b8   :  { %v15996_v3 = vpop.f32.mrb[127].mxu1 }
 0x2b9   :  { %v20702_v59 = vadd.f32 %v15994_v13, %v20644_v29  ;;  %v15997_v61 = vadd.f32 %v15996_v3, %v15995_v26 }
 0x2bb   :  { %v20705_v21 = vadd.f32 %v15997_v61, %v20649_v56 }
 0x2bd   :  { %v15998_v18 = vpop.f32.mrb[128].mxu1 }
 0x2be   :  { %1868 = vmatmul.mubr.bf16.gmra.mrb[112].mxu0 %v18103_v45  ;;  %v15999_v43 = vpop.f32.mrb[129].mxu1 }
 0x2bf   :  { %v16000_v47 = vadd.f32 %v15999_v43, %v15998_v18  ;;  %v16001_v51 = vpop.f32.mrb[130].mxu1 }
 0x2c0   :  { %v16002_v9 = vpop.f32.mrb[131].mxu1 }
 0x2c1   :  { %v20710_v46 = vadd.f32 %v16000_v47, %v20664_v5  ;;  %v16003_v25 = vadd.f32 %v16002_v9, %v16001_v51  ;;  %v18136_v47 = vld [vmem:[#allocation3 + $0x4a8] ss:$16 sps:$4 sm:$0xff]  }
 0x2c3   :  { %v20713_v29 = vadd.f32 %v16003_v25, %v20670_v39 }
 0x2c5   :  { %v16004_v23 = vpop.f32.mrb[132].mxu1 }
 0x2c6   :  { %v16005_v38 = vpop.f32.mrb[133].mxu1 }
 0x2c7   :  { %v16006_v22 = vadd.f32 %v16005_v38, %v16004_v23  ;;  %v16007_v58 = vpop.f32.mrb[134].mxu1  ;;  %v15963_v23 = vadd.f32 %v20691_v34, %v20689_v8 }
 0x2c8   :  { %v16008_v62 = vpop.f32.mrb[135].mxu1 }
 0x2c9   :  { %v20718_v4 = vadd.f32 %v16006_v22, %v20673_v19  ;;  %v16009_v55 = vadd.f32 %v16008_v62, %v16007_v58 }
 0x2cb   :  { %v20721_v7 = vadd.f32 %v16009_v55, %v20675_v31 }
 0x2cd   :  { %v16010_v5 = vpop.f32.mrb[136].mxu1 }
 0x2ce   :  { %v16011_v33 = vpop.f32.mrb[137].mxu1 }
 0x2cf   :  { %v16012_v6 = vadd.f32 %v16011_v33, %v16010_v5  ;;  %v16013_v17 = vpop.f32.mrb[138].mxu1 }
 0x2d0   :  { %v16014_v50 = vpop.f32.mrb[139].mxu1 }
 0x2d1   :  { %v20726_v15 = vadd.f32 %v16012_v6, %v20677_v14  ;;  %v16015_v36 = vadd.f32 %v16014_v50, %v16013_v17  ;;  %v20865_v17 = vld [vmem:[%s22100_s0 + $0x40] sm:$0xff]  }
 0x2d3   :  { %v20729_v30 = vadd.f32 %v16015_v36, %v20679_v20  ;;  %v15960_v20 = vadd.f32 %v20687_v49, %v20685_v48 }
 0x2d5   :  { %v16016_v19 = vpop.f32.mrb[140].mxu1 }
 0x2d6   :  { %v16017_v13 = vpop.f32.mrb[141].mxu1 }
 0x2d7   :  { %v16018_v26 = vadd.f32 %v16017_v13, %v16016_v19  ;;  %v16019_v45 = vpop.f32.mrb[142].mxu1 }
 0x2d8   :  { %v16020_v3 = vpop.f32.mrb[143].mxu1 }
 0x2d9   :  { %v20734_v61 = vadd.f32 %v16018_v26, %v20681_v1  ;;  %v16021_v18 = vadd.f32 %v16020_v3, %v16019_v45 }
 0x2db   :  { %v20737_v43 = vadd.f32 %v16021_v18, %v20683_v10  ;;  %v18104_v18 = vld [vmem:[#allocation3 + $0x408] ss:$16 sps:$4 sm:$0xff]  }
 0x2dd   :  { %v16022_v14 = vpop.f32.mrb[144].mxu1 }
 0x2de   :  { %v16023_v51 = vpop.f32.mrb[145].mxu1 }
 0x2df   :  { %v16024_v9 = vadd.f32 %v16023_v51, %v16022_v14  ;;  %v16025_v25 = vpop.f32.mrb[146].mxu1  ;;  %v18106_v14 = vld [vmem:[#allocation3 + $0x40c] ss:$16 sps:$4 sm:$0xff]   ;;  %v18112_v51 = vld [vmem:[#allocation3 + $0x428] ss:$16 sps:$4 sm:$0xff]  }
 0x2e0   :  { %v16026_v38 = vpop.f32.mrb[147].mxu1  ;;  %2885 = vmatprep.mubr.bf16.mxu1 %v18106_v14 }
 0x2e1   :  { %v20745_v1 = vadd.f32 %v16024_v9, %v15960_v20  ;;  %v16027_v22 = vadd.f32 %v16026_v38, %v16025_v25  ;;  %2886 = vmatmul.mubr.bf16.vlgmr.msra.gmra.mrb[156].mxu1 %v18104_v18  ;;  %v18110_v20 = vld [vmem:[#allocation3 + $0x42c] ss:$16 sps:$4 sm:$0xff]   ;;  %v20792_v25 = vld [vmem:[%s22100_s0 + $0x50] sm:$0xff]  }
 0x2e2   :  { %2893 = vmatprep.mubr.bf16.mxu1 %v18110_v20  ;;  %v20786_v9 = vld [vmem:[%s22100_s0 + $0x8] sm:$0xff]   ;;  %v20804_v38 = vld [vmem:[%s22100_s0 + $0x58] sm:$0xff]  }
 0x2e3   :  { %v20747_v58 = vadd.f32 %v16027_v22, %v15963_v23  ;;  %v20798_v23 = vld [vmem:[%s22100_s0 + $0x10] sm:$0xff]   ;;  %v18116_v22 = vld [vmem:[#allocation3 + $0x44c] ss:$16 sps:$4 sm:$0xff]  }
 0x2e4   :  { %v20852_v18 = vld [vmem:[%s22100_s0 + $0x78] sm:$0xff]  }
 0x2e5   :  { %v16028_v10 = vpop.f32.mrb[148].mxu1 }
 0x2e6   :  { %v16029_v48 = vpop.f32.mrb[149].mxu1 }
 0x2e7   :  { %v16030_v49 = vadd.f32 %v16029_v48, %v16028_v10  ;;  %v16031_v55 = vpop.f32.mrb[150].mxu1  ;;  %v18118_v10 = vld [vmem:[#allocation3 + $0x448] ss:$16 sps:$4 sm:$0xff]  }
 0x2e8   :  { %v16032_v5 = vpop.f32.mrb[151].mxu1  ;;  %v20810_v48 = vld [vmem:[%s22100_s0 + $0x18] sm:$0xff]  }
 0x2e9   :  { %v20752_v33 = vadd.f32 %v16030_v49, %v20693_v54  ;;  %v16033_v6 = vadd.f32 %v16032_v5, %v16031_v55  ;;  %2894 = vmatmul.mubr.bf16.gmra.mrb[160].mxu1 %v18112_v51  ;;  %v20816_v49 = vld [vmem:[%s22100_s0 + $0x60] sm:$0xff]   ;;  %v20828_v5 = vld [vmem:[%s22100_s0 + $0x68] sm:$0xff]   ;;  %v20859_v54 = vld [vmem:[%s22100_s0 + $0x38] sm:$0xff]  }
 0x2ea   :  { %2901 = vmatprep.mubr.bf16.mxu1 %v18116_v22  ;;  %v20822_v55 = vld [vmem:[%s22100_s0 + $0x20] sm:$0xff]   ;;  %v18128_v51 = vld [vmem:[#allocation3 + $0x48c] ss:$16 sps:$4 sm:$0xff]  }
 0x2eb   :  { %v20755_v8 = vadd.f32 %v16033_v6, %v20695_v63  ;;  %v20767_v63 = vld [vmem:[#allocation8 + $0x6] sm:$0x3]  ;;  %v18122_v6 = vld [vmem:[#allocation3 + $0x46c] ss:$16 sps:$4 sm:$0xff]  }
 0x2ec   :  { %17851 = vmatprep.subr.msk.bf16.mxu0 %vm1264_vm0, %v20767_v63 }
 0x2ed   :  { %v16034_v34 = vpop.f32.mrb[152].mxu1 }
 0x2ee   :  { %v16035_v50 = vpop.f32.mrb[153].mxu1 }
 0x2ef   :  { %v16036_v36 = vadd.f32 %v16035_v50, %v16034_v34  ;;  %v16037_v19 = vpop.f32.mrb[154].mxu1  ;;  %v18124_v34 = vld [vmem:[#allocation3 + $0x468] ss:$16 sps:$4 sm:$0xff]  }
 0x2f0   :  { %v16038_v13 = vpop.f32.mrb[155].mxu1  ;;  %v20834_v50 = vld [vmem:[%s22100_s0 + $0x28] sm:$0xff]  }
 0x2f1   :  { %v20760_v26 = vadd.f32 %v16036_v36, %v20697_v2  ;;  %v16039_v45 = vadd.f32 %v16038_v13, %v16037_v19  ;;  %v20774_v2 = vld [vmem:[%s22100_s0] sm:$0xff]   ;;  %2902 = vmatmul.mubr.bf16.gmra.mrb[164].mxu1 %v18118_v10  ;;  %v20840_v36 = vld [vmem:[%s22100_s0 + $0x70] sm:$0xff]   ;;  %v18130_v10 = vld [vmem:[#allocation3 + $0x488] ss:$16 sps:$4 sm:$0xff]  }
 0x2f2   :  { %16187 = vmatpush3.bf16.msra.mxu1 %v20774_v2  ;;  %2909 = vmatprep.mubr.bf16.mxu1 %v18122_v6  ;;  %v20846_v13 = vld [vmem:[%s22100_s0 + $0x30] sm:$0xff]  }
 0x2f3   :  { %v20763_v3 = vadd.f32 %v16039_v45, %v20699_v28  ;;  %v20780_v28 = vld [vmem:[%s22100_s0 + $0x48] sm:$0xff]  }
 0x2f4   :  { %16188 = vmatprep.subr.bf16.mxu1 %v20780_v28 }
 0x2f6   :  { %16189 = vmatpush3.bf16.msra.mxu1 %v20786_v9 }
 0x2f7   :  { %16190 = vmatprep.subr.bf16.mxu1 %v20792_v25 }
 0x2f9   :  { %2910 = vmatmul.mubr.bf16.gmra.mrb[168].mxu1 %v18124_v34 }
 0x2fa   :  { %16191 = vmatpush3.bf16.msra.mxu1 %v20798_v23  ;;  %2917 = vmatprep.mubr.bf16.mxu1 %v18128_v51 }
 0x2fb   :  { %16192 = vmatprep.subr.bf16.mxu1 %v20804_v38 }
 0x2fe   :  { %16193 = vmatpush3.bf16.msra.mxu1 %v20810_v48 }
 0x2ff   :  { %16194 = vmatprep.subr.bf16.mxu1 %v20816_v49 }
 0x301   :  { %2918 = vmatmul.mubr.bf16.gmra.mrb[172].mxu1 %v18130_v10  ;;  %v2448_v10 = vsel %vm1264_vm0, %v20767_v63, 0 }
 0x302   :  { %16195 = vmatpush3.bf16.msra.mxu1 %v20822_v55 }
 0x303   :  { %16196 = vmatprep.subr.bf16.mxu1 %v20828_v5 }
 0x306   :  { %16197 = vmatpush3.bf16.msra.mxu1 %v20834_v50 }
 0x307   :  { %16198 = vmatprep.subr.bf16.mxu1 %v20840_v36 }
 0x30a   :  { %16199 = vmatpush3.bf16.msra.mxu1 %v20846_v13 }
 0x30b   :  { %16200 = vmatprep.subr.bf16.mxu1 %v20852_v18 }
 0x30e   :  { %16201 = vmatpush3.bf16.msra.mxu1 %v20859_v54 }
 0x30f   :  { %16323 = vmatprep.subr.bf16.mxu1 %v20865_v17 }
 0x359   :  { %v15855_v19 = vpop.f32.mrb[84].mxu0 }
 0x35a   :  { %v15856_v45 = vpop.f32.mrb[85].mxu0 }
 0x35b   :  { %v15857_v14 = vadd.f32 %v15856_v45, %v15855_v19  ;;  %v15858_v20 = vpop.f32.mrb[86].mxu0 }
 0x35c   :  { %v15859_v22 = vpop.f32.mrb[87].mxu0 }
 0x35d   :  { %v1814_v6 = vadd.f32 %v15857_v14, %v20526_v12  ;;  %v15860_v34 = vadd.f32 %v15859_v22, %v15858_v20  ;;  %v18134_v22 = vld [vmem:[#allocation3 + $0x4ac] ss:$16 sps:$4 sm:$0xff]  }
 0x35e   :  { %2925 = vmatprep.mubr.bf16.mxu1 %v18134_v22 }
 0x35f   :  { %v1817_v19 = vadd.f32 %v15860_v34, %v20529_v27  ;;  %2926 = vmatmul.mubr.bf16.gmra.mrb[176].mxu1 %v18136_v47 }
 0x361   :  { %v15861_v12 = vpop.f32.mrb[88].mxu0  ;;  %v1876_v45 = vpack.c.bf16 %v1817_v19, %v1814_v6 }
 0x362   :  { %v15862_v14 = vpop.f32.mrb[89].mxu0 }
 0x363   :  { %v15863_v20 = vadd.f32 %v15862_v14, %v15861_v12  ;;  %v15864_v51 = vpop.f32.mrb[90].mxu0  ;;  %17054 = vmatprep.mubr.msk.bf16.mxu0 %vm1239_vm1, %v1876_v45  ;;  %v18140_v12 = vld [vmem:[#allocation3 + $0x4cc] ss:$16 sps:$4 sm:$0xff]   ;;  %v18142_v14 = vld [vmem:[#allocation3 + $0x4c8] ss:$16 sps:$4 sm:$0xff]  }
 0x364   :  { %v15865_v62 = vpop.f32.mrb[91].mxu0  ;;  %2933 = vmatprep.mubr.bf16.mxu1 %v18140_v12 }
 0x365   :  { %v1822_v31 = vadd.f32 %v15863_v20, %v20532_v52  ;;  %v15866_v39 = vadd.f32 %v15865_v62, %v15864_v51  ;;  %v18148_v51 = vld [vmem:[#allocation3 + $0x4e8] ss:$16 sps:$4 sm:$0xff]  }
 0x367   :  { %v1825_v56 = vadd.f32 %v15866_v39, %v20539_v40  ;;  %2934 = vmatmul.mubr.bf16.gmra.mrb[180].mxu1 %v18142_v14 }
 0x369   :  { %v1877_v24 = vpack.c.bf16 %v1825_v56, %v1822_v31  ;;  %v15867_v27 = vpop.f32.mrb[92].mxu0 }
 0x36a   :  { %v15868_v6 = vpop.f32.mrb[93].mxu0 }
 0x36b   :  { %v15869_v34 = vadd.f32 %v15868_v6, %v15867_v27  ;;  %v15870_v19 = vpop.f32.mrb[94].mxu0  ;;  %17055 = vmatmul.mubr.msk.bf16.vlgmr.msra.gmra.mrb[68].mxu0 %vm1239_vm1, %v1877_v24  ;;  %v18146_v24 = vld [vmem:[#allocation3 + $0x4ec] ss:$16 sps:$4 sm:$0xff]  }
 0x36c   :  { %v15871_v45 = vpop.f32.mrb[95].mxu0  ;;  %17071 = vmatpush3.bf16.msra.mxu0 %v2448_v10  ;;  %2941 = vmatprep.mubr.bf16.mxu1 %v18146_v24 }
 0x36d   :  { %v1830_v52 = vadd.f32 %v15869_v34, %v20548_v53  ;;  %v15872_v62 = vadd.f32 %v15871_v45, %v15870_v19  ;;  %16049 = vmatprep.subr.bf16.mxu0 %v20865_v17 }
 0x36f   :  { %v1833_v40 = vadd.f32 %v15872_v62, %v20550_v32  ;;  %2942 = vmatmul.mubr.bf16.gmra.mrb[184].mxu1 %v18148_v51 }
 0x371   :  { %v15873_v56 = vpop.f32.mrb[96].mxu0  ;;  %v1878_v39 = vpack.c.bf16 %v1833_v40, %v1830_v52 }
 0x372   :  { %v15874_v31 = vpop.f32.mrb[97].mxu0 }
 0x373   :  { %v15875_v47 = vadd.f32 %v15874_v31, %v15873_v56  ;;  %v15876_v63 = vpop.f32.mrb[98].mxu0  ;;  %17058 = vmatprep.mubr.msk.bf16.mxu0 %vm1239_vm1, %v1878_v39 }
 0x374   :  { %v15877_v20 = vpop.f32.mrb[99].mxu0 }
 0x375   :  { %v1838_v22 = vadd.f32 %v15875_v47, %v20560_v42  ;;  %v15878_v53 = vadd.f32 %v15877_v20, %v15876_v63 }
 0x377   :  { %v1841_v27 = vadd.f32 %v15878_v53, %v20562_v11 }
 0x379   :  { %v15879_v10 = vpop.f32.mrb[100].mxu0  ;;  %v1879_v32 = vpack.c.bf16 %v1841_v27, %v1838_v22 }
 0x37a   :  { %v15880_v6 = vpop.f32.mrb[101].mxu0 }
 0x37b   :  { %v15881_v34 = vadd.f32 %v15880_v6, %v15879_v10  ;;  %v15882_v19 = vpop.f32.mrb[102].mxu0  ;;  %17059 = vmatmul.mubr.msk.bf16.gmra.mrb[72].mxu0 %vm1239_vm1, %v1879_v32 }
 0x37c   :  { %v15883_v12 = vpop.f32.mrb[103].mxu0 }
 0x37d   :  { %v1846_v45 = vadd.f32 %v15881_v34, %v20569_v0  ;;  %v15884_v14 = vadd.f32 %v15883_v12, %v15882_v19 }
 0x37f   :  { %v1849_v52 = vadd.f32 %v15884_v14, %v20571_v41 }
 0x381   :  { %v15885_v62 = vpop.f32.mrb[104].mxu0  ;;  %v1880_v42 = vpack.c.bf16 %v1849_v52, %v1846_v45 }
 0x382   :  { %v15886_v40 = vpop.f32.mrb[105].mxu0 }
 0x383   :  { %v15887_v56 = vadd.f32 %v15886_v40, %v15885_v62  ;;  %v15888_v39 = vpop.f32.mrb[106].mxu0  ;;  %17062 = vmatprep.mubr.msk.bf16.mxu0 %vm1239_vm1, %v1880_v42  ;;  %v22117_v62 = vpack.c.bf16 %v20721_v7, %v20718_v4  ;;  %v2959_v4 = vld [vmem:[#allocation8 + $0x8] sm:$0x3]  ;;  %v18107_v7 = vld [vmem:[#allocation3 + $0x400] ss:$16 sps:$4 sm:$0xff]  }
 0x384   :  { %v15889_v11 = vpop.f32.mrb[107].mxu0  ;;  %v18137_v42 = vld [vmem:[#allocation3 + $0x4a4] ss:$16 sps:$4 sm:$0xff]   ;;  %v18139_v40 = vld [vmem:[#allocation3 + $0x4a0] ss:$16 sps:$4 sm:$0xff]  }
 0x385   :  { %v1854_v31 = vadd.f32 %v15887_v56, %v20578_v37  ;;  %v15890_v47 = vadd.f32 %v15889_v11, %v15888_v39  ;;  %v18143_v56 = vld [vmem:[#allocation3 + $0x4c4] ss:$16 sps:$4 sm:$0xff]   ;;  %v18145_v39 = vld [vmem:[#allocation3 + $0x4c0] ss:$16 sps:$4 sm:$0xff]  }
 0x386   :  { %v18149_v11 = vld [vmem:[#allocation3 + $0x4e4] ss:$16 sps:$4 sm:$0xff]  }
 0x387   :  { %v1857_v63 = vadd.f32 %v15890_v47, %v20580_v60 }
 0x389   :  { %v15891_v24 = vpop.f32.mrb[108].mxu0  ;;  %v1881_v20 = vpack.c.bf16 %v1857_v63, %v1854_v31  ;;  %v18151_v31 = vld [vmem:[#allocation3 + $0x4e0] ss:$16 sps:$4 sm:$0xff]  }
 0x38a   :  { %v15892_v51 = vpop.f32.mrb[109].mxu0 }
 0x38b   :  { %v15893_v0 = vadd.f32 %v15892_v51, %v15891_v24  ;;  %v15894_v22 = vpop.f32.mrb[110].mxu0  ;;  %17063 = vmatmul.mubr.msk.bf16.gmra.mrb[76].mxu0 %vm1239_vm1, %v1881_v20 }
 0x38c   :  { %v15895_v41 = vpop.f32.mrb[111].mxu0 }
 0x38d   :  { %v1862_v53 = vadd.f32 %v15893_v0, %v20596_v57  ;;  %v15896_v27 = vadd.f32 %v15895_v41, %v15894_v22  ;;  %v22115_v57 = vpack.c.bf16 %v20705_v21, %v20702_v59  ;;  %v22120_v59 = vpack.c.bf16 %v20747_v58, %v20745_v1  ;;  %v18119_v1 = vld [vmem:[#allocation3 + $0x444] ss:$16 sps:$4 sm:$0xff]   ;;  %v18121_v58 = vld [vmem:[#allocation3 + $0x440] ss:$16 sps:$4 sm:$0xff]  }
 0x38e   :  { %v22121_v21 = vpack.c.bf16 %v20755_v8, %v20752_v33  ;;  %v18125_v33 = vld [vmem:[#allocation3 + $0x464] ss:$16 sps:$4 sm:$0xff]   ;;  %v18127_v8 = vld [vmem:[#allocation3 + $0x460] ss:$16 sps:$4 sm:$0xff]  }
 0x38f   :  { %v1865_v10 = vadd.f32 %v15896_v27, %v20601_v16  ;;  %v22116_v16 = vpack.c.bf16 %v20713_v29, %v20710_v46  ;;  %v18109_v46 = vld [vmem:[#allocation3 + $0x404] ss:$16 sps:$4 sm:$0xff]   ;;  %v22122_v29 = vpack.c.bf16 %v20763_v3, %v20760_v26  ;;  %v18133_v3 = vld [vmem:[#allocation3 + $0x480] ss:$16 sps:$4 sm:$0xff]  }
 0x390   :  { %v18131_v26 = vld [vmem:[#allocation3 + $0x484] ss:$16 sps:$4 sm:$0xff]  }
 0x391   :  { %v15897_v32 = vpop.f32.mrb[112].mxu0  ;;  %v1882_v6 = vpack.c.bf16 %v1865_v10, %v1862_v53 }
 0x392   :  { %v15898_v34 = vpop.f32.mrb[113].mxu0 }
 0x393   :  { %v15899_v37 = vadd.f32 %v15898_v34, %v15897_v32  ;;  %v15900_v19 = vpop.f32.mrb[114].mxu0  ;;  %17066 = vmatprep.mubr.msk.bf16.mxu0 %vm1239_vm1, %v1882_v6 }
 0x394   :  { %v15901_v60 = vpop.f32.mrb[115].mxu0 }
 0x395   :  { %v1870_v12 = vadd.f32 %v15899_v37, %v20620_v44  ;;  %v15902_v45 = vadd.f32 %v15901_v60, %v15900_v19  ;;  %v22118_v44 = vpack.c.bf16 %v20729_v30, %v20726_v15  ;;  %v18113_v15 = vld [vmem:[#allocation3 + $0x424] ss:$16 sps:$4 sm:$0xff]   ;;  %v2985_v30 = vsel %vm1264_vm0, %v2959_v4, 0 }
 0x397   :  { %v1873_v14 = vadd.f32 %v15902_v45, %v20625_v35  ;;  %v22119_v35 = vpack.c.bf16 %v20737_v43, %v20734_v61  ;;  %v20946_v61 = vld [vmem:[%s22100_s0 + $0xc0] sm:$0xff]  }
 0x398   :  { %v18115_v43 = vld [vmem:[#allocation3 + $0x420] ss:$16 sps:$4 sm:$0xff]  }
 0x399   :  { %v1883_v52 = vpack.c.bf16 %v1873_v14, %v1870_v12 }
 0x39b   :  { %17067 = vmatmul.mubr.msk.bf16.gmra.mrb[80].mxu0 %vm1239_vm1, %v1883_v52 }
 0x39c   :  { %17072 = vmatprep.mubr.msk.bf16.mxu0 %vm1239_vm1, %v22115_v57 }
 0x3a3   :  { %17073 = vmatmul.mubr.msk.bf16.vlgmr.msra.gmra.mrb[68].mxu0 %vm1239_vm1, %v22116_v16 }
 0x3a4   :  { %17076 = vmatprep.mubr.msk.bf16.mxu0 %vm1239_vm1, %v22117_v62  ;;  %16050 = vmatpush3.bf16.msra.mxu0 %v20774_v2 }
 0x3a5   :  { %16051 = vmatprep.subr.bf16.mxu0 %v20780_v28 }
 0x3a8   :  { %16052 = vmatpush3.bf16.msra.mxu0 %v20786_v9 }
 0x3a9   :  { %16053 = vmatprep.subr.bf16.mxu0 %v20792_v25 }
 0x3ab   :  { %17077 = vmatmul.mubr.msk.bf16.gmra.mrb[72].mxu0 %vm1239_vm1, %v22118_v44 }
 0x3ac   :  { %17080 = vmatprep.mubr.msk.bf16.mxu0 %vm1239_vm1, %v22119_v35  ;;  %16054 = vmatpush3.bf16.msra.mxu0 %v20798_v23 }
 0x3ad   :  { %16055 = vmatprep.subr.bf16.mxu0 %v20804_v38 }
 0x3b0   :  { %16056 = vmatpush3.bf16.msra.mxu0 %v20810_v48 }
 0x3b1   :  { %16057 = vmatprep.subr.bf16.mxu0 %v20816_v49 }
 0x3b3   :  { %17081 = vmatmul.mubr.msk.bf16.gmra.mrb[76].mxu0 %vm1239_vm1, %v22120_v59 }
 0x3b4   :  { %17084 = vmatprep.mubr.msk.bf16.mxu0 %vm1239_vm1, %v22121_v21  ;;  %16058 = vmatpush3.bf16.msra.mxu0 %v20822_v55  ;;  %v16129_v47 = vpop.f32.mrb[156].mxu1 }
 0x3b5   :  { %16059 = vmatprep.subr.bf16.mxu0 %v20828_v5  ;;  %v16130_v63 = vpop.f32.mrb[157].mxu1 }
 0x3b6   :  { %v20949_v24 = vadd.f32 %v16130_v63, %v16129_v47  ;;  %v16132_v20 = vpop.f32.mrb[158].mxu1  ;;  %v18152_v63 = vld [vmem:[#allocation3 + $0x500] ss:$16 sps:$4 sm:$0xff]  }
 0x3b7   :  { %v16133_v51 = vpop.f32.mrb[159].mxu1 }
 0x3b8   :  { %16060 = vmatpush3.bf16.msra.mxu0 %v20834_v50  ;;  %v20951_v0 = vadd.f32 %v16133_v51, %v16132_v20  ;;  %v18154_v20 = vld [vmem:[#allocation3 + $0x504] ss:$16 sps:$4 sm:$0xff]  }
 0x3b9   :  { %16061 = vmatprep.subr.bf16.mxu0 %v20840_v36  ;;  %3325 = vmatprep.mubr.bf16.mxu1 %v18154_v20  ;;  %v18158_v51 = vld [vmem:[#allocation3 + $0x524] ss:$16 sps:$4 sm:$0xff]  }
 0x3ba   :  { %3326 = vmatmul.mubr.bf16.vlgmr.msra.gmra.mrb[188].mxu1 %v18152_v63  ;;  %v18206_v20 = vld [vmem:[#allocation3 + $0x644] ss:$16 sps:$4 sm:$0xff]  }
 0x3bb   :  { %17085 = vmatmul.mubr.msk.bf16.gmra.mrb[80].mxu0 %vm1239_vm1, %v22122_v29  ;;  %16324 = vmatpush3.bf16.msra.mxu1 %v20774_v2 }
 0x3bc   :  { %16062 = vmatpush3.bf16.msra.mxu0 %v20846_v13  ;;  %2788 = vmatprep.mubr.bf16.mxu0 %v18109_v46  ;;  %v16135_v22 = vpop.f32.mrb[160].mxu1 }
 0x3bd   :  { %16063 = vmatprep.subr.bf16.mxu0 %v20852_v18  ;;  %v16136_v41 = vpop.f32.mrb[161].mxu1  ;;  %16325 = vmatprep.subr.bf16.mxu1 %v20780_v28 }
 0x3be   :  { %v20953_v53 = vadd.f32 %v16136_v41, %v16135_v22  ;;  %v16138_v27 = vpop.f32.mrb[162].mxu1  ;;  %v18160_v22 = vld [vmem:[#allocation3 + $0x520] ss:$16 sps:$4 sm:$0xff]   ;;  %3333 = vmatprep.mubr.bf16.mxu1 %v18158_v51  ;;  %v18164_v41 = vld [vmem:[#allocation3 + $0x544] ss:$16 sps:$4 sm:$0xff]  }
 0x3bf   :  { %v16139_v10 = vpop.f32.mrb[163].mxu1  ;;  %16326 = vmatpush3.bf16.msra.mxu1 %v20786_v9 }
 0x3c0   :  { %16064 = vmatpush3.bf16.msra.mxu0 %v20859_v54  ;;  %v20955_v32 = vadd.f32 %v16139_v10, %v16138_v27  ;;  %16327 = vmatprep.subr.bf16.mxu1 %v20792_v25  ;;  %v18166_v27 = vld [vmem:[#allocation3 + $0x540] ss:$16 sps:$4 sm:$0xff]   ;;  %v18170_v10 = vld [vmem:[#allocation3 + $0x564] ss:$16 sps:$4 sm:$0xff]  }
 0x3c1   :  { %17852 = vmatprep.subr.msk.bf16.mxu0 %vm1264_vm0, %v2959_v4 }
 0x3c2   :  { %3334 = vmatmul.mubr.bf16.gmra.mrb[192].mxu1 %v18160_v22 }
 0x3c3   :  { %2789 = vmatmul.mubr.bf16.vlgmr.msra.gmra.mrb[116].mxu0 %v18107_v7  ;;  %16328 = vmatpush3.bf16.msra.mxu1 %v20798_v23 }
 0x3c4   :  { %2796 = vmatprep.mubr.bf16.mxu0 %v18113_v15  ;;  %17089 = vmatpush3.bf16.msra.mxu0 %v2985_v30  ;;  %v16141_v6 = vpop.f32.mrb[164].mxu1 }
 0x3c5   :  { %16250 = vmatprep.subr.bf16.mxu0 %v20946_v61  ;;  %v16142_v34 = vpop.f32.mrb[165].mxu1  ;;  %16329 = vmatprep.subr.bf16.mxu1 %v20804_v38 }
 0x3c6   :  { %v20957_v37 = vadd.f32 %v16142_v34, %v16141_v6  ;;  %v16144_v19 = vpop.f32.mrb[166].mxu1  ;;  %3341 = vmatprep.mubr.bf16.mxu1 %v18164_v41  ;;  %v18172_v6 = vld [vmem:[#allocation3 + $0x560] ss:$16 sps:$4 sm:$0xff]   ;;  %v18176_v34 = vld [vmem:[#allocation3 + $0x584] ss:$16 sps:$4 sm:$0xff]  }
 0x3c7   :  { %v16145_v60 = vpop.f32.mrb[167].mxu1  ;;  %16330 = vmatpush3.bf16.msra.mxu1 %v20810_v48 }
 0x3c8   :  { %v20959_v12 = vadd.f32 %v16145_v60, %v16144_v19  ;;  %16331 = vmatprep.subr.bf16.mxu1 %v20816_v49  ;;  %v18178_v19 = vld [vmem:[#allocation3 + $0x580] ss:$16 sps:$4 sm:$0xff]   ;;  %v18182_v60 = vld [vmem:[#allocation3 + $0x5a4] ss:$16 sps:$4 sm:$0xff]  }
 0x3ca   :  { %3342 = vmatmul.mubr.bf16.gmra.mrb[196].mxu1 %v18166_v27  ;;  %v18208_v27 = vld [vmem:[#allocation3 + $0x640] ss:$16 sps:$4 sm:$0xff]  }
 0x3cb   :  { %2797 = vmatmul.mubr.bf16.gmra.mrb[120].mxu0 %v18115_v43  ;;  %16332 = vmatpush3.bf16.msra.mxu1 %v20822_v55 }
 0x3cc   :  { %2804 = vmatprep.mubr.bf16.mxu0 %v18119_v1  ;;  %v16147_v45 = vpop.f32.mrb[168].mxu1  ;;  %16333 = vmatprep.subr.bf16.mxu1 %v20828_v5 }
 0x3cd   :  { %v16148_v14 = vpop.f32.mrb[169].mxu1  ;;  %3349 = vmatprep.mubr.bf16.mxu1 %v18170_v10 }
 0x3ce   :  { %v20961_v52 = vadd.f32 %v16148_v14, %v16147_v45  ;;  %v16150_v57 = vpop.f32.mrb[170].mxu1  ;;  %v18184_v45 = vld [vmem:[#allocation3 + $0x5a0] ss:$16 sps:$4 sm:$0xff]   ;;  %v18188_v14 = vld [vmem:[#allocation3 + $0x5c4] ss:$16 sps:$4 sm:$0xff]  }
 0x3cf   :  { %v16151_v16 = vpop.f32.mrb[171].mxu1  ;;  %16334 = vmatpush3.bf16.msra.mxu1 %v20834_v50 }
 0x3d0   :  { %v20963_v62 = vadd.f32 %v16151_v16, %v16150_v57  ;;  %16335 = vmatprep.subr.bf16.mxu1 %v20840_v36  ;;  %v18190_v57 = vld [vmem:[#allocation3 + $0x5c0] ss:$16 sps:$4 sm:$0xff]   ;;  %v18194_v16 = vld [vmem:[#allocation3 + $0x5e4] ss:$16 sps:$4 sm:$0xff]  }
 0x3d2   :  { %3350 = vmatmul.mubr.bf16.gmra.mrb[200].mxu1 %v18172_v6  ;;  %v21021_v6 = vld [vmem:[%s22100_s0 + $0xc8] sm:$0xff]  }
 0x3d3   :  { %2805 = vmatmul.mubr.bf16.gmra.mrb[124].mxu0 %v18121_v58  ;;  %16336 = vmatpush3.bf16.msra.mxu1 %v20846_v13 }
 0x3d4   :  { %2812 = vmatprep.mubr.bf16.mxu0 %v18125_v33  ;;  %v16153_v44 = vpop.f32.mrb[172].mxu1  ;;  %16337 = vmatprep.subr.bf16.mxu1 %v20852_v18 }
 0x3d5   :  { %v16154_v35 = vpop.f32.mrb[173].mxu1  ;;  %3357 = vmatprep.mubr.bf16.mxu1 %v18176_v34 }
 0x3d6   :  { %v20965_v59 = vadd.f32 %v16154_v35, %v16153_v44  ;;  %v16156_v21 = vpop.f32.mrb[174].mxu1  ;;  %v18196_v44 = vld [vmem:[#allocation3 + $0x5e0] ss:$16 sps:$4 sm:$0xff]  }
 0x3d7   :  { %v16157_v46 = vpop.f32.mrb[175].mxu1  ;;  %16338 = vmatpush3.bf16.msra.mxu1 %v20859_v54 }
 0x3d8   :  { %v20967_v29 = vadd.f32 %v16157_v46, %v16156_v21  ;;  %16460 = vmatprep.subr.bf16.mxu1 %v20865_v17  ;;  %v18202_v17 = vld [vmem:[#allocation3 + $0x604] ss:$16 sps:$4 sm:$0xff]  }
 0x3da   :  { %3358 = vmatmul.mubr.bf16.gmra.mrb[204].mxu1 %v18178_v19  ;;  %v21036_v19 = vld [vmem:[%s22100_s0 + $0xd0] sm:$0xff]  }
 0x3db   :  { %2813 = vmatmul.mubr.bf16.gmra.mrb[128].mxu0 %v18127_v8  ;;  %3365 = vmatprep.mubr.bf16.mxu1 %v18182_v60 }
 0x3dc   :  { %2820 = vmatprep.mubr.bf16.mxu0 %v18131_v26 }
 0x3e2   :  { %3366 = vmatmul.mubr.bf16.gmra.mrb[208].mxu1 %v18184_v45 }
 0x3e3   :  { %2821 = vmatmul.mubr.bf16.gmra.mrb[132].mxu0 %v18133_v3  ;;  %3373 = vmatprep.mubr.bf16.mxu1 %v18188_v14  ;;  %v18212_v14 = vld [vmem:[#allocation3 + $0x684] ss:$16 sps:$4 sm:$0xff]  }
 0x3e4   :  { %2828 = vmatprep.mubr.bf16.mxu0 %v18137_v42 }
 0x3ea   :  { %3374 = vmatmul.mubr.bf16.gmra.mrb[212].mxu1 %v18190_v57 }
 0x3eb   :  { %2829 = vmatmul.mubr.bf16.gmra.mrb[136].mxu0 %v18139_v40  ;;  %3381 = vmatprep.mubr.bf16.mxu1 %v18194_v16 }
 0x3ec   :  { %2836 = vmatprep.mubr.bf16.mxu0 %v18143_v56 }
 0x3f2   :  { %3382 = vmatmul.mubr.bf16.gmra.mrb[216].mxu1 %v18196_v44 }
 0x3f3   :  { %2837 = vmatmul.mubr.bf16.gmra.mrb[140].mxu0 %v18145_v39  ;;  %3862 = vmatprep.mubr.bf16.mxu1 %v18202_v17  ;;  %v18215_v17 = vld [vmem:[#allocation3 + $0x6a4] ss:$16 sps:$4 sm:$0xff]  }
 0x3f4   :  { %2844 = vmatprep.mubr.bf16.mxu0 %v18149_v11 }
 0x3fb   :  { %2845 = vmatmul.mubr.bf16.gmra.mrb[144].mxu0 %v18151_v31 }
 0x432   :  { %v16159_v4 = vpop.f32.mrb[176].mxu1 }
 0x433   :  { %v16160_v7 = vpop.f32.mrb[177].mxu1 }
 0x434   :  { %v20969_v15 = vadd.f32 %v16160_v7, %v16159_v4  ;;  %v16162_v30 = vpop.f32.mrb[178].mxu1  ;;  %v18200_v7 = vld [vmem:[#allocation3 + $0x600] ss:$16 sps:$4 sm:$0xff]  }
 0x435   :  { %v16163_v43 = vpop.f32.mrb[179].mxu1  ;;  %3863 = vmatmul.mubr.bf16.vlgmr.msra.gmra.mrb[220].mxu1 %v18200_v7 }
 0x436   :  { %v20971_v1 = vadd.f32 %v16163_v43, %v16162_v30  ;;  %v18203_v43 = vld [vmem:[#allocation3 + $0x624] ss:$16 sps:$4 sm:$0xff]   ;;  %16461 = vmatpush3.bf16.msra.mxu1 %v20774_v2 }
 0x437   :  { %3870 = vmatprep.mubr.bf16.mxu1 %v18203_v43  ;;  %16462 = vmatprep.subr.bf16.mxu1 %v20780_v28 }
 0x43a   :  { %v16165_v58 = vpop.f32.mrb[180].mxu1  ;;  %16463 = vmatpush3.bf16.msra.mxu1 %v20786_v9 }
 0x43b   :  { %v16166_v33 = vpop.f32.mrb[181].mxu1  ;;  %16464 = vmatprep.subr.bf16.mxu1 %v20792_v25  ;;  %v18209_v25 = vld [vmem:[#allocation3 + $0x664] ss:$16 sps:$4 sm:$0xff]  }
 0x43c   :  { %v20973_v8 = vadd.f32 %v16166_v33, %v16165_v58  ;;  %v16168_v26 = vpop.f32.mrb[182].mxu1 }
 0x43d   :  { %v16169_v3 = vpop.f32.mrb[183].mxu1 }
 0x43e   :  { %v20975_v42 = vadd.f32 %v16169_v3, %v16168_v26  ;;  %16465 = vmatpush3.bf16.msra.mxu1 %v20798_v23 }
 0x43f   :  { %16466 = vmatprep.subr.bf16.mxu1 %v20804_v38 }
 0x442   :  { %v16171_v40 = vpop.f32.mrb[184].mxu1  ;;  %16467 = vmatpush3.bf16.msra.mxu1 %v20810_v48 }
 0x443   :  { %v16172_v56 = vpop.f32.mrb[185].mxu1  ;;  %16468 = vmatprep.subr.bf16.mxu1 %v20816_v49  ;;  %v21029_v49 = vld [vmem:[%s22100_s0 + $0x88] sm:$0xff]  }
 0x444   :  { %v20977_v39 = vadd.f32 %v16172_v56, %v16171_v40  ;;  %v16174_v11 = vpop.f32.mrb[186].mxu1 }
 0x445   :  { %v16175_v31 = vpop.f32.mrb[187].mxu1 }
 0x446   :  { %v20979_v47 = vadd.f32 %v16175_v31, %v16174_v11  ;;  %v18205_v11 = vld [vmem:[#allocation3 + $0x620] ss:$16 sps:$4 sm:$0xff]   ;;  %16469 = vmatpush3.bf16.msra.mxu1 %v20822_v55 }
 0x447   :  { %3871 = vmatmul.mubr.bf16.gmra.mrb[224].mxu1 %v18205_v11  ;;  %16470 = vmatprep.subr.bf16.mxu1 %v20828_v5  ;;  %v18211_v55 = vld [vmem:[#allocation3 + $0x660] ss:$16 sps:$4 sm:$0xff]  }
 0x448   :  { %3878 = vmatprep.mubr.bf16.mxu1 %v18206_v20  ;;  %v21044_v5 = vld [vmem:[%s22100_s0 + $0x90] sm:$0xff]  }
 0x449   :  { %v18217_v11 = vld [vmem:[#allocation3 + $0x6a0] ss:$16 sps:$4 sm:$0xff]  }
 0x44a   :  { %16471 = vmatpush3.bf16.msra.mxu1 %v20834_v50 }
 0x44b   :  { %16472 = vmatprep.subr.bf16.mxu1 %v20840_v36  ;;  %v21060_v36 = vld [vmem:[%s22100_s0 + $0x98] sm:$0xff]  }
 0x44e   :  { %16473 = vmatpush3.bf16.msra.mxu1 %v20846_v13  ;;  %v18214_v13 = vld [vmem:[#allocation3 + $0x680] ss:$16 sps:$4 sm:$0xff]  }
 0x44f   :  { %3879 = vmatmul.mubr.bf16.gmra.mrb[228].mxu1 %v18208_v27  ;;  %16474 = vmatprep.subr.bf16.mxu1 %v20852_v18  ;;  %v21075_v18 = vld [vmem:[%s22100_s0 + $0xa0] sm:$0xff]  }
 0x450   :  { %3886 = vmatprep.mubr.bf16.mxu1 %v18209_v25 }
 0x452   :  { %16475 = vmatpush3.bf16.msra.mxu1 %v20859_v54 }
 0x453   :  { %16524 = vmatprep.subr.bf16.mxu1 %v20946_v61 }
 0x457   :  { %3887 = vmatmul.mubr.bf16.gmra.mrb[232].mxu1 %v18211_v55 }
 0x458   :  { %3894 = vmatprep.mubr.bf16.mxu1 %v18212_v14 }
 0x45f   :  { %3895 = vmatmul.mubr.bf16.gmra.mrb[236].mxu1 %v18214_v13  ;;  %v18155_v13 = vld [vmem:[#allocation3 + $0x508] ss:$16 sps:$4 sm:$0xff]  }
 0x460   :  { %3902 = vmatprep.mubr.bf16.mxu1 %v18215_v17  ;;  %v18163_v17 = vld [vmem:[#allocation3 + $0x528] ss:$16 sps:$4 sm:$0xff]  }
 0x467   :  { %3903 = vmatmul.mubr.bf16.gmra.mrb[240].mxu1 %v18217_v11  ;;  %v18179_v11 = vld [vmem:[#allocation3 + $0x58c] ss:$16 sps:$4 sm:$0xff]  }
 0x496   :  { %v16065_v35 = vpop.f32.mrb[116].mxu0 }
 0x497   :  { %v16066_v21 = vpop.f32.mrb[117].mxu0 }
 0x498   :  { %v16067_v46 = vadd.f32 %v16066_v21, %v16065_v35  ;;  %v16068_v4 = vpop.f32.mrb[118].mxu0  ;;  %v21052_v35 = vld [vmem:[%s22100_s0 + $0xd8] sm:$0xff]  }
 0x499   :  { %v16069_v30 = vpop.f32.mrb[119].mxu0 }
 0x49a   :  { %v2888_v58 = vadd.f32 %v20949_v24, %v16067_v46  ;;  %v16070_v33 = vadd.f32 %v16069_v30, %v16068_v4  ;;  %v21067_v46 = vld [vmem:[%s22100_s0 + $0xe0] sm:$0xff]  }
 0x49c   :  { %v2891_v26 = vadd.f32 %v20951_v0, %v16070_v33  ;;  %v21083_v33 = vld [vmem:[%s22100_s0 + $0xe8] sm:$0xff]  }
 0x49e   :  { %v16071_v3 = vpop.f32.mrb[120].mxu0  ;;  %v2950_v40 = vpack.c.bf16 %v2891_v26, %v2888_v58  ;;  %v21090_v26 = vld [vmem:[%s22100_s0 + $0xa8] sm:$0xff]  }
 0x49f   :  { %v16072_v56 = vpop.f32.mrb[121].mxu0 }
 0x4a0   :  { %v16073_v31 = vadd.f32 %v16072_v56, %v16071_v3  ;;  %v16074_v63 = vpop.f32.mrb[122].mxu0  ;;  %17090 = vmatprep.mubr.msk.bf16.mxu0 %vm1239_vm1, %v2950_v40  ;;  %v21096_v40 = vld [vmem:[%s22100_s0 + $0xf0] sm:$0xff]  }
 0x4a1   :  { %v16075_v24 = vpop.f32.mrb[123].mxu0 }
 0x4a2   :  { %v2896_v0 = vadd.f32 %v20953_v53, %v16073_v31  ;;  %v16076_v51 = vadd.f32 %v16075_v24, %v16074_v63  ;;  %v18218_v63 = vld [vmem:[#allocation3 + $0x6c4] ss:$16 sps:$4 sm:$0xff]  }
 0x4a3   :  { %v21103_v24 = vld [vmem:[%s22100_s0 + $0xb0] sm:$0xff]   ;;  %3910 = vmatprep.mubr.bf16.mxu1 %v18218_v63  ;;  %v18187_v63 = vld [vmem:[#allocation3 + $0x5a8] ss:$16 sps:$4 sm:$0xff]  }
 0x4a4   :  { %v2899_v2 = vadd.f32 %v20955_v32, %v16076_v51  ;;  %v21013_v32 = vld [vmem:[%s22100_s0 + $0x80] sm:$0xff]  }
 0x4a6   :  { %v2951_v28 = vpack.c.bf16 %v2899_v2, %v2896_v0  ;;  %v16077_v22 = vpop.f32.mrb[124].mxu0  ;;  %v21110_v2 = vld [vmem:[%s22100_s0 + $0xf8] sm:$0xff]  }
 0x4a7   :  { %v16078_v41 = vpop.f32.mrb[125].mxu0 }
 0x4a8   :  { %v16079_v10 = vadd.f32 %v16078_v41, %v16077_v22  ;;  %v16080_v9 = vpop.f32.mrb[126].mxu0  ;;  %17091 = vmatmul.mubr.msk.bf16.vlgmr.msra.gmra.mrb[68].mxu0 %vm1239_vm1, %v2951_v28  ;;  %v3496_v28 = vld [vmem:[#allocation8 + $0xa] sm:$0x3] }
 0x4a9   :  { %v16081_v53 = vpop.f32.mrb[127].mxu0  ;;  %16251 = vmatpush3.bf16.msra.mxu0 %v21013_v32  ;;  %v21117_v41 = vld [vmem:[%s22100_s0 + $0xb8] sm:$0xff]  }
 0x4aa   :  { %v2904_v23 = vadd.f32 %v20957_v37, %v16079_v10  ;;  %v16082_v38 = vadd.f32 %v16081_v53, %v16080_v9  ;;  %16252 = vmatprep.subr.bf16.mxu0 %v21021_v6  ;;  %v18220_v9 = vld [vmem:[#allocation3 + $0x6c0] ss:$16 sps:$4 sm:$0xff]  }
 0x4ab   :  { %3911 = vmatmul.mubr.bf16.gmra.mrb[244].mxu1 %v18220_v9 }
 0x4ac   :  { %v2907_v48 = vadd.f32 %v20959_v12, %v16082_v38 }
 0x4ad   :  { %16253 = vmatpush3.bf16.msra.mxu0 %v21029_v49 }
 0x4ae   :  { %v16083_v37 = vpop.f32.mrb[128].mxu0  ;;  %v2952_v34 = vpack.c.bf16 %v2907_v48, %v2904_v23  ;;  %16254 = vmatprep.subr.bf16.mxu0 %v21036_v19  ;;  %v18221_v23 = vld [vmem:[#allocation3 + $0x6e4] ss:$16 sps:$4 sm:$0xff]  }
 0x4af   :  { %v16084_v12 = vpop.f32.mrb[129].mxu0  ;;  %3918 = vmatprep.mubr.bf16.mxu1 %v18221_v23  ;;  %v18236_v23 = vld [vmem:[#allocation3 + $0x780] ss:$16 sps:$4 sm:$0xff]  }
 0x4b0   :  { %v16085_v60 = vadd.f32 %v16084_v12, %v16083_v37  ;;  %v16086_v45 = vpop.f32.mrb[130].mxu0  ;;  %17094 = vmatprep.mubr.msk.bf16.mxu0 %vm1239_vm1, %v2952_v34 }
 0x4b1   :  { %v16087_v57 = vpop.f32.mrb[131].mxu0  ;;  %16255 = vmatpush3.bf16.msra.mxu0 %v21044_v5 }
 0x4b2   :  { %v2912_v16 = vadd.f32 %v20961_v52, %v16085_v60  ;;  %v16088_v44 = vadd.f32 %v16087_v57, %v16086_v45  ;;  %16256 = vmatprep.subr.bf16.mxu0 %v21052_v35  ;;  %v18223_v60 = vld [vmem:[#allocation3 + $0x6e0] ss:$16 sps:$4 sm:$0xff]   ;;  %v18226_v57 = vld [vmem:[#allocation3 + $0x704] ss:$16 sps:$4 sm:$0xff]  }
 0x4b3   :  { %3919 = vmatmul.mubr.bf16.gmra.mrb[248].mxu1 %v18223_v60  ;;  %v18239_v60 = vld [vmem:[#allocation3 + $0x7a0] ss:$16 sps:$4 sm:$0xff]  }
 0x4b4   :  { %v2915_v50 = vadd.f32 %v20963_v62, %v16088_v44  ;;  %4399 = vmatprep.mubr.bf16.mxu1 %v18226_v57 }
 0x4b5   :  { %16257 = vmatpush3.bf16.msra.mxu0 %v21060_v36 }
 0x4b6   :  { %v16089_v52 = vpop.f32.mrb[132].mxu0  ;;  %v2953_v21 = vpack.c.bf16 %v2915_v50, %v2912_v16  ;;  %16258 = vmatprep.subr.bf16.mxu0 %v21067_v46 }
 0x4b7   :  { %v16090_v62 = vpop.f32.mrb[133].mxu0 }
 0x4b8   :  { %v16091_v4 = vadd.f32 %v16090_v62, %v16089_v52  ;;  %v16092_v7 = vpop.f32.mrb[134].mxu0  ;;  %17095 = vmatmul.mubr.msk.bf16.gmra.mrb[72].mxu0 %vm1239_vm1, %v2953_v21  ;;  %v18157_v52 = vld [vmem:[#allocation3 + $0x50c] ss:$16 sps:$4 sm:$0xff]   ;;  %v18224_v21 = vld [vmem:[#allocation3 + $0x700] ss:$16 sps:$4 sm:$0xff]  }
 0x4b9   :  { %v16093_v30 = vpop.f32.mrb[135].mxu0  ;;  %16259 = vmatpush3.bf16.msra.mxu0 %v21075_v18  ;;  %v18229_v62 = vld [vmem:[#allocation3 + $0x724] ss:$16 sps:$4 sm:$0xff]  }
 0x4ba   :  { %v2920_v43 = vadd.f32 %v20965_v59, %v16091_v4  ;;  %v16094_v58 = vadd.f32 %v16093_v30, %v16092_v7  ;;  %16260 = vmatprep.subr.bf16.mxu0 %v21083_v33  ;;  %v18161_v4 = vld [vmem:[#allocation3 + $0x52c] ss:$16 sps:$4 sm:$0xff]   ;;  %v18227_v7 = vld [vmem:[#allocation3 + $0x720] ss:$16 sps:$4 sm:$0xff]  }
 0x4bb   :  { %4400 = vmatmul.mubr.bf16.vlgmr.msra.gmra.mrb[252].mxu1 %v18224_v21  ;;  %v18167_v30 = vld [vmem:[#allocation3 + $0x54c] ss:$16 sps:$4 sm:$0xff]  }
 0x4bc   :  { %v2923_v54 = vadd.f32 %v20967_v29, %v16094_v58  ;;  %4407 = vmatprep.mubr.bf16.mxu1 %v18229_v62  ;;  %16525 = vmatpush3.bf16.msra.mxu1 %v21013_v32  ;;  %v18235_v58 = vld [vmem:[#allocation3 + $0x764] ss:$16 sps:$4 sm:$0xff]  }
 0x4bd   :  { %16261 = vmatpush3.bf16.msra.mxu0 %v21090_v26  ;;  %16526 = vmatprep.subr.bf16.mxu1 %v21021_v6 }
 0x4be   :  { %v16095_v59 = vpop.f32.mrb[136].mxu0  ;;  %v2954_v3 = vpack.c.bf16 %v2923_v54, %v2920_v43  ;;  %16262 = vmatprep.subr.bf16.mxu0 %v21096_v40  ;;  %v18230_v43 = vld [vmem:[#allocation3 + $0x740] ss:$16 sps:$4 sm:$0xff]   ;;  %v18169_v54 = vld [vmem:[#allocation3 + $0x548] ss:$16 sps:$4 sm:$0xff]  }
 0x4bf   :  { %v16096_v56 = vpop.f32.mrb[137].mxu0 }
 0x4c0   :  { %v16097_v29 = vadd.f32 %v16096_v56, %v16095_v59  ;;  %v16098_v31 = vpop.f32.mrb[138].mxu0  ;;  %17098 = vmatprep.mubr.msk.bf16.mxu0 %vm1239_vm1, %v2954_v3  ;;  %16527 = vmatpush3.bf16.msra.mxu1 %v21029_v49  ;;  %v18173_v59 = vld [vmem:[#allocation3 + $0x56c] ss:$16 sps:$4 sm:$0xff]   ;;  %v18233_v3 = vld [vmem:[#allocation3 + $0x760] ss:$16 sps:$4 sm:$0xff]  }
 0x4c1   :  { %v16099_v20 = vpop.f32.mrb[139].mxu0  ;;  %16263 = vmatpush3.bf16.msra.mxu0 %v21103_v24  ;;  %16528 = vmatprep.subr.bf16.mxu1 %v21036_v19  ;;  %v18175_v56 = vld [vmem:[#allocation3 + $0x568] ss:$16 sps:$4 sm:$0xff]  }
 0x4c2   :  { %v2928_v0 = vadd.f32 %v20969_v15, %v16097_v29  ;;  %v16100_v51 = vadd.f32 %v16099_v20, %v16098_v31  ;;  %16264 = vmatprep.subr.bf16.mxu0 %v21110_v2  ;;  %v18181_v29 = vld [vmem:[#allocation3 + $0x588] ss:$16 sps:$4 sm:$0xff]   ;;  %v18185_v31 = vld [vmem:[#allocation3 + $0x5ac] ss:$16 sps:$4 sm:$0xff]  }
 0x4c3   :  { %4408 = vmatmul.mubr.bf16.gmra.mrb[0].mxu1 %v18227_v7  ;;  %v18191_v20 = vld [vmem:[#allocation3 + $0x5cc] ss:$16 sps:$4 sm:$0xff]  }
 0x4c4   :  { %v2931_v22 = vadd.f32 %v20971_v1, %v16100_v51  ;;  %16529 = vmatpush3.bf16.msra.mxu1 %v21044_v5  ;;  %v18197_v51 = vld [vmem:[#allocation3 + $0x5ec] ss:$16 sps:$4 sm:$0xff]  }
 0x4c5   :  { %16265 = vmatpush3.bf16.msra.mxu0 %v21117_v41  ;;  %16530 = vmatprep.subr.bf16.mxu1 %v21052_v35 }
 0x4c6   :  { %v16101_v15 = vpop.f32.mrb[140].mxu0  ;;  %v2955_v27 = vpack.c.bf16 %v2931_v22, %v2928_v0  ;;  %17853 = vmatprep.subr.msk.bf16.mxu0 %vm1264_vm0, %v3496_v28  ;;  %v18193_v0 = vld [vmem:[#allocation3 + $0x5c8] ss:$16 sps:$4 sm:$0xff]   ;;  %v16202_v22 = vpop.f32.mrb[188].mxu1 }
 0x4c7   :  { %v16102_v10 = vpop.f32.mrb[141].mxu0 }
 0x4c8   :  { %v16103_v25 = vadd.f32 %v16102_v10, %v16101_v15  ;;  %v16104_v53 = vpop.f32.mrb[142].mxu0  ;;  %17099 = vmatmul.mubr.msk.bf16.gmra.mrb[76].mxu0 %vm1239_vm1, %v2955_v27  ;;  %16531 = vmatpush3.bf16.msra.mxu1 %v21060_v36  ;;  %v16203_v15 = vpop.f32.mrb[189].mxu1 }
 0x4c9   :  { %v16105_v1 = vpop.f32.mrb[143].mxu0  ;;  %16532 = vmatprep.subr.bf16.mxu1 %v21067_v46  ;;  %v21146_v27 = vadd.f32 %v16203_v15, %v16202_v22  ;;  %v16205_v10 = vpop.f32.mrb[190].mxu1 }
 0x4ca   :  { %v2936_v38 = vadd.f32 %v20973_v8, %v16103_v25  ;;  %v16106_v48 = vadd.f32 %v16105_v1, %v16104_v53  ;;  %v18238_v25 = vld [vmem:[#allocation3 + $0x784] ss:$16 sps:$4 sm:$0xff]  }
 0x4cc   :  { %v2939_v37 = vadd.f32 %v20975_v42, %v16106_v48  ;;  %16533 = vmatpush3.bf16.msra.mxu1 %v21075_v18 }
 0x4cd   :  { %16534 = vmatprep.subr.bf16.mxu1 %v21083_v33 }
 0x4ce   :  { %v16107_v34 = vpop.f32.mrb[144].mxu0  ;;  %v2956_v12 = vpack.c.bf16 %v2939_v37, %v2936_v38 }
 0x4cf   :  { %v16108_v55 = vpop.f32.mrb[145].mxu0 }
 0x4d0   :  { %v16109_v45 = vadd.f32 %v16108_v55, %v16107_v34  ;;  %v16110_v14 = vpop.f32.mrb[146].mxu0  ;;  %17102 = vmatprep.mubr.msk.bf16.mxu0 %vm1239_vm1, %v2956_v12  ;;  %16535 = vmatpush3.bf16.msra.mxu1 %v21090_v26  ;;  %v18241_v12 = vld [vmem:[#allocation3 + $0x7a4] ss:$16 sps:$4 sm:$0xff]  }
 0x4d1   :  { %v16111_v16 = vpop.f32.mrb[147].mxu0  ;;  %16536 = vmatprep.subr.bf16.mxu1 %v21096_v40 }
 0x4d2   :  { %v2944_v44 = vadd.f32 %v20977_v39, %v16109_v45  ;;  %v16112_v50 = vadd.f32 %v16111_v16, %v16110_v14  ;;  %v3522_v39 = vsel %vm1264_vm0, %v3496_v28, 0  ;;  %v18199_v28 = vld [vmem:[#allocation3 + $0x5e8] ss:$16 sps:$4 sm:$0xff]  }
 0x4d4   :  { %v2947_v8 = vadd.f32 %v20979_v47, %v16112_v50  ;;  %v18232_v47 = vld [vmem:[#allocation3 + $0x744] ss:$16 sps:$4 sm:$0xff]   ;;  %16537 = vmatpush3.bf16.msra.mxu1 %v21103_v24 }
 0x4d5   :  { %4415 = vmatprep.mubr.bf16.mxu1 %v18232_v47  ;;  %16538 = vmatprep.subr.bf16.mxu1 %v21110_v2  ;;  %v18244_v50 = vld [vmem:[#allocation3 + $0x7c4] ss:$16 sps:$4 sm:$0xff]   ;;  %v18245_v47 = vld [vmem:[#allocation3 + $0x7e0] ss:$16 sps:$4 sm:$0xff]  }
 0x4d6   :  { %v2957_v42 = vpack.c.bf16 %v2947_v8, %v2944_v44  ;;  %4416 = vmatmul.mubr.bf16.gmra.mrb[4].mxu1 %v18230_v43 }
 0x4d7   :  { %4423 = vmatprep.mubr.bf16.mxu1 %v18235_v58 }
 0x4d8   :  { %17103 = vmatmul.mubr.msk.bf16.gmra.mrb[80].mxu0 %vm1239_vm1, %v2957_v42  ;;  %16539 = vmatpush3.bf16.msra.mxu1 %v21117_v41 }
 0x4d9   :  { %3422 = vmatprep.mubr.bf16.mxu0 %v18157_v52  ;;  %16661 = vmatprep.subr.bf16.mxu1 %v20946_v61  ;;  %v18242_v52 = vld [vmem:[#allocation3 + $0x7c0] ss:$16 sps:$4 sm:$0xff]  }
 0x4de   :  { %4424 = vmatmul.mubr.bf16.gmra.mrb[8].mxu1 %v18233_v3 }
 0x4df   :  { %4431 = vmatprep.mubr.bf16.mxu1 %v18238_v25 }
 0x4e0   :  { %3423 = vmatmul.mubr.bf16.vlgmr.msra.gmra.mrb[148].mxu0 %v18155_v13 }
 0x4e1   :  { %3430 = vmatprep.mubr.bf16.mxu0 %v18161_v4  ;;  %17107 = vmatpush3.bf16.msra.mxu0 %v3522_v39  ;;  %v18247_v39 = vld [vmem:[#allocation3 + $0x7e4] ss:$16 sps:$4 sm:$0xff]  }
 0x4e2   :  { %16387 = vmatprep.subr.bf16.mxu0 %v20946_v61  ;;  %v16206_v61 = vpop.f32.mrb[191].mxu1 }
 0x4e3   :  { %v21148_v9 = vadd.f32 %v16206_v61, %v16205_v10  ;;  %v16208_v53 = vpop.f32.mrb[192].mxu1 }
 0x4e4   :  { %v16209_v1 = vpop.f32.mrb[193].mxu1 }
 0x4e5   :  { %v21150_v38 = vadd.f32 %v16209_v1, %v16208_v53  ;;  %v16211_v48 = vpop.f32.mrb[194].mxu1  ;;  %v18256_v53 = vld [vmem:[#allocation3 + $0x74c] ss:$16 sps:$4 sm:$0xff]   ;;  %v18254_v1 = vld [vmem:[#allocation3 + $0x748] ss:$16 sps:$4 sm:$0xff]  }
 0x4e6   :  { %4432 = vmatmul.mubr.bf16.gmra.mrb[12].mxu1 %v18236_v23  ;;  %v16212_v37 = vpop.f32.mrb[195].mxu1 }
 0x4e7   :  { %v21152_v34 = vadd.f32 %v16212_v37, %v16211_v48  ;;  %v16214_v55 = vpop.f32.mrb[196].mxu1  ;;  %4439 = vmatprep.mubr.bf16.mxu1 %v18241_v12 }
 0x4e8   :  { %3431 = vmatmul.mubr.bf16.gmra.mrb[152].mxu0 %v18163_v17  ;;  %v16215_v45 = vpop.f32.mrb[197].mxu1 }
 0x4e9   :  { %3438 = vmatprep.mubr.bf16.mxu0 %v18167_v30  ;;  %v21154_v14 = vadd.f32 %v16215_v45, %v16214_v55  ;;  %v16217_v57 = vpop.f32.mrb[198].mxu1  ;;  %v18259_v45 = vld [vmem:[#allocation3 + $0x76c] ss:$16 sps:$4 sm:$0xff]  }
 0x4ea   :  { %v16218_v16 = vpop.f32.mrb[199].mxu1 }
 0x4eb   :  { %v21156_v44 = vadd.f32 %v16218_v16, %v16217_v57  ;;  %v16220_v8 = vpop.f32.mrb[200].mxu1  ;;  %v18257_v57 = vld [vmem:[#allocation3 + $0x768] ss:$16 sps:$4 sm:$0xff]   ;;  %v18262_v16 = vld [vmem:[#allocation3 + $0x78c] ss:$16 sps:$4 sm:$0xff]  }
 0x4ec   :  { %v16221_v42 = vpop.f32.mrb[201].mxu1 }
 0x4ed   :  { %v21158_v21 = vadd.f32 %v16221_v42, %v16220_v8  ;;  %v16223_v62 = vpop.f32.mrb[202].mxu1  ;;  %v18268_v8 = vld [vmem:[#allocation3 + $0x7ac] ss:$16 sps:$4 sm:$0xff]  }
 0x4ee   :  { %4440 = vmatmul.mubr.bf16.gmra.mrb[16].mxu1 %v18239_v60  ;;  %v16224_v13 = vpop.f32.mrb[203].mxu1  ;;  %v18274_v42 = vld [vmem:[#allocation3 + $0x7cc] ss:$16 sps:$4 sm:$0xff]  }
 0x4ef   :  { %4447 = vmatprep.mubr.bf16.mxu1 %v18244_v50  ;;  %v21160_v4 = vadd.f32 %v16224_v13, %v16223_v62  ;;  %v16226_v7 = vpop.f32.mrb[204].mxu1  ;;  %v18260_v50 = vld [vmem:[#allocation3 + $0x788] ss:$16 sps:$4 sm:$0xff]   ;;  %v18280_v13 = vld [vmem:[#allocation3 + $0x7ec] ss:$16 sps:$4 sm:$0xff]  }
 0x4f0   :  { %3439 = vmatmul.mubr.bf16.gmra.mrb[156].mxu0 %v18169_v54  ;;  %v16227_v17 = vpop.f32.mrb[205].mxu1  ;;  %v18272_v62 = vld [vmem:[#allocation3 + $0x7c8] ss:$16 sps:$4 sm:$0xff]  }
 0x4f1   :  { %3446 = vmatprep.mubr.bf16.mxu0 %v18173_v59  ;;  %v21162_v30 = vadd.f32 %v16227_v17, %v16226_v7  ;;  %v16229_v43 = vpop.f32.mrb[206].mxu1  ;;  %v18250_v59 = vld [vmem:[#allocation3 + $0x70c] ss:$16 sps:$4 sm:$0xff]  }
 0x4f2   :  { %v16230_v58 = vpop.f32.mrb[207].mxu1 }
 0x4f3   :  { %v21164_v54 = vadd.f32 %v16230_v58, %v16229_v43  ;;  %v16232_v3 = vpop.f32.mrb[208].mxu1 }
 0x4f6   :  { %4448 = vmatmul.mubr.bf16.gmra.mrb[20].mxu1 %v18242_v52  ;;  %v18266_v52 = vld [vmem:[#allocation3 + $0x7a8] ss:$16 sps:$4 sm:$0xff]  }
 0x4f7   :  { %4455 = vmatprep.mubr.bf16.mxu1 %v18247_v39  ;;  %v18278_v39 = vld [vmem:[#allocation3 + $0x7e8] ss:$16 sps:$4 sm:$0xff]  }
 0x4f8   :  { %3447 = vmatmul.mubr.bf16.gmra.mrb[160].mxu0 %v18175_v56  ;;  %v18248_v56 = vld [vmem:[#allocation3 + $0x708] ss:$16 sps:$4 sm:$0xff]  }
 0x4f9   :  { %3454 = vmatprep.mubr.bf16.mxu0 %v18179_v11  ;;  %v16233_v11 = vpop.f32.mrb[209].mxu1 }
 0x4fe   :  { %4456 = vmatmul.mubr.bf16.gmra.mrb[24].mxu1 %v18245_v47 }
 0x4ff   :  { %4496 = vmatprep.mubr.bf16.mxu1 %v18250_v59 }
 0x500   :  { %3455 = vmatmul.mubr.bf16.gmra.mrb[164].mxu0 %v18181_v29  ;;  %v21166_v29 = vadd.f32 %v16233_v11, %v16232_v3 }
 0x501   :  { %3462 = vmatprep.mubr.bf16.mxu0 %v18185_v31  ;;  %v16235_v31 = vpop.f32.mrb[210].mxu1 }
 0x506   :  { %4497 = vmatmul.mubr.bf16.vlgmr.msra.gmra.mrb[28].mxu1 %v18248_v56 }
 0x507   :  { %16662 = vmatpush3.bf16.msra.mxu1 %v21013_v32 }
 0x508   :  { %3463 = vmatmul.mubr.bf16.gmra.mrb[168].mxu0 %v18187_v63  ;;  %v16236_v63 = vpop.f32.mrb[211].mxu1  ;;  %16663 = vmatprep.subr.bf16.mxu1 %v21021_v6 }
 0x509   :  { %3470 = vmatprep.mubr.bf16.mxu0 %v18191_v20  ;;  %v21169_v20 = vadd.f32 %v16236_v63, %v16235_v31 }
 0x50b   :  { %16664 = vmatpush3.bf16.msra.mxu1 %v21029_v49 }
 0x50c   :  { %16665 = vmatprep.subr.bf16.mxu1 %v21036_v19 }
 0x50f   :  { %16666 = vmatpush3.bf16.msra.mxu1 %v21044_v5 }
 0x510   :  { %3471 = vmatmul.mubr.bf16.gmra.mrb[172].mxu0 %v18193_v0  ;;  %v18253_v0 = vld [vmem:[#allocation3 + $0x72c] ss:$16 sps:$4 sm:$0xff]   ;;  %16667 = vmatprep.subr.bf16.mxu1 %v21052_v35 }
 0x511   :  { %3478 = vmatprep.mubr.bf16.mxu0 %v18197_v51  ;;  %v16238_v51 = vpop.f32.mrb[212].mxu1  ;;  %4504 = vmatprep.mubr.bf16.mxu1 %v18253_v0 }
 0x512   :  { %v16239_v22 = vpop.f32.mrb[213].mxu1 }
 0x513   :  { %v21174_v15 = vadd.f32 %v16239_v22, %v16238_v51  ;;  %v16241_v10 = vpop.f32.mrb[214].mxu1  ;;  %16668 = vmatpush3.bf16.msra.mxu1 %v21060_v36 }
 0x514   :  { %v16242_v61 = vpop.f32.mrb[215].mxu1  ;;  %16669 = vmatprep.subr.bf16.mxu1 %v21067_v46 }
 0x515   :  { %v21177_v25 = vadd.f32 %v16242_v61, %v16241_v10  ;;  %v16244_v23 = vpop.f32.mrb[216].mxu1 }
 0x516   :  { %v16245_v48 = vpop.f32.mrb[217].mxu1 }
 0x517   :  { %v21182_v37 = vadd.f32 %v16245_v48, %v16244_v23  ;;  %v16247_v12 = vpop.f32.mrb[218].mxu1  ;;  %16670 = vmatpush3.bf16.msra.mxu1 %v21075_v18 }
 0x518   :  { %3479 = vmatmul.mubr.bf16.gmra.mrb[176].mxu0 %v18199_v28  ;;  %v18251_v28 = vld [vmem:[#allocation3 + $0x728] ss:$16 sps:$4 sm:$0xff]   ;;  %v16248_v55 = vpop.f32.mrb[219].mxu1  ;;  %16671 = vmatprep.subr.bf16.mxu1 %v21083_v33 }
 0x519   :  { %4505 = vmatmul.mubr.bf16.gmra.mrb[32].mxu1 %v18251_v28  ;;  %v21185_v60 = vadd.f32 %v16248_v55, %v16247_v12  ;;  %v16339_v58 = vpop.f32.mrb[220].mxu1 }
 0x51a   :  { %4512 = vmatprep.mubr.bf16.mxu1 %v18256_v53  ;;  %v16340_v3 = vpop.f32.mrb[221].mxu1 }
 0x51b   :  { %16672 = vmatpush3.bf16.msra.mxu1 %v21090_v26  ;;  %v21194_v31 = vadd.f32 %v16340_v3, %v16339_v58  ;;  %v16342_v63 = vpop.f32.mrb[222].mxu1 }
 0x51c   :  { %16673 = vmatprep.subr.bf16.mxu1 %v21096_v40  ;;  %v16343_v0 = vpop.f32.mrb[223].mxu1 }
 0x51d   :  { %v21197_v28 = vadd.f32 %v16343_v0, %v16342_v63  ;;  %v16345_v22 = vpop.f32.mrb[224].mxu1 }
 0x51e   :  { %v16346_v10 = vpop.f32.mrb[225].mxu1 }
 0x51f   :  { %16674 = vmatpush3.bf16.msra.mxu1 %v21103_v24  ;;  %v21199_v23 = vadd.f32 %v16346_v10, %v16345_v22 }
 0x520   :  { %16675 = vmatprep.subr.bf16.mxu1 %v21110_v2 }
 0x521   :  { %4513 = vmatmul.mubr.bf16.gmra.mrb[36].mxu1 %v18254_v1  ;;  %v16348_v1 = vpop.f32.mrb[226].mxu1 }
 0x522   :  { %4520 = vmatprep.mubr.bf16.mxu1 %v18259_v45  ;;  %v16349_v12 = vpop.f32.mrb[227].mxu1 }
 0x523   :  { %16676 = vmatpush3.bf16.msra.mxu1 %v21117_v41  ;;  %v21202_v45 = vadd.f32 %v16349_v12, %v16348_v1 }
 0x529   :  { %4521 = vmatmul.mubr.bf16.gmra.mrb[40].mxu1 %v18257_v57  ;;  %v16351_v57 = vpop.f32.mrb[228].mxu1 }
 0x52a   :  { %4528 = vmatprep.mubr.bf16.mxu1 %v18262_v16 }
 0x531   :  { %4529 = vmatmul.mubr.bf16.gmra.mrb[44].mxu1 %v18260_v50 }
 0x532   :  { %4536 = vmatprep.mubr.bf16.mxu1 %v18268_v8 }
 0x539   :  { %4537 = vmatmul.mubr.bf16.gmra.mrb[48].mxu1 %v18266_v52 }
 0x53a   :  { %4544 = vmatprep.mubr.bf16.mxu1 %v18274_v42 }
 0x541   :  { %4545 = vmatmul.mubr.bf16.gmra.mrb[52].mxu1 %v18272_v62 }
 0x542   :  { %4552 = vmatprep.mubr.bf16.mxu1 %v18280_v13 }
 0x549   :  { %4553 = vmatmul.mubr.bf16.gmra.mrb[56].mxu1 %v18278_v39 }
 0x5b3   :  { %v16266_v7 = vpop.f32.mrb[148].mxu0 }
 0x5b4   :  { %v16267_v47 = vpop.f32.mrb[149].mxu0 }
 0x5b5   :  { %v16268_v17 = vadd.f32 %v16267_v47, %v16266_v7  ;;  %v16269_v43 = vpop.f32.mrb[150].mxu0 }
 0x5b6   :  { %v16270_v59 = vpop.f32.mrb[151].mxu0 }
 0x5b7   :  { %v3425_v56 = vadd.f32 %v16268_v17, %v21146_v27  ;;  %v16271_v11 = vadd.f32 %v16270_v59, %v16269_v43 }
 0x5b9   :  { %v3428_v51 = vadd.f32 %v16271_v11, %v21148_v9  ;;  %v16352_v9 = vpop.f32.mrb[229].mxu1 }
 0x5ba   :  { %v21205_v52 = vadd.f32 %v16352_v9, %v16351_v57  ;;  %v16354_v42 = vpop.f32.mrb[230].mxu1 }
 0x5bb   :  { %v16272_v61 = vpop.f32.mrb[152].mxu0  ;;  %v3487_v53 = vpack.c.bf16 %v3428_v51, %v3425_v56  ;;  %v16355_v62 = vpop.f32.mrb[231].mxu1 }
 0x5bc   :  { %v16273_v48 = vpop.f32.mrb[153].mxu0  ;;  %v21208_v39 = vadd.f32 %v16355_v62, %v16354_v42  ;;  %v16357_v7 = vpop.f32.mrb[232].mxu1 }
 0x5bd   :  { %v16274_v55 = vadd.f32 %v16273_v48, %v16272_v61  ;;  %v16275_v27 = vpop.f32.mrb[154].mxu0  ;;  %17108 = vmatprep.mubr.msk.bf16.mxu0 %vm1239_vm1, %v3487_v53  ;;  %v16358_v47 = vpop.f32.mrb[233].mxu1 }
 0x5be   :  { %v16276_v16 = vpop.f32.mrb[155].mxu0  ;;  %v21210_v58 = vadd.f32 %v16358_v47, %v16357_v7  ;;  %v16360_v59 = vpop.f32.mrb[234].mxu1 }
 0x5bf   :  { %v3433_v50 = vadd.f32 %v16274_v55, %v21150_v38  ;;  %v16277_v8 = vadd.f32 %v16276_v16, %v16275_v27  ;;  %v16361_v56 = vpop.f32.mrb[235].mxu1 }
 0x5c0   :  { %v21213_v63 = vadd.f32 %v16361_v56, %v16360_v59  ;;  %v16363_v0 = vpop.f32.mrb[236].mxu1 }
 0x5c1   :  { %v3436_v13 = vadd.f32 %v16277_v8, %v21152_v34  ;;  %v16364_v34 = vpop.f32.mrb[237].mxu1 }
 0x5c2   :  { %v21218_v61 = vadd.f32 %v16364_v34, %v16363_v0  ;;  %v16366_v53 = vpop.f32.mrb[238].mxu1 }
 0x5c3   :  { %v3488_v17 = vpack.c.bf16 %v3436_v13, %v3433_v50  ;;  %v16278_v43 = vpop.f32.mrb[156].mxu0  ;;  %v16367_v1 = vpop.f32.mrb[239].mxu1 }
 0x5c4   :  { %v16279_v3 = vpop.f32.mrb[157].mxu0  ;;  %v21221_v12 = vadd.f32 %v16367_v1, %v16366_v53  ;;  %v16369_v55 = vpop.f32.mrb[240].mxu1 }
 0x5c5   :  { %v16280_v11 = vadd.f32 %v16279_v3, %v16278_v43  ;;  %v16281_v38 = vpop.f32.mrb[158].mxu0  ;;  %17109 = vmatmul.mubr.msk.bf16.vlgmr.msra.gmra.mrb[68].mxu0 %vm1239_vm1, %v3488_v17  ;;  %v16370_v27 = vpop.f32.mrb[241].mxu1 }
 0x5c6   :  { %v16282_v51 = vpop.f32.mrb[159].mxu0  ;;  %16388 = vmatpush3.bf16.msra.mxu0 %v21013_v32  ;;  %v16372_v16 = vpop.f32.mrb[242].mxu1 }
 0x5c7   :  { %v3441_v22 = vadd.f32 %v16280_v11, %v21154_v14  ;;  %v16283_v10 = vadd.f32 %v16282_v51, %v16281_v38  ;;  %16389 = vmatprep.subr.bf16.mxu0 %v21021_v6  ;;  %v21225_v14 = vadd.f32 %v16370_v27, %v16369_v55  ;;  %v16373_v9 = vpop.f32.mrb[243].mxu1 }
 0x5c8   :  { %v16375_v42 = vpop.f32.mrb[244].mxu1 }
 0x5c9   :  { %v3444_v48 = vadd.f32 %v16283_v10, %v21156_v44  ;;  %v21228_v44 = vadd.f32 %v16373_v9, %v16372_v16 }
 0x5ca   :  { %16390 = vmatpush3.bf16.msra.mxu0 %v21029_v49  ;;  %v16376_v49 = vpop.f32.mrb[245].mxu1 }
 0x5cb   :  { %v3489_v57 = vpack.c.bf16 %v3444_v48, %v3441_v22  ;;  %v16284_v32 = vpop.f32.mrb[160].mxu0  ;;  %16391 = vmatprep.subr.bf16.mxu0 %v21036_v19  ;;  %v21233_v19 = vadd.f32 %v16376_v49, %v16375_v42  ;;  %v16378_v47 = vpop.f32.mrb[246].mxu1 }
 0x5cc   :  { %v16285_v6 = vpop.f32.mrb[161].mxu0  ;;  %v16379_v17 = vpop.f32.mrb[247].mxu1 }
 0x5cd   :  { %v16286_v50 = vadd.f32 %v16285_v6, %v16284_v32  ;;  %v16287_v8 = vpop.f32.mrb[162].mxu0  ;;  %17112 = vmatprep.mubr.msk.bf16.mxu0 %vm1239_vm1, %v3489_v57  ;;  %v21236_v59 = vadd.f32 %v16379_v17, %v16378_v47  ;;  %v16381_v3 = vpop.f32.mrb[248].mxu1 }
 0x5ce   :  { %v16288_v62 = vpop.f32.mrb[163].mxu0  ;;  %16392 = vmatpush3.bf16.msra.mxu0 %v21044_v5  ;;  %v16382_v56 = vpop.f32.mrb[249].mxu1 }
 0x5cf   :  { %v3449_v13 = vadd.f32 %v16286_v50, %v21158_v21  ;;  %v16289_v7 = vadd.f32 %v16288_v62, %v16287_v8  ;;  %16393 = vmatprep.subr.bf16.mxu0 %v21052_v35  ;;  %v21240_v21 = vadd.f32 %v16382_v56, %v16381_v3  ;;  %v16384_v38 = vpop.f32.mrb[250].mxu1 }
 0x5d0   :  { %v16385_v0 = vpop.f32.mrb[251].mxu1 }
 0x5d1   :  { %v3452_v43 = vadd.f32 %v16289_v7, %v21160_v4  ;;  %v21243_v4 = vadd.f32 %v16385_v0, %v16384_v38  ;;  %v16476_v22 = vpop.f32.mrb[252].mxu1 }
 0x5d2   :  { %16394 = vmatpush3.bf16.msra.mxu0 %v21060_v36  ;;  %v16477_v36 = vpop.f32.mrb[253].mxu1 }
 0x5d3   :  { %v3490_v11 = vpack.c.bf16 %v3452_v43, %v3449_v13  ;;  %v16290_v5 = vpop.f32.mrb[164].mxu0  ;;  %16395 = vmatprep.subr.bf16.mxu0 %v21067_v46  ;;  %v21248_v46 = vadd.f32 %v16477_v36, %v16476_v22  ;;  %v16479_v48 = vpop.f32.mrb[254].mxu1  ;;  %v4033_v43 = vld [vmem:[#allocation8 + $0xc] sm:$0x3] }
 0x5d4   :  { %v16291_v35 = vpop.f32.mrb[165].mxu0  ;;  %v16480_v55 = vpop.f32.mrb[255].mxu1 }
 0x5d5   :  { %v16292_v51 = vadd.f32 %v16291_v35, %v16290_v5  ;;  %v16293_v34 = vpop.f32.mrb[166].mxu0  ;;  %17113 = vmatmul.mubr.msk.bf16.gmra.mrb[72].mxu0 %vm1239_vm1, %v3490_v11  ;;  %v21251_v57 = vadd.f32 %v16480_v55, %v16479_v48  ;;  %v16482_v32 = vpop.f32.mrb[0].mxu1 }
 0x5d6   :  { %v16294_v10 = vpop.f32.mrb[167].mxu0  ;;  %16396 = vmatpush3.bf16.msra.mxu0 %v21075_v18  ;;  %v16483_v16 = vpop.f32.mrb[1].mxu1 }
 0x5d7   :  { %v3457_v53 = vadd.f32 %v16292_v51, %v21162_v30  ;;  %v16295_v1 = vadd.f32 %v16294_v10, %v16293_v34  ;;  %16397 = vmatprep.subr.bf16.mxu0 %v21083_v33  ;;  %v21255_v30 = vadd.f32 %v16483_v16, %v16482_v32  ;;  %v16485_v9 = vpop.f32.mrb[2].mxu1 }
 0x5d8   :  { %v16486_v50 = vpop.f32.mrb[3].mxu1 }
 0x5d9   :  { %v3460_v27 = vadd.f32 %v16295_v1, %v21164_v54  ;;  %v21258_v54 = vadd.f32 %v16486_v50, %v16485_v9  ;;  %v16488_v62 = vpop.f32.mrb[4].mxu1  ;;  %v18265_v9 = vld [vmem:[#allocation3 + $0x60c] ss:$16 sps:$4 sm:$0xff]   ;;  %v4059_v50 = vsel %vm1264_vm0, %v4033_v43, 0 }
 0x5da   :  { %16398 = vmatpush3.bf16.msra.mxu0 %v21090_v26  ;;  %v16489_v26 = vpop.f32.mrb[5].mxu1 }
 0x5db   :  { %v3491_v6 = vpack.c.bf16 %v3460_v27, %v3457_v53  ;;  %v16296_v18 = vpop.f32.mrb[168].mxu0  ;;  %16399 = vmatprep.subr.bf16.mxu0 %v21096_v40  ;;  %v21263_v40 = vadd.f32 %v16489_v26, %v16488_v62  ;;  %v16491_v47 = vpop.f32.mrb[6].mxu1  ;;  %v18281_v62 = vld [vmem:[#allocation3 + $0x66c] ss:$16 sps:$4 sm:$0xff]  }
 0x5dc   :  { %v16297_v33 = vpop.f32.mrb[169].mxu0  ;;  %v16492_v17 = vpop.f32.mrb[7].mxu1 }
 0x5dd   :  { %v16298_v8 = vadd.f32 %v16297_v33, %v16296_v18  ;;  %v16299_v42 = vpop.f32.mrb[170].mxu0  ;;  %17116 = vmatprep.mubr.msk.bf16.mxu0 %vm1239_vm1, %v3491_v6  ;;  %v21266_v56 = vadd.f32 %v16492_v17, %v16491_v47  ;;  %v16494_v11 = vpop.f32.mrb[8].mxu1  ;;  %v18284_v17 = vld [vmem:[#allocation3 + $0x68c] ss:$16 sps:$4 sm:$0xff]  }
 0x5de   :  { %v16300_v49 = vpop.f32.mrb[171].mxu0  ;;  %16400 = vmatpush3.bf16.msra.mxu0 %v21103_v24  ;;  %v16495_v5 = vpop.f32.mrb[9].mxu1 }
 0x5df   :  { %v3465_v13 = vadd.f32 %v16298_v8, %v21166_v29  ;;  %v16301_v7 = vadd.f32 %v16300_v49, %v16299_v42  ;;  %16401 = vmatprep.subr.bf16.mxu0 %v21110_v2  ;;  %v21269_v35 = vadd.f32 %v16495_v5, %v16494_v11  ;;  %v16497_v29 = vpop.f32.mrb[10].mxu1  ;;  %v18271_v8 = vld [vmem:[#allocation3 + $0x628] ss:$16 sps:$4 sm:$0xff]   ;;  %v18275_v42 = vld [vmem:[#allocation3 + $0x64c] ss:$16 sps:$4 sm:$0xff]  }
 0x5e0   :  { %v16498_v0 = vpop.f32.mrb[11].mxu1 }
 0x5e1   :  { %v3468_v3 = vadd.f32 %v16301_v7, %v21169_v20  ;;  %v21273_v20 = vadd.f32 %v16498_v0, %v16497_v29  ;;  %v18283_v7 = vld [vmem:[#allocation3 + $0x668] ss:$16 sps:$4 sm:$0xff]  }
 0x5e2   :  { %16402 = vmatpush3.bf16.msra.mxu0 %v21117_v41 }
 0x5e3   :  { %v3492_v24 = vpack.c.bf16 %v3468_v3, %v3465_v13  ;;  %v16302_v38 = vpop.f32.mrb[172].mxu0  ;;  %17854 = vmatprep.subr.msk.bf16.mxu0 %vm1264_vm0, %v4033_v43 }
 0x5e4   :  { %v16303_v2 = vpop.f32.mrb[173].mxu0 }
 0x5e5   :  { %v16304_v51 = vadd.f32 %v16303_v2, %v16302_v38  ;;  %v16305_v34 = vpop.f32.mrb[174].mxu0  ;;  %17117 = vmatmul.mubr.msk.bf16.gmra.mrb[76].mxu0 %vm1239_vm1, %v3492_v24  ;;  %v18286_v38 = vld [vmem:[#allocation3 + $0x688] ss:$16 sps:$4 sm:$0xff]   ;;  %v18287_v2 = vld [vmem:[#allocation3 + $0x6ac] ss:$16 sps:$4 sm:$0xff]  }
 0x5e6   :  { %v16306_v22 = vpop.f32.mrb[175].mxu0 }
 0x5e7   :  { %v3473_v10 = vadd.f32 %v16304_v51, %v21174_v15  ;;  %v16307_v41 = vadd.f32 %v16306_v22, %v16305_v34  ;;  %v18263_v15 = vld [vmem:[#allocation3 + $0x608] ss:$16 sps:$4 sm:$0xff]  }
 0x5e9   :  { %v3476_v36 = vadd.f32 %v16307_v41, %v21177_v25  ;;  %v18269_v25 = vld [vmem:[#allocation3 + $0x62c] ss:$16 sps:$4 sm:$0xff]   ;;  %v18289_v41 = vld [vmem:[#allocation3 + $0x6a8] ss:$16 sps:$4 sm:$0xff]  }
 0x5eb   :  { %v3493_v53 = vpack.c.bf16 %v3476_v36, %v3473_v10  ;;  %v16308_v1 = vpop.f32.mrb[176].mxu0 }
 0x5ec   :  { %v16309_v48 = vpop.f32.mrb[177].mxu0 }
 0x5ed   :  { %v16310_v55 = vadd.f32 %v16309_v48, %v16308_v1  ;;  %v16311_v27 = vpop.f32.mrb[178].mxu0  ;;  %17120 = vmatprep.mubr.msk.bf16.mxu0 %vm1239_vm1, %v3493_v53  ;;  %v18290_v53 = vld [vmem:[#allocation3 + $0x6cc] ss:$16 sps:$4 sm:$0xff]  }
 0x5ee   :  { %v16312_v32 = vpop.f32.mrb[179].mxu0 }
 0x5ef   :  { %v3481_v16 = vadd.f32 %v16310_v55, %v21182_v37  ;;  %v16313_v6 = vadd.f32 %v16312_v32, %v16311_v27  ;;  %v18277_v37 = vld [vmem:[#allocation3 + $0x648] ss:$16 sps:$4 sm:$0xff]  }
 0x5f1   :  { %v3484_v18 = vadd.f32 %v16313_v6, %v21185_v60  ;;  %v16500_v60 = vpop.f32.mrb[12].mxu1 }
 0x5f2   :  { %v16501_v49 = vpop.f32.mrb[13].mxu1 }
 0x5f3   :  { %v3494_v33 = vpack.c.bf16 %v3484_v18, %v3481_v16  ;;  %v21282_v26 = vadd.f32 %v16501_v49, %v16500_v60  ;;  %v16503_v13 = vpop.f32.mrb[14].mxu1  ;;  %v18292_v16 = vld [vmem:[#allocation3 + $0x6c8] ss:$16 sps:$4 sm:$0xff]   ;;  %v18293_v18 = vld [vmem:[#allocation3 + $0x6ec] ss:$16 sps:$4 sm:$0xff]  }
 0x5f4   :  { %v16504_v47 = vpop.f32.mrb[15].mxu1 }
 0x5f5   :  { %17121 = vmatmul.mubr.msk.bf16.gmra.mrb[80].mxu0 %vm1239_vm1, %v3494_v33  ;;  %v21284_v43 = vadd.f32 %v16504_v47, %v16503_v13  ;;  %v16506_v3 = vpop.f32.mrb[16].mxu1 }
 0x5f6   :  { %3959 = vmatprep.mubr.bf16.mxu0 %v18265_v9  ;;  %v16507_v11 = vpop.f32.mrb[17].mxu1 }
 0x5f7   :  { %v21286_v5 = vadd.f32 %v16507_v11, %v16506_v3  ;;  %v16509_v24 = vpop.f32.mrb[18].mxu1 }
 0x5f8   :  { %v16510_v29 = vpop.f32.mrb[19].mxu1 }
 0x5f9   :  { %v21288_v0 = vadd.f32 %v16510_v29, %v16509_v24  ;;  %v16512_v51 = vpop.f32.mrb[20].mxu1 }
 0x5fa   :  { %v16513_v34 = vpop.f32.mrb[21].mxu1 }
 0x5fb   :  { %v21290_v22 = vadd.f32 %v16513_v34, %v16512_v51  ;;  %v16515_v10 = vpop.f32.mrb[22].mxu1 }
 0x5fc   :  { %v16516_v36 = vpop.f32.mrb[23].mxu1 }
 0x5fd   :  { %3960 = vmatmul.mubr.bf16.vlgmr.msra.gmra.mrb[180].mxu0 %v18263_v15  ;;  %v21292_v1 = vadd.f32 %v16516_v36, %v16515_v10  ;;  %v16518_v48 = vpop.f32.mrb[24].mxu1 }
 0x5fe   :  { %3967 = vmatprep.mubr.bf16.mxu0 %v18269_v25  ;;  %17125 = vmatpush3.bf16.msra.mxu0 %v4059_v50  ;;  %v16519_v55 = vpop.f32.mrb[25].mxu1 }
 0x5ff   :  { %v21294_v27 = vadd.f32 %v16519_v55, %v16518_v48  ;;  %v16521_v32 = vpop.f32.mrb[26].mxu1 }
 0x600   :  { %v16522_v6 = vpop.f32.mrb[27].mxu1 }
 0x601   :  { %v21296_v9 = vadd.f32 %v16522_v6, %v16521_v32  ;;  %v16540_v33 = vpop.f32.mrb[28].mxu1 }
 0x602   :  { %v16541_v15 = vpop.f32.mrb[29].mxu1 }
 0x603   :  { %v16542_v25 = vadd.f32 %v16541_v15, %v16540_v33  ;;  %v16543_v50 = vpop.f32.mrb[30].mxu1 }
 0x605   :  { %3968 = vmatmul.mubr.bf16.gmra.mrb[184].mxu0 %v18271_v8  ;;  %v18295_v8 = vld [vmem:[#allocation3 + $0x6e8] ss:$16 sps:$4 sm:$0xff]  }
 0x606   :  { %3975 = vmatprep.mubr.bf16.mxu0 %v18275_v42  ;;  %v16544_v42 = vpop.f32.mrb[31].mxu1 }
 0x607   :  { %v16546_v13 = vpop.f32.mrb[32].mxu1 }
 0x60d   :  { %3976 = vmatmul.mubr.bf16.gmra.mrb[188].mxu0 %v18277_v37  ;;  %v21299_v37 = vadd.f32 %v16542_v25, %v21248_v46 }
 0x60e   :  { %3983 = vmatprep.mubr.bf16.mxu0 %v18281_v62  ;;  %v16545_v62 = vadd.f32 %v16544_v42, %v16543_v50 }
 0x610   :  { %v21302_v60 = vadd.f32 %v16545_v62, %v21251_v57 }
 0x612   :  { %v4561_v49 = vpack.c.bf16 %v21302_v60, %v21299_v37  ;;  %v19481_v37 = vld [vmem:[%s22100_s0 + $0x10] sm:$0xff]   ;;  %v19482_v60 = vld [vmem:[%s22100_s0 + $0x58] sm:$0xff]  }
 0x615   :  { %3984 = vmatmul.mubr.bf16.gmra.mrb[192].mxu0 %v18283_v7  ;;  %v16547_v7 = vpop.f32.mrb[33].mxu1 }
 0x616   :  { %3991 = vmatprep.mubr.bf16.mxu0 %v18284_v17  ;;  %v16548_v47 = vadd.f32 %v16547_v7, %v16546_v13  ;;  %v16549_v17 = vpop.f32.mrb[34].mxu1 }
 0x617   :  { %v16550_v3 = vpop.f32.mrb[35].mxu1 }
 0x618   :  { %v21307_v11 = vadd.f32 %v16548_v47, %v21255_v30  ;;  %v16551_v24 = vadd.f32 %v16550_v3, %v16549_v17 }
 0x61a   :  { %v21310_v46 = vadd.f32 %v16551_v24, %v21258_v54 }
 0x61c   :  { %v4562_v57 = vpack.c.bf16 %v21310_v46, %v21307_v11  ;;  %v19484_v11 = vld [vmem:[%s22100_s0 + $0x60] sm:$0xff]  }
 0x61d   :  { %3992 = vmatmul.mubr.bf16.gmra.mrb[196].mxu0 %v18286_v38  ;;  %v16552_v38 = vpop.f32.mrb[36].mxu1  ;;  %v19485_v46 = vld [vmem:[%s22100_s0 + $0x20] sm:$0xff]  }
 0x61e   :  { %3999 = vmatprep.mubr.bf16.mxu0 %v18287_v2  ;;  %v16553_v29 = vpop.f32.mrb[37].mxu1 }
 0x61f   :  { %v16554_v2 = vadd.f32 %v16553_v29, %v16552_v38  ;;  %v16555_v51 = vpop.f32.mrb[38].mxu1 }
 0x620   :  { %v16556_v34 = vpop.f32.mrb[39].mxu1 }
 0x621   :  { %v21315_v10 = vadd.f32 %v16554_v2, %v21263_v40  ;;  %v16558_v54 = vpop.f32.mrb[40].mxu1 }
 0x625   :  { %4000 = vmatmul.mubr.bf16.gmra.mrb[200].mxu0 %v18289_v41  ;;  %v16557_v41 = vadd.f32 %v16556_v34, %v16555_v51 }
 0x626   :  { %4007 = vmatprep.mubr.bf16.mxu0 %v18290_v53  ;;  %v16559_v53 = vpop.f32.mrb[41].mxu1 }
 0x627   :  { %v21318_v36 = vadd.f32 %v16557_v41, %v21266_v56  ;;  %v16560_v48 = vadd.f32 %v16559_v53, %v16558_v54  ;;  %v16561_v55 = vpop.f32.mrb[42].mxu1 }
 0x628   :  { %v16562_v32 = vpop.f32.mrb[43].mxu1 }
 0x629   :  { %v4563_v30 = vpack.c.bf16 %v21318_v36, %v21315_v10  ;;  %v16563_v6 = vadd.f32 %v16562_v32, %v16561_v55  ;;  %v16564_v56 = vpop.f32.mrb[44].mxu1  ;;  %v19487_v10 = vld [vmem:[%s22100_s0 + $0x28] sm:$0xff]   ;;  %v18301_v36 = vld [vmem:[#allocation3 + $0x804] ss:$16 sps:$4 sm:$0xff]  }
 0x62a   :  { %v16565_v33 = vpop.f32.mrb[45].mxu1 }
 0x62b   :  { %v16566_v15 = vadd.f32 %v16565_v33, %v16564_v56  ;;  %v16567_v25 = vpop.f32.mrb[46].mxu1 }
 0x62c   :  { %v16568_v50 = vpop.f32.mrb[47].mxu1 }
 0x62d   :  { %4008 = vmatmul.mubr.bf16.gmra.mrb[204].mxu0 %v18292_v16  ;;  %v21323_v16 = vadd.f32 %v16560_v48, %v21269_v35  ;;  %v16569_v42 = vadd.f32 %v16568_v50, %v16567_v25  ;;  %v18296_v25 = vld [vmem:[#allocation3 + $0x808] ss:$16 sps:$4 sm:$0xff]   ;;  %v18298_v50 = vld [vmem:[#allocation3 + $0x80c] ss:$16 sps:$4 sm:$0xff]  }
 0x62e   :  { %4015 = vmatprep.mubr.bf16.mxu0 %v18293_v18  ;;  %v21326_v18 = vadd.f32 %v16563_v6, %v21273_v20  ;;  %v16570_v20 = vpop.f32.mrb[48].mxu1  ;;  %5033 = vmatprep.mubr.bf16.mxu1 %v18298_v50 }
 0x62f   :  { %v21334_v62 = vadd.f32 %v16569_v42, %v21284_v43  ;;  %v16571_v13 = vpop.f32.mrb[49].mxu1  ;;  %5034 = vmatmul.mubr.bf16.vlgmr.msra.gmra.mrb[60].mxu1 %v18296_v25  ;;  %v18304_v42 = vld [vmem:[#allocation3 + $0x82c] ss:$16 sps:$4 sm:$0xff]  }
 0x630   :  { %v4564_v40 = vpack.c.bf16 %v21326_v18, %v21323_v16  ;;  %v16572_v7 = vadd.f32 %v16571_v13, %v16570_v20  ;;  %v16573_v47 = vpop.f32.mrb[50].mxu1  ;;  %v18302_v20 = vld [vmem:[#allocation3 + $0x828] ss:$16 sps:$4 sm:$0xff]   ;;  %5041 = vmatprep.mubr.bf16.mxu1 %v18304_v42  ;;  %v18328_v25 = vld [vmem:[#allocation3 + $0x8ac] ss:$16 sps:$4 sm:$0xff]   ;;  %v19489_v16 = vld [vmem:[%s22100_s0 + $0x30] sm:$0xff]  }
 0x631   :  { %v16574_v17 = vpop.f32.mrb[51].mxu1  ;;  %v18308_v13 = vld [vmem:[#allocation3 + $0x848] ss:$16 sps:$4 sm:$0xff]  }
 0x632   :  { %v21339_v3 = vadd.f32 %v16572_v7, %v21286_v5  ;;  %v16575_v24 = vadd.f32 %v16574_v17, %v16573_v47  ;;  %v16576_v43 = vpop.f32.mrb[52].mxu1  ;;  %v18314_v7 = vld [vmem:[#allocation3 + $0x868] ss:$16 sps:$4 sm:$0xff]  }
 0x633   :  { %v16577_v29 = vpop.f32.mrb[53].mxu1  ;;  %v18326_v42 = vld [vmem:[#allocation3 + $0x8a8] ss:$16 sps:$4 sm:$0xff]  }
 0x634   :  { %v21342_v38 = vadd.f32 %v16575_v24, %v21288_v0  ;;  %v16578_v2 = vadd.f32 %v16577_v29, %v16576_v43  ;;  %v16579_v51 = vpop.f32.mrb[54].mxu1  ;;  %v18322_v29 = vld [vmem:[#allocation3 + $0x88c] ss:$16 sps:$4 sm:$0xff]  }
 0x635   :  { %4016 = vmatmul.mubr.bf16.gmra.mrb[208].mxu0 %v18295_v8  ;;  %v21331_v8 = vadd.f32 %v16566_v15, %v21282_v26  ;;  %v16580_v34 = vpop.f32.mrb[55].mxu1  ;;  %v19490_v18 = vld [vmem:[%s22100_s0 + $0x78] sm:$0xff]  }
 0x636   :  { %v4566_v26 = vpack.c.bf16 %v21342_v38, %v21339_v3  ;;  %v21347_v41 = vadd.f32 %v16578_v2, %v21290_v22  ;;  %v16581_v54 = vadd.f32 %v16580_v34, %v16579_v51  ;;  %v16582_v0 = vpop.f32.mrb[56].mxu1  ;;  %v18320_v51 = vld [vmem:[#allocation3 + $0x888] ss:$16 sps:$4 sm:$0xff]   ;;  %v18307_v38 = vld [vmem:[#allocation3 + $0x820] ss:$16 sps:$4 sm:$0xff]  }
 0x637   :  { %v4565_v35 = vpack.c.bf16 %v21334_v62, %v21331_v8  ;;  %v16583_v48 = vpop.f32.mrb[57].mxu1  ;;  %5042 = vmatmul.mubr.bf16.gmra.mrb[64].mxu1 %v18302_v20  ;;  %v18299_v8 = vld [vmem:[#allocation3 + $0x800] ss:$16 sps:$4 sm:$0xff]   ;;  %v19491_v62 = vld [vmem:[%s22100_s0 + $0x38] sm:$0xff]  }
 0x638   :  { %v21350_v53 = vadd.f32 %v16581_v54, %v21292_v1  ;;  %v16584_v55 = vadd.f32 %v16583_v48, %v16582_v0  ;;  %v16585_v32 = vpop.f32.mrb[58].mxu1  ;;  %v4570_v1 = vld [vmem:[#allocation8 + $0xe] sm:$0x3] }
 0x639   :  { %v16586_v6 = vpop.f32.mrb[59].mxu1  ;;  %17855 = vmatprep.subr.msk.bf16.mxu0 %vm1264_vm0, %v4570_v1 }
 0x63a   :  { %v4567_v5 = vpack.c.bf16 %v21350_v53, %v21347_v41  ;;  %v21355_v56 = vadd.f32 %v16584_v55, %v21294_v27  ;;  %v16587_v33 = vadd.f32 %v16586_v6, %v16585_v32  ;;  %v18310_v27 = vld [vmem:[#allocation3 + $0x84c] ss:$16 sps:$4 sm:$0xff]   ;;  %v18313_v41 = vld [vmem:[#allocation3 + $0x840] ss:$16 sps:$4 sm:$0xff]   ;;  %v18317_v53 = vld [vmem:[#allocation3 + $0x864] ss:$16 sps:$4 sm:$0xff]  }
 0x63b   :  { %5049 = vmatprep.mubr.bf16.mxu1 %v18310_v27 }
 0x63c   :  { %v21358_v15 = vadd.f32 %v16587_v33, %v21296_v9  ;;  %v18316_v9 = vld [vmem:[#allocation3 + $0x86c] ss:$16 sps:$4 sm:$0xff]  }
 0x63e   :  { %v4568_v22 = vpack.c.bf16 %v21358_v15, %v21355_v56  ;;  %v18323_v56 = vld [vmem:[#allocation3 + $0x884] ss:$16 sps:$4 sm:$0xff]   ;;  %v18325_v15 = vld [vmem:[#allocation3 + $0x880] ss:$16 sps:$4 sm:$0xff]  }
 0x63f   :  { %5050 = vmatmul.mubr.bf16.gmra.mrb[68].mxu1 %v18308_v13 }
 0x640   :  { %5057 = vmatprep.mubr.bf16.mxu1 %v18316_v9  ;;  %v4596_v9 = vsel %vm1264_vm0, %v4570_v1, 0 }
 0x647   :  { %5058 = vmatmul.mubr.bf16.gmra.mrb[72].mxu1 %v18314_v7 }
 0x648   :  { %5065 = vmatprep.mubr.bf16.mxu1 %v18322_v29  ;;  %v18332_v29 = vld [vmem:[#allocation3 + $0x8c8] ss:$16 sps:$4 sm:$0xff]  }
 0x64f   :  { %5066 = vmatmul.mubr.bf16.gmra.mrb[76].mxu1 %v18320_v51 }
 0x650   :  { %5073 = vmatprep.mubr.bf16.mxu1 %v18328_v25 }
 0x657   :  { %5074 = vmatmul.mubr.bf16.gmra.mrb[80].mxu1 %v18326_v42 }
 0x6d0   :  { %v16403_v47 = vpop.f32.mrb[180].mxu0 }
 0x6d1   :  { %v16404_v17 = vpop.f32.mrb[181].mxu0 }
 0x6d2   :  { %v16405_v24 = vadd.f32 %v16404_v17, %v16403_v47  ;;  %v16406_v43 = vpop.f32.mrb[182].mxu0 }
 0x6d3   :  { %v16407_v2 = vpop.f32.mrb[183].mxu0 }
 0x6d4   :  { %v3962_v34 = vadd.f32 %v16405_v24, %v21194_v31  ;;  %v16408_v54 = vadd.f32 %v16407_v2, %v16406_v43  ;;  %v18334_v24 = vld [vmem:[#allocation3 + $0x8cc] ss:$16 sps:$4 sm:$0xff]  }
 0x6d5   :  { %5081 = vmatprep.mubr.bf16.mxu1 %v18334_v24 }
 0x6d6   :  { %v3965_v0 = vadd.f32 %v16408_v54, %v21197_v28  ;;  %5082 = vmatmul.mubr.bf16.gmra.mrb[84].mxu1 %v18332_v29 }
 0x6d8   :  { %v4024_v48 = vpack.c.bf16 %v3965_v0, %v3962_v34  ;;  %v16409_v55 = vpop.f32.mrb[184].mxu0 }
 0x6d9   :  { %v16410_v32 = vpop.f32.mrb[185].mxu0 }
 0x6da   :  { %v16411_v6 = vadd.f32 %v16410_v32, %v16409_v55  ;;  %v16412_v33 = vpop.f32.mrb[186].mxu0  ;;  %17126 = vmatprep.mubr.msk.bf16.mxu0 %vm1239_vm1, %v4024_v48  ;;  %v18340_v55 = vld [vmem:[#allocation3 + $0x8ec] ss:$16 sps:$4 sm:$0xff]  }
 0x6db   :  { %v16413_v50 = vpop.f32.mrb[187].mxu0  ;;  %5089 = vmatprep.mubr.bf16.mxu1 %v18340_v55 }
 0x6dc   :  { %v3970_v20 = vadd.f32 %v16411_v6, %v21199_v23  ;;  %v16414_v27 = vadd.f32 %v16413_v50, %v16412_v33 }
 0x6de   :  { %v3973_v31 = vadd.f32 %v16414_v27, %v21202_v45  ;;  %v19476_v45 = vld [vmem:[%s22100_s0 + $0x40] sm:$0xff]  }
 0x6e0   :  { %v4025_v13 = vpack.c.bf16 %v3973_v31, %v3970_v20  ;;  %v16415_v28 = vpop.f32.mrb[188].mxu0 }
 0x6e1   :  { %v16416_v7 = vpop.f32.mrb[189].mxu0 }
 0x6e2   :  { %v16417_v47 = vadd.f32 %v16416_v7, %v16415_v28  ;;  %v16418_v17 = vpop.f32.mrb[190].mxu0  ;;  %17127 = vmatmul.mubr.msk.bf16.vlgmr.msra.gmra.mrb[68].mxu0 %vm1239_vm1, %v4025_v13 }
 0x6e3   :  { %v16419_v43 = vpop.f32.mrb[191].mxu0  ;;  %17143 = vmatpush3.bf16.msra.mxu0 %v4596_v9 }
 0x6e4   :  { %v3978_v23 = vadd.f32 %v16417_v47, %v21205_v52  ;;  %v16420_v2 = vadd.f32 %v16419_v43, %v16418_v17  ;;  %16597 = vmatprep.subr.bf16.mxu0 %v19476_v45  ;;  %v18338_v52 = vld [vmem:[#allocation3 + $0x8e8] ss:$16 sps:$4 sm:$0xff]  }
 0x6e5   :  { %5090 = vmatmul.mubr.bf16.gmra.mrb[88].mxu1 %v18338_v52 }
 0x6e6   :  { %v3981_v1 = vadd.f32 %v16420_v2, %v21208_v39 }
 0x6e8   :  { %v4026_v51 = vpack.c.bf16 %v3981_v1, %v3978_v23  ;;  %v16421_v34 = vpop.f32.mrb[192].mxu0 }
 0x6e9   :  { %v16422_v54 = vpop.f32.mrb[193].mxu0 }
 0x6ea   :  { %v16423_v0 = vadd.f32 %v16422_v54, %v16421_v34  ;;  %v16424_v48 = vpop.f32.mrb[194].mxu0  ;;  %17130 = vmatprep.mubr.msk.bf16.mxu0 %vm1239_vm1, %v4026_v51 }
 0x6eb   :  { %v16425_v32 = vpop.f32.mrb[195].mxu0 }
 0x6ec   :  { %v3986_v6 = vadd.f32 %v16423_v0, %v21210_v58  ;;  %v16426_v33 = vadd.f32 %v16425_v32, %v16424_v48 }
 0x6ee   :  { %v3989_v25 = vadd.f32 %v16426_v33, %v21213_v63 }
 0x6f0   :  { %v4027_v50 = vpack.c.bf16 %v3989_v25, %v3986_v6  ;;  %v16427_v39 = vpop.f32.mrb[196].mxu0 }
 0x6f1   :  { %v16428_v42 = vpop.f32.mrb[197].mxu0 }
 0x6f2   :  { %v16429_v20 = vadd.f32 %v16428_v42, %v16427_v39  ;;  %v16430_v27 = vpop.f32.mrb[198].mxu0  ;;  %17131 = vmatmul.mubr.msk.bf16.gmra.mrb[72].mxu0 %vm1239_vm1, %v4027_v50  ;;  %v18331_v39 = vld [vmem:[#allocation3 + $0x8a0] ss:$16 sps:$4 sm:$0xff]   ;;  %v18335_v42 = vld [vmem:[#allocation3 + $0x8c4] ss:$16 sps:$4 sm:$0xff]  }
 0x6f3   :  { %v16431_v31 = vpop.f32.mrb[199].mxu0 }
 0x6f4   :  { %v3994_v13 = vadd.f32 %v16429_v20, %v21218_v61  ;;  %v16432_v28 = vadd.f32 %v16431_v31, %v16430_v27  ;;  %v18337_v20 = vld [vmem:[#allocation3 + $0x8c0] ss:$16 sps:$4 sm:$0xff]   ;;  %v18341_v27 = vld [vmem:[#allocation3 + $0x8e4] ss:$16 sps:$4 sm:$0xff]  }
 0x6f5   :  { %v18343_v31 = vld [vmem:[#allocation3 + $0x8e0] ss:$16 sps:$4 sm:$0xff]  }
 0x6f6   :  { %v3997_v9 = vadd.f32 %v16432_v28, %v21221_v12 }
 0x6f8   :  { %v4028_v7 = vpack.c.bf16 %v3997_v9, %v3994_v13  ;;  %v16433_v58 = vpop.f32.mrb[200].mxu0 }
 0x6f9   :  { %v16434_v47 = vpop.f32.mrb[201].mxu0 }
 0x6fa   :  { %v16435_v17 = vadd.f32 %v16434_v47, %v16433_v58  ;;  %v16436_v24 = vpop.f32.mrb[202].mxu0  ;;  %17134 = vmatprep.mubr.msk.bf16.mxu0 %vm1239_vm1, %v4028_v7 }
 0x6fb   :  { %v16437_v63 = vpop.f32.mrb[203].mxu0 }
 0x6fc   :  { %v4002_v43 = vadd.f32 %v16435_v17, %v21225_v14  ;;  %v16438_v29 = vadd.f32 %v16437_v63, %v16436_v24 }
 0x6fe   :  { %v4005_v23 = vadd.f32 %v16438_v29, %v21228_v44 }
 0x700   :  { %v4029_v2 = vpack.c.bf16 %v4005_v23, %v4002_v43  ;;  %v16439_v45 = vpop.f32.mrb[204].mxu0 }
 0x701   :  { %v16440_v1 = vpop.f32.mrb[205].mxu0 }
 0x702   :  { %v16441_v61 = vadd.f32 %v16440_v1, %v16439_v45  ;;  %v16442_v51 = vpop.f32.mrb[206].mxu0  ;;  %17135 = vmatmul.mubr.msk.bf16.gmra.mrb[76].mxu0 %vm1239_vm1, %v4029_v2  ;;  %v16677_v13 = vpop.f32.mrb[60].mxu1 }
 0x703   :  { %v16443_v12 = vpop.f32.mrb[207].mxu0  ;;  %v16678_v28 = vpop.f32.mrb[61].mxu1 }
 0x704   :  { %v4010_v34 = vadd.f32 %v16441_v61, %v21233_v19  ;;  %v16444_v54 = vadd.f32 %v16443_v12, %v16442_v51  ;;  %v19477_v19 = vld [vmem:[%s22100_s0] sm:$0xff]   ;;  %v16679_v9 = vadd.f32 %v16678_v28, %v16677_v13  ;;  %v16680_v7 = vpop.f32.mrb[62].mxu1 }
 0x705   :  { %v16681_v58 = vpop.f32.mrb[63].mxu1 }
 0x706   :  { %v4013_v0 = vadd.f32 %v16444_v54, %v21236_v59  ;;  %v19478_v59 = vld [vmem:[%s22100_s0 + $0x48] sm:$0xff]   ;;  %v16682_v47 = vadd.f32 %v16681_v58, %v16680_v7 }
 0x708   :  { %v4030_v48 = vpack.c.bf16 %v4013_v0, %v4010_v34  ;;  %v16445_v55 = vpop.f32.mrb[208].mxu0 }
 0x709   :  { %v16446_v32 = vpop.f32.mrb[209].mxu0 }
 0x70a   :  { %v16447_v14 = vadd.f32 %v16446_v32, %v16445_v55  ;;  %v16448_v52 = vpop.f32.mrb[210].mxu0  ;;  %17138 = vmatprep.mubr.msk.bf16.mxu0 %vm1239_vm1, %v4030_v48  ;;  %v16683_v17 = vpop.f32.mrb[64].mxu1 }
 0x70b   :  { %v16449_v44 = vpop.f32.mrb[211].mxu0  ;;  %v16684_v24 = vpop.f32.mrb[65].mxu1 }
 0x70c   :  { %v4018_v6 = vadd.f32 %v16447_v14, %v21240_v21  ;;  %v16450_v33 = vadd.f32 %v16449_v44, %v16448_v52  ;;  %v19479_v21 = vld [vmem:[%s22100_s0 + $0x8] sm:$0xff]   ;;  %v16685_v63 = vadd.f32 %v16684_v24, %v16683_v17  ;;  %v16686_v43 = vpop.f32.mrb[66].mxu1 }
 0x70d   :  { %v16687_v29 = vpop.f32.mrb[67].mxu1 }
 0x70e   :  { %v4021_v25 = vadd.f32 %v16450_v33, %v21243_v4  ;;  %v19480_v4 = vld [vmem:[%s22100_s0 + $0x50] sm:$0xff]   ;;  %v16688_v23 = vadd.f32 %v16687_v29, %v16686_v43 }
 0x710   :  { %v4031_v50 = vpack.c.bf16 %v4021_v25, %v4018_v6 }
 0x712   :  { %17139 = vmatmul.mubr.msk.bf16.gmra.mrb[80].mxu0 %vm1239_vm1, %v4031_v50  ;;  %v16689_v2 = vpop.f32.mrb[68].mxu1 }
 0x713   :  { %17144 = vmatprep.mubr.msk.bf16.mxu0 %vm1239_vm1, %v4561_v49  ;;  %v19483_v49 = vld [vmem:[%s22100_s0 + $0x18] sm:$0xff]   ;;  %v16690_v45 = vpop.f32.mrb[69].mxu1 }
 0x714   :  { %v16691_v1 = vadd.f32 %v16690_v45, %v16689_v2  ;;  %v16692_v61 = vpop.f32.mrb[70].mxu1 }
 0x715   :  { %v16693_v51 = vpop.f32.mrb[71].mxu1 }
 0x716   :  { %v16694_v12 = vadd.f32 %v16693_v51, %v16692_v61 }
 0x71a   :  { %17145 = vmatmul.mubr.msk.bf16.vlgmr.msra.gmra.mrb[68].mxu0 %vm1239_vm1, %v4562_v57  ;;  %v19486_v57 = vld [vmem:[%s22100_s0 + $0x68] sm:$0xff]   ;;  %v16695_v34 = vpop.f32.mrb[72].mxu1 }
 0x71b   :  { %17148 = vmatprep.mubr.msk.bf16.mxu0 %vm1239_vm1, %v4563_v30  ;;  %16598 = vmatpush3.bf16.msra.mxu0 %v19477_v19  ;;  %v19488_v30 = vld [vmem:[%s22100_s0 + $0x70] sm:$0xff]   ;;  %v16696_v54 = vpop.f32.mrb[73].mxu1 }
 0x71c   :  { %16599 = vmatprep.subr.bf16.mxu0 %v19478_v59  ;;  %v21470_v0 = vadd.f32 %v16696_v54, %v16695_v34  ;;  %v16698_v48 = vpop.f32.mrb[74].mxu1 }
 0x71d   :  { %v16699_v55 = vpop.f32.mrb[75].mxu1 }
 0x71e   :  { %v16700_v32 = vadd.f32 %v16699_v55, %v16698_v48 }
 0x71f   :  { %16600 = vmatpush3.bf16.msra.mxu0 %v19479_v21 }
 0x720   :  { %16601 = vmatprep.subr.bf16.mxu0 %v19480_v4 }
 0x722   :  { %17149 = vmatmul.mubr.msk.bf16.gmra.mrb[72].mxu0 %vm1239_vm1, %v4564_v40  ;;  %v5107_v40 = vld [vmem:[#allocation8 + $0x10] sm:$0x3]  ;;  %v16701_v14 = vpop.f32.mrb[76].mxu1 }
 0x723   :  { %17152 = vmatprep.mubr.msk.bf16.mxu0 %vm1239_vm1, %v4565_v35  ;;  %16602 = vmatpush3.bf16.msra.mxu0 %v19481_v37  ;;  %v18305_v35 = vld [vmem:[#allocation3 + $0x824] ss:$16 sps:$4 sm:$0xff]   ;;  %v5133_v3 = vsel %vm1264_vm0, %v5107_v40, 0  ;;  %v16702_v52 = vpop.f32.mrb[77].mxu1 }
 0x724   :  { %16603 = vmatprep.subr.bf16.mxu0 %v19482_v60  ;;  %v21472_v44 = vadd.f32 %v16702_v52, %v16701_v14  ;;  %v16704_v6 = vpop.f32.mrb[78].mxu1 }
 0x725   :  { %v16705_v33 = vpop.f32.mrb[79].mxu1 }
 0x726   :  { %v21474_v25 = vadd.f32 %v16705_v33, %v16704_v6 }
 0x727   :  { %16604 = vmatpush3.bf16.msra.mxu0 %v19483_v49 }
 0x728   :  { %16605 = vmatprep.subr.bf16.mxu0 %v19484_v11 }
 0x72a   :  { %17153 = vmatmul.mubr.msk.bf16.gmra.mrb[76].mxu0 %vm1239_vm1, %v4566_v26  ;;  %v18311_v26 = vld [vmem:[#allocation3 + $0x844] ss:$16 sps:$4 sm:$0xff]   ;;  %v16707_v50 = vpop.f32.mrb[80].mxu1 }
 0x72b   :  { %17156 = vmatprep.mubr.msk.bf16.mxu0 %vm1239_vm1, %v4567_v5  ;;  %16606 = vmatpush3.bf16.msra.mxu0 %v19485_v46  ;;  %v18319_v5 = vld [vmem:[#allocation3 + $0x860] ss:$16 sps:$4 sm:$0xff]   ;;  %v16708_v19 = vpop.f32.mrb[81].mxu1 }
 0x72c   :  { %16607 = vmatprep.subr.bf16.mxu0 %v19486_v57  ;;  %v21476_v59 = vadd.f32 %v16708_v19, %v16707_v50  ;;  %v16710_v21 = vpop.f32.mrb[82].mxu1 }
 0x72d   :  { %v16711_v4 = vpop.f32.mrb[83].mxu1 }
 0x72e   :  { %v21478_v37 = vadd.f32 %v16711_v4, %v16710_v21 }
 0x72f   :  { %16608 = vmatpush3.bf16.msra.mxu0 %v19487_v10 }
 0x730   :  { %16609 = vmatprep.subr.bf16.mxu0 %v19488_v30 }
 0x732   :  { %17157 = vmatmul.mubr.msk.bf16.gmra.mrb[80].mxu0 %vm1239_vm1, %v4568_v22  ;;  %v18329_v22 = vld [vmem:[#allocation3 + $0x8a4] ss:$16 sps:$4 sm:$0xff]  }
 0x733   :  { %16610 = vmatpush3.bf16.msra.mxu0 %v19489_v16  ;;  %4936 = vmatprep.mubr.bf16.mxu0 %v18301_v36 }
 0x734   :  { %16611 = vmatprep.subr.bf16.mxu0 %v19490_v18 }
 0x737   :  { %16612 = vmatpush3.bf16.msra.mxu0 %v19491_v62 }
 0x738   :  { %17856 = vmatprep.subr.msk.bf16.mxu0 %vm1264_vm0, %v5107_v40 }
 0x73a   :  { %4937 = vmatmul.mubr.bf16.vlgmr.msra.gmra.mrb[212].mxu0 %v18299_v8 }
 0x73b   :  { %4944 = vmatprep.mubr.bf16.mxu0 %v18305_v35  ;;  %17161 = vmatpush3.bf16.msra.mxu0 %v5133_v3 }
 0x742   :  { %4945 = vmatmul.mubr.bf16.gmra.mrb[216].mxu0 %v18307_v38 }
 0x743   :  { %4952 = vmatprep.mubr.bf16.mxu0 %v18311_v26 }
 0x74a   :  { %4953 = vmatmul.mubr.bf16.gmra.mrb[220].mxu0 %v18313_v41 }
 0x74b   :  { %4960 = vmatprep.mubr.bf16.mxu0 %v18317_v53 }
 0x752   :  { %4961 = vmatmul.mubr.bf16.gmra.mrb[224].mxu0 %v18319_v5 }
 0x753   :  { %4968 = vmatprep.mubr.bf16.mxu0 %v18323_v56 }
 0x75a   :  { %4969 = vmatmul.mubr.bf16.gmra.mrb[228].mxu0 %v18325_v15 }
 0x75b   :  { %4976 = vmatprep.mubr.bf16.mxu0 %v18329_v22 }
 0x762   :  { %4977 = vmatmul.mubr.bf16.gmra.mrb[232].mxu0 %v18331_v39 }
 0x763   :  { %4984 = vmatprep.mubr.bf16.mxu0 %v18335_v42 }
 0x76a   :  { %4985 = vmatmul.mubr.bf16.gmra.mrb[236].mxu0 %v18337_v20 }
 0x76b   :  { %4992 = vmatprep.mubr.bf16.mxu0 %v18341_v27 }
 0x772   :  { %4993 = vmatmul.mubr.bf16.gmra.mrb[240].mxu0 %v18343_v31 }
 0x7a9   :  { %v16713_v60 = vpop.f32.mrb[84].mxu1 }
 0x7aa   :  { %v16714_v49 = vpop.f32.mrb[85].mxu1 }
 0x7ab   :  { %v21480_v11 = vadd.f32 %v16714_v49, %v16713_v60  ;;  %v16716_v46 = vpop.f32.mrb[86].mxu1 }
 0x7ac   :  { %v16717_v57 = vpop.f32.mrb[87].mxu1 }
 0x7ad   :  { %v21482_v10 = vadd.f32 %v16717_v57, %v16716_v46 }
 0x7b8   :  { %v16719_v36 = vpop.f32.mrb[88].mxu1 }
 0x7b9   :  { %v16720_v30 = vpop.f32.mrb[89].mxu1 }
 0x7ba   :  { %v21484_v16 = vadd.f32 %v16720_v30, %v16719_v36  ;;  %v16722_v18 = vpop.f32.mrb[90].mxu1 }
 0x7bb   :  { %v16723_v40 = vpop.f32.mrb[91].mxu1 }
 0x7bc   :  { %v21486_v8 = vadd.f32 %v16723_v40, %v16722_v18 }
 0x80d   :  { %v16613_v62 = vpop.f32.mrb[212].mxu0 }
 0x80e   :  { %v16614_v35 = vpop.f32.mrb[213].mxu0 }
 0x80f   :  { %v16615_v3 = vadd.f32 %v16614_v35, %v16613_v62  ;;  %v16616_v38 = vpop.f32.mrb[214].mxu0 }
 0x810   :  { %v16617_v26 = vpop.f32.mrb[215].mxu0 }
 0x811   :  { %v5036_v41 = vadd.f32 %v16679_v9, %v16615_v3  ;;  %v16618_v53 = vadd.f32 %v16617_v26, %v16616_v38 }
 0x813   :  { %v5039_v5 = vadd.f32 %v16682_v47, %v16618_v53 }
 0x815   :  { %v5098_v56 = vpack.c.bf16 %v5039_v5, %v5036_v41  ;;  %v16619_v15 = vpop.f32.mrb[216].mxu0 }
 0x816   :  { %v16620_v22 = vpop.f32.mrb[217].mxu0 }
 0x817   :  { %v16621_v39 = vadd.f32 %v16620_v22, %v16619_v15  ;;  %v16622_v42 = vpop.f32.mrb[218].mxu0  ;;  %17162 = vmatprep.mubr.msk.bf16.mxu0 %vm1239_vm1, %v5098_v56 }
 0x818   :  { %v16623_v20 = vpop.f32.mrb[219].mxu0 }
 0x819   :  { %v5044_v27 = vadd.f32 %v16685_v63, %v16621_v39  ;;  %v16624_v31 = vadd.f32 %v16623_v20, %v16622_v42  ;;  %v18346_v42 = vld [vmem:[#allocation5] sm:$0xff]  }
 0x81a   :  { %17194 = vmatprep.mubr.bf16.mxu1 %v18346_v42  ;;  %v18351_v42 = vld [vmem:[#allocation5 + $0x48] sm:$0xff]  }
 0x81b   :  { %v5047_v13 = vadd.f32 %v16688_v23, %v16624_v31 }
 0x81d   :  { %v5099_v28 = vpack.c.bf16 %v5047_v13, %v5044_v27  ;;  %v16625_v7 = vpop.f32.mrb[220].mxu0 }
 0x81e   :  { %v16626_v58 = vpop.f32.mrb[221].mxu0 }
 0x81f   :  { %v16627_v17 = vadd.f32 %v16626_v58, %v16625_v7  ;;  %v16628_v24 = vpop.f32.mrb[222].mxu0  ;;  %17163 = vmatmul.mubr.msk.bf16.vlgmr.msra.gmra.mrb[68].mxu0 %vm1239_vm1, %v5099_v28 }
 0x820   :  { %v16629_v9 = vpop.f32.mrb[223].mxu0 }
 0x821   :  { %v5052_v47 = vadd.f32 %v16691_v1, %v16627_v17  ;;  %v16630_v43 = vadd.f32 %v16629_v9, %v16628_v24 }
 0x823   :  { %v5055_v29 = vadd.f32 %v16694_v12, %v16630_v43 }
 0x825   :  { %v5100_v2 = vpack.c.bf16 %v5055_v29, %v5052_v47  ;;  %v16631_v45 = vpop.f32.mrb[224].mxu0 }
 0x826   :  { %v16632_v61 = vpop.f32.mrb[225].mxu0 }
 0x827   :  { %v16633_v51 = vadd.f32 %v16632_v61, %v16631_v45  ;;  %v16634_v34 = vpop.f32.mrb[226].mxu0  ;;  %17166 = vmatprep.mubr.msk.bf16.mxu0 %vm1239_vm1, %v5100_v2 }
 0x828   :  { %v16635_v63 = vpop.f32.mrb[227].mxu0 }
 0x829   :  { %v5060_v23 = vadd.f32 %v21470_v0, %v16633_v51  ;;  %v16636_v54 = vadd.f32 %v16635_v63, %v16634_v34 }
 0x82b   :  { %v5063_v48 = vadd.f32 %v16700_v32, %v16636_v54 }
 0x82d   :  { %v5101_v55 = vpack.c.bf16 %v5063_v48, %v5060_v23  ;;  %v16637_v14 = vpop.f32.mrb[228].mxu0 }
 0x82e   :  { %v16638_v52 = vpop.f32.mrb[229].mxu0 }
 0x82f   :  { %v16639_v6 = vadd.f32 %v16638_v52, %v16637_v14  ;;  %v16640_v33 = vpop.f32.mrb[230].mxu0  ;;  %17167 = vmatmul.mubr.msk.bf16.gmra.mrb[72].mxu0 %vm1239_vm1, %v5101_v55 }
 0x830   :  { %v16641_v1 = vpop.f32.mrb[231].mxu0 }
 0x831   :  { %v5068_v12 = vadd.f32 %v21472_v44, %v16639_v6  ;;  %v16642_v50 = vadd.f32 %v16641_v1, %v16640_v33 }
 0x833   :  { %v5071_v19 = vadd.f32 %v21474_v25, %v16642_v50 }
 0x835   :  { %v5102_v21 = vpack.c.bf16 %v5071_v19, %v5068_v12  ;;  %v16643_v4 = vpop.f32.mrb[232].mxu0 }
 0x836   :  { %v16644_v60 = vpop.f32.mrb[233].mxu0 }
 0x837   :  { %v16645_v49 = vadd.f32 %v16644_v60, %v16643_v4  ;;  %v16646_v0 = vpop.f32.mrb[234].mxu0  ;;  %17170 = vmatprep.mubr.msk.bf16.mxu0 %vm1239_vm1, %v5102_v21 }
 0x838   :  { %v16647_v32 = vpop.f32.mrb[235].mxu0 }
 0x839   :  { %v5076_v46 = vadd.f32 %v21476_v59, %v16645_v49  ;;  %v16648_v57 = vadd.f32 %v16647_v32, %v16646_v0 }
 0x83b   :  { %v5079_v36 = vadd.f32 %v21478_v37, %v16648_v57 }
 0x83d   :  { %v5103_v30 = vpack.c.bf16 %v5079_v36, %v5076_v46  ;;  %v16649_v18 = vpop.f32.mrb[236].mxu0 }
 0x83e   :  { %v16650_v40 = vpop.f32.mrb[237].mxu0 }
 0x83f   :  { %v16651_v44 = vadd.f32 %v16650_v40, %v16649_v18  ;;  %v16652_v62 = vpop.f32.mrb[238].mxu0  ;;  %17171 = vmatmul.mubr.msk.bf16.gmra.mrb[76].mxu0 %vm1239_vm1, %v5103_v30 }
 0x840   :  { %v16653_v25 = vpop.f32.mrb[239].mxu0 }
 0x841   :  { %v5084_v35 = vadd.f32 %v21480_v11, %v16651_v44  ;;  %v16654_v3 = vadd.f32 %v16653_v25, %v16652_v62  ;;  %v18344_v11 = vld [vmem:[#allocation5 + $0x10] sm:$0xff]  }
 0x843   :  { %v5087_v38 = vadd.f32 %v21482_v10, %v16654_v3  ;;  %v21505_v10 = vld [vmem:[#allocation19] ss:$0 sm:$0xff] }
 0x845   :  { %v5104_v26 = vpack.c.bf16 %v5087_v38, %v5084_v35  ;;  %v16655_v41 = vpop.f32.mrb[240].mxu0 }
 0x846   :  { %v16656_v53 = vpop.f32.mrb[241].mxu0 }
 0x847   :  { %v16657_v59 = vadd.f32 %v16656_v53, %v16655_v41  ;;  %v16658_v5 = vpop.f32.mrb[242].mxu0  ;;  %17174 = vmatprep.mubr.msk.bf16.mxu0 %vm1239_vm1, %v5104_v26 }
 0x848   :  { %v16659_v37 = vpop.f32.mrb[243].mxu0 }
 0x849   :  { %v5092_v56 = vadd.f32 %v21484_v16, %v16657_v59  ;;  %v16660_v15 = vadd.f32 %v16659_v37, %v16658_v5  ;;  %v18345_v37 = vld [vmem:[#allocation5 + $0x18] sm:$0xff]  }
 0x84b   :  { %v5095_v22 = vadd.f32 %v21486_v8, %v16660_v15  ;;  %v18348_v15 = vld [vmem:[#allocation5 + $0x30] sm:$0xff]  }
 0x84d   :  { %v5105_v39 = vpack.c.bf16 %v5095_v22, %v5092_v56  ;;  %v18347_v56 = vld [vmem:[#allocation5 + $0x8] sm:$0xff]  }
 0x84e   :  { %v18354_v22 = vld [vmem:[#allocation10 + $0x10] sm:$0xff]  }
 0x84f   :  { %17175 = vmatmul.mubr.msk.bf16.gmra.mrb[80].mxu0 %vm1239_vm1, %v5105_v39  ;;  %v18349_v39 = vld [vmem:[#allocation5 + $0x38] sm:$0xff]  }
 0x850   :  { %17214 = vmatprep.mubr.bf16.mxu0 %v18344_v11  ;;  %v18350_v11 = vld [vmem:[#allocation5 + $0x40] sm:$0xff]  }
 0x8f2   :  { %v17164_v20 = vpop.f32.mrb[68].mxu0 }
 0x8f3   :  { %v5251_v27 = vadd.f32 %v17164_v20, %v21505_v10  ;;  %v5169_v31 = vpop.f32.mrb[69].mxu0  ;;  %v18355_v20 = vld [vmem:[#allocation10 + $0x18] sm:$0xff]  }
 0x8f4   :  { %v5249_v13 = vadd.f32 %v21505_v10, %v5169_v31  ;;  %v17165_v28 = vpop.f32.mrb[70].mxu0  ;;  %v18353_v31 = vld [vmem:[#allocation5 + $0x68] sm:$0xff]  }
 0x8f5   :  { %v5252_v16 = vadd.f32 %v17165_v28, %v21505_v10  ;;  %v5172_v7 = vpop.f32.mrb[71].mxu0  ;;  %v5267_v58 = vmax.f32 %v5251_v27, 0.0  ;;  %v18356_v27 = vld [vmem:[#allocation10] sm:$0xff]  }
 0x8f6   :  { %v5250_v8 = vadd.f32 %v21505_v10, %v5172_v7  ;;  %v5265_v24 = vmax.f32 %v5249_v13, 0.0 }
 0x8f7   :  { %v5268_v17 = vmax.f32 %v5252_v16, 0.0 }
 0x8f8   :  { %v5266_v9 = vmax.f32 %v5250_v8, 0.0 }
 0x8f9   :  { %v21511_v47 = vpack.c.bf16 %v5268_v17, %v5267_v58 }
 0x8fa   :  { %v21513_v43 = vpack.c.bf16 %v5266_v9, %v5265_v24 }
 0x8fc   :  { %17178 = vmatprep.subr.bf16.mxu1 %v21513_v43  ;;  %17198 = vmatprep.subr.bf16.mxu0 %v21513_v43 }
 0x8fd   :  { %17179 = vmatpush3.bf16.msra.mxu1 %v21513_v43  ;;  %17199 = vmatpush3.bf16.msra.mxu0 %v21513_v43 }
 0x8fe   :  { %17180 = vmatprep.subr.bf16.mxu1 %v21511_v47  ;;  %17200 = vmatprep.subr.bf16.mxu0 %v21511_v47 }
 0x901   :  { %17181 = vmatpush3.bf16.msra.mxu1 %v21511_v47  ;;  %17201 = vmatpush3.bf16.msra.mxu0 %v21511_v47 }
 0x902   :  { %v17168_v29 = vpop.f32.mrb[72].mxu0 }
 0x903   :  { %v5255_v2 = vadd.f32 %v17168_v29, %v21505_v10  ;;  %v5185_v45 = vpop.f32.mrb[73].mxu0 }
 0x904   :  { %v5253_v61 = vadd.f32 %v21505_v10, %v5185_v45  ;;  %v17169_v51 = vpop.f32.mrb[74].mxu0 }
 0x905   :  { %v5256_v34 = vadd.f32 %v17169_v51, %v21505_v10  ;;  %v5188_v63 = vpop.f32.mrb[75].mxu0  ;;  %v5271_v54 = vmax.f32 %v5255_v2, 0.0  ;;  %v18358_v51 = vld [vmem:[#allocation5 + $0x20] sm:$0xff]  }
 0x906   :  { %v5254_v23 = vadd.f32 %v21505_v10, %v5188_v63  ;;  %v5269_v55 = vmax.f32 %v5253_v61, 0.0  ;;  %v18357_v61 = vld [vmem:[#allocation10 + $0x8] sm:$0xff]  }
 0x907   :  { %v5272_v48 = vmax.f32 %v5256_v34, 0.0 }
 0x908   :  { %v5270_v14 = vmax.f32 %v5254_v23, 0.0 }
 0x909   :  { %v21527_v52 = vpack.c.bf16 %v5272_v48, %v5271_v54 }
 0x90a   :  { %v21529_v6 = vpack.c.bf16 %v5270_v14, %v5269_v55  ;;  %v18360_v14 = vld [vmem:[#allocation10 + $0x20] sm:$0xff]  }
 0x90c   :  { %17182 = vmatprep.subr.bf16.mxu1 %v21529_v6  ;;  %17202 = vmatprep.subr.bf16.mxu0 %v21529_v6 }
 0x90d   :  { %17183 = vmatpush3.bf16.msra.mxu1 %v21529_v6  ;;  %17203 = vmatpush3.bf16.msra.mxu0 %v21529_v6 }
 0x90e   :  { %17184 = vmatprep.subr.bf16.mxu1 %v21527_v52  ;;  %17204 = vmatprep.subr.bf16.mxu0 %v21527_v52 }
 0x911   :  { %17185 = vmatpush3.bf16.msra.mxu1 %v21527_v52  ;;  %17205 = vmatpush3.bf16.msra.mxu0 %v21527_v52 }
 0x912   :  { %v17172_v33 = vpop.f32.mrb[76].mxu0 }
 0x913   :  { %v5259_v1 = vadd.f32 %v17172_v33, %v21505_v10  ;;  %v5201_v12 = vpop.f32.mrb[77].mxu0  ;;  %v18359_v33 = vld [vmem:[#allocation5 + $0x28] sm:$0xff]  }
 0x914   :  { %v5257_v50 = vadd.f32 %v21505_v10, %v5201_v12  ;;  %v17173_v19 = vpop.f32.mrb[78].mxu0  ;;  %v18362_v12 = vld [vmem:[#allocation10 + $0x30] sm:$0xff]  }
 0x915   :  { %v5260_v21 = vadd.f32 %v17173_v19, %v21505_v10  ;;  %v5204_v4 = vpop.f32.mrb[79].mxu0  ;;  %v5275_v49 = vmax.f32 %v5259_v1, 0.0  ;;  %v18361_v1 = vld [vmem:[#allocation10 + $0x28] sm:$0xff]  }
 0x916   :  { %v5258_v60 = vadd.f32 %v21505_v10, %v5204_v4  ;;  %v5273_v32 = vmax.f32 %v5257_v50, 0.0 }
 0x917   :  { %v5276_v0 = vmax.f32 %v5260_v21, 0.0 }
 0x918   :  { %v5274_v46 = vmax.f32 %v5258_v60, 0.0 }
 0x919   :  { %v21543_v57 = vpack.c.bf16 %v5276_v0, %v5275_v49 }
 0x91a   :  { %v21545_v36 = vpack.c.bf16 %v5274_v46, %v5273_v32 }
 0x91c   :  { %17186 = vmatprep.subr.bf16.mxu1 %v21545_v36  ;;  %17206 = vmatprep.subr.bf16.mxu0 %v21545_v36 }
 0x91d   :  { %17187 = vmatpush3.bf16.msra.mxu1 %v21545_v36  ;;  %17207 = vmatpush3.bf16.msra.mxu0 %v21545_v36 }
 0x91e   :  { %17188 = vmatprep.subr.bf16.mxu1 %v21543_v57  ;;  %17208 = vmatprep.subr.bf16.mxu0 %v21543_v57 }
 0x921   :  { %17189 = vmatpush3.bf16.msra.mxu1 %v21543_v57  ;;  %17209 = vmatpush3.bf16.msra.mxu0 %v21543_v57 }
 0x922   :  { %v17176_v30 = vpop.f32.mrb[80].mxu0 }
 0x923   :  { %v5263_v18 = vadd.f32 %v17176_v30, %v21505_v10  ;;  %v5217_v40 = vpop.f32.mrb[81].mxu0 }
 0x924   :  { %v5261_v44 = vadd.f32 %v21505_v10, %v5217_v40  ;;  %v17177_v62 = vpop.f32.mrb[82].mxu0 }
 0x925   :  { %v5264_v25 = vadd.f32 %v17177_v62, %v21505_v10  ;;  %v5220_v35 = vpop.f32.mrb[83].mxu0  ;;  %v5279_v38 = vmax.f32 %v5263_v18, 0.0  ;;  %v18364_v62 = vld [vmem:[#allocation10 + $0x40] sm:$0xff]  }
 0x926   :  { %v5262_v3 = vadd.f32 %v21505_v10, %v5220_v35  ;;  %v5277_v41 = vmax.f32 %v5261_v44, 0.0  ;;  %v18352_v10 = vld [vmem:[#allocation5 + $0x60] sm:$0xff]   ;;  %v18363_v44 = vld [vmem:[#allocation10 + $0x38] sm:$0xff]  }
 0x927   :  { %v5280_v26 = vmax.f32 %v5264_v25, 0.0  ;;  %v18365_v25 = vld [vmem:[#allocation10 + $0x48] sm:$0xff]   ;;  %v18366_v35 = vld [vmem:[#allocation5 + $0x50] sm:$0xff]  }
 0x928   :  { %v5278_v53 = vmax.f32 %v5262_v3, 0.0  ;;  %v18368_v3 = vld [vmem:[#allocation10 + $0x50] sm:$0xff]  }
 0x929   :  { %v21559_v59 = vpack.c.bf16 %v5280_v26, %v5279_v38  ;;  %v18367_v38 = vld [vmem:[#allocation5 + $0x58] sm:$0xff]   ;;  %v18369_v26 = vld [vmem:[#allocation10 + $0x58] sm:$0xff]  }
 0x92a   :  { %v21561_v5 = vpack.c.bf16 %v5278_v53, %v5277_v41  ;;  %v18370_v41 = vld [vmem:[#allocation10 + $0x60] sm:$0xff]  }
 0x92c   :  { %17190 = vmatprep.subr.bf16.mxu1 %v21561_v5  ;;  %17210 = vmatprep.subr.bf16.mxu0 %v21561_v5 }
 0x92d   :  { %17191 = vmatpush3.bf16.msra.mxu1 %v21561_v5  ;;  %17211 = vmatpush3.bf16.msra.mxu0 %v21561_v5 }
 0x92e   :  { %17192 = vmatprep.subr.bf16.mxu1 %v21559_v59  ;;  %17212 = vmatprep.subr.bf16.mxu0 %v21559_v59 }
 0x931   :  { %17193 = vmatpush3.bf16.msra.mxu1 %v21559_v59  ;;  %17213 = vmatpush3.bf16.msra.mxu0 %v21559_v59 }
 0x932   :  { %17262 = vmatprep.subr.bf16.mxu0 %v21513_v43  ;;  %17218 = vmatprep.subr.bf16.mxu1 %v18354_v22 }
 0x934   :  { %17215 = vmatmul.mubr.bf16.vlgmr.msra.gmra.mrb[244].mxu0 %v18345_v37  ;;  %17195 = vmatmul.mubr.bf16.vlgmr.msra.gmra.mrb[92].mxu1 %v18347_v56 }
 0x935   :  { %17263 = vmatpush3.bf16.msra.mxu0 %v21513_v43  ;;  %17278 = vmatprep.mubr.bf16.mxu0 %v18348_v15 }
 0x936   :  { %17264 = vmatprep.subr.bf16.mxu0 %v21511_v47  ;;  %17219 = vmatpush3.bf16.msra.mxu1 %v18354_v22 }
 0x937   :  { %17220 = vmatprep.subr.bf16.mxu1 %v18355_v20 }
 0x939   :  { %17265 = vmatpush3.bf16.msra.mxu0 %v21511_v47 }
 0x93a   :  { %17266 = vmatprep.subr.bf16.mxu0 %v21529_v6  ;;  %17221 = vmatpush3.bf16.msra.mxu1 %v18355_v20 }
 0x93b   :  { %17226 = vmatprep.subr.bf16.mxu1 %v18356_v27 }
 0x93d   :  { %17267 = vmatpush3.bf16.msra.mxu0 %v21529_v6 }
 0x93e   :  { %17268 = vmatprep.subr.bf16.mxu0 %v21527_v52 }
 0x941   :  { %17269 = vmatpush3.bf16.msra.mxu0 %v21527_v52 }
 0x942   :  { %17270 = vmatprep.subr.bf16.mxu0 %v21545_v36 }
 0x945   :  { %17271 = vmatpush3.bf16.msra.mxu0 %v21545_v36 }
 0x946   :  { %17272 = vmatprep.subr.bf16.mxu0 %v21543_v57 }
 0x949   :  { %17273 = vmatpush3.bf16.msra.mxu0 %v21543_v57 }
 0x94a   :  { %17274 = vmatprep.subr.bf16.mxu0 %v21561_v5 }
 0x94d   :  { %17275 = vmatpush3.bf16.msra.mxu0 %v21561_v5 }
 0x94e   :  { %17276 = vmatprep.subr.bf16.mxu0 %v21559_v59 }
 0x951   :  { %17277 = vmatpush3.bf16.msra.mxu0 %v21559_v59 }
 0x952   :  { %17290 = vmatprep.subr.bf16.mxu0 %v21513_v43 }
 0x954   :  { %17279 = vmatmul.mubr.bf16.vlgmr.msra.gmra.mrb[248].mxu0 %v18349_v39 }
 0x955   :  { %17291 = vmatpush3.bf16.msra.mxu0 %v21513_v43  ;;  %17306 = vmatprep.mubr.bf16.mxu0 %v18350_v11  ;;  %v18374_v11 = vld [vmem:[#allocation5 + $0x80] sm:$0xff]  }
 0x956   :  { %17292 = vmatprep.subr.bf16.mxu0 %v21511_v47 }
 0x959   :  { %17293 = vmatpush3.bf16.msra.mxu0 %v21511_v47 }
 0x95a   :  { %17294 = vmatprep.subr.bf16.mxu0 %v21529_v6 }
 0x95d   :  { %17295 = vmatpush3.bf16.msra.mxu0 %v21529_v6 }
 0x95e   :  { %17296 = vmatprep.subr.bf16.mxu0 %v21527_v52 }
 0x961   :  { %17297 = vmatpush3.bf16.msra.mxu0 %v21527_v52 }
 0x962   :  { %17298 = vmatprep.subr.bf16.mxu0 %v21545_v36 }
 0x965   :  { %17299 = vmatpush3.bf16.msra.mxu0 %v21545_v36 }
 0x966   :  { %17300 = vmatprep.subr.bf16.mxu0 %v21543_v57 }
 0x969   :  { %17301 = vmatpush3.bf16.msra.mxu0 %v21543_v57 }
 0x96a   :  { %17302 = vmatprep.subr.bf16.mxu0 %v21561_v5 }
 0x96d   :  { %17303 = vmatpush3.bf16.msra.mxu0 %v21561_v5 }
 0x96e   :  { %17304 = vmatprep.subr.bf16.mxu0 %v21559_v59 }
 0x971   :  { %17305 = vmatpush3.bf16.msra.mxu0 %v21559_v59 }
 0x972   :  { %17346 = vmatprep.subr.bf16.mxu0 %v21513_v43 }
 0x974   :  { %17307 = vmatmul.mubr.bf16.vlgmr.msra.gmra.mrb[252].mxu0 %v18351_v42  ;;  %v18375_v42 = vld [vmem:[#allocation5 + $0x88] sm:$0xff]  }
 0x975   :  { %17347 = vmatpush3.bf16.msra.mxu0 %v21513_v43  ;;  %17362 = vmatprep.mubr.bf16.mxu0 %v18352_v10 }
 0x976   :  { %17348 = vmatprep.subr.bf16.mxu0 %v21511_v47 }
 0x979   :  { %17349 = vmatpush3.bf16.msra.mxu0 %v21511_v47 }
 0x97a   :  { %17350 = vmatprep.subr.bf16.mxu0 %v21529_v6 }
 0x97d   :  { %17351 = vmatpush3.bf16.msra.mxu0 %v21529_v6 }
 0x97e   :  { %17352 = vmatprep.subr.bf16.mxu0 %v21527_v52 }
 0x981   :  { %17353 = vmatpush3.bf16.msra.mxu0 %v21527_v52 }
 0x982   :  { %17354 = vmatprep.subr.bf16.mxu0 %v21545_v36 }
 0x985   :  { %17355 = vmatpush3.bf16.msra.mxu0 %v21545_v36 }
 0x986   :  { %17356 = vmatprep.subr.bf16.mxu0 %v21543_v57 }
 0x989   :  { %17357 = vmatpush3.bf16.msra.mxu0 %v21543_v57 }
 0x98a   :  { %17358 = vmatprep.subr.bf16.mxu0 %v21561_v5 }
 0x98d   :  { %17359 = vmatpush3.bf16.msra.mxu0 %v21561_v5 }
 0x98e   :  { %17360 = vmatprep.subr.bf16.mxu0 %v21559_v59 }
 0x991   :  { %17361 = vmatpush3.bf16.msra.mxu0 %v21559_v59 }
 0x992   :  { %17402 = vmatprep.subr.bf16.mxu0 %v21513_v43 }
 0x994   :  { %17363 = vmatmul.mubr.bf16.vlgmr.msra.gmra.mrb[0].mxu0 %v18353_v31 }
 0x995   :  { %17403 = vmatpush3.bf16.msra.mxu0 %v21513_v43  ;;  %17418 = vmatprep.mubr.bf16.mxu0 %v18374_v11  ;;  %v18402_v11 = vld [vmem:[#allocation11] sm:$0xff]  }
 0x996   :  { %17404 = vmatprep.subr.bf16.mxu0 %v21511_v47 }
 0x999   :  { %17405 = vmatpush3.bf16.msra.mxu0 %v21511_v47 }
 0x99a   :  { %17406 = vmatprep.subr.bf16.mxu0 %v21529_v6 }
 0x99d   :  { %17407 = vmatpush3.bf16.msra.mxu0 %v21529_v6 }
 0x99e   :  { %17408 = vmatprep.subr.bf16.mxu0 %v21527_v52 }
 0x9a1   :  { %17409 = vmatpush3.bf16.msra.mxu0 %v21527_v52 }
 0x9a2   :  { %17410 = vmatprep.subr.bf16.mxu0 %v21545_v36 }
 0x9a5   :  { %17411 = vmatpush3.bf16.msra.mxu0 %v21545_v36 }
 0x9a6   :  { %17412 = vmatprep.subr.bf16.mxu0 %v21543_v57 }
 0x9a9   :  { %17413 = vmatpush3.bf16.msra.mxu0 %v21543_v57 }
 0x9aa   :  { %17414 = vmatprep.subr.bf16.mxu0 %v21561_v5 }
 0x9ad   :  { %17415 = vmatpush3.bf16.msra.mxu0 %v21561_v5 }
 0x9ae   :  { %17416 = vmatprep.subr.bf16.mxu0 %v21559_v59 }
 0x9b1   :  { %17417 = vmatpush3.bf16.msra.mxu0 %v21559_v59 }
 0x9b4   :  { %17419 = vmatmul.mubr.bf16.vlgmr.msra.gmra.mrb[4].mxu0 %v18375_v42 }
 0xa07   :  { %v17216_v13 = vpop.f32.mrb[244].mxu0  ;;  %v17196_v28 = vpop.f32.mrb[92].mxu1 }
 0xa08   :  { %v5411_v16 = vpop.f32.mrb[245].mxu0  ;;  %v5339_v7 = vpop.f32.mrb[93].mxu1 }
 0xa09   :  { %v17217_v8 = vpop.f32.mrb[246].mxu0  ;;  %v17197_v58 = vpop.f32.mrb[94].mxu1 }
 0xa0a   :  { %v5427_v17 = vpack.c.bf16 %v17217_v8, %v17216_v13  ;;  %v5414_v24 = vpop.f32.mrb[247].mxu0  ;;  %v5355_v9 = vpack.c.bf16 %v17197_v58, %v17196_v28  ;;  %v5342_v29 = vpop.f32.mrb[95].mxu1 }
 0xa0b   :  { %v5426_v2 = vpack.c.bf16 %v5414_v24, %v5411_v16  ;;  %v5354_v45 = vpack.c.bf16 %v5342_v29, %v5339_v7  ;;  %v18371_v16 = vld [vmem:[#allocation10 + $0x68] sm:$0xff]   ;;  %v18372_v7 = vld [vmem:[#allocation5 + $0x70] sm:$0xff]  }
 0xa0d   :  { %17222 = vmatprep.mubr.msk.bf16.mxu1 %vm5445_vm2, %v5426_v2 }
 0xa0e   :  { %17223 = vmatmul.mubr.msk.bf16.vlgmr.msra.gmra.mrb[96].mxu1 %vm5445_vm2, %v5427_v17 }
 0xa0f   :  { %17227 = vmatpush3.bf16.msra.mxu1 %v18356_v27  ;;  %17230 = vmatprep.mubr.msk.bf16.mxu1 %vm5445_vm2, %v5354_v45 }
 0xa10   :  { %17228 = vmatprep.subr.bf16.mxu1 %v18357_v61 }
 0xa13   :  { %17229 = vmatpush3.bf16.msra.mxu1 %v18357_v61  ;;  %v18379_v61 = vld [vmem:[#allocation10 + $0x88] sm:$0xff]  }
 0xa14   :  { %17234 = vmatprep.subr.bf16.mxu1 %v21513_v43 }
 0xa1a   :  { %17231 = vmatmul.mubr.msk.bf16.vlgmr.msra.gmra.mrb[96].mxu1 %vm5445_vm2, %v5355_v9 }
 0xa1b   :  { %17235 = vmatpush3.bf16.msra.mxu1 %v21513_v43  ;;  %17250 = vmatprep.mubr.bf16.mxu1 %v18358_v51  ;;  %v18380_v51 = vld [vmem:[#allocation7] sm:$0xff]  }
 0xa1c   :  { %17236 = vmatprep.subr.bf16.mxu1 %v21511_v47  ;;  %17434 = vmatprep.mubr.msk.bf16.mxu0 %vm5445_vm2, %v18380_v51 }
 0xa1f   :  { %17237 = vmatpush3.bf16.msra.mxu1 %v21511_v47 }
 0xa20   :  { %17238 = vmatprep.subr.bf16.mxu1 %v21529_v6 }
 0xa23   :  { %17239 = vmatpush3.bf16.msra.mxu1 %v21529_v6 }
 0xa24   :  { %17240 = vmatprep.subr.bf16.mxu1 %v21527_v52 }
 0xa27   :  { %17241 = vmatpush3.bf16.msra.mxu1 %v21527_v52  ;;  %v17280_v34 = vpop.f32.mrb[248].mxu0 }
 0xa28   :  { %17242 = vmatprep.subr.bf16.mxu1 %v21545_v36  ;;  %v5763_v63 = vpop.f32.mrb[249].mxu0 }
 0xa29   :  { %v17281_v23 = vpop.f32.mrb[250].mxu0 }
 0xa2a   :  { %v5779_v54 = vpack.c.bf16 %v17281_v23, %v17280_v34  ;;  %v5766_v48 = vpop.f32.mrb[251].mxu0  ;;  %v18398_v34 = vld [vmem:[#allocation11 + $0x20] sm:$0xff]  }
 0xa2b   :  { %17243 = vmatpush3.bf16.msra.mxu1 %v21545_v36  ;;  %v5778_v55 = vpack.c.bf16 %v5766_v48, %v5763_v63  ;;  %v6576_v63 = vld [vmem:[#allocation19 + $0x1] ss:$0 sm:$0xff] }
 0xa2c   :  { %17244 = vmatprep.subr.bf16.mxu1 %v21543_v57 }
 0xa2f   :  { %17245 = vmatpush3.bf16.msra.mxu1 %v21543_v57 }
 0xa30   :  { %17246 = vmatprep.subr.bf16.mxu1 %v21561_v5 }
 0xa33   :  { %17247 = vmatpush3.bf16.msra.mxu1 %v21561_v5 }
 0xa34   :  { %17248 = vmatprep.subr.bf16.mxu1 %v21559_v59 }
 0xa37   :  { %17249 = vmatpush3.bf16.msra.mxu1 %v21559_v59 }
 0xa38   :  { %17254 = vmatprep.subr.bf16.mxu1 %v18360_v14 }
 0xa3a   :  { %17251 = vmatmul.mubr.bf16.vlgmr.msra.gmra.mrb[100].mxu1 %v18359_v33 }
 0xa3b   :  { %17255 = vmatpush3.bf16.msra.mxu1 %v18360_v14 }
 0xa3c   :  { %17256 = vmatprep.subr.bf16.mxu1 %v18361_v1 }
 0xa3f   :  { %17257 = vmatpush3.bf16.msra.mxu1 %v18361_v1 }
 0xa40   :  { %17282 = vmatprep.subr.bf16.mxu1 %v18362_v12 }
 0xa47   :  { %v17308_v50 = vpop.f32.mrb[252].mxu0 }
 0xa48   :  { %v5907_v19 = vpop.f32.mrb[253].mxu0 }
 0xa49   :  { %v17309_v21 = vpop.f32.mrb[254].mxu0 }
 0xa4a   :  { %v5923_v4 = vpack.c.bf16 %v17309_v21, %v17308_v50  ;;  %v5910_v60 = vpop.f32.mrb[255].mxu0 }
 0xa4b   :  { %v5922_v49 = vpack.c.bf16 %v5910_v60, %v5907_v19 }
 0xa67   :  { %v17364_v53 = vpop.f32.mrb[0].mxu0 }
 0xa68   :  { %v6195_v37 = vpop.f32.mrb[1].mxu0 }
 0xa69   :  { %v17365_v56 = vpop.f32.mrb[2].mxu0 }
 0xa6a   :  { %v6211_v15 = vpack.c.bf16 %v17365_v56, %v17364_v53  ;;  %v6198_v22 = vpop.f32.mrb[3].mxu0  ;;  %v18395_v53 = vld [vmem:[#allocation7 + $0x78] sm:$0xff]   ;;  %v18397_v56 = vld [vmem:[#allocation7 + $0x88] sm:$0xff]  }
 0xa6b   :  { %v6210_v39 = vpack.c.bf16 %v6198_v22, %v6195_v37  ;;  %v18396_v37 = vld [vmem:[#allocation7 + $0x80] sm:$0xff]  }
 0xa6c   :  { %v18400_v22 = vld [vmem:[#allocation11 + $0x30] sm:$0xff]  }
 0xb0d   :  { %v17252_v0 = vpop.f32.mrb[100].mxu1 }
 0xb0e   :  { %v5619_v32 = vpop.f32.mrb[101].mxu1 }
 0xb0f   :  { %v17253_v46 = vpop.f32.mrb[102].mxu1 }
 0xb10   :  { %v5635_v30 = vpack.c.bf16 %v17253_v46, %v17252_v0  ;;  %v5622_v18 = vpop.f32.mrb[103].mxu1  ;;  %v18381_v0 = vld [vmem:[#allocation7 + $0x8] sm:$0xff]   ;;  %v18383_v46 = vld [vmem:[#allocation7 + $0x18] sm:$0xff]  }
 0xb11   :  { %v5634_v40 = vpack.c.bf16 %v5622_v18, %v5619_v32  ;;  %v18382_v32 = vld [vmem:[#allocation7 + $0x10] sm:$0xff]   ;;  %v18385_v18 = vld [vmem:[#allocation7 + $0x28] sm:$0xff]  }
 0xb13   :  { %17258 = vmatprep.mubr.msk.bf16.mxu1 %vm5445_vm2, %v5634_v40  ;;  %v18386_v40 = vld [vmem:[#allocation7 + $0x30] sm:$0xff]  }
 0xb14   :  { %17259 = vmatmul.mubr.msk.bf16.vlgmr.msra.gmra.mrb[96].mxu1 %vm5445_vm2, %v5635_v30  ;;  %v18384_v30 = vld [vmem:[#allocation7 + $0x20] sm:$0xff]  }
 0xb15   :  { %17283 = vmatpush3.bf16.msra.mxu1 %v18362_v12  ;;  %17286 = vmatprep.mubr.msk.bf16.mxu1 %vm5445_vm2, %v5778_v55 }
 0xb16   :  { %17284 = vmatprep.subr.bf16.mxu1 %v18363_v44 }
 0xb19   :  { %17285 = vmatpush3.bf16.msra.mxu1 %v18363_v44  ;;  %v18387_v44 = vld [vmem:[#allocation7 + $0x38] sm:$0xff]  }
 0xb1a   :  { %17310 = vmatprep.subr.bf16.mxu1 %v18364_v62 }
 0xb20   :  { %17287 = vmatmul.mubr.msk.bf16.vlgmr.msra.gmra.mrb[96].mxu1 %vm5445_vm2, %v5779_v54 }
 0xb21   :  { %17311 = vmatpush3.bf16.msra.mxu1 %v18364_v62  ;;  %17314 = vmatprep.mubr.msk.bf16.mxu1 %vm5445_vm2, %v5922_v49  ;;  %v18388_v62 = vld [vmem:[#allocation7 + $0x40] sm:$0xff]  }
 0xb22   :  { %17312 = vmatprep.subr.bf16.mxu1 %v18365_v25 }
 0xb25   :  { %17313 = vmatpush3.bf16.msra.mxu1 %v18365_v25  ;;  %v18389_v25 = vld [vmem:[#allocation7 + $0x48] sm:$0xff]  }
 0xb26   :  { %17318 = vmatprep.subr.bf16.mxu1 %v21513_v43 }
 0xb2c   :  { %17315 = vmatmul.mubr.msk.bf16.vlgmr.msra.gmra.mrb[96].mxu1 %vm5445_vm2, %v5923_v4 }
 0xb2d   :  { %17319 = vmatpush3.bf16.msra.mxu1 %v21513_v43  ;;  %17334 = vmatprep.mubr.bf16.mxu1 %v18366_v35  ;;  %v18390_v35 = vld [vmem:[#allocation7 + $0x50] sm:$0xff]  }
 0xb2e   :  { %17320 = vmatprep.subr.bf16.mxu1 %v21511_v47 }
 0xb31   :  { %17321 = vmatpush3.bf16.msra.mxu1 %v21511_v47 }
 0xb32   :  { %17322 = vmatprep.subr.bf16.mxu1 %v21529_v6 }
 0xb35   :  { %17323 = vmatpush3.bf16.msra.mxu1 %v21529_v6 }
 0xb36   :  { %17324 = vmatprep.subr.bf16.mxu1 %v21527_v52 }
 0xb39   :  { %17325 = vmatpush3.bf16.msra.mxu1 %v21527_v52 }
 0xb3a   :  { %17326 = vmatprep.subr.bf16.mxu1 %v21545_v36 }
 0xb3d   :  { %17327 = vmatpush3.bf16.msra.mxu1 %v21545_v36 }
 0xb3e   :  { %17328 = vmatprep.subr.bf16.mxu1 %v21543_v57 }
 0xb41   :  { %17329 = vmatpush3.bf16.msra.mxu1 %v21543_v57 }
 0xb42   :  { %17330 = vmatprep.subr.bf16.mxu1 %v21561_v5 }
 0xb45   :  { %17331 = vmatpush3.bf16.msra.mxu1 %v21561_v5 }
 0xb46   :  { %17332 = vmatprep.subr.bf16.mxu1 %v21559_v59 }
 0xb49   :  { %17333 = vmatpush3.bf16.msra.mxu1 %v21559_v59 }
 0xb4a   :  { %17338 = vmatprep.subr.bf16.mxu1 %v18368_v3 }
 0xb4c   :  { %17335 = vmatmul.mubr.bf16.vlgmr.msra.gmra.mrb[104].mxu1 %v18367_v38  ;;  %v18392_v38 = vld [vmem:[#allocation7 + $0x60] sm:$0xff]  }
 0xb4d   :  { %17339 = vmatpush3.bf16.msra.mxu1 %v18368_v3  ;;  %v18391_v3 = vld [vmem:[#allocation7 + $0x58] sm:$0xff]  }
 0xb4e   :  { %17340 = vmatprep.subr.bf16.mxu1 %v18369_v26 }
 0xb51   :  { %17341 = vmatpush3.bf16.msra.mxu1 %v18369_v26  ;;  %v18393_v26 = vld [vmem:[#allocation7 + $0x68] sm:$0xff]  }
 0xb52   :  { %17366 = vmatprep.subr.bf16.mxu1 %v18370_v41 }
 0xc1f   :  { %v17336_v10 = vpop.f32.mrb[104].mxu1 }
 0xc20   :  { %v6051_v20 = vpop.f32.mrb[105].mxu1 }
 0xc21   :  { %v17337_v27 = vpop.f32.mrb[106].mxu1 }
 0xc22   :  { %v6067_v31 = vpack.c.bf16 %v17337_v27, %v17336_v10  ;;  %v6054_v13 = vpop.f32.mrb[107].mxu1 }
 0xc23   :  { %v6066_v28 = vpack.c.bf16 %v6054_v13, %v6051_v20 }
 0xc25   :  { %17342 = vmatprep.mubr.msk.bf16.mxu1 %vm5445_vm2, %v6066_v28 }
 0xc26   :  { %17343 = vmatmul.mubr.msk.bf16.vlgmr.msra.gmra.mrb[96].mxu1 %vm5445_vm2, %v6067_v31 }
 0xc27   :  { %17367 = vmatpush3.bf16.msra.mxu1 %v18370_v41  ;;  %17370 = vmatprep.mubr.msk.bf16.mxu1 %vm5445_vm2, %v6210_v39  ;;  %v18394_v41 = vld [vmem:[#allocation7 + $0x70] sm:$0xff]  }
 0xc28   :  { %17368 = vmatprep.subr.bf16.mxu1 %v18371_v16  ;;  %v18401_v39 = vld [vmem:[#allocation11 + $0x38] sm:$0xff]  }
 0xc2b   :  { %17369 = vmatpush3.bf16.msra.mxu1 %v18371_v16 }
 0xc2c   :  { %17374 = vmatprep.subr.bf16.mxu1 %v21513_v43 }
 0xc32   :  { %17371 = vmatmul.mubr.msk.bf16.vlgmr.msra.gmra.mrb[96].mxu1 %vm5445_vm2, %v6211_v15  ;;  %v18399_v15 = vld [vmem:[#allocation11 + $0x28] sm:$0xff]  }
 0xc33   :  { %17375 = vmatpush3.bf16.msra.mxu1 %v21513_v43  ;;  %17390 = vmatprep.mubr.bf16.mxu1 %v18372_v7  ;;  %v18373_v43 = vld [vmem:[#allocation5 + $0x78] sm:$0xff]  }
 0xc34   :  { %17376 = vmatprep.subr.bf16.mxu1 %v21511_v47 }
 0xc37   :  { %17377 = vmatpush3.bf16.msra.mxu1 %v21511_v47  ;;  %v18376_v47 = vld [vmem:[#allocation10 + $0x70] sm:$0xff]  }
 0xc38   :  { %17378 = vmatprep.subr.bf16.mxu1 %v21529_v6 }
 0xc3b   :  { %17379 = vmatpush3.bf16.msra.mxu1 %v21529_v6  ;;  %v18378_v6 = vld [vmem:[#allocation10 + $0x80] sm:$0xff]  }
 0xc3c   :  { %17380 = vmatprep.subr.bf16.mxu1 %v21527_v52 }
 0xc3f   :  { %17381 = vmatpush3.bf16.msra.mxu1 %v21527_v52  ;;  %v18377_v52 = vld [vmem:[#allocation10 + $0x78] sm:$0xff]  }
 0xc40   :  { %17382 = vmatprep.subr.bf16.mxu1 %v21545_v36 }
 0xc43   :  { %17383 = vmatpush3.bf16.msra.mxu1 %v21545_v36  ;;  %v17420_v36 = vpop.f32.mrb[4].mxu0 }
 0xc44   :  { %17384 = vmatprep.subr.bf16.mxu1 %v21543_v57 }
 0xc47   :  { %17385 = vmatpush3.bf16.msra.mxu1 %v21543_v57  ;;  %v6483_v57 = vpop.f32.mrb[5].mxu0 }
 0xc48   :  { %17386 = vmatprep.subr.bf16.mxu1 %v21561_v5  ;;  %v17421_v8 = vpop.f32.mrb[6].mxu0 }
 0xc49   :  { %v6499_v58 = vpack.c.bf16 %v17421_v8, %v17420_v36  ;;  %v6486_v17 = vpop.f32.mrb[7].mxu0 }
 0xc4b   :  { %17387 = vmatpush3.bf16.msra.mxu1 %v21561_v5  ;;  %v6498_v5 = vpack.c.bf16 %v6486_v17, %v6483_v57  ;;  %v18404_v57 = vld [vmem:[#allocation11 + $0x10] sm:$0xff]  }
 0xc4c   :  { %17388 = vmatprep.subr.bf16.mxu1 %v21559_v59 }
 0xc4f   :  { %17389 = vmatpush3.bf16.msra.mxu1 %v21559_v59 }
 0xc50   :  { %17394 = vmatprep.subr.bf16.mxu1 %v18376_v47 }
 0xc52   :  { %17391 = vmatmul.mubr.bf16.vlgmr.msra.gmra.mrb[108].mxu1 %v18373_v43 }
 0xc53   :  { %17395 = vmatpush3.bf16.msra.mxu1 %v18376_v47 }
 0xc54   :  { %17396 = vmatprep.subr.bf16.mxu1 %v18377_v52 }
 0xc57   :  { %17397 = vmatpush3.bf16.msra.mxu1 %v18377_v52 }
 0xc58   :  { %17422 = vmatprep.subr.bf16.mxu1 %v18378_v6 }
 0xd25   :  { %v17392_v24 = vpop.f32.mrb[108].mxu1 }
 0xd26   :  { %v6339_v9 = vpop.f32.mrb[109].mxu1 }
 0xd27   :  { %v17393_v29 = vpop.f32.mrb[110].mxu1 }
 0xd28   :  { %v6355_v2 = vpack.c.bf16 %v17393_v29, %v17392_v24  ;;  %v6342_v45 = vpop.f32.mrb[111].mxu1 }
 0xd29   :  { %v6354_v59 = vpack.c.bf16 %v6342_v45, %v6339_v9  ;;  %v18405_v9 = vld [vmem:[#allocation11 + $0x18] sm:$0xff]  }
 0xd2b   :  { %17398 = vmatprep.mubr.msk.bf16.mxu1 %vm5445_vm2, %v6354_v59 }
 0xd2c   :  { %17399 = vmatmul.mubr.msk.bf16.vlgmr.msra.gmra.mrb[96].mxu1 %vm5445_vm2, %v6355_v2  ;;  %v18406_v2 = vld [vmem:[#allocation11 + $0x40] sm:$0xff]  }
 0xd2d   :  { %17423 = vmatpush3.bf16.msra.mxu1 %v18378_v6  ;;  %17426 = vmatprep.mubr.msk.bf16.mxu1 %vm5445_vm2, %v6498_v5  ;;  %v18403_v6 = vld [vmem:[#allocation11 + $0x8] sm:$0xff]  }
 0xd2e   :  { %17424 = vmatprep.subr.bf16.mxu1 %v18379_v61 }
 0xd31   :  { %17425 = vmatpush3.bf16.msra.mxu1 %v18379_v61 }
 0xd32   :  { %17446 = vmatprep.subr.bf16.mxu1 %v18398_v34 }
 0xd38   :  { %17427 = vmatmul.mubr.msk.bf16.vlgmr.msra.gmra.mrb[96].mxu1 %vm5445_vm2, %v6499_v58 }
 0xd39   :  { %17447 = vmatpush3.bf16.msra.mxu1 %v18398_v34 }
 0xd3a   :  { %17448 = vmatprep.subr.bf16.mxu1 %v18399_v15 }
 0xd3d   :  { %17449 = vmatpush3.bf16.msra.mxu1 %v18399_v15  ;;  %v18415_v15 = vld [vmem:[#allocation11 + $0x88] sm:$0xff]  }
 0xd3e   :  { %17450 = vmatprep.subr.bf16.mxu1 %v18400_v22 }
 0xd41   :  { %17451 = vmatpush3.bf16.msra.mxu1 %v18400_v22 }
 0xd42   :  { %17452 = vmatprep.subr.bf16.mxu1 %v18401_v39 }
 0xd45   :  { %17453 = vmatpush3.bf16.msra.mxu1 %v18401_v39  ;;  %v18416_v39 = vld [vmem:[#allocation11 + $0x90] sm:$0xff]  }
 0xd46   :  { %17458 = vmatprep.subr.bf16.mxu1 %v18402_v11 }
 0xe0b   :  { %v17428_v23 = vpop.f32.mrb[96].mxu1 }
 0xe0c   :  { %v6579_v54 = vadd.f32 %v17428_v23, %v6576_v63  ;;  %v6557_v48 = vpop.f32.mrb[97].mxu1 }
 0xe0d   :  { %v6577_v55 = vadd.f32 %v6576_v63, %v6557_v48  ;;  %v17429_v14 = vpop.f32.mrb[98].mxu1 }
 0xe0e   :  { %v6580_v33 = vadd.f32 %v17429_v14, %v6576_v63  ;;  %v6560_v1 = vpop.f32.mrb[99].mxu1  ;;  %v6583_v50 = vmax.f32 %v6579_v54, 0.0  ;;  %v18408_v54 = vld [vmem:[#allocation11 + $0x50] sm:$0xff]  }
 0xe0f   :  { %v6578_v12 = vadd.f32 %v6576_v63, %v6560_v1  ;;  %v6581_v21 = vmax.f32 %v6577_v55, 0.0  ;;  %v18407_v63 = vld [vmem:[#allocation11 + $0x48] sm:$0xff]  }
 0xe10   :  { %v6584_v19 = vmax.f32 %v6580_v33, 0.0 }
 0xe11   :  { %v6582_v4 = vmax.f32 %v6578_v12, 0.0  ;;  %v18409_v12 = vld [vmem:[#allocation11 + $0x58] sm:$0xff]  }
 0xe12   :  { %v21702_v60 = vpack.c.bf16 %v6584_v19, %v6583_v50  ;;  %v18410_v19 = vld [vmem:[#allocation11 + $0x60] sm:$0xff]  }
 0xe13   :  { %v21704_v49 = vpack.c.bf16 %v6582_v4, %v6581_v21 }
 0xe15   :  { %17430 = vmatprep.subr.bf16.mxu0 %v21704_v49 }
 0xe16   :  { %17431 = vmatpush3.bf16.msra.mxu0 %v21704_v49 }
 0xe17   :  { %17432 = vmatprep.subr.bf16.mxu0 %v21702_v60 }
 0xe1a   :  { %17433 = vmatpush3.bf16.msra.mxu0 %v21702_v60 }
 0xe1b   :  { %17438 = vmatprep.subr.bf16.mxu0 %v21704_v49 }
 0xe1d   :  { %17435 = vmatmul.mubr.msk.bf16.vlgmr.msra.gmra.mrb[8].mxu0 %vm5445_vm2, %v18381_v0 }
 0xe1e   :  { %17439 = vmatpush3.bf16.msra.mxu0 %v21704_v49  ;;  %17442 = vmatprep.mubr.msk.bf16.mxu0 %vm5445_vm2, %v18382_v32  ;;  %v18411_v32 = vld [vmem:[#allocation11 + $0x68] sm:$0xff]  }
 0xe1f   :  { %17440 = vmatprep.subr.bf16.mxu0 %v21702_v60 }
 0xe22   :  { %17441 = vmatpush3.bf16.msra.mxu0 %v21702_v60 }
 0xe23   :  { %17470 = vmatprep.subr.bf16.mxu0 %v21704_v49 }
 0xe25   :  { %17443 = vmatmul.mubr.msk.bf16.vlgmr.msra.gmra.mrb[12].mxu0 %vm5445_vm2, %v18383_v46 }
 0xe26   :  { %17471 = vmatpush3.bf16.msra.mxu0 %v21704_v49  ;;  %17474 = vmatprep.mubr.msk.bf16.mxu0 %vm5445_vm2, %v18384_v30  ;;  %v18412_v30 = vld [vmem:[#allocation11 + $0x70] sm:$0xff]  }
 0xe27   :  { %17472 = vmatprep.subr.bf16.mxu0 %v21702_v60 }
 0xe2a   :  { %17473 = vmatpush3.bf16.msra.mxu0 %v21702_v60 }
 0xe2b   :  { %17490 = vmatprep.subr.bf16.mxu0 %v21704_v49 }
 0xe2d   :  { %17475 = vmatmul.mubr.msk.bf16.vlgmr.msra.gmra.mrb[16].mxu0 %vm5445_vm2, %v18385_v18 }
 0xe2e   :  { %17491 = vmatpush3.bf16.msra.mxu0 %v21704_v49  ;;  %17494 = vmatprep.mubr.msk.bf16.mxu0 %vm5445_vm2, %v18386_v40 }
 0xe2f   :  { %17492 = vmatprep.subr.bf16.mxu0 %v21702_v60 }
 0xe32   :  { %17493 = vmatpush3.bf16.msra.mxu0 %v21702_v60 }
 0xe33   :  { %17510 = vmatprep.subr.bf16.mxu0 %v21704_v49 }
 0xe35   :  { %17495 = vmatmul.mubr.msk.bf16.vlgmr.msra.gmra.mrb[20].mxu0 %vm5445_vm2, %v18387_v44 }
 0xe36   :  { %17511 = vmatpush3.bf16.msra.mxu0 %v21704_v49  ;;  %17514 = vmatprep.mubr.msk.bf16.mxu0 %vm5445_vm2, %v18388_v62 }
 0xe37   :  { %17512 = vmatprep.subr.bf16.mxu0 %v21702_v60 }
 0xe3a   :  { %17513 = vmatpush3.bf16.msra.mxu0 %v21702_v60 }
 0xe3b   :  { %17530 = vmatprep.subr.bf16.mxu0 %v21704_v49 }
 0xe3d   :  { %17515 = vmatmul.mubr.msk.bf16.vlgmr.msra.gmra.mrb[24].mxu0 %vm5445_vm2, %v18389_v25 }
 0xe3e   :  { %17531 = vmatpush3.bf16.msra.mxu0 %v21704_v49  ;;  %17534 = vmatprep.mubr.msk.bf16.mxu0 %vm5445_vm2, %v18390_v35  ;;  %v18413_v35 = vld [vmem:[#allocation11 + $0x78] sm:$0xff]  }
 0xe3f   :  { %17532 = vmatprep.subr.bf16.mxu0 %v21702_v60 }
 0xe42   :  { %17533 = vmatpush3.bf16.msra.mxu0 %v21702_v60 }
 0xe43   :  { %17550 = vmatprep.subr.bf16.mxu0 %v21704_v49 }
 0xe45   :  { %17535 = vmatmul.mubr.msk.bf16.vlgmr.msra.gmra.mrb[28].mxu0 %vm5445_vm2, %v18391_v3 }
 0xe46   :  { %17551 = vmatpush3.bf16.msra.mxu0 %v21704_v49  ;;  %17554 = vmatprep.mubr.msk.bf16.mxu0 %vm5445_vm2, %v18392_v38  ;;  %v18414_v38 = vld [vmem:[#allocation11 + $0x80] sm:$0xff]  }
 0xe47   :  { %17552 = vmatprep.subr.bf16.mxu0 %v21702_v60 }
 0xe4a   :  { %17553 = vmatpush3.bf16.msra.mxu0 %v21702_v60 }
 0xe4b   :  { %17570 = vmatprep.subr.bf16.mxu0 %v21704_v49 }
 0xe4d   :  { %17555 = vmatmul.mubr.msk.bf16.vlgmr.msra.gmra.mrb[32].mxu0 %vm5445_vm2, %v18393_v26 }
 0xe4e   :  { %17571 = vmatpush3.bf16.msra.mxu0 %v21704_v49  ;;  %17574 = vmatprep.mubr.msk.bf16.mxu0 %vm5445_vm2, %v18394_v41 }
 0xe4f   :  { %17572 = vmatprep.subr.bf16.mxu0 %v21702_v60 }
 0xe52   :  { %17573 = vmatpush3.bf16.msra.mxu0 %v21702_v60 }
 0xe53   :  { %17590 = vmatprep.subr.bf16.mxu0 %v21704_v49 }
 0xe55   :  { %17575 = vmatmul.mubr.msk.bf16.vlgmr.msra.gmra.mrb[36].mxu0 %vm5445_vm2, %v18395_v53 }
 0xe56   :  { %17591 = vmatpush3.bf16.msra.mxu0 %v21704_v49  ;;  %17594 = vmatprep.mubr.msk.bf16.mxu0 %vm5445_vm2, %v18396_v37 }
 0xe57   :  { %17592 = vmatprep.subr.bf16.mxu0 %v21702_v60 }
 0xe5a   :  { %17593 = vmatpush3.bf16.msra.mxu0 %v21702_v60 }
 0xe5d   :  { %17595 = vmatmul.mubr.msk.bf16.vlgmr.msra.gmra.mrb[40].mxu0 %vm5445_vm2, %v18397_v56 }
 0xef0   :  { %v17436_v42 = vpop.f32.mrb[8].mxu0 }
 0xef1   :  { %v6641_v10 = vpop.f32.mrb[9].mxu0 }
 0xef2   :  { %v17437_v20 = vpop.f32.mrb[10].mxu0 }
 0xef3   :  { %v6657_v27 = vpack.c.bf16 %v17437_v20, %v17436_v42  ;;  %v6644_v31 = vpop.f32.mrb[11].mxu0 }
 0xef4   :  { %v6656_v13 = vpack.c.bf16 %v6644_v31, %v6641_v10  ;;  %v18417_v31 = vld [vmem:[#allocation11 + $0x98] sm:$0xff]  }
 0xef8   :  { %v17444_v28 = vpop.f32.mrb[12].mxu0 }
 0xef9   :  { %v6721_v16 = vpop.f32.mrb[13].mxu0 }
 0xefa   :  { %v17445_v7 = vpop.f32.mrb[14].mxu0 }
 0xefb   :  { %v6737_v47 = vpack.c.bf16 %v17445_v7, %v17444_v28  ;;  %v6724_v43 = vpop.f32.mrb[15].mxu0  ;;  %v18419_v28 = vld [vmem:[#allocation11 + $0xa8] sm:$0xff]   ;;  %v18421_v7 = vld [vmem:[#allocation11 + $0xb8] sm:$0xff]  }
 0xefc   :  { %v6736_v52 = vpack.c.bf16 %v6724_v43, %v6721_v16  ;;  %v18420_v16 = vld [vmem:[#allocation11 + $0xb0] sm:$0xff]   ;;  %v18423_v43 = vld [vmem:[#allocation11 + $0xc8] sm:$0xff]  }
 0xefe   :  { %17454 = vmatprep.mubr.msk.bf16.mxu1 %vm6771_vm3, %v6736_v52  ;;  %v18424_v52 = vld [vmem:[#allocation11 + $0xd0] sm:$0xff]  }
 0xeff   :  { %17455 = vmatmul.mubr.msk.bf16.vlgmr.msra.gmra.mrb[112].mxu1 %vm6771_vm3, %v6737_v47  ;;  %v18422_v47 = vld [vmem:[#allocation11 + $0xc0] sm:$0xff]  }
 0xf00   :  { %17459 = vmatpush3.bf16.msra.mxu1 %v18402_v11  ;;  %17466 = vmatprep.mubr.msk.bf16.mxu1 %vm6771_vm3, %v6656_v13  ;;  %v17476_v36 = vpop.f32.mrb[16].mxu0  ;;  %v18418_v13 = vld [vmem:[#allocation11 + $0xa0] sm:$0xff]  }
 0xf01   :  { %17460 = vmatprep.subr.bf16.mxu1 %v18403_v6  ;;  %v6961_v8 = vpop.f32.mrb[17].mxu0 }
 0xf02   :  { %v17477_v58 = vpop.f32.mrb[18].mxu0 }
 0xf03   :  { %v6977_v17 = vpack.c.bf16 %v17477_v58, %v17476_v36  ;;  %v6964_v5 = vpop.f32.mrb[19].mxu0  ;;  %v18426_v36 = vld [vmem:[#allocation11 + $0xe0] sm:$0xff]   ;;  %v18429_v58 = vld [vmem:[#allocation11 + $0xf8] sm:$0xff]  }
 0xf04   :  { %17461 = vmatpush3.bf16.msra.mxu1 %v18403_v6  ;;  %v6976_v24 = vpack.c.bf16 %v6964_v5, %v6961_v8  ;;  %v18425_v6 = vld [vmem:[#allocation11 + $0xd8] sm:$0xff]   ;;  %v18428_v8 = vld [vmem:[#allocation11 + $0xf0] sm:$0xff]   ;;  %v18431_v5 = vld [vmem:[#allocation11 + $0x108] sm:$0xff]  }
 0xf05   :  { %17462 = vmatprep.subr.bf16.mxu1 %v18404_v57 }
 0xf08   :  { %17463 = vmatpush3.bf16.msra.mxu1 %v18404_v57  ;;  %v21762_v29 = vpop.f32.mrb[20].mxu0  ;;  %v18427_v57 = vld [vmem:[#allocation11 + $0xe8] sm:$0xff]  }
 0xf09   :  { %17464 = vmatprep.subr.bf16.mxu1 %v18405_v9  ;;  %v7125_v45 = vpop.f32.mrb[21].mxu0 }
 0xf0a   :  { %v17497_v59 = vpop.f32.mrb[22].mxu0 }
 0xf0b   :  { %v7141_v61 = vpack.c.bf16 %v17497_v59, %v21762_v29  ;;  %v7128_v51 = vpop.f32.mrb[23].mxu0  ;;  %v18436_v29 = vld [vmem:[#allocation13 + $0x84] ss:$16 sps:$4 sm:$0xff]   ;;  %v18437_v59 = vld [vmem:[#allocation13 + $0x180] ss:$16 sps:$4 sm:$0xff]  }
 0xf0c   :  { %17465 = vmatpush3.bf16.msra.mxu1 %v18405_v9  ;;  %v7140_v34 = vpack.c.bf16 %v7128_v51, %v7125_v45  ;;  %v18433_v9 = vld [vmem:[#allocation11 + $0x118] sm:$0xff]   ;;  %v18434_v45 = vld [vmem:[#allocation13 + $0x80] ss:$16 sps:$4 sm:$0xff]   ;;  %8187 = vmatprep.subr.bf16.mxu0 %v18436_v29  ;;  %v18445_v51 = vld [vmem:[#allocation13 + $0x1a4] ss:$16 sps:$4 sm:$0xff]  }
 0xf0d   :  { %17478 = vmatprep.subr.bf16.mxu1 %v18406_v2  ;;  %8188 = vmatpush1.bf16.msra.mxu0 %v18434_v45  ;;  %v18494_v29 = vld [vmem:[#allocation13 + $0x40] ss:$16 sps:$4 sm:$0xff]   ;;  %v18502_v45 = vld [vmem:[#allocation13 + $0x64] ss:$16 sps:$4 sm:$0xff]  }
 0xf0f   :  { %17467 = vmatmul.mubr.msk.bf16.vlgmr.msra.gmra.mrb[112].mxu1 %vm6771_vm3, %v6657_v27 }
 0xf10   :  { %17479 = vmatpush3.bf16.msra.mxu1 %v18406_v2  ;;  %17486 = vmatprep.mubr.msk.bf16.mxu1 %vm6771_vm3, %v6976_v24  ;;  %v21767_v23 = vpop.f32.mrb[24].mxu0  ;;  %v18432_v24 = vld [vmem:[#allocation11 + $0x110] sm:$0xff]  }
 0xf11   :  { %17480 = vmatprep.subr.bf16.mxu1 %v18407_v63  ;;  %v7289_v48 = vpop.f32.mrb[25].mxu0  ;;  %v18439_v2 = vld [vmem:[#allocation13 + $0x184] ss:$16 sps:$4 sm:$0xff]  }
 0xf12   :  { %v21769_v55 = vpop.f32.mrb[26].mxu0 }
 0xf13   :  { %v7305_v14 = vpack.c.bf16 %v21769_v55, %v21767_v23  ;;  %v7292_v33 = vpop.f32.mrb[27].mxu0  ;;  %v18448_v23 = vld [vmem:[#allocation13 + $0xc4] ss:$16 sps:$4 sm:$0xff]   ;;  %v18449_v55 = vld [vmem:[#allocation13 + $0x1c0] ss:$16 sps:$4 sm:$0xff]  }
 0xf14   :  { %17481 = vmatpush3.bf16.msra.mxu1 %v18407_v63  ;;  %v7304_v1 = vpack.c.bf16 %v7292_v33, %v7289_v48  ;;  %v18443_v63 = vld [vmem:[#allocation13 + $0x1a0] ss:$16 sps:$4 sm:$0xff]   ;;  %v18457_v33 = vld [vmem:[#allocation13 + $0x1e4] ss:$16 sps:$4 sm:$0xff]  }
 0xf15   :  { %17482 = vmatprep.subr.bf16.mxu1 %v18408_v54  ;;  %v18446_v48 = vld [vmem:[#allocation13 + $0xc0] ss:$16 sps:$4 sm:$0xff]  }
 0xf18   :  { %17483 = vmatpush3.bf16.msra.mxu1 %v18408_v54  ;;  %v21773_v50 = vpop.f32.mrb[28].mxu0  ;;  %v18451_v54 = vld [vmem:[#allocation13 + $0x1c4] ss:$16 sps:$4 sm:$0xff]  }
 0xf19   :  { %17484 = vmatprep.subr.bf16.mxu1 %v18409_v12  ;;  %v7453_v21 = vpop.f32.mrb[29].mxu0 }
 0xf1a   :  { %v21775_v4 = vpop.f32.mrb[30].mxu0 }
 0xf1b   :  { %v7469_v60 = vpack.c.bf16 %v21775_v4, %v21773_v50  ;;  %v7456_v49 = vpop.f32.mrb[31].mxu0  ;;  %v18460_v50 = vld [vmem:[#allocation13 + $0x8c] ss:$16 sps:$4 sm:$0xff]   ;;  %v8054_v4 = vld [vmem:[#allocation19 + $0x2] ss:$0 sm:$0xff] }
 0xf1c   :  { %17485 = vmatpush3.bf16.msra.mxu1 %v18409_v12  ;;  %v7468_v0 = vpack.c.bf16 %v7456_v49, %v7453_v21  ;;  %v18455_v12 = vld [vmem:[#allocation13 + $0x1e0] ss:$16 sps:$4 sm:$0xff]   ;;  %v19768_v21 = vmov 0  }
 0xf1d   :  { %17498 = vmatprep.subr.bf16.mxu1 %v18410_v19  ;;  %8219 = vmatprep.mubr.bf16.mxu0 %v19768_v21 }
 0xf1f   :  { %17487 = vmatmul.mubr.msk.bf16.vlgmr.msra.gmra.mrb[112].mxu1 %vm6771_vm3, %v6977_v17  ;;  %v18430_v17 = vld [vmem:[#allocation11 + $0x100] sm:$0xff]  }
 0xf20   :  { %17499 = vmatpush3.bf16.msra.mxu1 %v18410_v19  ;;  %17506 = vmatprep.mubr.msk.bf16.mxu1 %vm6771_vm3, %v7140_v34  ;;  %v21781_v46 = vpop.f32.mrb[32].mxu0  ;;  %v18440_v34 = vld [vmem:[#allocation13 + $0xa0] ss:$16 sps:$4 sm:$0xff]   ;;  %v18463_v19 = vld [vmem:[#allocation13 + $0x204] ss:$16 sps:$4 sm:$0xff]  }
 0xf21   :  { %17500 = vmatprep.subr.bf16.mxu1 %v18411_v32  ;;  %v7617_v18 = vpop.f32.mrb[33].mxu0 }
 0xf22   :  { %v21783_v40 = vpop.f32.mrb[34].mxu0 }
 0xf23   :  { %v7633_v44 = vpack.c.bf16 %v21783_v40, %v21781_v46  ;;  %v7620_v62 = vpop.f32.mrb[35].mxu0 }
 0xf24   :  { %17501 = vmatpush3.bf16.msra.mxu1 %v18411_v32  ;;  %v7632_v25 = vpack.c.bf16 %v7620_v62, %v7617_v18 }
 0xf25   :  { %17502 = vmatprep.subr.bf16.mxu1 %v18412_v30 }
 0xf28   :  { %17503 = vmatpush3.bf16.msra.mxu1 %v18412_v30  ;;  %v21787_v3 = vpop.f32.mrb[36].mxu0 }
 0xf29   :  { %17504 = vmatprep.subr.bf16.mxu1 %v18413_v35  ;;  %v7781_v26 = vpop.f32.mrb[37].mxu0 }
 0xf2a   :  { %v21789_v41 = vpop.f32.mrb[38].mxu0 }
 0xf2b   :  { %v7797_v53 = vpack.c.bf16 %v21789_v41, %v21787_v3  ;;  %v7784_v37 = vpop.f32.mrb[39].mxu0  ;;  %v18458_v41 = vld [vmem:[#allocation13 + $0x88] ss:$16 sps:$4 sm:$0xff]  }
 0xf2c   :  { %17505 = vmatpush3.bf16.msra.mxu1 %v18413_v35  ;;  %v7796_v56 = vpack.c.bf16 %v7784_v37, %v7781_v26 }
 0xf2d   :  { %17518 = vmatprep.subr.bf16.mxu1 %v18414_v38 }
 0xf2f   :  { %17507 = vmatmul.mubr.msk.bf16.vlgmr.msra.gmra.mrb[112].mxu1 %vm6771_vm3, %v7141_v61  ;;  %v18442_v61 = vld [vmem:[#allocation13 + $0xa4] ss:$16 sps:$4 sm:$0xff]  }
 0xf30   :  { %17519 = vmatpush3.bf16.msra.mxu1 %v18414_v38  ;;  %17526 = vmatprep.mubr.msk.bf16.mxu1 %vm6771_vm3, %v7304_v1  ;;  %v21795_v22 = vpop.f32.mrb[40].mxu0  ;;  %v18452_v1 = vld [vmem:[#allocation13 + $0xe0] ss:$16 sps:$4 sm:$0xff]  }
 0xf31   :  { %17520 = vmatprep.subr.bf16.mxu1 %v18415_v15  ;;  %v7945_v11 = vpop.f32.mrb[41].mxu0  ;;  %8189 = vmatprep.subr.bf16.mxu0 %v18442_v61  ;;  %v18500_v61 = vld [vmem:[#allocation13 + $0x60] ss:$16 sps:$4 sm:$0xff]  }
 0xf32   :  { %v21797_v42 = vpop.f32.mrb[42].mxu0  ;;  %8190 = vmatpush1.bf16.msra.mxu0 %v18440_v34  ;;  %v18508_v34 = vld [vmem:[#allocation13 + $0xc] ss:$16 sps:$4 sm:$0xff]  }
 0xf33   :  { %v7961_v10 = vpack.c.bf16 %v21797_v42, %v21795_v22  ;;  %v7948_v20 = vpop.f32.mrb[43].mxu0  ;;  %8191 = vmatprep.subr.bf16.mxu0 %v18448_v23  ;;  %v18467_v42 = vld [vmem:[#allocation13 + $0x220] ss:$16 sps:$4 sm:$0xff]  }
 0xf34   :  { %17521 = vmatpush3.bf16.msra.mxu1 %v18415_v15  ;;  %v7960_v27 = vpack.c.bf16 %v7948_v20, %v7945_v11  ;;  %v18466_v15 = vld [vmem:[#allocation13 + $0xac] ss:$16 sps:$4 sm:$0xff]   ;;  %v18464_v11 = vld [vmem:[#allocation13 + $0xa8] ss:$16 sps:$4 sm:$0xff]   ;;  %v18475_v20 = vld [vmem:[#allocation13 + $0x244] ss:$16 sps:$4 sm:$0xff]  }
 0xf35   :  { %17522 = vmatprep.subr.bf16.mxu1 %v18416_v39 }
 0xf36   :  { %8192 = vmatpush1.bf16.msra.mxu0 %v18446_v48  ;;  %v18509_v48 = vld [vmem:[#allocation13 + $0x300] ss:$16 sps:$4 sm:$0xff]  }
 0xf38   :  { %17523 = vmatpush3.bf16.msra.mxu1 %v18416_v39  ;;  %v18469_v39 = vld [vmem:[#allocation13 + $0x224] ss:$16 sps:$4 sm:$0xff]  }
 0xf39   :  { %17524 = vmatprep.subr.bf16.mxu1 %v18417_v31 }
 0xf3c   :  { %17525 = vmatpush3.bf16.msra.mxu1 %v18417_v31  ;;  %v18473_v31 = vld [vmem:[#allocation13 + $0x240] ss:$16 sps:$4 sm:$0xff]  }
 0xf3d   :  { %17538 = vmatprep.subr.bf16.mxu1 %v18418_v13 }
 0xf3f   :  { %17527 = vmatmul.mubr.msk.bf16.vlgmr.msra.gmra.mrb[112].mxu1 %vm6771_vm3, %v7305_v14  ;;  %v18454_v14 = vld [vmem:[#allocation13 + $0xe4] ss:$16 sps:$4 sm:$0xff]  }
 0xf40   :  { %17539 = vmatpush3.bf16.msra.mxu1 %v18418_v13  ;;  %17546 = vmatprep.mubr.msk.bf16.mxu1 %vm6771_vm3, %v7468_v0  ;;  %v18478_v13 = vld [vmem:[#allocation13 + $0xec] ss:$16 sps:$4 sm:$0xff]  }
 0xf41   :  { %17540 = vmatprep.subr.bf16.mxu1 %v18419_v28  ;;  %8193 = vmatprep.subr.bf16.mxu0 %v18454_v14 }
 0xf42   :  { %8194 = vmatpush1.bf16.msra.mxu0 %v18452_v1  ;;  %v18517_v1 = vld [vmem:[#allocation13 + $0x324] ss:$16 sps:$4 sm:$0xff]  }
 0xf43   :  { %8228 = vmatprep.subr.bf16.mxu0 %v18460_v50  ;;  %v18515_v50 = vld [vmem:[#allocation13 + $0x320] ss:$16 sps:$4 sm:$0xff]  }
 0xf44   :  { %17541 = vmatpush3.bf16.msra.mxu1 %v18419_v28  ;;  %v18481_v28 = vld [vmem:[#allocation13 + $0x264] ss:$16 sps:$4 sm:$0xff]  }
 0xf45   :  { %17542 = vmatprep.subr.bf16.mxu1 %v18420_v16 }
 0xf48   :  { %17543 = vmatpush3.bf16.msra.mxu1 %v18420_v16  ;;  %v18476_v16 = vld [vmem:[#allocation13 + $0xe8] ss:$16 sps:$4 sm:$0xff]  }
 0xf49   :  { %17544 = vmatprep.subr.bf16.mxu1 %v18421_v7 }
 0xf4c   :  { %17545 = vmatpush3.bf16.msra.mxu1 %v18421_v7  ;;  %v18479_v7 = vld [vmem:[#allocation13 + $0x260] ss:$16 sps:$4 sm:$0xff]  }
 0xf4d   :  { %17558 = vmatprep.subr.bf16.mxu1 %v18422_v47 }
 0xf4f   :  { %17547 = vmatmul.mubr.msk.bf16.vlgmr.msra.gmra.mrb[112].mxu1 %vm6771_vm3, %v7469_v60 }
 0xf50   :  { %17559 = vmatpush3.bf16.msra.mxu1 %v18422_v47  ;;  %17566 = vmatprep.mubr.msk.bf16.mxu1 %vm6771_vm3, %v7632_v25  ;;  %v18484_v47 = vld [vmem:[#allocation13 + $0x4] ss:$16 sps:$4 sm:$0xff]  }
 0xf51   :  { %17560 = vmatprep.subr.bf16.mxu1 %v18423_v43 }
 0xf54   :  { %17561 = vmatpush3.bf16.msra.mxu1 %v18423_v43  ;;  %v18487_v43 = vld [vmem:[#allocation13 + $0x284] ss:$16 sps:$4 sm:$0xff]  }
 0xf55   :  { %17562 = vmatprep.subr.bf16.mxu1 %v18424_v52 }
 0xf58   :  { %17563 = vmatpush3.bf16.msra.mxu1 %v18424_v52 }
 0xf59   :  { %17564 = vmatprep.subr.bf16.mxu1 %v18425_v6 }
 0xf5c   :  { %17565 = vmatpush3.bf16.msra.mxu1 %v18425_v6  ;;  %v18482_v6 = vld [vmem:[#allocation13] ss:$16 sps:$4 sm:$0xff]  }
 0xf5d   :  { %17578 = vmatprep.subr.bf16.mxu1 %v18426_v36 }
 0xf5f   :  { %17567 = vmatmul.mubr.msk.bf16.vlgmr.msra.gmra.mrb[112].mxu1 %vm6771_vm3, %v7633_v44 }
 0xf60   :  { %17579 = vmatpush3.bf16.msra.mxu1 %v18426_v36  ;;  %17586 = vmatprep.mubr.msk.bf16.mxu1 %vm6771_vm3, %v7796_v56  ;;  %v18485_v36 = vld [vmem:[#allocation13 + $0x280] ss:$16 sps:$4 sm:$0xff]  }
 0xf61   :  { %17580 = vmatprep.subr.bf16.mxu1 %v18427_v57 }
 0xf64   :  { %17581 = vmatpush3.bf16.msra.mxu1 %v18427_v57  ;;  %v18490_v57 = vld [vmem:[#allocation13 + $0x24] ss:$16 sps:$4 sm:$0xff]  }
 0xf65   :  { %17582 = vmatprep.subr.bf16.mxu1 %v18428_v8 }
 0xf68   :  { %17583 = vmatpush3.bf16.msra.mxu1 %v18428_v8 }
 0xf69   :  { %17584 = vmatprep.subr.bf16.mxu1 %v18429_v58 }
 0xf6c   :  { %17585 = vmatpush3.bf16.msra.mxu1 %v18429_v58  ;;  %v18493_v58 = vld [vmem:[#allocation13 + $0x2a4] ss:$16 sps:$4 sm:$0xff]  }
 0xf6d   :  { %17598 = vmatprep.subr.bf16.mxu1 %v18430_v17 }
 0xf6f   :  { %17587 = vmatmul.mubr.msk.bf16.vlgmr.msra.gmra.mrb[112].mxu1 %vm6771_vm3, %v7797_v53  ;;  %v18461_v53 = vld [vmem:[#allocation13 + $0x200] ss:$16 sps:$4 sm:$0xff]  }
 0xf70   :  { %17599 = vmatpush3.bf16.msra.mxu1 %v18430_v17  ;;  %17606 = vmatprep.mubr.msk.bf16.mxu1 %vm6771_vm3, %v7960_v27  ;;  %v18470_v27 = vld [vmem:[#allocation13 + $0xc8] ss:$16 sps:$4 sm:$0xff]   ;;  %v18488_v17 = vld [vmem:[#allocation13 + $0x20] ss:$16 sps:$4 sm:$0xff]  }
 0xf71   :  { %17600 = vmatprep.subr.bf16.mxu1 %v18431_v5 }
 0xf74   :  { %17601 = vmatpush3.bf16.msra.mxu1 %v18431_v5  ;;  %v18491_v5 = vld [vmem:[#allocation13 + $0x2a0] ss:$16 sps:$4 sm:$0xff]  }
 0xf75   :  { %17602 = vmatprep.subr.bf16.mxu1 %v18432_v24 }
 0xf78   :  { %17603 = vmatpush3.bf16.msra.mxu1 %v18432_v24  ;;  %v18496_v24 = vld [vmem:[#allocation13 + $0x44] ss:$16 sps:$4 sm:$0xff]  }
 0xf79   :  { %17604 = vmatprep.subr.bf16.mxu1 %v18433_v9 }
 0xf7c   :  { %17605 = vmatpush3.bf16.msra.mxu1 %v18433_v9  ;;  %v18499_v9 = vld [vmem:[#allocation13 + $0x2c4] ss:$16 sps:$4 sm:$0xff]  }
 0xf7d   :  { %8726 = vmatprep.subr.bf16.mxu1 %v18439_v2  ;;  %v18497_v2 = vld [vmem:[#allocation13 + $0x2c0] ss:$16 sps:$4 sm:$0xff]  }
 0xf7f   :  { %17607 = vmatmul.mubr.msk.bf16.vlgmr.msra.gmra.mrb[112].mxu1 %vm6771_vm3, %v7961_v10  ;;  %v18472_v10 = vld [vmem:[#allocation13 + $0xcc] ss:$16 sps:$4 sm:$0xff]  }
 0xf80   :  { %8727 = vmatpush1.bf16.msra.mxu1 %v18437_v59  ;;  %8758 = vmatprep.mubr.bf16.mxu1 %v19768_v21  ;;  %v18505_v59 = vld [vmem:[#allocation13 + $0x2e4] ss:$16 sps:$4 sm:$0xff]  }
 0xf81   :  { %8728 = vmatprep.subr.bf16.mxu1 %v18445_v51  ;;  %v18503_v51 = vld [vmem:[#allocation13 + $0x2e0] ss:$16 sps:$4 sm:$0xff]  }
 0xf84   :  { %8729 = vmatpush1.bf16.msra.mxu1 %v18443_v63  ;;  %v18511_v63 = vld [vmem:[#allocation13 + $0x304] ss:$16 sps:$4 sm:$0xff]  }
 0xf85   :  { %8730 = vmatprep.subr.bf16.mxu1 %v18451_v54  ;;  %v18506_v54 = vld [vmem:[#allocation13 + $0x8] ss:$16 sps:$4 sm:$0xff]  }
 0xf88   :  { %8731 = vmatpush1.bf16.msra.mxu1 %v18449_v55  ;;  %v18514_v55 = vld [vmem:[#allocation13 + $0x2c] ss:$16 sps:$4 sm:$0xff]  }
 0xf89   :  { %8732 = vmatprep.subr.bf16.mxu1 %v18457_v33 }
 0xf8c   :  { %8733 = vmatpush1.bf16.msra.mxu1 %v18455_v12  ;;  %v18512_v12 = vld [vmem:[#allocation13 + $0x28] ss:$16 sps:$4 sm:$0xff]  }
 0xf8d   :  { %8915 = vmatprep.subr.bf16.mxu1 %v18463_v19  ;;  %v18520_v19 = vld [vmem:[#allocation13 + $0x4c] ss:$16 sps:$4 sm:$0xff]  }
0x1052   :  { %v17608_v60 = vpop.f32.mrb[112].mxu1 }
0x1053   :  { %v8057_v49 = vadd.f32 %v17608_v60, %v8054_v4  ;;  %v8035_v0 = vpop.f32.mrb[113].mxu1  ;;  %v18518_v60 = vld [vmem:[#allocation13 + $0x48] ss:$16 sps:$4 sm:$0xff]  }
0x1054   :  { %v8055_v32 = vadd.f32 %v8054_v4, %v8035_v0  ;;  %v17609_v46 = vpop.f32.mrb[114].mxu1  ;;  %v18526_v0 = vld [vmem:[#allocation13 + $0x6c] ss:$16 sps:$4 sm:$0xff]  }
0x1055   :  { %v8058_v30 = vadd.f32 %v17609_v46, %v8054_v4  ;;  %v8038_v18 = vpop.f32.mrb[115].mxu1  ;;  %v8061_v44 = vmax.f32 %v8057_v49, 0.0  ;;  %v18521_v49 = vld [vmem:[#allocation13 + $0x340] ss:$16 sps:$4 sm:$0xff]   ;;  %v18524_v46 = vld [vmem:[#allocation13 + $0x68] ss:$16 sps:$4 sm:$0xff]  }
0x1056   :  { %v8056_v40 = vadd.f32 %v8054_v4, %v8038_v18  ;;  %v8059_v25 = vmax.f32 %v8055_v32, 0.0  ;;  %v18523_v4 = vld [vmem:[#allocation13 + $0x344] ss:$16 sps:$4 sm:$0xff]  }
0x1057   :  { %v8062_v62 = vmax.f32 %v8058_v30, 0.0  ;;  %v18529_v32 = vld [vmem:[#allocation13 + $0x364] ss:$16 sps:$4 sm:$0xff]   ;;  %v18527_v30 = vld [vmem:[#allocation13 + $0x360] ss:$16 sps:$4 sm:$0xff]  }
0x1058   :  { %v8060_v35 = vmax.f32 %v8056_v40, 0.0  ;;  %v18532_v18 = vld [vmem:[#allocation13 + $0x104] ss:$16 sps:$4 sm:$0xff]  }
0x1059   :  { %v8064_v3 = vpack.c.bf16 %v8062_v62, %v8061_v44  ;;  %v18535_v40 = vld [vmem:[#allocation13 + $0x384] ss:$16 sps:$4 sm:$0xff]   ;;  %v18530_v62 = vld [vmem:[#allocation13 + $0x100] ss:$16 sps:$4 sm:$0xff]  }
0x105a   :  { %v8063_v38 = vpack.c.bf16 %v8060_v35, %v8059_v25  ;;  %v18533_v25 = vld [vmem:[#allocation13 + $0x380] ss:$16 sps:$4 sm:$0xff]   ;;  %v18538_v35 = vld [vmem:[#allocation13 + $0x124] ss:$16 sps:$4 sm:$0xff]  }
0x105b   :  { %8066 = vst.msk [vmem:[#allocation2 + $0x8] sm:$0xff] %vm6771_vm3, %v8064_v3 }
0x105c   :  { %8065 = vst.msk [vmem:[#allocation2] sm:$0xff] %vm6771_vm3, %v8063_v38  ;;  %v18541_v38 = vld [vmem:[#allocation13 + $0x3a4] ss:$16 sps:$4 sm:$0xff]  }
0x1063   :  { %v8084_v26 = vld [vmem:[#allocation2] sm:$0x2]  ;;  %v21829_v56 = vld [vmem:[#allocation2] sm:$0x8]  ;;  %v21838_v52 = vld [vmem:[#allocation2] sm:$0x10] }
0x1064   :  { %v8103_v37 = vrot.slane %v8084_v26, 1  ;;  %v8642_v22 = vrot.slane %v21829_v56, 3  ;;  %v8831_v8 = vrot.slane %v21838_v52, 4  ;;  %v21847_v23 = vld [vmem:[#allocation2] sm:$0x20] }
0x1065   :  { %v9020_v14 = vrot.slane %v21847_v23, 5  ;;  %v8067_v33 = vld [vmem:[#allocation2] sm:$0x1]  ;;  %v21856_v44 = vld [vmem:[#allocation2] sm:$0x40] }
0x1066   :  { %14829 = vmatmul.mubr.msk.bf16.vlgmr.msra.gmra.mrb[44].mxu0 %vm6771_vm3, %v8103_v37  ;;  %14883 = vmatmul.mubr.msk.bf16.vlgmr.msra.gmra.mrb[116].mxu1 %vm6771_vm3, %v8642_v22  ;;  %v9209_v3 = vrot.slane %v21856_v44, 6  ;;  %v18536_v26 = vld [vmem:[#allocation13 + $0x120] ss:$16 sps:$4 sm:$0xff]   ;;  %v18614_v56 = vld [vmem:[#allocation13 + $0x248] ss:$16 sps:$4 sm:$0xff]  }
0x1067   :  { %8229 = vmatpush1.bf16.msra.mxu0 %v18458_v41  ;;  %8916 = vmatpush1.bf16.msra.mxu1 %v18461_v53  ;;  %v18539_v41 = vld [vmem:[#allocation13 + $0x3a0] ss:$16 sps:$4 sm:$0xff]   ;;  %v18544_v53 = vld [vmem:[#allocation13 + $0x144] ss:$16 sps:$4 sm:$0xff]   ;;  %v18638_v52 = vld [vmem:[#allocation13 + $0x2c8] ss:$16 sps:$4 sm:$0xff]  }
0x1068   :  { %8230 = vmatprep.subr.bf16.mxu0 %v18466_v15  ;;  %8917 = vmatprep.subr.bf16.mxu1 %v18469_v39  ;;  %v18542_v15 = vld [vmem:[#allocation13 + $0x140] ss:$16 sps:$4 sm:$0xff]   ;;  %v18662_v23 = vld [vmem:[#allocation13 + $0x348] ss:$16 sps:$4 sm:$0xff]  }
0x1069   :  { %8260 = vmatprep.mubr.bf16.mxu0 %v19768_v21  ;;  %8947 = vmatprep.mubr.bf16.mxu1 %v19768_v21  ;;  %v18545_v39 = vld [vmem:[#allocation13 + $0x3c0] ss:$16 sps:$4 sm:$0xff]   ;;  %v18686_v44 = vld [vmem:[#allocation13 + $0x3c8] ss:$16 sps:$4 sm:$0xff]  }
0x106b   :  { %8231 = vmatpush1.bf16.msra.mxu0 %v18464_v11  ;;  %8918 = vmatpush1.bf16.msra.mxu1 %v18467_v42  ;;  %v18550_v11 = vld [vmem:[#allocation13 + $0x164] ss:$16 sps:$4 sm:$0xff]  }
0x106c   :  { %8232 = vmatprep.subr.bf16.mxu0 %v18472_v10  ;;  %8919 = vmatprep.subr.bf16.mxu1 %v18475_v20  ;;  %v18553_v42 = vld [vmem:[#allocation13 + $0x3e4] ss:$16 sps:$4 sm:$0xff]   ;;  %v18548_v10 = vld [vmem:[#allocation13 + $0x160] ss:$16 sps:$4 sm:$0xff]  }
0x106d   :  { %v18551_v20 = vld [vmem:[#allocation13 + $0x3e0] ss:$16 sps:$4 sm:$0xff]  }
0x106f   :  { %8233 = vmatpush1.bf16.msra.mxu0 %v18470_v27  ;;  %8920 = vmatpush1.bf16.msra.mxu1 %v18473_v31  ;;  %v18556_v27 = vld [vmem:[#allocation13 + $0x10c] ss:$16 sps:$4 sm:$0xff]   ;;  %v8434_v31 = vld [vmem:[#allocation2] sm:$0x4] }
0x1070   :  { %8234 = vmatprep.subr.bf16.mxu0 %v18478_v13  ;;  %8921 = vmatprep.subr.bf16.mxu1 %v18481_v28  ;;  %v18559_v13 = vld [vmem:[#allocation13 + $0x404] ss:$16 sps:$4 sm:$0xff]  }
0x1071   :  { %v21865_v28 = vld [vmem:[#allocation2] sm:$0x80] }
0x1073   :  { %8235 = vmatpush1.bf16.msra.mxu0 %v18476_v16  ;;  %8922 = vmatpush1.bf16.msra.mxu1 %v18479_v7  ;;  %v18554_v16 = vld [vmem:[#allocation13 + $0x108] ss:$16 sps:$4 sm:$0xff]   ;;  %v8453_v7 = vrot.slane %v8434_v31, 2 }
0x1074   :  { %8352 = vmatprep.subr.bf16.mxu0 %v18484_v47  ;;  %9104 = vmatprep.subr.bf16.mxu1 %v18487_v43  ;;  %v18557_v47 = vld [vmem:[#allocation13 + $0x400] ss:$16 sps:$4 sm:$0xff]   ;;  %v18562_v43 = vld [vmem:[#allocation13 + $0x12c] ss:$16 sps:$4 sm:$0xff]   ;;  %v18626_v31 = vld [vmem:[#allocation13 + $0x288] ss:$16 sps:$4 sm:$0xff]  }
0x1076   :  { %14830 = vmatmul.mubr.msk.bf16.vlgmr.msra.gmra.mrb[48].mxu0 %vm6771_vm3, %v8103_v37  ;;  %14901 = vmatmul.mubr.msk.bf16.vlgmr.msra.gmra.mrb[120].mxu1 %vm6771_vm3, %v8831_v8  ;;  %v18547_v37 = vld [vmem:[#allocation13 + $0x3c4] ss:$16 sps:$4 sm:$0xff]  }
0x1077   :  { %8353 = vmatpush1.bf16.msra.mxu0 %v18482_v6  ;;  %9105 = vmatpush1.bf16.msra.mxu1 %v18485_v36  ;;  %v9398_v6 = vrot.slane %v21865_v28, 7  ;;  %v18565_v36 = vld [vmem:[#allocation13 + $0x424] ss:$16 sps:$4 sm:$0xff]   ;;  %v18710_v28 = vld [vmem:[#allocation13 + $0x448] ss:$16 sps:$4 sm:$0xff]  }
0x1078   :  { %8354 = vmatprep.subr.bf16.mxu0 %v18490_v57  ;;  %9106 = vmatprep.subr.bf16.mxu1 %v18493_v58  ;;  %v18560_v57 = vld [vmem:[#allocation13 + $0x128] ss:$16 sps:$4 sm:$0xff]   ;;  %v18563_v58 = vld [vmem:[#allocation13 + $0x420] ss:$16 sps:$4 sm:$0xff]  }
0x1079   :  { %8384 = vmatprep.mubr.bf16.mxu0 %v19768_v21  ;;  %9136 = vmatprep.mubr.bf16.mxu1 %v19768_v21 }
0x107b   :  { %8355 = vmatpush1.bf16.msra.mxu0 %v18488_v17  ;;  %9107 = vmatpush1.bf16.msra.mxu1 %v18491_v5  ;;  %v18568_v17 = vld [vmem:[#allocation13 + $0x14c] ss:$16 sps:$4 sm:$0xff]   ;;  %v18571_v5 = vld [vmem:[#allocation13 + $0x444] ss:$16 sps:$4 sm:$0xff]  }
0x107c   :  { %8356 = vmatprep.subr.bf16.mxu0 %v18496_v24  ;;  %9108 = vmatprep.subr.bf16.mxu1 %v18499_v9  ;;  %v18566_v24 = vld [vmem:[#allocation13 + $0x148] ss:$16 sps:$4 sm:$0xff]   ;;  %v18569_v9 = vld [vmem:[#allocation13 + $0x440] ss:$16 sps:$4 sm:$0xff]  }
0x107f   :  { %8357 = vmatpush1.bf16.msra.mxu0 %v18494_v29  ;;  %9109 = vmatpush1.bf16.msra.mxu1 %v18497_v2  ;;  %v18574_v29 = vld [vmem:[#allocation13 + $0x16c] ss:$16 sps:$4 sm:$0xff]   ;;  %v18577_v2 = vld [vmem:[#allocation13 + $0x464] ss:$16 sps:$4 sm:$0xff]  }
0x1080   :  { %8358 = vmatprep.subr.bf16.mxu0 %v18502_v45  ;;  %9110 = vmatprep.subr.bf16.mxu1 %v18505_v59  ;;  %v18572_v45 = vld [vmem:[#allocation13 + $0x168] ss:$16 sps:$4 sm:$0xff]   ;;  %v18575_v59 = vld [vmem:[#allocation13 + $0x460] ss:$16 sps:$4 sm:$0xff]  }
0x1083   :  { %8359 = vmatpush1.bf16.msra.mxu0 %v18500_v61  ;;  %9111 = vmatpush1.bf16.msra.mxu1 %v18503_v51  ;;  %v18580_v61 = vld [vmem:[#allocation13 + $0x18c] ss:$16 sps:$4 sm:$0xff]   ;;  %v18583_v51 = vld [vmem:[#allocation13 + $0x484] ss:$16 sps:$4 sm:$0xff]  }
0x1084   :  { %8393 = vmatprep.subr.bf16.mxu0 %v18508_v34  ;;  %9293 = vmatprep.subr.bf16.mxu1 %v18511_v63  ;;  %v18578_v34 = vld [vmem:[#allocation13 + $0x188] ss:$16 sps:$4 sm:$0xff]   ;;  %v18581_v63 = vld [vmem:[#allocation13 + $0x480] ss:$16 sps:$4 sm:$0xff]  }
0x1086   :  { %14847 = vmatmul.mubr.msk.bf16.vlgmr.msra.gmra.mrb[52].mxu0 %vm6771_vm3, %v8067_v33  ;;  %14919 = vmatmul.mubr.msk.bf16.vlgmr.msra.gmra.mrb[124].mxu1 %vm6771_vm3, %v9020_v14 }
0x1087   :  { %8394 = vmatpush1.bf16.msra.mxu0 %v18506_v54  ;;  %9294 = vmatpush1.bf16.msra.mxu1 %v18509_v48  ;;  %v18586_v54 = vld [vmem:[#allocation13 + $0x1ac] ss:$16 sps:$4 sm:$0xff]   ;;  %v18589_v48 = vld [vmem:[#allocation13 + $0x4a4] ss:$16 sps:$4 sm:$0xff]  }
0x1088   :  { %8395 = vmatprep.subr.bf16.mxu0 %v18514_v55  ;;  %9295 = vmatprep.subr.bf16.mxu1 %v18517_v1  ;;  %v21875_v55 = vld [vmem:[#allocation2 + $0x8] sm:$0x1]  ;;  %v18587_v1 = vld [vmem:[#allocation13 + $0x4a0] ss:$16 sps:$4 sm:$0xff]  }
0x1089   :  { %8425 = vmatprep.mubr.bf16.mxu0 %v19768_v21  ;;  %9325 = vmatprep.mubr.bf16.mxu1 %v19768_v21 }
0x108b   :  { %8396 = vmatpush1.bf16.msra.mxu0 %v18512_v12  ;;  %9296 = vmatpush1.bf16.msra.mxu1 %v18515_v50  ;;  %v18592_v12 = vld [vmem:[#allocation13 + $0x1cc] ss:$16 sps:$4 sm:$0xff]   ;;  %v18595_v50 = vld [vmem:[#allocation13 + $0x4c4] ss:$16 sps:$4 sm:$0xff]  }
0x108c   :  { %8397 = vmatprep.subr.bf16.mxu0 %v18520_v19  ;;  %9297 = vmatprep.subr.bf16.mxu1 %v18523_v4  ;;  %v18590_v19 = vld [vmem:[#allocation13 + $0x1c8] ss:$16 sps:$4 sm:$0xff]   ;;  %v18593_v4 = vld [vmem:[#allocation13 + $0x4c0] ss:$16 sps:$4 sm:$0xff]  }
0x108f   :  { %8398 = vmatpush1.bf16.msra.mxu0 %v18518_v60  ;;  %9298 = vmatpush1.bf16.msra.mxu1 %v18521_v49  ;;  %v18598_v60 = vld [vmem:[#allocation13 + $0x1ec] ss:$16 sps:$4 sm:$0xff]   ;;  %v18601_v49 = vld [vmem:[#allocation13 + $0x4e4] ss:$16 sps:$4 sm:$0xff]  }
0x1090   :  { %8399 = vmatprep.subr.bf16.mxu0 %v18526_v0  ;;  %9299 = vmatprep.subr.bf16.mxu1 %v18529_v32  ;;  %v18596_v0 = vld [vmem:[#allocation13 + $0x1e8] ss:$16 sps:$4 sm:$0xff]   ;;  %v18599_v32 = vld [vmem:[#allocation13 + $0x4e0] ss:$16 sps:$4 sm:$0xff]  }
0x1093   :  { %8400 = vmatpush1.bf16.msra.mxu0 %v18524_v46  ;;  %9300 = vmatpush1.bf16.msra.mxu1 %v18527_v30  ;;  %v18604_v46 = vld [vmem:[#allocation13 + $0x20c] ss:$16 sps:$4 sm:$0xff]   ;;  %v18607_v30 = vld [vmem:[#allocation13 + $0x504] ss:$16 sps:$4 sm:$0xff]  }
0x1094   :  { %8537 = vmatprep.subr.bf16.mxu0 %v18532_v18  ;;  %9482 = vmatprep.subr.bf16.mxu1 %v18535_v40  ;;  %v21881_v18 = vld [vmem:[#allocation2 + $0x8] sm:$0x2]  ;;  %v18602_v40 = vld [vmem:[#allocation13 + $0x208] ss:$16 sps:$4 sm:$0xff]  }
0x1096   :  { %14848 = vmatmul.mubr.msk.bf16.vlgmr.msra.gmra.mrb[56].mxu0 %vm6771_vm3, %v8067_v33  ;;  %14937 = vmatmul.mubr.msk.bf16.vlgmr.msra.gmra.mrb[128].mxu1 %vm6771_vm3, %v9209_v3  ;;  %v18584_v33 = vld [vmem:[#allocation13 + $0x1a8] ss:$16 sps:$4 sm:$0xff]  }
0x1097   :  { %8538 = vmatpush1.bf16.msra.mxu0 %v18530_v62  ;;  %9483 = vmatpush1.bf16.msra.mxu1 %v18533_v25  ;;  %v18605_v62 = vld [vmem:[#allocation13 + $0x500] ss:$16 sps:$4 sm:$0xff]   ;;  %v18610_v25 = vld [vmem:[#allocation13 + $0x22c] ss:$16 sps:$4 sm:$0xff]  }
0x1098   :  { %8539 = vmatprep.subr.bf16.mxu0 %v18538_v35  ;;  %9484 = vmatprep.subr.bf16.mxu1 %v18541_v38  ;;  %v9774_v35 = vrot.slane %v21881_v18, 1  ;;  %v18613_v38 = vld [vmem:[#allocation13 + $0x524] ss:$16 sps:$4 sm:$0xff]   ;;  %v18760_v18 = vld [vmem:[#allocation13 + $0x58c] ss:$16 sps:$4 sm:$0xff]  }
0x1099   :  { %8569 = vmatprep.mubr.bf16.mxu0 %v19768_v21  ;;  %9514 = vmatprep.mubr.bf16.mxu1 %v19768_v21 }
0x109b   :  { %8540 = vmatpush1.bf16.msra.mxu0 %v18536_v26  ;;  %9485 = vmatpush1.bf16.msra.mxu1 %v18539_v41  ;;  %v18608_v26 = vld [vmem:[#allocation13 + $0x228] ss:$16 sps:$4 sm:$0xff]   ;;  %v18611_v41 = vld [vmem:[#allocation13 + $0x520] ss:$16 sps:$4 sm:$0xff]  }
0x109c   :  { %8541 = vmatprep.subr.bf16.mxu0 %v18544_v53  ;;  %9486 = vmatprep.subr.bf16.mxu1 %v18547_v37  ;;  %v18616_v53 = vld [vmem:[#allocation13 + $0x24c] ss:$16 sps:$4 sm:$0xff]   ;;  %v18619_v37 = vld [vmem:[#allocation13 + $0x544] ss:$16 sps:$4 sm:$0xff]  }
0x109f   :  { %8542 = vmatpush1.bf16.msra.mxu0 %v18542_v15  ;;  %9487 = vmatpush1.bf16.msra.mxu1 %v18545_v39  ;;  %v18622_v15 = vld [vmem:[#allocation13 + $0x26c] ss:$16 sps:$4 sm:$0xff]   ;;  %v18625_v39 = vld [vmem:[#allocation13 + $0x564] ss:$16 sps:$4 sm:$0xff]  }
0x10a0   :  { %8543 = vmatprep.subr.bf16.mxu0 %v18550_v11  ;;  %9488 = vmatprep.subr.bf16.mxu1 %v18553_v42  ;;  %v18620_v11 = vld [vmem:[#allocation13 + $0x268] ss:$16 sps:$4 sm:$0xff]   ;;  %v18623_v42 = vld [vmem:[#allocation13 + $0x560] ss:$16 sps:$4 sm:$0xff]  }
0x10a3   :  { %8544 = vmatpush1.bf16.msra.mxu0 %v18548_v10  ;;  %9489 = vmatpush1.bf16.msra.mxu1 %v18551_v20  ;;  %v18628_v10 = vld [vmem:[#allocation13 + $0x28c] ss:$16 sps:$4 sm:$0xff]   ;;  %v18631_v20 = vld [vmem:[#allocation13 + $0x584] ss:$16 sps:$4 sm:$0xff]  }
0x10a4   :  { %8578 = vmatprep.subr.bf16.mxu0 %v18556_v27  ;;  %9669 = vmatprep.subr.bf16.mxu1 %v18559_v13  ;;  %v21892_v27 = vld [vmem:[#allocation2 + $0x8] sm:$0x4]  ;;  %v18629_v13 = vld [vmem:[#allocation13 + $0x580] ss:$16 sps:$4 sm:$0xff]  }
0x10a6   :  { %14865 = vmatmul.mubr.msk.bf16.vlgmr.msra.gmra.mrb[60].mxu0 %vm6771_vm3, %v8453_v7  ;;  %14955 = vmatmul.mubr.msk.bf16.vlgmr.msra.gmra.mrb[132].mxu1 %vm6771_vm3, %v9398_v6 }
0x10a7   :  { %8579 = vmatpush1.bf16.msra.mxu0 %v18554_v16  ;;  %9670 = vmatpush1.bf16.msra.mxu1 %v18557_v47  ;;  %v18634_v16 = vld [vmem:[#allocation13 + $0x2ac] ss:$16 sps:$4 sm:$0xff]   ;;  %v18637_v47 = vld [vmem:[#allocation13 + $0x5a4] ss:$16 sps:$4 sm:$0xff]  }
0x10a8   :  { %8580 = vmatprep.subr.bf16.mxu0 %v18562_v43  ;;  %9671 = vmatprep.subr.bf16.mxu1 %v18565_v36  ;;  %v18632_v43 = vld [vmem:[#allocation13 + $0x2a8] ss:$16 sps:$4 sm:$0xff]   ;;  %v18635_v36 = vld [vmem:[#allocation13 + $0x5a0] ss:$16 sps:$4 sm:$0xff]  }
0x10a9   :  { %8610 = vmatprep.mubr.bf16.mxu0 %v19768_v21  ;;  %9701 = vmatprep.mubr.bf16.mxu1 %v19768_v21 }
0x10ab   :  { %8581 = vmatpush1.bf16.msra.mxu0 %v18560_v57  ;;  %9672 = vmatpush1.bf16.msra.mxu1 %v18563_v58  ;;  %v18640_v57 = vld [vmem:[#allocation13 + $0x2cc] ss:$16 sps:$4 sm:$0xff]   ;;  %v18643_v58 = vld [vmem:[#allocation13 + $0x5c4] ss:$16 sps:$4 sm:$0xff]  }
0x10ac   :  { %8582 = vmatprep.subr.bf16.mxu0 %v18568_v17  ;;  %9673 = vmatprep.subr.bf16.mxu1 %v18571_v5  ;;  %v18646_v17 = vld [vmem:[#allocation13 + $0x2ec] ss:$16 sps:$4 sm:$0xff]   ;;  %v18649_v5 = vld [vmem:[#allocation13 + $0x5e4] ss:$16 sps:$4 sm:$0xff]  }
0x10af   :  { %8583 = vmatpush1.bf16.msra.mxu0 %v18566_v24  ;;  %9674 = vmatpush1.bf16.msra.mxu1 %v18569_v9  ;;  %v18644_v24 = vld [vmem:[#allocation13 + $0x2e8] ss:$16 sps:$4 sm:$0xff]   ;;  %v18647_v9 = vld [vmem:[#allocation13 + $0x5e0] ss:$16 sps:$4 sm:$0xff]  }
0x10b0   :  { %8584 = vmatprep.subr.bf16.mxu0 %v18574_v29  ;;  %9675 = vmatprep.subr.bf16.mxu1 %v18577_v2  ;;  %v18652_v29 = vld [vmem:[#allocation13 + $0x30c] ss:$16 sps:$4 sm:$0xff]   ;;  %v18655_v2 = vld [vmem:[#allocation13 + $0x604] ss:$16 sps:$4 sm:$0xff]  }
0x10b3   :  { %8585 = vmatpush1.bf16.msra.mxu0 %v18572_v45  ;;  %9676 = vmatpush1.bf16.msra.mxu1 %v18575_v59  ;;  %v21903_v45 = vld [vmem:[#allocation2 + $0x8] sm:$0x8] }
0x10b4   :  { %8767 = vmatprep.subr.bf16.mxu0 %v18580_v61  ;;  %9858 = vmatprep.subr.bf16.mxu1 %v18583_v51  ;;  %v18650_v59 = vld [vmem:[#allocation13 + $0x308] ss:$16 sps:$4 sm:$0xff]   ;;  %v18653_v61 = vld [vmem:[#allocation13 + $0x600] ss:$16 sps:$4 sm:$0xff]   ;;  %v18658_v51 = vld [vmem:[#allocation13 + $0x32c] ss:$16 sps:$4 sm:$0xff]  }
0x10b6   :  { %14866 = vmatmul.mubr.msk.bf16.vlgmr.msra.gmra.mrb[64].mxu0 %vm6771_vm3, %v8453_v7  ;;  %14973 = vmatmul.mubr.msk.bf16.vlgmr.msra.gmra.mrb[136].mxu1 %vm6771_vm3, %v21875_v55  ;;  %v9963_v7 = vrot.slane %v21892_v27, 2 }
0x10b7   :  { %8768 = vmatpush1.bf16.msra.mxu0 %v18578_v34  ;;  %9859 = vmatpush1.bf16.msra.mxu1 %v18581_v63  ;;  %v10152_v34 = vrot.slane %v21903_v45, 3  ;;  %v18661_v63 = vld [vmem:[#allocation13 + $0x624] ss:$16 sps:$4 sm:$0xff]   ;;  %v18781_v45 = vld [vmem:[#allocation13 + $0x66c] ss:$16 sps:$4 sm:$0xff]  }
0x10b8   :  { %8769 = vmatprep.subr.bf16.mxu0 %v18586_v54  ;;  %9860 = vmatprep.subr.bf16.mxu1 %v18589_v48  ;;  %v18656_v54 = vld [vmem:[#allocation13 + $0x328] ss:$16 sps:$4 sm:$0xff]   ;;  %v18659_v48 = vld [vmem:[#allocation13 + $0x620] ss:$16 sps:$4 sm:$0xff]  }
0x10b9   :  { %8799 = vmatprep.mubr.bf16.mxu0 %v19768_v21  ;;  %9890 = vmatprep.mubr.bf16.mxu1 %v19768_v21 }
0x10bb   :  { %8770 = vmatpush1.bf16.msra.mxu0 %v18584_v33  ;;  %9861 = vmatpush1.bf16.msra.mxu1 %v18587_v1  ;;  %v18664_v33 = vld [vmem:[#allocation13 + $0x34c] ss:$16 sps:$4 sm:$0xff]   ;;  %v18667_v1 = vld [vmem:[#allocation13 + $0x644] ss:$16 sps:$4 sm:$0xff]  }
0x10bc   :  { %8771 = vmatprep.subr.bf16.mxu0 %v18592_v12  ;;  %9862 = vmatprep.subr.bf16.mxu1 %v18595_v50  ;;  %v18670_v12 = vld [vmem:[#allocation13 + $0x36c] ss:$16 sps:$4 sm:$0xff]   ;;  %v18673_v50 = vld [vmem:[#allocation13 + $0x664] ss:$16 sps:$4 sm:$0xff]  }
0x10bf   :  { %8772 = vmatpush1.bf16.msra.mxu0 %v18590_v19  ;;  %9863 = vmatpush1.bf16.msra.mxu1 %v18593_v4  ;;  %v18668_v19 = vld [vmem:[#allocation13 + $0x368] ss:$16 sps:$4 sm:$0xff]   ;;  %v18671_v4 = vld [vmem:[#allocation13 + $0x660] ss:$16 sps:$4 sm:$0xff]  }
0x10c0   :  { %8773 = vmatprep.subr.bf16.mxu0 %v18598_v60  ;;  %9864 = vmatprep.subr.bf16.mxu1 %v18601_v49  ;;  %v18676_v60 = vld [vmem:[#allocation13 + $0x38c] ss:$16 sps:$4 sm:$0xff]   ;;  %v18679_v49 = vld [vmem:[#allocation13 + $0x684] ss:$16 sps:$4 sm:$0xff]  }
0x10c3   :  { %8774 = vmatpush1.bf16.msra.mxu0 %v18596_v0  ;;  %9865 = vmatpush1.bf16.msra.mxu1 %v18599_v32  ;;  %v21914_v0 = vld [vmem:[#allocation2 + $0x8] sm:$0x10] }
0x10c4   :  { %8956 = vmatprep.subr.bf16.mxu0 %v18604_v46  ;;  %10047 = vmatprep.subr.bf16.mxu1 %v18607_v30  ;;  %v18674_v32 = vld [vmem:[#allocation13 + $0x388] ss:$16 sps:$4 sm:$0xff]   ;;  %v18677_v46 = vld [vmem:[#allocation13 + $0x680] ss:$16 sps:$4 sm:$0xff]   ;;  %v18682_v30 = vld [vmem:[#allocation13 + $0x3ac] ss:$16 sps:$4 sm:$0xff]  }
0x10c6   :  { %14884 = vmatmul.mubr.msk.bf16.vlgmr.msra.gmra.mrb[84].mxu0 %vm6771_vm3, %v8642_v22  ;;  %14991 = vmatmul.mubr.msk.bf16.vlgmr.msra.gmra.mrb[140].mxu1 %vm6771_vm3, %v9774_v35  ;;  %v18617_v22 = vld [vmem:[#allocation13 + $0x540] ss:$16 sps:$4 sm:$0xff]  }
0x10c7   :  { %8957 = vmatpush1.bf16.msra.mxu0 %v18602_v40  ;;  %10048 = vmatpush1.bf16.msra.mxu1 %v18605_v62  ;;  %v10341_v40 = vrot.slane %v21914_v0, 4  ;;  %v18685_v62 = vld [vmem:[#allocation13 + $0x6a4] ss:$16 sps:$4 sm:$0xff]  }
0x10c8   :  { %8958 = vmatprep.subr.bf16.mxu0 %v18610_v25  ;;  %10049 = vmatprep.subr.bf16.mxu1 %v18613_v38  ;;  %v18680_v25 = vld [vmem:[#allocation13 + $0x3a8] ss:$16 sps:$4 sm:$0xff]   ;;  %v18683_v38 = vld [vmem:[#allocation13 + $0x6a0] ss:$16 sps:$4 sm:$0xff]  }
0x10c9   :  { %8988 = vmatprep.mubr.bf16.mxu0 %v19768_v21  ;;  %10079 = vmatprep.mubr.bf16.mxu1 %v19768_v21 }
0x10cb   :  { %8959 = vmatpush1.bf16.msra.mxu0 %v18608_v26  ;;  %10050 = vmatpush1.bf16.msra.mxu1 %v18611_v41  ;;  %v18688_v26 = vld [vmem:[#allocation13 + $0x3cc] ss:$16 sps:$4 sm:$0xff]   ;;  %v18691_v41 = vld [vmem:[#allocation13 + $0x6c4] ss:$16 sps:$4 sm:$0xff]  }
0x10cc   :  { %8960 = vmatprep.subr.bf16.mxu0 %v18616_v53  ;;  %10051 = vmatprep.subr.bf16.mxu1 %v18619_v37  ;;  %v18694_v53 = vld [vmem:[#allocation13 + $0x3ec] ss:$16 sps:$4 sm:$0xff]   ;;  %v18697_v37 = vld [vmem:[#allocation13 + $0x6e4] ss:$16 sps:$4 sm:$0xff]  }
0x10cf   :  { %8961 = vmatpush1.bf16.msra.mxu0 %v18614_v56  ;;  %10052 = vmatpush1.bf16.msra.mxu1 %v18617_v22  ;;  %v18692_v56 = vld [vmem:[#allocation13 + $0x3e8] ss:$16 sps:$4 sm:$0xff]   ;;  %v18695_v22 = vld [vmem:[#allocation13 + $0x6e0] ss:$16 sps:$4 sm:$0xff]  }
0x10d0   :  { %8962 = vmatprep.subr.bf16.mxu0 %v18622_v15  ;;  %10053 = vmatprep.subr.bf16.mxu1 %v18625_v39  ;;  %v18700_v15 = vld [vmem:[#allocation13 + $0x40c] ss:$16 sps:$4 sm:$0xff]   ;;  %v18703_v39 = vld [vmem:[#allocation13 + $0x704] ss:$16 sps:$4 sm:$0xff]  }
0x10d3   :  { %8963 = vmatpush1.bf16.msra.mxu0 %v18620_v11  ;;  %10054 = vmatpush1.bf16.msra.mxu1 %v18623_v42  ;;  %v21925_v11 = vld [vmem:[#allocation2 + $0x8] sm:$0x20] }
0x10d4   :  { %9145 = vmatprep.subr.bf16.mxu0 %v18628_v10  ;;  %10236 = vmatprep.subr.bf16.mxu1 %v18631_v20  ;;  %v18698_v42 = vld [vmem:[#allocation13 + $0x408] ss:$16 sps:$4 sm:$0xff]   ;;  %v18701_v10 = vld [vmem:[#allocation13 + $0x700] ss:$16 sps:$4 sm:$0xff]   ;;  %v18706_v20 = vld [vmem:[#allocation13 + $0x42c] ss:$16 sps:$4 sm:$0xff]  }
0x10d6   :  { %14902 = vmatmul.mubr.msk.bf16.vlgmr.msra.gmra.mrb[88].mxu0 %vm6771_vm3, %v8831_v8  ;;  %15009 = vmatmul.mubr.msk.bf16.vlgmr.msra.gmra.mrb[144].mxu1 %vm6771_vm3, %v9963_v7  ;;  %v18641_v8 = vld [vmem:[#allocation13 + $0x5c0] ss:$16 sps:$4 sm:$0xff]  }
0x10d7   :  { %9146 = vmatpush1.bf16.msra.mxu0 %v18626_v31  ;;  %10237 = vmatpush1.bf16.msra.mxu1 %v18629_v13  ;;  %v10530_v31 = vrot.slane %v21925_v11, 5  ;;  %v18709_v13 = vld [vmem:[#allocation13 + $0x724] ss:$16 sps:$4 sm:$0xff]  }
0x10d8   :  { %9147 = vmatprep.subr.bf16.mxu0 %v18634_v16  ;;  %10238 = vmatprep.subr.bf16.mxu1 %v18637_v47  ;;  %v18704_v16 = vld [vmem:[#allocation13 + $0x428] ss:$16 sps:$4 sm:$0xff]   ;;  %v18707_v47 = vld [vmem:[#allocation13 + $0x720] ss:$16 sps:$4 sm:$0xff]  }
0x10d9   :  { %9177 = vmatprep.mubr.bf16.mxu0 %v19768_v21  ;;  %10268 = vmatprep.mubr.bf16.mxu1 %v19768_v21 }
0x10db   :  { %9148 = vmatpush1.bf16.msra.mxu0 %v18632_v43  ;;  %10239 = vmatpush1.bf16.msra.mxu1 %v18635_v36  ;;  %v18712_v43 = vld [vmem:[#allocation13 + $0x44c] ss:$16 sps:$4 sm:$0xff]   ;;  %v18715_v36 = vld [vmem:[#allocation13 + $0x744] ss:$16 sps:$4 sm:$0xff]  }
0x10dc   :  { %9149 = vmatprep.subr.bf16.mxu0 %v18640_v57  ;;  %10240 = vmatprep.subr.bf16.mxu1 %v18643_v58  ;;  %v18718_v57 = vld [vmem:[#allocation13 + $0x46c] ss:$16 sps:$4 sm:$0xff]   ;;  %v18721_v58 = vld [vmem:[#allocation13 + $0x764] ss:$16 sps:$4 sm:$0xff]  }
0x10df   :  { %9150 = vmatpush1.bf16.msra.mxu0 %v18638_v52  ;;  %10241 = vmatpush1.bf16.msra.mxu1 %v18641_v8  ;;  %v18716_v52 = vld [vmem:[#allocation13 + $0x468] ss:$16 sps:$4 sm:$0xff]   ;;  %v18719_v8 = vld [vmem:[#allocation13 + $0x760] ss:$16 sps:$4 sm:$0xff]  }
0x10e0   :  { %9151 = vmatprep.subr.bf16.mxu0 %v18646_v17  ;;  %10242 = vmatprep.subr.bf16.mxu1 %v18649_v5  ;;  %v18724_v17 = vld [vmem:[#allocation13 + $0x48c] ss:$16 sps:$4 sm:$0xff]   ;;  %v18727_v5 = vld [vmem:[#allocation13 + $0x784] ss:$16 sps:$4 sm:$0xff]  }
0x10e3   :  { %9152 = vmatpush1.bf16.msra.mxu0 %v18644_v24  ;;  %10243 = vmatpush1.bf16.msra.mxu1 %v18647_v9  ;;  %v21936_v24 = vld [vmem:[#allocation2 + $0x8] sm:$0x40]  ;;  %v18722_v9 = vld [vmem:[#allocation13 + $0x488] ss:$16 sps:$4 sm:$0xff]  }
0x10e4   :  { %9334 = vmatprep.subr.bf16.mxu0 %v18652_v29  ;;  %10425 = vmatprep.subr.bf16.mxu1 %v18655_v2  ;;  %v18725_v29 = vld [vmem:[#allocation13 + $0x780] ss:$16 sps:$4 sm:$0xff]   ;;  %v18730_v2 = vld [vmem:[#allocation13 + $0x4ac] ss:$16 sps:$4 sm:$0xff]  }
0x10e6   :  { %14920 = vmatmul.mubr.msk.bf16.vlgmr.msra.gmra.mrb[92].mxu0 %vm6771_vm3, %v9020_v14  ;;  %15027 = vmatmul.mubr.msk.bf16.vlgmr.msra.gmra.mrb[148].mxu1 %vm6771_vm3, %v10152_v34  ;;  %v18665_v14 = vld [vmem:[#allocation13 + $0x640] ss:$16 sps:$4 sm:$0xff]  }
0x10e7   :  { %9335 = vmatpush1.bf16.msra.mxu0 %v18650_v59  ;;  %10426 = vmatpush1.bf16.msra.mxu1 %v18653_v61  ;;  %v10719_v59 = vrot.slane %v21936_v24, 6  ;;  %v18733_v61 = vld [vmem:[#allocation13 + $0x7a4] ss:$16 sps:$4 sm:$0xff]  }
0x10e8   :  { %9336 = vmatprep.subr.bf16.mxu0 %v18658_v51  ;;  %10427 = vmatprep.subr.bf16.mxu1 %v18661_v63  ;;  %v18728_v51 = vld [vmem:[#allocation13 + $0x4a8] ss:$16 sps:$4 sm:$0xff]   ;;  %v18731_v63 = vld [vmem:[#allocation13 + $0x7a0] ss:$16 sps:$4 sm:$0xff]  }
0x10e9   :  { %9366 = vmatprep.mubr.bf16.mxu0 %v19768_v21  ;;  %10457 = vmatprep.mubr.bf16.mxu1 %v19768_v21 }
0x10eb   :  { %9337 = vmatpush1.bf16.msra.mxu0 %v18656_v54  ;;  %10428 = vmatpush1.bf16.msra.mxu1 %v18659_v48  ;;  %v18736_v54 = vld [vmem:[#allocation13 + $0x4cc] ss:$16 sps:$4 sm:$0xff]   ;;  %v18739_v48 = vld [vmem:[#allocation13 + $0x7c4] ss:$16 sps:$4 sm:$0xff]  }
0x10ec   :  { %9338 = vmatprep.subr.bf16.mxu0 %v18664_v33  ;;  %10429 = vmatprep.subr.bf16.mxu1 %v18667_v1  ;;  %v18734_v33 = vld [vmem:[#allocation13 + $0x4c8] ss:$16 sps:$4 sm:$0xff]   ;;  %v18742_v1 = vld [vmem:[#allocation13 + $0x4ec] ss:$16 sps:$4 sm:$0xff]  }
0x10ef   :  { %9339 = vmatpush1.bf16.msra.mxu0 %v18662_v23  ;;  %10430 = vmatpush1.bf16.msra.mxu1 %v18665_v14  ;;  %v18745_v23 = vld [vmem:[#allocation13 + $0x7e4] ss:$16 sps:$4 sm:$0xff]   ;;  %v18740_v14 = vld [vmem:[#allocation13 + $0x4e8] ss:$16 sps:$4 sm:$0xff]  }
0x10f0   :  { %9340 = vmatprep.subr.bf16.mxu0 %v18670_v12  ;;  %10431 = vmatprep.subr.bf16.mxu1 %v18673_v50  ;;  %v18743_v12 = vld [vmem:[#allocation13 + $0x7e0] ss:$16 sps:$4 sm:$0xff]   ;;  %v18748_v50 = vld [vmem:[#allocation13 + $0x50c] ss:$16 sps:$4 sm:$0xff]  }
0x10f3   :  { %9341 = vmatpush1.bf16.msra.mxu0 %v18668_v19  ;;  %10432 = vmatpush1.bf16.msra.mxu1 %v18671_v4  ;;  %v21946_v19 = vld [vmem:[#allocation2 + $0x8] sm:$0x80]  ;;  %v18746_v4 = vld [vmem:[#allocation13 + $0x508] ss:$16 sps:$4 sm:$0xff]  }
0x10f4   :  { %9523 = vmatprep.subr.bf16.mxu0 %v18676_v60  ;;  %10614 = vmatprep.subr.bf16.mxu1 %v18679_v49  ;;  %v18751_v60 = vld [vmem:[#allocation13 + $0x52c] ss:$16 sps:$4 sm:$0xff]   ;;  %v10908_v49 = vrot.slane %v21946_v19, 7 }
0x10f6   :  { %14938 = vmatmul.mubr.msk.bf16.vlgmr.msra.gmra.mrb[96].mxu0 %vm6771_vm3, %v9209_v3  ;;  %15045 = vmatmul.mubr.msk.bf16.vlgmr.msra.gmra.mrb[152].mxu1 %vm6771_vm3, %v10341_v40  ;;  %v18689_v3 = vld [vmem:[#allocation13 + $0x6c0] ss:$16 sps:$4 sm:$0xff]  }
0x10f7   :  { %9524 = vmatpush1.bf16.msra.mxu0 %v18674_v32  ;;  %10615 = vmatpush1.bf16.msra.mxu1 %v18677_v46  ;;  %v18749_v32 = vld [vmem:[#allocation13 + $0x528] ss:$16 sps:$4 sm:$0xff]   ;;  %v18754_v46 = vld [vmem:[#allocation13 + $0x54c] ss:$16 sps:$4 sm:$0xff]  }
0x10f8   :  { %9525 = vmatprep.subr.bf16.mxu0 %v18682_v30  ;;  %10616 = vmatprep.subr.bf16.mxu1 %v18685_v62  ;;  %v18752_v30 = vld [vmem:[#allocation13 + $0x548] ss:$16 sps:$4 sm:$0xff]   ;;  %v18757_v62 = vld [vmem:[#allocation13 + $0x56c] ss:$16 sps:$4 sm:$0xff]  }
0x10f9   :  { %9555 = vmatprep.mubr.bf16.mxu0 %v19768_v21  ;;  %10646 = vmatprep.mubr.bf16.mxu1 %v19768_v21 }
0x10fb   :  { %9526 = vmatpush1.bf16.msra.mxu0 %v18680_v25  ;;  %10617 = vmatpush1.bf16.msra.mxu1 %v18683_v38  ;;  %v18755_v25 = vld [vmem:[#allocation13 + $0x568] ss:$16 sps:$4 sm:$0xff]   ;;  %v18763_v38 = vld [vmem:[#allocation13 + $0x5ac] ss:$16 sps:$4 sm:$0xff]  }
0x10fc   :  { %9527 = vmatprep.subr.bf16.mxu0 %v18688_v26  ;;  %10618 = vmatprep.subr.bf16.mxu1 %v18691_v41  ;;  %v18761_v26 = vld [vmem:[#allocation13 + $0x5a8] ss:$16 sps:$4 sm:$0xff]   ;;  %v18766_v41 = vld [vmem:[#allocation13 + $0x5cc] ss:$16 sps:$4 sm:$0xff]  }
0x10ff   :  { %9528 = vmatpush1.bf16.msra.mxu0 %v18686_v44  ;;  %10619 = vmatpush1.bf16.msra.mxu1 %v18689_v3 }
0x1100   :  { %9529 = vmatprep.subr.bf16.mxu0 %v18694_v53  ;;  %10620 = vmatprep.subr.bf16.mxu1 %v18697_v37 }
0x1103   :  { %9530 = vmatpush1.bf16.msra.mxu0 %v18692_v56  ;;  %10621 = vmatpush1.bf16.msra.mxu1 %v18695_v22  ;;  %v18764_v22 = vld [vmem:[#allocation13 + $0x5c8] ss:$16 sps:$4 sm:$0xff]  }
0x1104   :  { %9710 = vmatprep.subr.bf16.mxu0 %v18700_v15  ;;  %10803 = vmatprep.subr.bf16.mxu1 %v18703_v39 }
0x1106   :  { %14956 = vmatmul.mubr.msk.bf16.vlgmr.msra.gmra.mrb[100].mxu0 %vm6771_vm3, %v9398_v6  ;;  %15063 = vmatmul.mubr.msk.bf16.vlgmr.msra.gmra.mrb[156].mxu1 %vm6771_vm3, %v10530_v31  ;;  %v18713_v6 = vld [vmem:[#allocation13 + $0x740] ss:$16 sps:$4 sm:$0xff]  }
0x1107   :  { %9711 = vmatpush1.bf16.msra.mxu0 %v18698_v42  ;;  %10804 = vmatpush1.bf16.msra.mxu1 %v18701_v10  ;;  %v18818_v42 = vld [vmem:[#allocation14] ss:$40 sps:$4 sm:$0xff]   ;;  %v18820_v10 = vld [vmem:[#allocation14 + $0x4] ss:$40 sps:$4 sm:$0xff]  }
0x1108   :  { %9712 = vmatprep.subr.bf16.mxu0 %v18706_v20  ;;  %10805 = vmatprep.subr.bf16.mxu1 %v18709_v13  ;;  %v18767_v20 = vld [vmem:[#allocation13 + $0x5e8] ss:$16 sps:$4 sm:$0xff]   ;;  %v18826_v13 = vld [vmem:[#allocation14 + $0x54] ss:$40 sps:$4 sm:$0xff]  }
0x1109   :  { %9742 = vmatprep.mubr.bf16.mxu0 %v19768_v21  ;;  %10835 = vmatprep.mubr.bf16.mxu1 %v19768_v21 }
0x110b   :  { %9713 = vmatpush1.bf16.msra.mxu0 %v18704_v16  ;;  %10806 = vmatpush1.bf16.msra.mxu1 %v18707_v47  ;;  %v18772_v16 = vld [vmem:[#allocation13 + $0x60c] ss:$16 sps:$4 sm:$0xff]   ;;  %v18824_v47 = vld [vmem:[#allocation14 + $0x50] ss:$40 sps:$4 sm:$0xff]  }
0x110c   :  { %9714 = vmatprep.subr.bf16.mxu0 %v18712_v43  ;;  %10807 = vmatprep.subr.bf16.mxu1 %v18715_v36  ;;  %v18770_v43 = vld [vmem:[#allocation13 + $0x608] ss:$16 sps:$4 sm:$0xff]   ;;  %v18775_v36 = vld [vmem:[#allocation13 + $0x62c] ss:$16 sps:$4 sm:$0xff]  }
0x110f   :  { %9715 = vmatpush1.bf16.msra.mxu0 %v18710_v28  ;;  %10808 = vmatpush1.bf16.msra.mxu1 %v18713_v6  ;;  %v18773_v28 = vld [vmem:[#allocation13 + $0x628] ss:$16 sps:$4 sm:$0xff]   ;;  %v18778_v6 = vld [vmem:[#allocation13 + $0x64c] ss:$16 sps:$4 sm:$0xff]  }
0x1110   :  { %9716 = vmatprep.subr.bf16.mxu0 %v18718_v57  ;;  %10809 = vmatprep.subr.bf16.mxu1 %v18721_v58 }
0x1113   :  { %9717 = vmatpush1.bf16.msra.mxu0 %v18716_v52  ;;  %10810 = vmatpush1.bf16.msra.mxu1 %v18719_v8 }
0x1114   :  { %9899 = vmatprep.subr.bf16.mxu0 %v18724_v17  ;;  %10992 = vmatprep.subr.bf16.mxu1 %v18727_v5  ;;  %v18776_v5 = vld [vmem:[#allocation13 + $0x648] ss:$16 sps:$4 sm:$0xff]  }
0x1116   :  { %14974 = vmatmul.mubr.msk.bf16.vlgmr.msra.gmra.mrb[104].mxu0 %vm6771_vm3, %v21875_v55  ;;  %15081 = vmatmul.mubr.msk.bf16.vlgmr.msra.gmra.mrb[160].mxu1 %vm6771_vm3, %v10719_v59  ;;  %v18737_v55 = vld [vmem:[#allocation13 + $0x7c0] ss:$16 sps:$4 sm:$0xff]  }
0x1117   :  { %9900 = vmatpush1.bf16.msra.mxu0 %v18722_v9  ;;  %10993 = vmatpush1.bf16.msra.mxu1 %v18725_v29  ;;  %v18830_v29 = vld [vmem:[#allocation14 + $0xa0] ss:$40 sps:$4 sm:$0xff]  }
0x1118   :  { %9901 = vmatprep.subr.bf16.mxu0 %v18730_v2  ;;  %10994 = vmatprep.subr.bf16.mxu1 %v18733_v61  ;;  %v18832_v2 = vld [vmem:[#allocation14 + $0xa4] ss:$40 sps:$4 sm:$0xff]  }
0x1119   :  { %9931 = vmatprep.mubr.bf16.mxu0 %v19768_v21  ;;  %11024 = vmatprep.mubr.bf16.mxu1 %v19768_v21 }
0x111b   :  { %9902 = vmatpush1.bf16.msra.mxu0 %v18728_v51  ;;  %10995 = vmatpush1.bf16.msra.mxu1 %v18731_v63  ;;  %v18838_v51 = vld [vmem:[#allocation14 + $0xf4] ss:$40 sps:$4 sm:$0xff]   ;;  %v18779_v63 = vld [vmem:[#allocation13 + $0x668] ss:$16 sps:$4 sm:$0xff]  }
0x111c   :  { %9903 = vmatprep.subr.bf16.mxu0 %v18736_v54  ;;  %10996 = vmatprep.subr.bf16.mxu1 %v18739_v48  ;;  %v18836_v54 = vld [vmem:[#allocation14 + $0xf0] ss:$40 sps:$4 sm:$0xff]   ;;  %v18784_v48 = vld [vmem:[#allocation13 + $0x68c] ss:$16 sps:$4 sm:$0xff]  }
0x111f   :  { %9904 = vmatpush1.bf16.msra.mxu0 %v18734_v33  ;;  %10997 = vmatpush1.bf16.msra.mxu1 %v18737_v55  ;;  %v18844_v33 = vld [vmem:[#allocation14 + $0x144] ss:$40 sps:$4 sm:$0xff]   ;;  %v18782_v55 = vld [vmem:[#allocation13 + $0x688] ss:$16 sps:$4 sm:$0xff]  }
0x1120   :  { %9905 = vmatprep.subr.bf16.mxu0 %v18742_v1  ;;  %10998 = vmatprep.subr.bf16.mxu1 %v18745_v23  ;;  %v18787_v1 = vld [vmem:[#allocation13 + $0x6ac] ss:$16 sps:$4 sm:$0xff]   ;;  %v18842_v23 = vld [vmem:[#allocation14 + $0x140] ss:$40 sps:$4 sm:$0xff]  }
0x1123   :  { %9906 = vmatpush1.bf16.msra.mxu0 %v18740_v14  ;;  %10999 = vmatpush1.bf16.msra.mxu1 %v18743_v12  ;;  %v18850_v14 = vld [vmem:[#allocation14 + $0x194] ss:$40 sps:$4 sm:$0xff]   ;;  %v18785_v12 = vld [vmem:[#allocation13 + $0x6a8] ss:$16 sps:$4 sm:$0xff]  }
0x1124   :  { %10088 = vmatprep.subr.bf16.mxu0 %v18748_v50  ;;  %12092 = vmatprep.subr.bf16.mxu1 %v18820_v10  ;;  %v18790_v50 = vld [vmem:[#allocation13 + $0x6cc] ss:$16 sps:$4 sm:$0xff]  }
0x1125   :  { %v18874_v10 = vld [vmem:[#allocation14 + $0x2d4] ss:$40 sps:$4 sm:$0xff]  }
0x1126   :  { %14992 = vmatmul.mubr.msk.bf16.vlgmr.msra.gmra.mrb[108].mxu0 %vm6771_vm3, %v9774_v35  ;;  %15099 = vmatmul.mubr.msk.bf16.vlgmr.msra.gmra.mrb[164].mxu1 %vm6771_vm3, %v10908_v49  ;;  %v18758_v35 = vld [vmem:[#allocation13 + $0x588] ss:$16 sps:$4 sm:$0xff]  }
0x1127   :  { %10089 = vmatpush1.bf16.msra.mxu0 %v18746_v4  ;;  %10120 = vmatprep.mubr.bf16.mxu0 %v19768_v21  ;;  %v18848_v4 = vld [vmem:[#allocation14 + $0x190] ss:$40 sps:$4 sm:$0xff]  }
0x1128   :  { %10090 = vmatprep.subr.bf16.mxu0 %v18751_v60  ;;  %12093 = vmatpush1.bf16.msra.mxu1 %v18818_v42  ;;  %v18866_v42 = vld [vmem:[#allocation14 + $0x280] ss:$40 sps:$4 sm:$0xff]  }
0x1129   :  { %12094 = vmatprep.subr.bf16.mxu1 %v18826_v13  ;;  %v18802_v13 = vld [vmem:[#allocation13 + $0x74c] ss:$16 sps:$4 sm:$0xff]  }
0x112b   :  { %10091 = vmatpush1.bf16.msra.mxu0 %v18749_v32 }
0x112c   :  { %10092 = vmatprep.subr.bf16.mxu0 %v18754_v46  ;;  %12095 = vmatpush1.bf16.msra.mxu1 %v18824_v47 }
0x112d   :  { %12096 = vmatprep.subr.bf16.mxu1 %v18832_v2  ;;  %v18886_v2 = vld [vmem:[#allocation14 + $0x374] ss:$40 sps:$4 sm:$0xff]  }
0x112f   :  { %10093 = vmatpush1.bf16.msra.mxu0 %v18752_v30 }
0x1130   :  { %10094 = vmatprep.subr.bf16.mxu0 %v18757_v62  ;;  %12097 = vmatpush1.bf16.msra.mxu1 %v18830_v29  ;;  %v18880_v29 = vld [vmem:[#allocation14 + $0x324] ss:$40 sps:$4 sm:$0xff]  }
0x1131   :  { %12098 = vmatprep.subr.bf16.mxu1 %v18838_v51  ;;  %v18884_v51 = vld [vmem:[#allocation14 + $0x370] ss:$40 sps:$4 sm:$0xff]  }
0x1133   :  { %10095 = vmatpush1.bf16.msra.mxu0 %v18755_v25  ;;  %v18788_v25 = vld [vmem:[#allocation13 + $0x6c8] ss:$16 sps:$4 sm:$0xff]  }
0x1134   :  { %10277 = vmatprep.subr.bf16.mxu0 %v18760_v18  ;;  %12099 = vmatpush1.bf16.msra.mxu1 %v18836_v54  ;;  %v18793_v18 = vld [vmem:[#allocation13 + $0x6ec] ss:$16 sps:$4 sm:$0xff]   ;;  %v18806_v54 = vld [vmem:[#allocation13 + $0x788] ss:$16 sps:$4 sm:$0xff]  }
0x1135   :  { %12100 = vmatprep.subr.bf16.mxu1 %v18844_v33  ;;  %v18890_v33 = vld [vmem:[#allocation14 + $0x3c0] ss:$40 sps:$4 sm:$0xff]  }
0x1136   :  { %15010 = vmatmul.mubr.msk.bf16.vlgmr.msra.gmra.mrb[112].mxu0 %vm6771_vm3, %v9963_v7  ;;  %v18769_v7 = vld [vmem:[#allocation13 + $0x5ec] ss:$16 sps:$4 sm:$0xff]  }
0x1137   :  { %10278 = vmatpush1.bf16.msra.mxu0 %v18758_v35  ;;  %10309 = vmatprep.mubr.bf16.mxu0 %v19768_v21 }
0x1138   :  { %10279 = vmatprep.subr.bf16.mxu0 %v18763_v38  ;;  %12101 = vmatpush1.bf16.msra.mxu1 %v18842_v23  ;;  %v18814_v23 = vld [vmem:[#allocation13 + $0x7cc] ss:$16 sps:$4 sm:$0xff]  }
0x1139   :  { %v21960_v44 = vpop.f32.mrb[44].mxu0  ;;  %v21962_v3 = vpop.f32.mrb[116].mxu1  ;;  %12102 = vmatprep.subr.bf16.mxu1 %v18850_v14  ;;  %v18896_v14 = vld [vmem:[#allocation14 + $0x410] ss:$40 sps:$4 sm:$0xff]  }
0x113a   :  { %v21964_v53 = vpop.f32.mrb[45].mxu0  ;;  %v21966_v37 = vpop.f32.mrb[117].mxu1 }
0x113b   :  { %10280 = vmatpush1.bf16.msra.mxu0 %v18761_v26  ;;  %v8225_v56 = vpop.f32.mrb[46].mxu0  ;;  %v8764_v27 = vpop.f32.mrb[118].mxu1  ;;  %v18854_v26 = vld [vmem:[#allocation14 + $0x1e0] ss:$40 sps:$4 sm:$0xff]  }
0x113c   :  { %v8226_v15 = vpop.f32.mrb[47].mxu0  ;;  %10281 = vmatprep.subr.bf16.mxu0 %v18766_v41  ;;  %v8765_v39 = vpop.f32.mrb[119].mxu1  ;;  %12103 = vmatpush1.bf16.msra.mxu1 %v18848_v4  ;;  %v18856_v41 = vld [vmem:[#allocation14 + $0x1e4] ss:$40 sps:$4 sm:$0xff]   ;;  %v18862_v56 = vld [vmem:[#allocation14 + $0x234] ss:$40 sps:$4 sm:$0xff]  }
0x113d   :  { %12104 = vmatprep.subr.bf16.mxu1 %v18856_v41  ;;  %v18860_v27 = vld [vmem:[#allocation14 + $0x230] ss:$40 sps:$4 sm:$0xff]   ;;  %v18868_v15 = vld [vmem:[#allocation14 + $0x284] ss:$40 sps:$4 sm:$0xff]  }
0x113e   :  { %v18799_v39 = vld [vmem:[#allocation13 + $0x72c] ss:$16 sps:$4 sm:$0xff]  }
0x113f   :  { %10282 = vmatpush1.bf16.msra.mxu0 %v18764_v22  ;;  %v18791_v22 = vld [vmem:[#allocation13 + $0x6e8] ss:$16 sps:$4 sm:$0xff]  }
0x1140   :  { %10283 = vmatprep.subr.bf16.mxu0 %v18769_v7  ;;  %12105 = vmatpush1.bf16.msra.mxu1 %v18854_v26  ;;  %v18794_v7 = vld [vmem:[#allocation13 + $0x708] ss:$16 sps:$4 sm:$0xff]  }
0x1141   :  { %12106 = vmatprep.subr.bf16.mxu1 %v18862_v56  ;;  %v18815_v56 = vld [vmem:[#allocation13 + $0x7e8] ss:$16 sps:$4 sm:$0xff]  }
0x1143   :  { %10284 = vmatpush1.bf16.msra.mxu0 %v18767_v20  ;;  %v18797_v20 = vld [vmem:[#allocation13 + $0x728] ss:$16 sps:$4 sm:$0xff]  }
0x1144   :  { %10466 = vmatprep.subr.bf16.mxu0 %v18772_v16  ;;  %12107 = vmatpush1.bf16.msra.mxu1 %v18860_v27  ;;  %v18872_v16 = vld [vmem:[#allocation14 + $0x2d0] ss:$40 sps:$4 sm:$0xff]   ;;  %v18910_v27 = vld [vmem:[#allocation14 + $0x4b4] ss:$40 sps:$4 sm:$0xff]  }
0x1145   :  { %12108 = vmatprep.subr.bf16.mxu1 %v18868_v15 }
0x1146   :  { %15028 = vmatmul.mubr.msk.bf16.vlgmr.msra.gmra.mrb[116].mxu0 %vm6771_vm3, %v10152_v34 }
0x1147   :  { %10467 = vmatpush1.bf16.msra.mxu0 %v18770_v43  ;;  %10498 = vmatprep.mubr.bf16.mxu0 %v19768_v21 }
0x1148   :  { %10468 = vmatprep.subr.bf16.mxu0 %v18775_v36  ;;  %12109 = vmatpush1.bf16.msra.mxu1 %v18866_v42 }
0x1149   :  { %v21972_v57 = vpop.f32.mrb[48].mxu0  ;;  %v21974_v58 = vpop.f32.mrb[120].mxu1  ;;  %12110 = vmatprep.subr.bf16.mxu1 %v18874_v10 }
0x114a   :  { %v21976_v52 = vpop.f32.mrb[49].mxu0  ;;  %v21978_v8 = vpop.f32.mrb[121].mxu1 }
0x114b   :  { %v8266_v17 = vpop.f32.mrb[50].mxu0  ;;  %10469 = vmatpush1.bf16.msra.mxu0 %v18773_v28  ;;  %v8953_v9 = vpop.f32.mrb[122].mxu1 }
0x114c   :  { %v8267_v34 = vpop.f32.mrb[51].mxu0  ;;  %10470 = vmatprep.subr.bf16.mxu0 %v18778_v6  ;;  %v8954_v61 = vpop.f32.mrb[123].mxu1  ;;  %v18800_v17 = vld [vmem:[#allocation13 + $0x748] ss:$16 sps:$4 sm:$0xff]   ;;  %12111 = vmatpush1.bf16.msra.mxu1 %v18872_v16 }
0x114d   :  { %v18878_v34 = vld [vmem:[#allocation14 + $0x320] ss:$40 sps:$4 sm:$0xff]   ;;  %12112 = vmatprep.subr.bf16.mxu1 %v18880_v29  ;;  %v18853_v29 = vld [vmem:[#allocation14 + $0x19c] ss:$40 sps:$4 sm:$0xff]  }
0x114e   :  { %v18803_v61 = vld [vmem:[#allocation13 + $0x768] ss:$16 sps:$4 sm:$0xff]  }
0x114f   :  { %10471 = vmatpush1.bf16.msra.mxu0 %v18776_v5  ;;  %v18805_v5 = vld [vmem:[#allocation13 + $0x76c] ss:$16 sps:$4 sm:$0xff]  }
0x1150   :  { %10472 = vmatprep.subr.bf16.mxu0 %v18781_v45  ;;  %12113 = vmatpush1.bf16.msra.mxu1 %v18878_v34  ;;  %v18847_v34 = vld [vmem:[#allocation14 + $0x14c] ss:$40 sps:$4 sm:$0xff]  }
0x1151   :  { %12114 = vmatprep.subr.bf16.mxu1 %v18886_v2 }
0x1153   :  { %10473 = vmatpush1.bf16.msra.mxu0 %v18779_v63  ;;  %v18892_v63 = vld [vmem:[#allocation14 + $0x3c4] ss:$40 sps:$4 sm:$0xff]  }
0x1154   :  { %10655 = vmatprep.subr.bf16.mxu0 %v18784_v48  ;;  %v18811_v48 = vld [vmem:[#allocation13 + $0x7ac] ss:$16 sps:$4 sm:$0xff]   ;;  %12115 = vmatpush1.bf16.msra.mxu1 %v18884_v51 }
0x1155   :  { %12116 = vmatprep.subr.bf16.mxu1 %v18892_v63 }
0x1156   :  { %15046 = vmatmul.mubr.msk.bf16.vlgmr.msra.gmra.mrb[120].mxu0 %vm6771_vm3, %v10341_v40 }
0x1157   :  { %10656 = vmatpush1.bf16.msra.mxu0 %v18782_v55  ;;  %10687 = vmatprep.mubr.bf16.mxu0 %v19768_v21  ;;  %v18898_v55 = vld [vmem:[#allocation14 + $0x414] ss:$40 sps:$4 sm:$0xff]  }
0x1158   :  { %10657 = vmatprep.subr.bf16.mxu0 %v18787_v1  ;;  %v18809_v1 = vld [vmem:[#allocation13 + $0x7a8] ss:$16 sps:$4 sm:$0xff]   ;;  %12117 = vmatpush1.bf16.msra.mxu1 %v18890_v33 }
0x1159   :  { %v8386_v60 = vpop.f32.mrb[52].mxu0  ;;  %v21987_v46 = vpop.f32.mrb[124].mxu1  ;;  %12118 = vmatprep.subr.bf16.mxu1 %v18898_v55  ;;  %v18857_v55 = vld [vmem:[#allocation14 + $0x1e8] ss:$40 sps:$4 sm:$0xff]  }
0x115a   :  { %v21985_v32 = vadd.f32 %v8386_v60, %v21960_v44  ;;  %v8388_v30 = vpop.f32.mrb[53].mxu0  ;;  %v21992_v40 = vpop.f32.mrb[125].mxu1 }
0x115b   :  { %v21990_v0 = vadd.f32 %v8388_v30, %v21964_v53  ;;  %v8390_v62 = vpop.f32.mrb[54].mxu0  ;;  %10658 = vmatpush1.bf16.msra.mxu0 %v18785_v12  ;;  %v9142_v35 = vpop.f32.mrb[126].mxu1  ;;  %v18796_v53 = vld [vmem:[#allocation13 + $0x70c] ss:$16 sps:$4 sm:$0xff]  }
0x115c   :  { %v8391_v38 = vpop.f32.mrb[55].mxu0  ;;  %10659 = vmatprep.subr.bf16.mxu0 %v18790_v50  ;;  %v9143_v44 = vpop.f32.mrb[127].mxu1  ;;  %v18817_v35 = vld [vmem:[#allocation13 + $0x7ec] ss:$16 sps:$4 sm:$0xff]   ;;  %12119 = vmatpush1.bf16.msra.mxu1 %v18896_v14 }
0x115d   :  { %v18904_v38 = vld [vmem:[#allocation14 + $0x464] ss:$40 sps:$4 sm:$0xff]  }
0x115e   :  { %12120 = vmatprep.subr.bf16.mxu1 %v18904_v38 }
0x115f   :  { %10660 = vmatpush1.bf16.msra.mxu0 %v18788_v25 }
0x1160   :  { %10661 = vmatprep.subr.bf16.mxu0 %v18793_v18 }
0x1163   :  { %10662 = vmatpush1.bf16.msra.mxu0 %v18791_v22 }
0x1164   :  { %10844 = vmatprep.subr.bf16.mxu0 %v18796_v53  ;;  %v18908_v53 = vld [vmem:[#allocation14 + $0x4b0] ss:$40 sps:$4 sm:$0xff]  }
0x1166   :  { %15064 = vmatmul.mubr.msk.bf16.vlgmr.msra.gmra.mrb[124].mxu0 %vm6771_vm3, %v10530_v31 }
0x1167   :  { %10845 = vmatpush1.bf16.msra.mxu0 %v18794_v7  ;;  %10876 = vmatprep.mubr.bf16.mxu0 %v19768_v21 }
0x1168   :  { %10846 = vmatprep.subr.bf16.mxu0 %v18799_v39 }
0x1169   :  { %v8427_v47 = vpop.f32.mrb[56].mxu0  ;;  %v22001_v36 = vpop.f32.mrb[128].mxu1 }
0x116a   :  { %v21999_v43 = vadd.f32 %v8427_v47, %v21972_v57  ;;  %v8429_v28 = vpop.f32.mrb[57].mxu0  ;;  %v22006_v31 = vpop.f32.mrb[129].mxu1 }
0x116b   :  { %v22004_v11 = vadd.f32 %v8429_v28, %v21976_v52  ;;  %v8431_v6 = vpop.f32.mrb[58].mxu0  ;;  %10847 = vmatpush1.bf16.msra.mxu0 %v18797_v20  ;;  %v9331_v45 = vpop.f32.mrb[130].mxu1  ;;  %v18808_v52 = vld [vmem:[#allocation13 + $0x78c] ss:$16 sps:$4 sm:$0xff]  }
0x116c   :  { %v8432_v9 = vpop.f32.mrb[59].mxu0  ;;  %10848 = vmatprep.subr.bf16.mxu0 %v18802_v13  ;;  %v9332_v57 = vpop.f32.mrb[131].mxu1  ;;  %v18833_v6 = vld [vmem:[#allocation14 + $0xa8] ss:$40 sps:$4 sm:$0xff]  }
0x116d   :  { %v18839_v9 = vld [vmem:[#allocation14 + $0xf8] ss:$40 sps:$4 sm:$0xff]   ;;  %v18859_v57 = vld [vmem:[#allocation14 + $0x1ec] ss:$40 sps:$4 sm:$0xff]  }
0x116f   :  { %10849 = vmatpush1.bf16.msra.mxu0 %v18800_v17 }
0x1170   :  { %10850 = vmatprep.subr.bf16.mxu0 %v18805_v5 }
0x1173   :  { %10851 = vmatpush1.bf16.msra.mxu0 %v18803_v61 }
0x1174   :  { %11033 = vmatprep.subr.bf16.mxu0 %v18808_v52 }
0x1176   :  { %15082 = vmatmul.mubr.msk.bf16.vlgmr.msra.gmra.mrb[128].mxu0 %vm6771_vm3, %v10719_v59  ;;  %v18812_v59 = vld [vmem:[#allocation13 + $0x7c8] ss:$16 sps:$4 sm:$0xff]  }
0x1177   :  { %11034 = vmatpush1.bf16.msra.mxu0 %v18806_v54  ;;  %11065 = vmatprep.mubr.bf16.mxu0 %v19768_v21 }
0x1178   :  { %11035 = vmatprep.subr.bf16.mxu0 %v18811_v48 }
0x1179   :  { %v8571_v12 = vpop.f32.mrb[60].mxu0  ;;  %v9516_v4 = vpop.f32.mrb[132].mxu1 }
0x117a   :  { %v8619_v50 = vadd.f32 %v8571_v12, %v21985_v32  ;;  %v8573_v60 = vpop.f32.mrb[61].mxu0  ;;  %v9518_v62 = vpop.f32.mrb[133].mxu1  ;;  %v18902_v32 = vld [vmem:[#allocation14 + $0x460] ss:$40 sps:$4 sm:$0xff]   ;;  %v18865_v12 = vld [vmem:[#allocation14 + $0x23c] ss:$40 sps:$4 sm:$0xff]  }
0x117b   :  { %v8620_v30 = vadd.f32 %v8573_v60, %v21990_v0  ;;  %v8575_v24 = vpop.f32.mrb[62].mxu0  ;;  %11036 = vmatpush1.bf16.msra.mxu0 %v18809_v1  ;;  %v9520_v18 = vpop.f32.mrb[134].mxu1  ;;  %12121 = vmatpush1.bf16.msra.mxu1 %v18902_v32  ;;  %v18863_v60 = vld [vmem:[#allocation14 + $0x238] ss:$40 sps:$4 sm:$0xff]  }
0x117c   :  { %v8808_v25 = vadd.f32 %v21962_v3, %v8619_v50  ;;  %v8576_v21 = vpop.f32.mrb[63].mxu0  ;;  %11037 = vmatprep.subr.bf16.mxu0 %v18814_v23  ;;  %v9521_v41 = vpop.f32.mrb[135].mxu1  ;;  %v18823_v3 = vld [vmem:[#allocation14 + $0xc] ss:$40 sps:$4 sm:$0xff]   ;;  %12122 = vmatprep.subr.bf16.mxu1 %v18910_v27  ;;  %v18877_v24 = vld [vmem:[#allocation14 + $0x2dc] ss:$40 sps:$4 sm:$0xff]  }
0x117d   :  { %v8809_v26 = vadd.f32 %v21966_v37, %v8620_v30  ;;  %v18916_v50 = vld [vmem:[#allocation14 + $0x504] ss:$40 sps:$4 sm:$0xff]  }
0x117e   :  { %v8997_v44 = vadd.f32 %v21974_v58, %v8808_v25  ;;  %v18821_v58 = vld [vmem:[#allocation14 + $0x8] ss:$40 sps:$4 sm:$0xff]   ;;  %v18871_v30 = vld [vmem:[#allocation14 + $0x28c] ss:$40 sps:$4 sm:$0xff]  }
0x117f   :  { %v8998_v0 = vadd.f32 %v21978_v8, %v8809_v26  ;;  %11038 = vmatpush1.bf16.msra.mxu0 %v18812_v59  ;;  %v18829_v8 = vld [vmem:[#allocation14 + $0x5c] ss:$40 sps:$4 sm:$0xff]   ;;  %12123 = vmatpush1.bf16.msra.mxu1 %v18908_v53  ;;  %v18875_v59 = vld [vmem:[#allocation14 + $0x2d8] ss:$40 sps:$4 sm:$0xff]   ;;  %v18883_v25 = vld [vmem:[#allocation14 + $0x32c] ss:$40 sps:$4 sm:$0xff]  }
0x1180   :  { %v9186_v22 = vadd.f32 %v21987_v46, %v8997_v44  ;;  %11039 = vmatprep.subr.bf16.mxu0 %v18817_v35  ;;  %v18827_v46 = vld [vmem:[#allocation14 + $0x58] ss:$40 sps:$4 sm:$0xff]   ;;  %12133 = vmatprep.subr.bf16.mxu1 %v18916_v50  ;;  %v18889_v53 = vld [vmem:[#allocation14 + $0x37c] ss:$40 sps:$4 sm:$0xff]  }
0x1181   :  { %v9187_v15 = vadd.f32 %v21992_v40, %v8998_v0  ;;  %v18835_v40 = vld [vmem:[#allocation14 + $0xac] ss:$40 sps:$4 sm:$0xff]   ;;  %v18881_v0 = vld [vmem:[#allocation14 + $0x328] ss:$40 sps:$4 sm:$0xff]  }
0x1182   :  { %v9375_v37 = vadd.f32 %v22001_v36, %v9186_v22 }
0x1183   :  { %v9376_v7 = vadd.f32 %v22006_v31, %v9187_v15  ;;  %11040 = vmatpush1.bf16.msra.mxu0 %v18815_v56  ;;  %v18887_v15 = vld [vmem:[#allocation14 + $0x378] ss:$40 sps:$4 sm:$0xff]  }
0x1184   :  { %v9564_v39 = vadd.f32 %v9516_v4, %v9375_v37  ;;  %12174 = vmatprep.subr.bf16.mxu0 %v18823_v3  ;;  %v18895_v37 = vld [vmem:[#allocation14 + $0x3cc] ss:$40 sps:$4 sm:$0xff]  }
0x1185   :  { %v9565_v42 = vadd.f32 %v9518_v62, %v9376_v7  ;;  %v18869_v62 = vld [vmem:[#allocation14 + $0x288] ss:$40 sps:$4 sm:$0xff]  }
0x1186   :  { %15100 = vmatmul.mubr.msk.bf16.vlgmr.msra.gmra.mrb[132].mxu0 %vm6771_vm3, %v10908_v49  ;;  %v18841_v49 = vld [vmem:[#allocation14 + $0xfc] ss:$40 sps:$4 sm:$0xff]   ;;  %v18893_v7 = vld [vmem:[#allocation14 + $0x3c8] ss:$40 sps:$4 sm:$0xff]  }
0x1187   :  { %12175 = vmatpush1.bf16.msra.mxu0 %v18821_v58  ;;  %v18901_v58 = vld [vmem:[#allocation14 + $0x41c] ss:$40 sps:$4 sm:$0xff]  }
0x1188   :  { %12176 = vmatprep.subr.bf16.mxu0 %v18829_v8  ;;  %v18907_v8 = vld [vmem:[#allocation14 + $0x46c] ss:$40 sps:$4 sm:$0xff]  }
0x1189   :  { %v8612_v10 = vpop.f32.mrb[64].mxu0  ;;  %v9703_v13 = vpop.f32.mrb[136].mxu1 }
0x118a   :  { %v8621_v20 = vadd.f32 %v8612_v10, %v21999_v43  ;;  %v8614_v16 = vpop.f32.mrb[65].mxu0  ;;  %v9751_v47 = vadd.f32 %v9703_v13, %v9564_v39  ;;  %v9705_v28 = vpop.f32.mrb[137].mxu1  ;;  %v18845_v43 = vld [vmem:[#allocation14 + $0x148] ss:$40 sps:$4 sm:$0xff]   ;;  %v18899_v39 = vld [vmem:[#allocation14 + $0x418] ss:$40 sps:$4 sm:$0xff]  }
0x118b   :  { %v8622_v36 = vadd.f32 %v8614_v16, %v22004_v11  ;;  %v8616_v31 = vpop.f32.mrb[66].mxu0  ;;  %12177 = vmatpush1.bf16.msra.mxu0 %v18827_v46  ;;  %v9752_v17 = vadd.f32 %v9705_v28, %v9565_v42  ;;  %v9707_v19 = vpop.f32.mrb[138].mxu1  ;;  %v18851_v11 = vld [vmem:[#allocation14 + $0x198] ss:$40 sps:$4 sm:$0xff]  }
0x118c   :  { %v8617_v5 = vpop.f32.mrb[67].mxu0  ;;  %12178 = vmatprep.subr.bf16.mxu0 %v18835_v40  ;;  %v9708_v45 = vpop.f32.mrb[139].mxu1 }
0x118d   :  { %v18911_v5 = vld [vmem:[#allocation14 + $0x4b8] ss:$40 sps:$4 sm:$0xff]  }
0x118f   :  { %12179 = vmatpush1.bf16.msra.mxu0 %v18833_v6 }
0x1190   :  { %12180 = vmatprep.subr.bf16.mxu0 %v18841_v49  ;;  %v18919_v49 = vld [vmem:[#allocation14 + $0x50c] ss:$40 sps:$4 sm:$0xff]  }
0x1193   :  { %12181 = vmatpush1.bf16.msra.mxu0 %v18839_v9 }
0x1194   :  { %12182 = vmatprep.subr.bf16.mxu0 %v18847_v34 }
0x1197   :  { %12183 = vmatpush1.bf16.msra.mxu0 %v18845_v43 }
0x1198   :  { %12184 = vmatprep.subr.bf16.mxu0 %v18853_v29 }
0x1199   :  { %v8801_v2 = vpop.f32.mrb[84].mxu0  ;;  %v9892_v52 = vpop.f32.mrb[140].mxu1 }
0x119a   :  { %v8810_v61 = vadd.f32 %v8801_v2, %v8621_v20  ;;  %v8803_v51 = vpop.f32.mrb[85].mxu0  ;;  %v9940_v63 = vadd.f32 %v9892_v52, %v9751_v47  ;;  %v9894_v48 = vpop.f32.mrb[141].mxu1 }
0x119b   :  { %v8811_v54 = vadd.f32 %v8803_v51, %v8622_v36  ;;  %v8805_v33 = vpop.f32.mrb[86].mxu0  ;;  %12185 = vmatpush1.bf16.msra.mxu0 %v18851_v11  ;;  %v9941_v1 = vadd.f32 %v9894_v48, %v9752_v17  ;;  %v9896_v23 = vpop.f32.mrb[142].mxu1  ;;  %v18905_v36 = vld [vmem:[#allocation14 + $0x468] ss:$40 sps:$4 sm:$0xff]   ;;  %v18913_v17 = vld [vmem:[#allocation14 + $0x4bc] ss:$40 sps:$4 sm:$0xff]  }
0x119c   :  { %v8806_v14 = vpop.f32.mrb[87].mxu0  ;;  %12186 = vmatprep.subr.bf16.mxu0 %v18859_v57  ;;  %v9897_v4 = vpop.f32.mrb[143].mxu1 }
0x119f   :  { %12187 = vmatpush1.bf16.msra.mxu0 %v18857_v55 }
0x11a0   :  { %12188 = vmatprep.subr.bf16.mxu0 %v18865_v12 }
0x11a3   :  { %12189 = vmatpush1.bf16.msra.mxu0 %v18863_v60 }
0x11a4   :  { %12190 = vmatprep.subr.bf16.mxu0 %v18871_v30 }
0x11a7   :  { %12191 = vmatpush1.bf16.msra.mxu0 %v18869_v62 }
0x11a8   :  { %12192 = vmatprep.subr.bf16.mxu0 %v18877_v24 }
0x11a9   :  { %v8990_v18 = vpop.f32.mrb[88].mxu0  ;;  %v10081_v35 = vpop.f32.mrb[144].mxu1 }
0x11aa   :  { %v8999_v21 = vadd.f32 %v8990_v18, %v8810_v61  ;;  %v8992_v38 = vpop.f32.mrb[89].mxu0  ;;  %v10129_v26 = vadd.f32 %v10081_v35, %v9940_v63  ;;  %v10083_v32 = vpop.f32.mrb[145].mxu1 }
0x11ab   :  { %v9000_v41 = vadd.f32 %v8992_v38, %v8811_v54  ;;  %v8994_v44 = vpop.f32.mrb[90].mxu0  ;;  %12193 = vmatpush1.bf16.msra.mxu0 %v18875_v59  ;;  %v10130_v56 = vadd.f32 %v10083_v32, %v9941_v1  ;;  %v10085_v22 = vpop.f32.mrb[146].mxu1 }
0x11ac   :  { %v8995_v3 = vpop.f32.mrb[91].mxu0  ;;  %12194 = vmatprep.subr.bf16.mxu0 %v18883_v25  ;;  %v10086_v27 = vpop.f32.mrb[147].mxu1 }
0x11ad   :  { %v22032_v3 = vld [vmem:[#allocation19 + $0x3] ss:$8 sm:$0xf] }
0x11af   :  { %12195 = vmatpush1.bf16.msra.mxu0 %v18881_v0  ;;  %v11081_v0 = vlaneseq }
0x11b0   :  { %12196 = vmatprep.subr.bf16.mxu0 %v18889_v53 }
0x11b3   :  { %12197 = vmatpush1.bf16.msra.mxu0 %v18887_v15 }
0x11b4   :  { %12198 = vmatprep.subr.bf16.mxu0 %v18895_v37 }
0x11b7   :  { %12199 = vmatpush1.bf16.msra.mxu0 %v18893_v7 }
0x11b8   :  { %12200 = vmatprep.subr.bf16.mxu0 %v18901_v58 }
0x11b9   :  { %v9179_v42 = vpop.f32.mrb[92].mxu0  ;;  %v10270_v40 = vpop.f32.mrb[148].mxu1 }
0x11ba   :  { %v9188_v46 = vadd.f32 %v9179_v42, %v8999_v21  ;;  %v9181_v10 = vpop.f32.mrb[93].mxu0  ;;  %v10318_v20 = vadd.f32 %v10270_v40, %v10129_v26  ;;  %v10272_v16 = vpop.f32.mrb[149].mxu1 }
0x11bb   :  { %v9189_v13 = vadd.f32 %v9181_v10, %v9000_v41  ;;  %v9183_v47 = vpop.f32.mrb[94].mxu0  ;;  %12201 = vmatpush1.bf16.msra.mxu0 %v18899_v39  ;;  %v10319_v28 = vadd.f32 %v10272_v16, %v10130_v56  ;;  %v10274_v31 = vpop.f32.mrb[150].mxu1  ;;  %v22027_v56 = vshrl.u32 %v11081_v0, 7  ;;  %v18959_v0 = vld [vmem:[#allocation14 + $0x738] ss:$40 sps:$4 sm:$0xff]  }
0x11bc   :  { %v9184_v6 = vpop.f32.mrb[95].mxu0  ;;  %12202 = vmatprep.subr.bf16.mxu0 %v18907_v8  ;;  %v10275_v19 = vpop.f32.mrb[151].mxu1  ;;  %v18914_v31 = vld [vmem:[#allocation14 + $0x500] ss:$40 sps:$4 sm:$0xff]  }
0x11bd   :  { %v22030_v22 = vsub.s32 0, %v22027_v56  ;;  %v22035_v53 = vsub.s32 1, %v22027_v56  ;;  %v18917_v6 = vld [vmem:[#allocation14 + $0x508] ss:$40 sps:$4 sm:$0xff]   ;;  %v18922_v19 = vld [vmem:[#allocation14 + $0x554] ss:$40 sps:$4 sm:$0xff]  }
0x11bf   :  { %12203 = vmatpush1.bf16.msra.mxu0 %v18905_v36  ;;  %v11084_v15 = vrot.slane %v22032_v3, %v22030_v22  ;;  %v11088_v39 = vrot.slane %v22032_v3, %v22035_v53 }
0x11c0   :  { %12204 = vmatprep.subr.bf16.mxu0 %v18913_v17 }
0x11c3   :  { %12205 = vmatpush1.bf16.msra.mxu0 %v18911_v5  ;;  %v18925_v5 = vld [vmem:[#allocation14 + $0x55c] ss:$40 sps:$4 sm:$0xff]  }
0x11c4   :  { %12215 = vmatprep.subr.bf16.mxu0 %v18919_v49  ;;  %v18920_v49 = vld [vmem:[#allocation14 + $0x550] ss:$40 sps:$4 sm:$0xff]  }
0x11c9   :  { %v9368_v45 = vpop.f32.mrb[96].mxu0  ;;  %v10459_v34 = vpop.f32.mrb[152].mxu1 }
0x11ca   :  { %v9377_v9 = vadd.f32 %v9368_v45, %v9188_v46  ;;  %v9370_v43 = vpop.f32.mrb[97].mxu0  ;;  %v10507_v29 = vadd.f32 %v10459_v34, %v10318_v20  ;;  %v10461_v57 = vpop.f32.mrb[153].mxu1  ;;  %v18923_v45 = vld [vmem:[#allocation14 + $0x558] ss:$40 sps:$4 sm:$0xff]   ;;  %v18931_v34 = vld [vmem:[#allocation14 + $0x5ac] ss:$40 sps:$4 sm:$0xff]  }
0x11cb   :  { %v9378_v11 = vadd.f32 %v9370_v43, %v9189_v13  ;;  %v9372_v2 = vpop.f32.mrb[98].mxu0  ;;  %v10508_v61 = vadd.f32 %v10461_v57, %v10319_v28  ;;  %v10463_v52 = vpop.f32.mrb[154].mxu1  ;;  %v18926_v43 = vld [vmem:[#allocation14 + $0x5a0] ss:$40 sps:$4 sm:$0xff]   ;;  %v18934_v57 = vld [vmem:[#allocation14 + $0x5f4] ss:$40 sps:$4 sm:$0xff]  }
0x11cc   :  { %v9373_v51 = vpop.f32.mrb[99].mxu0  ;;  %v10464_v63 = vpop.f32.mrb[155].mxu1  ;;  %v18937_v2 = vld [vmem:[#allocation14 + $0x5fc] ss:$40 sps:$4 sm:$0xff]  }
0x11d9   :  { %v9557_v54 = vpop.f32.mrb[100].mxu0  ;;  %v10648_v33 = vpop.f32.mrb[156].mxu1 }
0x11da   :  { %v9566_v48 = vadd.f32 %v9557_v54, %v9377_v9  ;;  %v9559_v55 = vpop.f32.mrb[101].mxu0  ;;  %v10696_v1 = vadd.f32 %v10648_v33, %v10507_v29  ;;  %v10650_v14 = vpop.f32.mrb[157].mxu1  ;;  %v18928_v9 = vld [vmem:[#allocation14 + $0x5a4] ss:$40 sps:$4 sm:$0xff]   ;;  %v18929_v29 = vld [vmem:[#allocation14 + $0x5a8] ss:$40 sps:$4 sm:$0xff]  }
0x11db   :  { %v9567_v23 = vadd.f32 %v9559_v55, %v9378_v11  ;;  %v9561_v12 = vpop.f32.mrb[102].mxu0  ;;  %v10697_v50 = vadd.f32 %v10650_v14, %v10508_v61  ;;  %v10652_v4 = vpop.f32.mrb[158].mxu1  ;;  %v18935_v33 = vld [vmem:[#allocation14 + $0x5f8] ss:$40 sps:$4 sm:$0xff]   ;;  %v18940_v55 = vld [vmem:[#allocation14 + $0x644] ss:$40 sps:$4 sm:$0xff]  }
0x11dc   :  { %v9562_v60 = vpop.f32.mrb[103].mxu0  ;;  %v10653_v30 = vpop.f32.mrb[159].mxu1  ;;  %v18941_v14 = vld [vmem:[#allocation14 + $0x648] ss:$40 sps:$4 sm:$0xff]   ;;  %v18946_v12 = vld [vmem:[#allocation14 + $0x694] ss:$40 sps:$4 sm:$0xff]  }
0x11dd   :  { %v18944_v4 = vld [vmem:[#allocation14 + $0x690] ss:$40 sps:$4 sm:$0xff]   ;;  %v18952_v30 = vld [vmem:[#allocation14 + $0x6e4] ss:$40 sps:$4 sm:$0xff]  }
0x11de   :  { %v18947_v60 = vld [vmem:[#allocation14 + $0x698] ss:$40 sps:$4 sm:$0xff]  }
0x11e9   :  { %v9744_v62 = vpop.f32.mrb[104].mxu0  ;;  %v10837_v59 = vpop.f32.mrb[160].mxu1 }
0x11ea   :  { %v9753_v24 = vadd.f32 %v9744_v62, %v9566_v48  ;;  %v9746_v25 = vpop.f32.mrb[105].mxu0  ;;  %v10885_v18 = vadd.f32 %v10837_v59, %v10696_v1  ;;  %v10839_v35 = vpop.f32.mrb[161].mxu1  ;;  %v18932_v48 = vld [vmem:[#allocation14 + $0x5f0] ss:$40 sps:$4 sm:$0xff]   ;;  %v18943_v1 = vld [vmem:[#allocation14 + $0x64c] ss:$40 sps:$4 sm:$0xff]  }
0x11eb   :  { %v9754_v21 = vadd.f32 %v9746_v25, %v9567_v23  ;;  %v9748_v38 = vpop.f32.mrb[106].mxu0  ;;  %v10886_v26 = vadd.f32 %v10839_v35, %v10697_v50  ;;  %v10841_v41 = vpop.f32.mrb[162].mxu1  ;;  %v18938_v23 = vld [vmem:[#allocation14 + $0x640] ss:$40 sps:$4 sm:$0xff]   ;;  %v18949_v50 = vld [vmem:[#allocation14 + $0x69c] ss:$40 sps:$4 sm:$0xff]  }
0x11ec   :  { %v9749_v32 = vpop.f32.mrb[107].mxu0  ;;  %v10842_v44 = vpop.f32.mrb[163].mxu1  ;;  %v18955_v62 = vld [vmem:[#allocation14 + $0x6ec] ss:$40 sps:$4 sm:$0xff]   ;;  %v18953_v59 = vld [vmem:[#allocation14 + $0x6e8] ss:$40 sps:$4 sm:$0xff]  }
0x11ed   :  { %v18956_v44 = vld [vmem:[#allocation14 + $0x730] ss:$40 sps:$4 sm:$0xff]  }
0x11f9   :  { %v9933_v27 = vpop.f32.mrb[108].mxu0  ;;  %v11026_v7 = vpop.f32.mrb[164].mxu1 }
0x11fa   :  { %v9942_v37 = vadd.f32 %v9933_v27, %v9753_v24  ;;  %v9935_v58 = vpop.f32.mrb[109].mxu0  ;;  %v11074_v8 = vadd.f32 %v11026_v7, %v10885_v18  ;;  %v11028_v46 = vpop.f32.mrb[165].mxu1  ;;  %v18950_v24 = vld [vmem:[#allocation14 + $0x6e0] ss:$40 sps:$4 sm:$0xff]   ;;  %v18958_v18 = vld [vmem:[#allocation14 + $0x734] ss:$40 sps:$4 sm:$0xff]  }
0x11fb   :  { %v9943_v42 = vadd.f32 %v9935_v58, %v9754_v21  ;;  %v9937_v40 = vpop.f32.mrb[110].mxu0  ;;  %v11075_v10 = vadd.f32 %v11028_v46, %v10886_v26  ;;  %v11030_v20 = vpop.f32.mrb[166].mxu1  ;;  %v18961_v21 = vld [vmem:[#allocation14 + $0x73c] ss:$40 sps:$4 sm:$0xff]   ;;  %v18965_v7 = vld [vmem:[#allocation14 + $0x788] ss:$40 sps:$4 sm:$0xff]  }
0x11fc   :  { %v9938_v13 = vpop.f32.mrb[111].mxu0  ;;  %v11101_v16 = vadd.f32 %v11084_v15, %v11074_v8  ;;  %v11031_v47 = vpop.f32.mrb[167].mxu1  ;;  %v18964_v27 = vld [vmem:[#allocation14 + $0x784] ss:$40 sps:$4 sm:$0xff]   ;;  %v18970_v58 = vld [vmem:[#allocation14 + $0x7d4] ss:$40 sps:$4 sm:$0xff]  }
0x11fd   :  { %v11102_v36 = vadd.f32 %v11088_v39, %v11075_v10  ;;  %v18967_v15 = vld [vmem:[#allocation14 + $0x78c] ss:$40 sps:$4 sm:$0xff]   ;;  %v18973_v39 = vld [vmem:[#allocation14 + $0x7dc] ss:$40 sps:$4 sm:$0xff]   ;;  %v18968_v8 = vld [vmem:[#allocation14 + $0x7d0] ss:$40 sps:$4 sm:$0xff]  }
0x11fe   :  { %v11425_v17 = vpack.c.bf16 %v11101_v16, %v11101_v16  ;;  %v18976_v46 = vld [vmem:[#allocation14 + $0x824] ss:$40 sps:$4 sm:$0xff]   ;;  %v18974_v10 = vld [vmem:[#allocation14 + $0x820] ss:$40 sps:$4 sm:$0xff]   ;;  %v18982_v16 = vld [vmem:[#allocation14 + $0x874] ss:$40 sps:$4 sm:$0xff]  }
0x11ff   :  { %v11426_v28 = vpack.c.bf16 %v11102_v36, %v11102_v36  ;;  %v18979_v40 = vld [vmem:[#allocation14 + $0x82c] ss:$40 sps:$4 sm:$0xff]   ;;  %v18977_v20 = vld [vmem:[#allocation14 + $0x828] ss:$40 sps:$4 sm:$0xff]   ;;  %v18985_v47 = vld [vmem:[#allocation14 + $0x87c] ss:$40 sps:$4 sm:$0xff]  }
0x1201   :  { %12124 = vmatprep.mubr.bf16.mxu1 %v11426_v28  ;;  %12206 = vmatprep.mubr.bf16.mxu0 %v11426_v28 }
0x1202   :  { %12125 = vmatmul.mubr.bf16.vlgmr.msra.gmra.mrb[168].mxu1 %v11425_v17  ;;  %12207 = vmatmul.mubr.bf16.vlgmr.msra.gmra.mrb[136].mxu0 %v11425_v17 }
0x1203   :  { %12134 = vmatpush1.bf16.msra.mxu1 %v18914_v31  ;;  %12216 = vmatpush1.bf16.msra.mxu0 %v18917_v6 }
0x1204   :  { %12135 = vmatprep.subr.bf16.mxu1 %v18922_v19  ;;  %12217 = vmatprep.subr.bf16.mxu0 %v18925_v5  ;;  %v18980_v19 = vld [vmem:[#allocation14 + $0x870] ss:$40 sps:$4 sm:$0xff]  }
0x1205   :  { %v18983_v5 = vld [vmem:[#allocation14 + $0x878] ss:$40 sps:$4 sm:$0xff]  }
0x1207   :  { %12136 = vmatpush1.bf16.msra.mxu1 %v18920_v49  ;;  %12218 = vmatpush1.bf16.msra.mxu0 %v18923_v45  ;;  %v18988_v49 = vld [vmem:[#allocation14 + $0x8c4] ss:$40 sps:$4 sm:$0xff]  }
0x1208   :  { %12137 = vmatprep.subr.bf16.mxu1 %v18928_v9  ;;  %12219 = vmatprep.subr.bf16.mxu0 %v18931_v34  ;;  %v18991_v45 = vld [vmem:[#allocation14 + $0x8cc] ss:$40 sps:$4 sm:$0xff]   ;;  %v18986_v9 = vld [vmem:[#allocation14 + $0x8c0] ss:$40 sps:$4 sm:$0xff]  }
0x1209   :  { %v10122_v11 = vpop.f32.mrb[112].mxu0  ;;  %v18989_v34 = vld [vmem:[#allocation14 + $0x8c8] ss:$40 sps:$4 sm:$0xff]  }
0x120a   :  { %v10131_v61 = vadd.f32 %v10122_v11, %v9942_v37  ;;  %v10124_v52 = vpop.f32.mrb[113].mxu0  ;;  %v18962_v37 = vld [vmem:[#allocation14 + $0x780] ss:$40 sps:$4 sm:$0xff]   ;;  %v18992_v11 = vld [vmem:[#allocation14 + $0x910] ss:$40 sps:$4 sm:$0xff]  }
0x120b   :  { %v10132_v51 = vadd.f32 %v10124_v52, %v9943_v42  ;;  %v10126_v63 = vpop.f32.mrb[114].mxu0  ;;  %12138 = vmatpush1.bf16.msra.mxu1 %v18926_v43  ;;  %12220 = vmatpush1.bf16.msra.mxu0 %v18929_v29  ;;  %v18971_v42 = vld [vmem:[#allocation14 + $0x7d8] ss:$40 sps:$4 sm:$0xff]   ;;  %v18994_v43 = vld [vmem:[#allocation14 + $0x914] ss:$40 sps:$4 sm:$0xff]  }
0x120c   :  { %v10127_v54 = vpop.f32.mrb[115].mxu0  ;;  %12139 = vmatprep.subr.bf16.mxu1 %v18934_v57  ;;  %12221 = vmatprep.subr.bf16.mxu0 %v18937_v2  ;;  %v18997_v29 = vld [vmem:[#allocation14 + $0x91c] ss:$40 sps:$4 sm:$0xff]   ;;  %v18995_v57 = vld [vmem:[#allocation14 + $0x918] ss:$40 sps:$4 sm:$0xff]  }
0x120d   :  { %v19000_v2 = vld [vmem:[#allocation14 + $0x964] ss:$40 sps:$4 sm:$0xff]   ;;  %v18998_v52 = vld [vmem:[#allocation14 + $0x960] ss:$40 sps:$4 sm:$0xff]   ;;  %v19006_v54 = vld [vmem:[#allocation14 + $0x9b4] ss:$40 sps:$4 sm:$0xff]  }
0x120f   :  { %12140 = vmatpush1.bf16.msra.mxu1 %v18932_v48  ;;  %12222 = vmatpush1.bf16.msra.mxu0 %v18935_v33  ;;  %v19009_v48 = vld [vmem:[#allocation14 + $0x9bc] ss:$40 sps:$4 sm:$0xff]  }
0x1210   :  { %12141 = vmatprep.subr.bf16.mxu1 %v18940_v55  ;;  %12223 = vmatprep.subr.bf16.mxu0 %v18943_v1 }
0x1213   :  { %12142 = vmatpush1.bf16.msra.mxu1 %v18938_v23  ;;  %12224 = vmatpush1.bf16.msra.mxu0 %v18941_v14 }
0x1214   :  { %12143 = vmatprep.subr.bf16.mxu1 %v18946_v12  ;;  %12225 = vmatprep.subr.bf16.mxu0 %v18949_v50  ;;  %v19004_v12 = vld [vmem:[#allocation14 + $0x9b0] ss:$40 sps:$4 sm:$0xff]  }
0x1215   :  { %v19007_v50 = vld [vmem:[#allocation14 + $0x9b8] ss:$40 sps:$4 sm:$0xff]  }
0x1217   :  { %12144 = vmatpush1.bf16.msra.mxu1 %v18944_v4  ;;  %12226 = vmatpush1.bf16.msra.mxu0 %v18947_v60  ;;  %v19012_v4 = vld [vmem:[#allocation14 + $0x14] ss:$40 sps:$4 sm:$0xff]  }
0x1218   :  { %12145 = vmatprep.subr.bf16.mxu1 %v18952_v30  ;;  %12227 = vmatprep.subr.bf16.mxu0 %v18955_v62  ;;  %v19015_v60 = vld [vmem:[#allocation14 + $0x1c] ss:$40 sps:$4 sm:$0xff]  }
0x1219   :  { %v10311_v25 = vpop.f32.mrb[116].mxu0 }
0x121a   :  { %v10320_v35 = vadd.f32 %v10311_v25, %v10131_v61  ;;  %v10313_v38 = vpop.f32.mrb[117].mxu0  ;;  %v19003_v61 = vld [vmem:[#allocation14 + $0x96c] ss:$40 sps:$4 sm:$0xff]  }
0x121b   :  { %v10321_v26 = vadd.f32 %v10313_v38, %v10132_v51  ;;  %v10315_v41 = vpop.f32.mrb[118].mxu0  ;;  %12146 = vmatpush1.bf16.msra.mxu1 %v18950_v24  ;;  %12228 = vmatpush1.bf16.msra.mxu0 %v18953_v59  ;;  %v19001_v51 = vld [vmem:[#allocation14 + $0x968] ss:$40 sps:$4 sm:$0xff]  }
0x121c   :  { %v10316_v32 = vpop.f32.mrb[119].mxu0  ;;  %12147 = vmatprep.subr.bf16.mxu1 %v18958_v18  ;;  %12229 = vmatprep.subr.bf16.mxu0 %v18961_v21  ;;  %v22042_v21 = vsub.s32 2, %v22027_v56 }
0x121e   :  { %v11092_v38 = vrot.slane %v22032_v3, %v22042_v21 }
0x121f   :  { %12148 = vmatpush1.bf16.msra.mxu1 %v18956_v44  ;;  %12230 = vmatpush1.bf16.msra.mxu0 %v18959_v0 }
0x1220   :  { %12149 = vmatprep.subr.bf16.mxu1 %v18964_v27  ;;  %12231 = vmatprep.subr.bf16.mxu0 %v18967_v15 }
0x1223   :  { %12150 = vmatpush1.bf16.msra.mxu1 %v18962_v37  ;;  %12232 = vmatpush1.bf16.msra.mxu0 %v18965_v7 }
0x1224   :  { %12151 = vmatprep.subr.bf16.mxu1 %v18970_v58  ;;  %12233 = vmatprep.subr.bf16.mxu0 %v18973_v39  ;;  %v19010_v39 = vld [vmem:[#allocation14 + $0x10] ss:$40 sps:$4 sm:$0xff]  }
0x1227   :  { %12152 = vmatpush1.bf16.msra.mxu1 %v18968_v8  ;;  %12234 = vmatpush1.bf16.msra.mxu0 %v18971_v42  ;;  %v19013_v8 = vld [vmem:[#allocation14 + $0x18] ss:$40 sps:$4 sm:$0xff]  }
0x1228   :  { %12153 = vmatprep.subr.bf16.mxu1 %v18976_v46  ;;  %12235 = vmatprep.subr.bf16.mxu0 %v18979_v40  ;;  %v19021_v46 = vld [vmem:[#allocation14 + $0x6c] ss:$40 sps:$4 sm:$0xff]   ;;  %v19019_v40 = vld [vmem:[#allocation14 + $0x68] ss:$40 sps:$4 sm:$0xff]  }
0x1229   :  { %v10500_v13 = vpop.f32.mrb[120].mxu0 }
0x122a   :  { %v10509_v36 = vadd.f32 %v10500_v13, %v10320_v35  ;;  %v10502_v28 = vpop.f32.mrb[121].mxu0  ;;  %v22045_v35 = vsub.s32 3, %v22027_v56  ;;  %v19018_v56 = vld [vmem:[#allocation14 + $0x64] ss:$40 sps:$4 sm:$0xff]   ;;  %v19022_v13 = vld [vmem:[#allocation14 + $0xb0] ss:$40 sps:$4 sm:$0xff]  }
0x122b   :  { %v10510_v31 = vadd.f32 %v10502_v28, %v10321_v26  ;;  %v10504_v6 = vpop.f32.mrb[122].mxu0  ;;  %12154 = vmatpush1.bf16.msra.mxu1 %v18974_v10  ;;  %12236 = vmatpush1.bf16.msra.mxu0 %v18977_v20  ;;  %v19024_v10 = vld [vmem:[#allocation14 + $0xb4] ss:$40 sps:$4 sm:$0xff]   ;;  %v19028_v28 = vld [vmem:[#allocation14 + $0x100] ss:$40 sps:$4 sm:$0xff]  }
0x122c   :  { %v10505_v17 = vpop.f32.mrb[123].mxu0  ;;  %12155 = vmatprep.subr.bf16.mxu1 %v18982_v16  ;;  %12237 = vmatprep.subr.bf16.mxu0 %v18985_v47  ;;  %v11096_v41 = vrot.slane %v22032_v3, %v22045_v35  ;;  %v19016_v3 = vld [vmem:[#allocation14 + $0x60] ss:$40 sps:$4 sm:$0xff]   ;;  %v19027_v20 = vld [vmem:[#allocation14 + $0xbc] ss:$40 sps:$4 sm:$0xff]  }
0x122d   :  { %v19025_v16 = vld [vmem:[#allocation14 + $0xb8] ss:$40 sps:$4 sm:$0xff]   ;;  %v19030_v47 = vld [vmem:[#allocation14 + $0x104] ss:$40 sps:$4 sm:$0xff]   ;;  %v19036_v6 = vld [vmem:[#allocation14 + $0x154] ss:$40 sps:$4 sm:$0xff]  }
0x122e   :  { %v19039_v17 = vld [vmem:[#allocation14 + $0x15c] ss:$40 sps:$4 sm:$0xff]  }
0x122f   :  { %12156 = vmatpush1.bf16.msra.mxu1 %v18980_v19  ;;  %12238 = vmatpush1.bf16.msra.mxu0 %v18983_v5  ;;  %v19034_v19 = vld [vmem:[#allocation14 + $0x150] ss:$40 sps:$4 sm:$0xff]  }
0x1230   :  { %12157 = vmatprep.subr.bf16.mxu1 %v18988_v49  ;;  %12239 = vmatprep.subr.bf16.mxu0 %v18991_v45  ;;  %v19037_v5 = vld [vmem:[#allocation14 + $0x158] ss:$40 sps:$4 sm:$0xff]   ;;  %v19042_v49 = vld [vmem:[#allocation14 + $0x1a4] ss:$40 sps:$4 sm:$0xff]  }
0x1231   :  { %v19045_v45 = vld [vmem:[#allocation14 + $0x1ac] ss:$40 sps:$4 sm:$0xff]  }
0x1233   :  { %12158 = vmatpush1.bf16.msra.mxu1 %v18986_v9  ;;  %12240 = vmatpush1.bf16.msra.mxu0 %v18989_v34  ;;  %v19040_v9 = vld [vmem:[#allocation14 + $0x1a0] ss:$40 sps:$4 sm:$0xff]  }
0x1234   :  { %12159 = vmatprep.subr.bf16.mxu1 %v18994_v43  ;;  %12241 = vmatprep.subr.bf16.mxu0 %v18997_v29  ;;  %v19043_v34 = vld [vmem:[#allocation14 + $0x1a8] ss:$40 sps:$4 sm:$0xff]   ;;  %v19048_v43 = vld [vmem:[#allocation14 + $0x1f4] ss:$40 sps:$4 sm:$0xff]  }
0x1235   :  { %v19051_v29 = vld [vmem:[#allocation14 + $0x1fc] ss:$40 sps:$4 sm:$0xff]  }
0x1237   :  { %12160 = vmatpush1.bf16.msra.mxu1 %v18992_v11  ;;  %12242 = vmatpush1.bf16.msra.mxu0 %v18995_v57  ;;  %v19046_v11 = vld [vmem:[#allocation14 + $0x1f0] ss:$40 sps:$4 sm:$0xff]  }
0x1238   :  { %12161 = vmatprep.subr.bf16.mxu1 %v19000_v2  ;;  %12243 = vmatprep.subr.bf16.mxu0 %v19003_v61  ;;  %v19049_v57 = vld [vmem:[#allocation14 + $0x1f8] ss:$40 sps:$4 sm:$0xff]   ;;  %v19054_v2 = vld [vmem:[#allocation14 + $0x244] ss:$40 sps:$4 sm:$0xff]  }
0x1239   :  { %v10689_v63 = vpop.f32.mrb[124].mxu0  ;;  %v19057_v61 = vld [vmem:[#allocation14 + $0x24c] ss:$40 sps:$4 sm:$0xff]  }
0x123a   :  { %v10698_v33 = vadd.f32 %v10689_v63, %v10509_v36  ;;  %v10691_v55 = vpop.f32.mrb[125].mxu0  ;;  %v19033_v36 = vld [vmem:[#allocation14 + $0x10c] ss:$40 sps:$4 sm:$0xff]  }
0x123b   :  { %v10699_v1 = vadd.f32 %v10691_v55, %v10510_v31  ;;  %v10693_v23 = vpop.f32.mrb[126].mxu0  ;;  %12162 = vmatpush1.bf16.msra.mxu1 %v18998_v52  ;;  %12244 = vmatpush1.bf16.msra.mxu0 %v19001_v51  ;;  %v19031_v31 = vld [vmem:[#allocation14 + $0x108] ss:$40 sps:$4 sm:$0xff]   ;;  %v19060_v63 = vld [vmem:[#allocation14 + $0x294] ss:$40 sps:$4 sm:$0xff]  }
0x123c   :  { %v10694_v14 = vpop.f32.mrb[127].mxu0  ;;  %12163 = vmatprep.subr.bf16.mxu1 %v19006_v54  ;;  %12245 = vmatprep.subr.bf16.mxu0 %v19009_v48  ;;  %v19052_v52 = vld [vmem:[#allocation14 + $0x240] ss:$40 sps:$4 sm:$0xff]   ;;  %v19063_v54 = vld [vmem:[#allocation14 + $0x29c] ss:$40 sps:$4 sm:$0xff]  }
0x123d   :  { %v19055_v51 = vld [vmem:[#allocation14 + $0x248] ss:$40 sps:$4 sm:$0xff]   ;;  %v19066_v55 = vld [vmem:[#allocation14 + $0x2e4] ss:$40 sps:$4 sm:$0xff]  }
0x123e   :  { %v19058_v48 = vld [vmem:[#allocation14 + $0x290] ss:$40 sps:$4 sm:$0xff]   ;;  %v19064_v23 = vld [vmem:[#allocation14 + $0x2e0] ss:$40 sps:$4 sm:$0xff]  }
0x123f   :  { %12164 = vmatpush1.bf16.msra.mxu1 %v19004_v12  ;;  %12246 = vmatpush1.bf16.msra.mxu0 %v19007_v50  ;;  %v19067_v14 = vld [vmem:[#allocation14 + $0x2e8] ss:$40 sps:$4 sm:$0xff]   ;;  %v19072_v12 = vld [vmem:[#allocation14 + $0x334] ss:$40 sps:$4 sm:$0xff]  }
0x1240   :  { %12923 = vmatprep.subr.bf16.mxu1 %v19012_v4  ;;  %13005 = vmatprep.subr.bf16.mxu0 %v19015_v60  ;;  %v19075_v50 = vld [vmem:[#allocation14 + $0x33c] ss:$40 sps:$4 sm:$0xff]   ;;  %v19070_v4 = vld [vmem:[#allocation14 + $0x330] ss:$40 sps:$4 sm:$0xff]  }
0x1241   :  { %v19073_v60 = vld [vmem:[#allocation14 + $0x338] ss:$40 sps:$4 sm:$0xff]  }
0x1249   :  { %v10878_v30 = vpop.f32.mrb[128].mxu0 }
0x124a   :  { %v10887_v62 = vadd.f32 %v10878_v30, %v10698_v33  ;;  %v10880_v24 = vpop.f32.mrb[129].mxu0  ;;  %v19061_v33 = vld [vmem:[#allocation14 + $0x298] ss:$40 sps:$4 sm:$0xff]   ;;  %v19078_v30 = vld [vmem:[#allocation14 + $0x384] ss:$40 sps:$4 sm:$0xff]  }
0x124b   :  { %v10888_v59 = vadd.f32 %v10880_v24, %v10699_v1  ;;  %v10882_v25 = vpop.f32.mrb[130].mxu0  ;;  %v19069_v1 = vld [vmem:[#allocation14 + $0x2ec] ss:$40 sps:$4 sm:$0xff]   ;;  %v19076_v24 = vld [vmem:[#allocation14 + $0x380] ss:$40 sps:$4 sm:$0xff]  }
0x124c   :  { %v10883_v18 = vpop.f32.mrb[131].mxu0  ;;  %v19084_v25 = vld [vmem:[#allocation14 + $0x3d4] ss:$40 sps:$4 sm:$0xff]  }
0x124d   :  { %v19087_v18 = vld [vmem:[#allocation14 + $0x3dc] ss:$40 sps:$4 sm:$0xff]  }
0x1259   :  { %v11067_v26 = vpop.f32.mrb[132].mxu0 }
0x125a   :  { %v11076_v32 = vadd.f32 %v11067_v26, %v10887_v62  ;;  %v11069_v44 = vpop.f32.mrb[133].mxu0  ;;  %v19081_v62 = vld [vmem:[#allocation14 + $0x38c] ss:$40 sps:$4 sm:$0xff]   ;;  %v19085_v26 = vld [vmem:[#allocation14 + $0x3d8] ss:$40 sps:$4 sm:$0xff]  }
0x125b   :  { %v11077_v0 = vadd.f32 %v11069_v44, %v10888_v59  ;;  %v11071_v27 = vpop.f32.mrb[134].mxu0  ;;  %v19079_v59 = vld [vmem:[#allocation14 + $0x388] ss:$40 sps:$4 sm:$0xff]  }
0x125c   :  { %v11103_v15 = vadd.f32 %v11092_v38, %v11076_v32  ;;  %v11072_v37 = vpop.f32.mrb[135].mxu0  ;;  %v19082_v38 = vld [vmem:[#allocation14 + $0x3d0] ss:$40 sps:$4 sm:$0xff]   ;;  %v19093_v32 = vld [vmem:[#allocation14 + $0x42c] ss:$40 sps:$4 sm:$0xff]  }
0x125d   :  { %v11104_v7 = vadd.f32 %v11096_v41, %v11077_v0  ;;  %v19090_v41 = vld [vmem:[#allocation14 + $0x424] ss:$40 sps:$4 sm:$0xff]   ;;  %v19088_v44 = vld [vmem:[#allocation14 + $0x420] ss:$40 sps:$4 sm:$0xff]   ;;  %v19096_v27 = vld [vmem:[#allocation14 + $0x474] ss:$40 sps:$4 sm:$0xff]  }
0x125e   :  { %v11427_v42 = vpack.c.bf16 %v11103_v15, %v11103_v15  ;;  %v19091_v0 = vld [vmem:[#allocation14 + $0x428] ss:$40 sps:$4 sm:$0xff]   ;;  %v19099_v15 = vld [vmem:[#allocation14 + $0x47c] ss:$40 sps:$4 sm:$0xff]  }
0x125f   :  { %v11428_v58 = vpack.c.bf16 %v11104_v7, %v11104_v7  ;;  %v19094_v37 = vld [vmem:[#allocation14 + $0x470] ss:$40 sps:$4 sm:$0xff]  }
0x1260   :  { %v19097_v7 = vld [vmem:[#allocation14 + $0x478] ss:$40 sps:$4 sm:$0xff]  }
0x1261   :  { %12165 = vmatprep.mubr.bf16.mxu1 %v11428_v58  ;;  %12247 = vmatprep.mubr.bf16.mxu0 %v11428_v58  ;;  %v19100_v58 = vld [vmem:[#allocation14 + $0x4c0] ss:$40 sps:$4 sm:$0xff]  }
0x1262   :  { %12166 = vmatmul.mubr.bf16.vlgmr.msra.gmra.mrb[168].mxu1 %v11427_v42  ;;  %12248 = vmatmul.mubr.bf16.vlgmr.msra.gmra.mrb[136].mxu0 %v11427_v42  ;;  %v19105_v42 = vld [vmem:[#allocation14 + $0x4cc] ss:$40 sps:$4 sm:$0xff]  }
0x1263   :  { %12924 = vmatpush1.bf16.msra.mxu1 %v19010_v39  ;;  %13006 = vmatpush1.bf16.msra.mxu0 %v19013_v8  ;;  %v19102_v39 = vld [vmem:[#allocation14 + $0x4c4] ss:$40 sps:$4 sm:$0xff]   ;;  %v19103_v8 = vld [vmem:[#allocation14 + $0x4c8] ss:$40 sps:$4 sm:$0xff]  }
0x1264   :  { %12925 = vmatprep.subr.bf16.mxu1 %v19018_v56  ;;  %13007 = vmatprep.subr.bf16.mxu0 %v19021_v46  ;;  %v19108_v56 = vld [vmem:[#allocation14 + $0x514] ss:$40 sps:$4 sm:$0xff]  }
0x1265   :  { %v19111_v46 = vld [vmem:[#allocation14 + $0x51c] ss:$40 sps:$4 sm:$0xff]  }
0x1267   :  { %12926 = vmatpush1.bf16.msra.mxu1 %v19016_v3  ;;  %13008 = vmatpush1.bf16.msra.mxu0 %v19019_v40  ;;  %v22051_v3 = vld [vmem:[#allocation19 + $0x4] ss:$8 sm:$0xf] }
0x1268   :  { %12927 = vmatprep.subr.bf16.mxu1 %v19024_v10  ;;  %13009 = vmatprep.subr.bf16.mxu0 %v19027_v20  ;;  %v11435_v40 = vrot.slane %v22051_v3, %v22030_v22  ;;  %v11439_v10 = vrot.slane %v22051_v3, %v22035_v53  ;;  %v11447_v20 = vrot.slane %v22051_v3, %v22045_v35 }
0x126b   :  { %12928 = vmatpush1.bf16.msra.mxu1 %v19022_v13  ;;  %13010 = vmatpush1.bf16.msra.mxu0 %v19025_v16 }
0x126c   :  { %12929 = vmatprep.subr.bf16.mxu1 %v19030_v47  ;;  %13011 = vmatprep.subr.bf16.mxu0 %v19033_v36 }
0x126f   :  { %12930 = vmatpush1.bf16.msra.mxu1 %v19028_v28  ;;  %13012 = vmatpush1.bf16.msra.mxu0 %v19031_v31 }
0x1270   :  { %12931 = vmatprep.subr.bf16.mxu1 %v19036_v6  ;;  %13013 = vmatprep.subr.bf16.mxu0 %v19039_v17 }
0x1273   :  { %12932 = vmatpush1.bf16.msra.mxu1 %v19034_v19  ;;  %13014 = vmatpush1.bf16.msra.mxu0 %v19037_v5 }
0x1274   :  { %12933 = vmatprep.subr.bf16.mxu1 %v19042_v49  ;;  %13015 = vmatprep.subr.bf16.mxu0 %v19045_v45 }
0x1277   :  { %12934 = vmatpush1.bf16.msra.mxu1 %v19040_v9  ;;  %13016 = vmatpush1.bf16.msra.mxu0 %v19043_v34  ;;  %v19106_v9 = vld [vmem:[#allocation14 + $0x510] ss:$40 sps:$4 sm:$0xff]  }
0x1278   :  { %12935 = vmatprep.subr.bf16.mxu1 %v19048_v43  ;;  %13017 = vmatprep.subr.bf16.mxu0 %v19051_v29  ;;  %v19109_v34 = vld [vmem:[#allocation14 + $0x518] ss:$40 sps:$4 sm:$0xff]   ;;  %v19114_v29 = vld [vmem:[#allocation14 + $0x564] ss:$40 sps:$4 sm:$0xff]  }
0x127b   :  { %12936 = vmatpush1.bf16.msra.mxu1 %v19046_v11  ;;  %13018 = vmatpush1.bf16.msra.mxu0 %v19049_v57  ;;  %v19117_v11 = vld [vmem:[#allocation14 + $0x56c] ss:$40 sps:$4 sm:$0xff]  }
0x127c   :  { %12937 = vmatprep.subr.bf16.mxu1 %v19054_v2  ;;  %13019 = vmatprep.subr.bf16.mxu0 %v19057_v61  ;;  %v19112_v2 = vld [vmem:[#allocation14 + $0x560] ss:$40 sps:$4 sm:$0xff]  }
0x127d   :  { %v19115_v61 = vld [vmem:[#allocation14 + $0x568] ss:$40 sps:$4 sm:$0xff]  }
0x127f   :  { %12938 = vmatpush1.bf16.msra.mxu1 %v19052_v52  ;;  %13020 = vmatpush1.bf16.msra.mxu0 %v19055_v51  ;;  %v19120_v52 = vld [vmem:[#allocation14 + $0x5b4] ss:$40 sps:$4 sm:$0xff]  }
0x1280   :  { %12939 = vmatprep.subr.bf16.mxu1 %v19060_v63  ;;  %13021 = vmatprep.subr.bf16.mxu0 %v19063_v54  ;;  %v19123_v51 = vld [vmem:[#allocation14 + $0x5bc] ss:$40 sps:$4 sm:$0xff]   ;;  %v19118_v63 = vld [vmem:[#allocation14 + $0x5b0] ss:$40 sps:$4 sm:$0xff]  }
0x1281   :  { %v19121_v54 = vld [vmem:[#allocation14 + $0x5b8] ss:$40 sps:$4 sm:$0xff]  }
0x1283   :  { %12940 = vmatpush1.bf16.msra.mxu1 %v19058_v48  ;;  %13022 = vmatpush1.bf16.msra.mxu0 %v19061_v33  ;;  %v19126_v48 = vld [vmem:[#allocation14 + $0x604] ss:$40 sps:$4 sm:$0xff]  }
0x1284   :  { %12941 = vmatprep.subr.bf16.mxu1 %v19066_v55  ;;  %13023 = vmatprep.subr.bf16.mxu0 %v19069_v1  ;;  %v19129_v33 = vld [vmem:[#allocation14 + $0x60c] ss:$40 sps:$4 sm:$0xff]   ;;  %v19124_v55 = vld [vmem:[#allocation14 + $0x600] ss:$40 sps:$4 sm:$0xff]  }
0x1285   :  { %v19127_v1 = vld [vmem:[#allocation14 + $0x608] ss:$40 sps:$4 sm:$0xff]  }
0x1287   :  { %12942 = vmatpush1.bf16.msra.mxu1 %v19064_v23  ;;  %13024 = vmatpush1.bf16.msra.mxu0 %v19067_v14  ;;  %v19132_v23 = vld [vmem:[#allocation14 + $0x654] ss:$40 sps:$4 sm:$0xff]  }
0x1288   :  { %12943 = vmatprep.subr.bf16.mxu1 %v19072_v12  ;;  %13025 = vmatprep.subr.bf16.mxu0 %v19075_v50  ;;  %v19135_v14 = vld [vmem:[#allocation14 + $0x65c] ss:$40 sps:$4 sm:$0xff]   ;;  %v19130_v12 = vld [vmem:[#allocation14 + $0x650] ss:$40 sps:$4 sm:$0xff]  }
0x1289   :  { %v19133_v50 = vld [vmem:[#allocation14 + $0x658] ss:$40 sps:$4 sm:$0xff]  }
0x128b   :  { %12944 = vmatpush1.bf16.msra.mxu1 %v19070_v4  ;;  %13026 = vmatpush1.bf16.msra.mxu0 %v19073_v60  ;;  %v19138_v4 = vld [vmem:[#allocation14 + $0x6a4] ss:$40 sps:$4 sm:$0xff]  }
0x128c   :  { %12945 = vmatprep.subr.bf16.mxu1 %v19078_v30  ;;  %13027 = vmatprep.subr.bf16.mxu0 %v19081_v62  ;;  %v19141_v60 = vld [vmem:[#allocation14 + $0x6ac] ss:$40 sps:$4 sm:$0xff]   ;;  %v19136_v30 = vld [vmem:[#allocation14 + $0x6a0] ss:$40 sps:$4 sm:$0xff]  }
0x128d   :  { %v19139_v62 = vld [vmem:[#allocation14 + $0x6a8] ss:$40 sps:$4 sm:$0xff]  }
0x128f   :  { %12946 = vmatpush1.bf16.msra.mxu1 %v19076_v24  ;;  %13028 = vmatpush1.bf16.msra.mxu0 %v19079_v59  ;;  %v19144_v24 = vld [vmem:[#allocation14 + $0x6f4] ss:$40 sps:$4 sm:$0xff]  }
0x1290   :  { %12947 = vmatprep.subr.bf16.mxu1 %v19084_v25  ;;  %13029 = vmatprep.subr.bf16.mxu0 %v19087_v18  ;;  %v19147_v59 = vld [vmem:[#allocation14 + $0x6fc] ss:$40 sps:$4 sm:$0xff]   ;;  %v19142_v25 = vld [vmem:[#allocation14 + $0x6f0] ss:$40 sps:$4 sm:$0xff]  }
0x1291   :  { %v19145_v18 = vld [vmem:[#allocation14 + $0x6f8] ss:$40 sps:$4 sm:$0xff]  }
0x1293   :  { %12948 = vmatpush1.bf16.msra.mxu1 %v19082_v38  ;;  %13030 = vmatpush1.bf16.msra.mxu0 %v19085_v26  ;;  %v19150_v38 = vld [vmem:[#allocation14 + $0x744] ss:$40 sps:$4 sm:$0xff]  }
0x1294   :  { %12949 = vmatprep.subr.bf16.mxu1 %v19090_v41  ;;  %13031 = vmatprep.subr.bf16.mxu0 %v19093_v32  ;;  %v19153_v26 = vld [vmem:[#allocation14 + $0x74c] ss:$40 sps:$4 sm:$0xff]   ;;  %v19148_v41 = vld [vmem:[#allocation14 + $0x740] ss:$40 sps:$4 sm:$0xff]  }
0x1295   :  { %v19151_v32 = vld [vmem:[#allocation14 + $0x748] ss:$40 sps:$4 sm:$0xff]  }
0x1297   :  { %12950 = vmatpush1.bf16.msra.mxu1 %v19088_v44  ;;  %13032 = vmatpush1.bf16.msra.mxu0 %v19091_v0  ;;  %v19156_v44 = vld [vmem:[#allocation14 + $0x794] ss:$40 sps:$4 sm:$0xff]  }
0x1298   :  { %12951 = vmatprep.subr.bf16.mxu1 %v19096_v27  ;;  %13033 = vmatprep.subr.bf16.mxu0 %v19099_v15  ;;  %v19159_v0 = vld [vmem:[#allocation14 + $0x79c] ss:$40 sps:$4 sm:$0xff]   ;;  %v19154_v27 = vld [vmem:[#allocation14 + $0x790] ss:$40 sps:$4 sm:$0xff]  }
0x1299   :  { %v19157_v15 = vld [vmem:[#allocation14 + $0x798] ss:$40 sps:$4 sm:$0xff]  }
0x129b   :  { %12952 = vmatpush1.bf16.msra.mxu1 %v19094_v37  ;;  %13034 = vmatpush1.bf16.msra.mxu0 %v19097_v7  ;;  %v19162_v37 = vld [vmem:[#allocation14 + $0x7e4] ss:$40 sps:$4 sm:$0xff]  }
0x129c   :  { %12953 = vmatprep.subr.bf16.mxu1 %v19102_v39  ;;  %13035 = vmatprep.subr.bf16.mxu0 %v19105_v42  ;;  %v19165_v7 = vld [vmem:[#allocation14 + $0x7ec] ss:$40 sps:$4 sm:$0xff]   ;;  %v19163_v39 = vld [vmem:[#allocation14 + $0x7e8] ss:$40 sps:$4 sm:$0xff]   ;;  %v19171_v42 = vld [vmem:[#allocation14 + $0x83c] ss:$40 sps:$4 sm:$0xff]  }
0x129f   :  { %12954 = vmatpush1.bf16.msra.mxu1 %v19100_v58  ;;  %13036 = vmatpush1.bf16.msra.mxu0 %v19103_v8  ;;  %v19160_v58 = vld [vmem:[#allocation14 + $0x7e0] ss:$40 sps:$4 sm:$0xff]   ;;  %v19168_v8 = vld [vmem:[#allocation14 + $0x834] ss:$40 sps:$4 sm:$0xff]  }
0x12a0   :  { %12964 = vmatprep.subr.bf16.mxu1 %v19108_v56  ;;  %13046 = vmatprep.subr.bf16.mxu0 %v19111_v46  ;;  %v19166_v56 = vld [vmem:[#allocation14 + $0x830] ss:$40 sps:$4 sm:$0xff]  }
0x12a1   :  { %v19169_v46 = vld [vmem:[#allocation14 + $0x838] ss:$40 sps:$4 sm:$0xff]  }
0x1335   :  { %v12167_v13 = vpop.f32.mrb[168].mxu1  ;;  %v22059_v16 = vpop.f32.mrb[136].mxu0 }
0x1336   :  { %v17626_v47 = vadd.f32 %v12167_v13, %v11435_v40  ;;  %v12169_v36 = vpop.f32.mrb[169].mxu1  ;;  %v12251_v28 = vpop.f32.mrb[137].mxu0  ;;  %v19174_v40 = vld [vmem:[#allocation14 + $0x884] ss:$40 sps:$4 sm:$0xff]   ;;  %v19175_v13 = vld [vmem:[#allocation14 + $0x888] ss:$40 sps:$4 sm:$0xff]  }
0x1337   :  { %v17627_v31 = vadd.f32 %v12169_v36, %v11439_v10  ;;  %v12171_v6 = vpop.f32.mrb[170].mxu1  ;;  %v12253_v17 = vpop.f32.mrb[138].mxu0  ;;  %v17629_v19 = vadd.f32 %v12251_v28, %v11447_v20  ;;  %v19177_v10 = vld [vmem:[#allocation14 + $0x88c] ss:$40 sps:$4 sm:$0xff]   ;;  %v19172_v20 = vld [vmem:[#allocation14 + $0x880] ss:$40 sps:$4 sm:$0xff]  }
0x1338   :  { %v12172_v5 = vpop.f32.mrb[171].mxu1  ;;  %v12254_v49 = vpop.f32.mrb[139].mxu0  ;;  %v12256_v43 = vpack.c.bf16 %v17626_v47, %v17626_v47  ;;  %v19180_v47 = vld [vmem:[#allocation14 + $0x8d4] ss:$40 sps:$4 sm:$0xff]   ;;  %v19178_v28 = vld [vmem:[#allocation14 + $0x8d0] ss:$40 sps:$4 sm:$0xff]  }
0x1339   :  { %v12257_v45 = vpack.c.bf16 %v17627_v31, %v17627_v31  ;;  %v12259_v57 = vpack.c.bf16 %v17629_v19, %v17629_v19  ;;  %v19183_v36 = vld [vmem:[#allocation14 + $0x8dc] ss:$40 sps:$4 sm:$0xff]   ;;  %v19181_v31 = vld [vmem:[#allocation14 + $0x8d8] ss:$40 sps:$4 sm:$0xff]   ;;  %v19189_v17 = vld [vmem:[#allocation14 + $0x92c] ss:$40 sps:$4 sm:$0xff]  }
0x133a   :  { %v19186_v6 = vld [vmem:[#allocation14 + $0x924] ss:$40 sps:$4 sm:$0xff]   ;;  %v19184_v19 = vld [vmem:[#allocation14 + $0x920] ss:$40 sps:$4 sm:$0xff]   ;;  %v19192_v49 = vld [vmem:[#allocation14 + $0x974] ss:$40 sps:$4 sm:$0xff]  }
0x133b   :  { %12955 = vmatprep.mubr.bf16.mxu1 %v12257_v45  ;;  %13037 = vmatprep.mubr.bf16.mxu0 %v12257_v45  ;;  %v19187_v5 = vld [vmem:[#allocation14 + $0x928] ss:$40 sps:$4 sm:$0xff]   ;;  %v19195_v45 = vld [vmem:[#allocation14 + $0x97c] ss:$40 sps:$4 sm:$0xff]  }
0x133c   :  { %12956 = vmatmul.mubr.bf16.vlgmr.msra.gmra.mrb[172].mxu1 %v12256_v43  ;;  %13038 = vmatmul.mubr.bf16.vlgmr.msra.gmra.mrb[140].mxu0 %v12256_v43  ;;  %v11443_v43 = vrot.slane %v22051_v3, %v22042_v21  ;;  %v19205_v3 = vld [vmem:[#allocation14 + $0x70] ss:$40 sps:$4 sm:$0xff]  }
0x133d   :  { %12965 = vmatpush1.bf16.msra.mxu1 %v19106_v9  ;;  %13047 = vmatpush1.bf16.msra.mxu0 %v19109_v34  ;;  %v19190_v9 = vld [vmem:[#allocation14 + $0x970] ss:$40 sps:$4 sm:$0xff]  }
0x133e   :  { %12996 = vmatprep.mubr.bf16.mxu1 %v12259_v57  ;;  %13078 = vmatprep.mubr.bf16.mxu0 %v12259_v57  ;;  %v19193_v34 = vld [vmem:[#allocation14 + $0x978] ss:$40 sps:$4 sm:$0xff]  }
0x133f   :  { %12966 = vmatprep.subr.bf16.mxu1 %v19114_v29  ;;  %13048 = vmatprep.subr.bf16.mxu0 %v19117_v11  ;;  %v19198_v29 = vld [vmem:[#allocation14 + $0x9c4] ss:$40 sps:$4 sm:$0xff]   ;;  %v19196_v57 = vld [vmem:[#allocation14 + $0x9c0] ss:$40 sps:$4 sm:$0xff]  }
0x1340   :  { %v19201_v11 = vld [vmem:[#allocation14 + $0x9cc] ss:$40 sps:$4 sm:$0xff]  }
0x1341   :  { %12967 = vmatpush1.bf16.msra.mxu1 %v19112_v2  ;;  %13049 = vmatpush1.bf16.msra.mxu0 %v19115_v61  ;;  %v19199_v2 = vld [vmem:[#allocation14 + $0x9c8] ss:$40 sps:$4 sm:$0xff]   ;;  %v17628_v61 = vadd.f32 %v22059_v16, %v11443_v43  ;;  %v19330_v43 = vld [vmem:[#allocation16 + $0xa4] ss:$8 sps:$4 sm:$0xff]  }
0x1342   :  { %12968 = vmatprep.subr.bf16.mxu1 %v19120_v52  ;;  %13050 = vmatprep.subr.bf16.mxu0 %v19123_v51  ;;  %v19204_v52 = vld [vmem:[#allocation14 + $0x24] ss:$40 sps:$4 sm:$0xff]   ;;  %v19202_v51 = vld [vmem:[#allocation14 + $0x20] ss:$40 sps:$4 sm:$0xff]   ;;  %v19211_v16 = vld [vmem:[#allocation14 + $0x110] ss:$40 sps:$4 sm:$0xff]  }
0x1345   :  { %12969 = vmatpush1.bf16.msra.mxu1 %v19118_v63  ;;  %13051 = vmatpush1.bf16.msra.mxu0 %v19121_v54  ;;  %v12258_v63 = vpack.c.bf16 %v17628_v61, %v17628_v61  ;;  %v19207_v54 = vld [vmem:[#allocation14 + $0x74] ss:$40 sps:$4 sm:$0xff]   ;;  %v19334_v61 = vld [vmem:[#allocation16 + $0xc0] ss:$8 sps:$4 sm:$0xff]  }
0x1346   :  { %12970 = vmatprep.subr.bf16.mxu1 %v19126_v48  ;;  %13052 = vmatprep.subr.bf16.mxu0 %v19129_v33  ;;  %v19210_v48 = vld [vmem:[#allocation14 + $0xc4] ss:$40 sps:$4 sm:$0xff]   ;;  %v19208_v33 = vld [vmem:[#allocation14 + $0xc0] ss:$40 sps:$4 sm:$0xff]  }
0x1349   :  { %12971 = vmatpush1.bf16.msra.mxu1 %v19124_v55  ;;  %13053 = vmatpush1.bf16.msra.mxu0 %v19127_v1  ;;  %v19213_v55 = vld [vmem:[#allocation14 + $0x114] ss:$40 sps:$4 sm:$0xff]   ;;  %v19216_v1 = vld [vmem:[#allocation14 + $0x164] ss:$40 sps:$4 sm:$0xff]  }
0x134a   :  { %12972 = vmatprep.subr.bf16.mxu1 %v19132_v23  ;;  %13054 = vmatprep.subr.bf16.mxu0 %v19135_v14  ;;  %v19214_v23 = vld [vmem:[#allocation14 + $0x160] ss:$40 sps:$4 sm:$0xff]   ;;  %v19219_v14 = vld [vmem:[#allocation14 + $0x1b4] ss:$40 sps:$4 sm:$0xff]  }
0x134d   :  { %12973 = vmatpush1.bf16.msra.mxu1 %v19130_v12  ;;  %13055 = vmatpush1.bf16.msra.mxu0 %v19133_v50  ;;  %v19217_v12 = vld [vmem:[#allocation14 + $0x1b0] ss:$40 sps:$4 sm:$0xff]   ;;  %v19222_v50 = vld [vmem:[#allocation14 + $0x204] ss:$40 sps:$4 sm:$0xff]  }
0x134e   :  { %12974 = vmatprep.subr.bf16.mxu1 %v19138_v4  ;;  %13056 = vmatprep.subr.bf16.mxu0 %v19141_v60  ;;  %v19220_v4 = vld [vmem:[#allocation14 + $0x200] ss:$40 sps:$4 sm:$0xff]   ;;  %v19225_v60 = vld [vmem:[#allocation14 + $0x254] ss:$40 sps:$4 sm:$0xff]  }
0x1351   :  { %12975 = vmatpush1.bf16.msra.mxu1 %v19136_v30  ;;  %13057 = vmatpush1.bf16.msra.mxu0 %v19139_v62  ;;  %v19223_v30 = vld [vmem:[#allocation14 + $0x250] ss:$40 sps:$4 sm:$0xff]   ;;  %v19228_v62 = vld [vmem:[#allocation14 + $0x2a4] ss:$40 sps:$4 sm:$0xff]  }
0x1352   :  { %12976 = vmatprep.subr.bf16.mxu1 %v19144_v24  ;;  %13058 = vmatprep.subr.bf16.mxu0 %v19147_v59  ;;  %v19226_v24 = vld [vmem:[#allocation14 + $0x2a0] ss:$40 sps:$4 sm:$0xff]   ;;  %v19231_v59 = vld [vmem:[#allocation14 + $0x2f4] ss:$40 sps:$4 sm:$0xff]  }
0x1355   :  { %12977 = vmatpush1.bf16.msra.mxu1 %v19142_v25  ;;  %13059 = vmatpush1.bf16.msra.mxu0 %v19145_v18  ;;  %v19229_v25 = vld [vmem:[#allocation14 + $0x2f0] ss:$40 sps:$4 sm:$0xff]   ;;  %v19234_v18 = vld [vmem:[#allocation14 + $0x344] ss:$40 sps:$4 sm:$0xff]  }
0x1356   :  { %12978 = vmatprep.subr.bf16.mxu1 %v19150_v38  ;;  %13060 = vmatprep.subr.bf16.mxu0 %v19153_v26  ;;  %v19232_v38 = vld [vmem:[#allocation14 + $0x340] ss:$40 sps:$4 sm:$0xff]   ;;  %v19237_v26 = vld [vmem:[#allocation14 + $0x394] ss:$40 sps:$4 sm:$0xff]  }
0x1359   :  { %12979 = vmatpush1.bf16.msra.mxu1 %v19148_v41  ;;  %13061 = vmatpush1.bf16.msra.mxu0 %v19151_v32  ;;  %v19235_v41 = vld [vmem:[#allocation14 + $0x390] ss:$40 sps:$4 sm:$0xff]   ;;  %v19240_v32 = vld [vmem:[#allocation14 + $0x3e4] ss:$40 sps:$4 sm:$0xff]  }
0x135a   :  { %12980 = vmatprep.subr.bf16.mxu1 %v19156_v44  ;;  %13062 = vmatprep.subr.bf16.mxu0 %v19159_v0  ;;  %v19238_v44 = vld [vmem:[#allocation14 + $0x3e0] ss:$40 sps:$4 sm:$0xff]   ;;  %v19243_v0 = vld [vmem:[#allocation14 + $0x434] ss:$40 sps:$4 sm:$0xff]  }
0x135d   :  { %12981 = vmatpush1.bf16.msra.mxu1 %v19154_v27  ;;  %13063 = vmatpush1.bf16.msra.mxu0 %v19157_v15  ;;  %v19241_v27 = vld [vmem:[#allocation14 + $0x430] ss:$40 sps:$4 sm:$0xff]   ;;  %v19246_v15 = vld [vmem:[#allocation14 + $0x484] ss:$40 sps:$4 sm:$0xff]  }
0x135e   :  { %12982 = vmatprep.subr.bf16.mxu1 %v19162_v37  ;;  %13064 = vmatprep.subr.bf16.mxu0 %v19165_v7  ;;  %v19244_v37 = vld [vmem:[#allocation14 + $0x480] ss:$40 sps:$4 sm:$0xff]   ;;  %v19249_v7 = vld [vmem:[#allocation14 + $0x4d4] ss:$40 sps:$4 sm:$0xff]  }
0x1361   :  { %12983 = vmatpush1.bf16.msra.mxu1 %v19160_v58  ;;  %13065 = vmatpush1.bf16.msra.mxu0 %v19163_v39  ;;  %v19247_v58 = vld [vmem:[#allocation14 + $0x4d0] ss:$40 sps:$4 sm:$0xff]   ;;  %v19252_v39 = vld [vmem:[#allocation14 + $0x524] ss:$40 sps:$4 sm:$0xff]  }
0x1362   :  { %12984 = vmatprep.subr.bf16.mxu1 %v19168_v8  ;;  %13066 = vmatprep.subr.bf16.mxu0 %v19171_v42  ;;  %v19298_v8 = vld [vmem:[#allocation16] ss:$8 sps:$4 sm:$0xff]   ;;  %v19300_v42 = vld [vmem:[#allocation16 + $0x4] ss:$8 sps:$4 sm:$0xff]  }
0x1365   :  { %12985 = vmatpush1.bf16.msra.mxu1 %v19166_v56  ;;  %13067 = vmatpush1.bf16.msra.mxu0 %v19169_v46  ;;  %v19303_v56 = vld [vmem:[#allocation16 + $0x14] ss:$8 sps:$4 sm:$0xff]   ;;  %v19301_v46 = vld [vmem:[#allocation16 + $0x10] ss:$8 sps:$4 sm:$0xff]  }
0x1366   :  { %12986 = vmatprep.subr.bf16.mxu1 %v19174_v40  ;;  %13068 = vmatprep.subr.bf16.mxu0 %v19177_v10  ;;  %v19306_v40 = vld [vmem:[#allocation16 + $0x24] ss:$8 sps:$4 sm:$0xff]   ;;  %v19304_v10 = vld [vmem:[#allocation16 + $0x20] ss:$8 sps:$4 sm:$0xff]  }
0x1369   :  { %12987 = vmatpush1.bf16.msra.mxu1 %v19172_v20  ;;  %13069 = vmatpush1.bf16.msra.mxu0 %v19175_v13  ;;  %v19309_v20 = vld [vmem:[#allocation16 + $0x34] ss:$8 sps:$4 sm:$0xff]   ;;  %v19307_v13 = vld [vmem:[#allocation16 + $0x30] ss:$8 sps:$4 sm:$0xff]  }
0x136a   :  { %12988 = vmatprep.subr.bf16.mxu1 %v19180_v47  ;;  %13070 = vmatprep.subr.bf16.mxu0 %v19183_v36  ;;  %v19312_v47 = vld [vmem:[#allocation16 + $0x44] ss:$8 sps:$4 sm:$0xff]   ;;  %v19310_v36 = vld [vmem:[#allocation16 + $0x40] ss:$8 sps:$4 sm:$0xff]  }
0x136d   :  { %12989 = vmatpush1.bf16.msra.mxu1 %v19178_v28  ;;  %13071 = vmatpush1.bf16.msra.mxu0 %v19181_v31  ;;  %v19315_v28 = vld [vmem:[#allocation16 + $0x54] ss:$8 sps:$4 sm:$0xff]   ;;  %v19313_v31 = vld [vmem:[#allocation16 + $0x50] ss:$8 sps:$4 sm:$0xff]  }
0x136e   :  { %12990 = vmatprep.subr.bf16.mxu1 %v19186_v6  ;;  %13072 = vmatprep.subr.bf16.mxu0 %v19189_v17  ;;  %v19318_v6 = vld [vmem:[#allocation16 + $0x64] ss:$8 sps:$4 sm:$0xff]   ;;  %v19316_v17 = vld [vmem:[#allocation16 + $0x60] ss:$8 sps:$4 sm:$0xff]  }
0x1371   :  { %12991 = vmatpush1.bf16.msra.mxu1 %v19184_v19  ;;  %13073 = vmatpush1.bf16.msra.mxu0 %v19187_v5  ;;  %v19321_v19 = vld [vmem:[#allocation16 + $0x74] ss:$8 sps:$4 sm:$0xff]   ;;  %v19319_v5 = vld [vmem:[#allocation16 + $0x70] ss:$8 sps:$4 sm:$0xff]  }
0x1372   :  { %12992 = vmatprep.subr.bf16.mxu1 %v19192_v49  ;;  %13074 = vmatprep.subr.bf16.mxu0 %v19195_v45  ;;  %v19324_v49 = vld [vmem:[#allocation16 + $0x84] ss:$8 sps:$4 sm:$0xff]   ;;  %v19322_v45 = vld [vmem:[#allocation16 + $0x80] ss:$8 sps:$4 sm:$0xff]  }
0x1375   :  { %12993 = vmatpush1.bf16.msra.mxu1 %v19190_v9  ;;  %13075 = vmatpush1.bf16.msra.mxu0 %v19193_v34  ;;  %v19327_v9 = vld [vmem:[#allocation16 + $0x94] ss:$8 sps:$4 sm:$0xff]   ;;  %v19325_v34 = vld [vmem:[#allocation16 + $0x90] ss:$8 sps:$4 sm:$0xff]  }
0x1376   :  { %12994 = vmatprep.subr.bf16.mxu1 %v19198_v29  ;;  %13076 = vmatprep.subr.bf16.mxu0 %v19201_v11  ;;  %v19328_v29 = vld [vmem:[#allocation16 + $0xa0] ss:$8 sps:$4 sm:$0xff]   ;;  %v19333_v11 = vld [vmem:[#allocation16 + $0xb4] ss:$8 sps:$4 sm:$0xff]  }
0x1379   :  { %12995 = vmatpush1.bf16.msra.mxu1 %v19196_v57  ;;  %13077 = vmatpush1.bf16.msra.mxu0 %v19199_v2  ;;  %v19331_v57 = vld [vmem:[#allocation16 + $0xb0] ss:$8 sps:$4 sm:$0xff]   ;;  %v19336_v2 = vld [vmem:[#allocation16 + $0xc4] ss:$8 sps:$4 sm:$0xff]  }
0x137a   :  { %13424 = vmatprep.subr.bf16.mxu1 %v19204_v52  ;;  %13715 = vmatprep.subr.bf16.mxu0 %v19300_v42  ;;  %v19339_v52 = vld [vmem:[#allocation16 + $0xd4] ss:$8 sps:$4 sm:$0xff]   ;;  %v19274_v42 = vld [vmem:[#allocation14 + $0x7a0] ss:$40 sps:$4 sm:$0xff]  }
0x137c   :  { %12997 = vmatmul.mubr.bf16.vlgmr.msra.gmra.mrb[172].mxu1 %v12258_v63  ;;  %13079 = vmatmul.mubr.bf16.vlgmr.msra.gmra.mrb[140].mxu0 %v12258_v63  ;;  %v19337_v63 = vld [vmem:[#allocation16 + $0xd0] ss:$8 sps:$4 sm:$0xff]  }
0x137d   :  { %13425 = vmatpush1.bf16.msra.mxu1 %v19202_v51  ;;  %13716 = vmatpush1.bf16.msra.mxu0 %v19298_v8  ;;  %v22064_v51 = vld [vmem:[#allocation19 + $0x5] ss:$8 sm:$0xf] }
0x137e   :  { %13426 = vmatprep.subr.bf16.mxu1 %v19207_v54  ;;  %13717 = vmatprep.subr.bf16.mxu0 %v19303_v56  ;;  %v12266_v54 = vrot.slane %v22064_v51, %v22030_v22  ;;  %v19276_v8 = vld [vmem:[#allocation14 + $0x7a4] ss:$40 sps:$4 sm:$0xff]   ;;  %v19279_v56 = vld [vmem:[#allocation14 + $0x7f4] ss:$40 sps:$4 sm:$0xff]  }
0x1381   :  { %13427 = vmatpush1.bf16.msra.mxu1 %v19205_v3  ;;  %13718 = vmatpush1.bf16.msra.mxu0 %v19301_v46  ;;  %v12270_v3 = vrot.slane %v22064_v51, %v22035_v53  ;;  %v19277_v46 = vld [vmem:[#allocation14 + $0x7f0] ss:$40 sps:$4 sm:$0xff]  }
0x1382   :  { %13428 = vmatprep.subr.bf16.mxu1 %v19210_v48  ;;  %13719 = vmatprep.subr.bf16.mxu0 %v19306_v40  ;;  %v12278_v48 = vrot.slane %v22064_v51, %v22045_v35  ;;  %v19282_v40 = vld [vmem:[#allocation14 + $0x844] ss:$40 sps:$4 sm:$0xff]  }
0x1385   :  { %13429 = vmatpush1.bf16.msra.mxu1 %v19208_v33  ;;  %13720 = vmatpush1.bf16.msra.mxu0 %v19304_v10  ;;  %v19280_v10 = vld [vmem:[#allocation14 + $0x840] ss:$40 sps:$4 sm:$0xff]  }
0x1386   :  { %13430 = vmatprep.subr.bf16.mxu1 %v19213_v55  ;;  %13721 = vmatprep.subr.bf16.mxu0 %v19309_v20  ;;  %v19285_v20 = vld [vmem:[#allocation14 + $0x894] ss:$40 sps:$4 sm:$0xff]  }
0x1389   :  { %13431 = vmatpush1.bf16.msra.mxu1 %v19211_v16  ;;  %13722 = vmatpush1.bf16.msra.mxu0 %v19307_v13  ;;  %v19283_v13 = vld [vmem:[#allocation14 + $0x890] ss:$40 sps:$4 sm:$0xff]  }
0x138a   :  { %13432 = vmatprep.subr.bf16.mxu1 %v19216_v1  ;;  %13723 = vmatprep.subr.bf16.mxu0 %v19312_v47  ;;  %v19288_v47 = vld [vmem:[#allocation14 + $0x8e4] ss:$40 sps:$4 sm:$0xff]  }
0x138d   :  { %13433 = vmatpush1.bf16.msra.mxu1 %v19214_v23  ;;  %13724 = vmatpush1.bf16.msra.mxu0 %v19310_v36  ;;  %v19286_v36 = vld [vmem:[#allocation14 + $0x8e0] ss:$40 sps:$4 sm:$0xff]  }
0x138e   :  { %13434 = vmatprep.subr.bf16.mxu1 %v19219_v14  ;;  %13725 = vmatprep.subr.bf16.mxu0 %v19315_v28  ;;  %v19291_v28 = vld [vmem:[#allocation14 + $0x934] ss:$40 sps:$4 sm:$0xff]  }
0x1391   :  { %13435 = vmatpush1.bf16.msra.mxu1 %v19217_v12  ;;  %13726 = vmatpush1.bf16.msra.mxu0 %v19313_v31  ;;  %v19289_v31 = vld [vmem:[#allocation14 + $0x930] ss:$40 sps:$4 sm:$0xff]  }
0x1392   :  { %13436 = vmatprep.subr.bf16.mxu1 %v19222_v50  ;;  %13727 = vmatprep.subr.bf16.mxu0 %v19318_v6  ;;  %v19294_v6 = vld [vmem:[#allocation14 + $0x984] ss:$40 sps:$4 sm:$0xff]  }
0x1395   :  { %13437 = vmatpush1.bf16.msra.mxu1 %v19220_v4  ;;  %13728 = vmatpush1.bf16.msra.mxu0 %v19316_v17  ;;  %v19292_v17 = vld [vmem:[#allocation14 + $0x980] ss:$40 sps:$4 sm:$0xff]  }
0x1396   :  { %13438 = vmatprep.subr.bf16.mxu1 %v19225_v60  ;;  %13729 = vmatprep.subr.bf16.mxu0 %v19321_v19  ;;  %v12274_v19 = vrot.slane %v22064_v51, %v22042_v21  ;;  %v19346_v21 = vld [vmem:[#allocation17 + $0xc0] sm:$0xff]   ;;  %v19382_v51 = vld [vmem:[#allocation17 + $0x50] sm:$0xff]  }
0x1399   :  { %13439 = vmatpush1.bf16.msra.mxu1 %v19223_v30  ;;  %13730 = vmatpush1.bf16.msra.mxu0 %v19319_v5  ;;  %v19297_v5 = vld [vmem:[#allocation14 + $0x9d4] ss:$40 sps:$4 sm:$0xff]  }
0x139a   :  { %13440 = vmatprep.subr.bf16.mxu1 %v19228_v62  ;;  %13731 = vmatprep.subr.bf16.mxu0 %v19324_v49  ;;  %v19295_v49 = vld [vmem:[#allocation14 + $0x9d0] ss:$40 sps:$4 sm:$0xff]  }
0x139d   :  { %13441 = vmatpush1.bf16.msra.mxu1 %v19226_v24  ;;  %13732 = vmatpush1.bf16.msra.mxu0 %v19322_v45  ;;  %v19250_v24 = vld [vmem:[#allocation14 + $0x520] ss:$40 sps:$4 sm:$0xff]  }
0x139e   :  { %13442 = vmatprep.subr.bf16.mxu1 %v19231_v59  ;;  %13733 = vmatprep.subr.bf16.mxu0 %v19327_v9 }
0x13a1   :  { %13443 = vmatpush1.bf16.msra.mxu1 %v19229_v25  ;;  %13734 = vmatpush1.bf16.msra.mxu0 %v19325_v34  ;;  %v19255_v25 = vld [vmem:[#allocation14 + $0x574] ss:$40 sps:$4 sm:$0xff]   ;;  %v19342_v34 = vld [vmem:[#allocation16 + $0xe4] ss:$8 sps:$4 sm:$0xff]  }
0x13a2   :  { %13444 = vmatprep.subr.bf16.mxu1 %v19234_v18  ;;  %13735 = vmatprep.subr.bf16.mxu0 %v19330_v43  ;;  %v19253_v18 = vld [vmem:[#allocation14 + $0x570] ss:$40 sps:$4 sm:$0xff]   ;;  %v19340_v43 = vld [vmem:[#allocation16 + $0xe0] ss:$8 sps:$4 sm:$0xff]  }
0x13a5   :  { %13445 = vmatpush1.bf16.msra.mxu1 %v19232_v38  ;;  %13736 = vmatpush1.bf16.msra.mxu0 %v19328_v29  ;;  %v19258_v38 = vld [vmem:[#allocation14 + $0x5c4] ss:$40 sps:$4 sm:$0xff]   ;;  %v19345_v29 = vld [vmem:[#allocation16 + $0xf4] ss:$8 sps:$4 sm:$0xff]  }
0x13a6   :  { %13446 = vmatprep.subr.bf16.mxu1 %v19237_v26  ;;  %13737 = vmatprep.subr.bf16.mxu0 %v19333_v11  ;;  %v19256_v26 = vld [vmem:[#allocation14 + $0x5c0] ss:$40 sps:$4 sm:$0xff]   ;;  %v19343_v11 = vld [vmem:[#allocation16 + $0xf0] ss:$8 sps:$4 sm:$0xff]  }
0x13a9   :  { %13447 = vmatpush1.bf16.msra.mxu1 %v19235_v41  ;;  %13738 = vmatpush1.bf16.msra.mxu0 %v19331_v57  ;;  %v19261_v41 = vld [vmem:[#allocation14 + $0x614] ss:$40 sps:$4 sm:$0xff]   ;;  %v19378_v57 = vld [vmem:[#allocation17 + $0x40] sm:$0xff]  }
0x13aa   :  { %13448 = vmatprep.subr.bf16.mxu1 %v19240_v32  ;;  %13739 = vmatprep.subr.bf16.mxu0 %v19336_v2  ;;  %v19259_v32 = vld [vmem:[#allocation14 + $0x610] ss:$40 sps:$4 sm:$0xff]   ;;  %v19379_v2 = vld [vmem:[#allocation17] sm:$0xff]  }
0x13ad   :  { %13449 = vmatpush1.bf16.msra.mxu1 %v19238_v44  ;;  %13740 = vmatpush1.bf16.msra.mxu0 %v19334_v61  ;;  %v19264_v44 = vld [vmem:[#allocation14 + $0x664] ss:$40 sps:$4 sm:$0xff]  }
0x13ae   :  { %13450 = vmatprep.subr.bf16.mxu1 %v19243_v0  ;;  %13741 = vmatprep.subr.bf16.mxu0 %v19339_v52  ;;  %v19262_v0 = vld [vmem:[#allocation14 + $0x660] ss:$40 sps:$4 sm:$0xff]  }
0x13af   :  { %v19380_v61 = vld [vmem:[#allocation17 + $0x48] sm:$0xff]  }
0x13b0   :  { %v19381_v52 = vld [vmem:[#allocation17 + $0x8] sm:$0xff]  }
0x13b1   :  { %13451 = vmatpush1.bf16.msra.mxu1 %v19241_v27  ;;  %13742 = vmatpush1.bf16.msra.mxu0 %v19337_v63  ;;  %v19267_v27 = vld [vmem:[#allocation14 + $0x6b4] ss:$40 sps:$4 sm:$0xff]  }
0x13b2   :  { %13452 = vmatprep.subr.bf16.mxu1 %v19246_v15  ;;  %v19265_v15 = vld [vmem:[#allocation14 + $0x6b0] ss:$40 sps:$4 sm:$0xff]   ;;  %13743 = vmatprep.subr.bf16.mxu0 %v19342_v34 }
0x13b3   :  { %v19383_v63 = vld [vmem:[#allocation17 + $0x10] sm:$0xff]  }
0x13b4   :  { %v19390_v34 = vld [vmem:[#allocation17 + $0x70] sm:$0xff]  }
0x13b5   :  { %13453 = vmatpush1.bf16.msra.mxu1 %v19244_v37  ;;  %v19270_v37 = vld [vmem:[#allocation14 + $0x704] ss:$40 sps:$4 sm:$0xff]   ;;  %13744 = vmatpush1.bf16.msra.mxu0 %v19340_v43  ;;  %v19391_v43 = vld [vmem:[#allocation17 + $0x30] sm:$0xff]  }
0x13b6   :  { %13454 = vmatprep.subr.bf16.mxu1 %v19249_v7  ;;  %v19268_v7 = vld [vmem:[#allocation14 + $0x700] ss:$40 sps:$4 sm:$0xff]   ;;  %13745 = vmatprep.subr.bf16.mxu0 %v19345_v29  ;;  %v19392_v29 = vld [vmem:[#allocation17 + $0x78] sm:$0xff]  }
0x13b9   :  { %13455 = vmatpush1.bf16.msra.mxu1 %v19247_v58  ;;  %v19273_v58 = vld [vmem:[#allocation14 + $0x754] ss:$40 sps:$4 sm:$0xff]   ;;  %13746 = vmatpush1.bf16.msra.mxu0 %v19343_v11 }
0x13ba   :  { %13465 = vmatprep.subr.bf16.mxu1 %v19252_v39  ;;  %v19271_v39 = vld [vmem:[#allocation14 + $0x750] ss:$40 sps:$4 sm:$0xff]   ;;  %16950 = vmatprep.subr.bf16.mxu0 %v19346_v21  ;;  %v13543_v21 = vld [vmem:[#allocation19 + $0x7] ss:$8 sm:$0x3] }
0x13bb   :  { %v19393_v11 = vld [vmem:[#allocation17 + $0x38] sm:$0xff]  }
0x144f   :  { %v12998_v33 = vpop.f32.mrb[172].mxu1  ;;  %v22072_v55 = vpop.f32.mrb[140].mxu0 }
0x1450   :  { %v17630_v16 = vadd.f32 %v12998_v33, %v12266_v54  ;;  %v13000_v1 = vpop.f32.mrb[173].mxu1  ;;  %v13082_v23 = vpop.f32.mrb[141].mxu0  ;;  %v17632_v45 = vadd.f32 %v22072_v55, %v12274_v19  ;;  %v19384_v54 = vld [vmem:[#allocation17 + $0x58] sm:$0xff]   ;;  %v19387_v33 = vld [vmem:[#allocation17 + $0x20] sm:$0xff]   ;;  %v19388_v55 = vld [vmem:[#allocation17 + $0x68] sm:$0xff]  }
0x1451   :  { %v17631_v14 = vadd.f32 %v13000_v1, %v12270_v3  ;;  %v17633_v12 = vadd.f32 %v13082_v23, %v12278_v48  ;;  %v13002_v50 = vpop.f32.mrb[174].mxu1  ;;  %v13084_v4 = vpop.f32.mrb[142].mxu0  ;;  %v19385_v3 = vld [vmem:[#allocation17 + $0x18] sm:$0xff]   ;;  %v19386_v48 = vld [vmem:[#allocation17 + $0x60] sm:$0xff]   ;;  %v19372_v19 = vld [vmem:[#allocation17 + $0x168] sm:$0xff]  }
0x1452   :  { %v13003_v60 = vpop.f32.mrb[175].mxu1  ;;  %v13085_v30 = vpop.f32.mrb[143].mxu0  ;;  %v22076_v59 = vpack.c.bf16 %v17630_v16, %v17630_v16  ;;  %v22086_v9 = vpack.c.bf16 %v17632_v45, %v17632_v45  ;;  %v19389_v16 = vld [vmem:[#allocation17 + $0x28] sm:$0xff]   ;;  %v19377_v45 = vld [vmem:[#allocation17 + $0x138] sm:$0xff]  }
0x1453   :  { %v22074_v62 = vpack.c.bf16 %v17631_v14, %v17631_v14  ;;  %v22078_v35 = vpack.c.bf16 %v17633_v12, %v17633_v12  ;;  %v13092_v1 = vld [vmem:[#allocation19 + $0x6] ss:$8 sm:$0x3] }
0x1454   :  { %v13097_v23 = vrot.slane %v13092_v1, %v22030_v22  ;;  %v13101_v14 = vrot.slane %v13092_v1, %v22035_v53 }
0x1455   :  { %13456 = vmatprep.mubr.bf16.mxu1 %v22074_v62 }
0x1456   :  { %13457 = vmatmul.mubr.bf16.vlgmr.msra.gmra.mrb[176].mxu1 %v22076_v59 }
0x1457   :  { %13466 = vmatpush1.bf16.msra.mxu1 %v19250_v24  ;;  %13497 = vmatprep.mubr.bf16.mxu1 %v22078_v35 }
0x1458   :  { %13467 = vmatprep.subr.bf16.mxu1 %v19255_v25 }
0x145b   :  { %13468 = vmatpush1.bf16.msra.mxu1 %v19253_v18 }
0x145c   :  { %13469 = vmatprep.subr.bf16.mxu1 %v19258_v38 }
0x145f   :  { %13470 = vmatpush1.bf16.msra.mxu1 %v19256_v26  ;;  %v19347_v26 = vld [vmem:[#allocation17 + $0x80] sm:$0xff]  }
0x1460   :  { %13471 = vmatprep.subr.bf16.mxu1 %v19261_v41 }
0x1463   :  { %13472 = vmatpush1.bf16.msra.mxu1 %v19259_v32  ;;  %v19348_v32 = vld [vmem:[#allocation17 + $0xc8] sm:$0xff]  }
0x1464   :  { %13473 = vmatprep.subr.bf16.mxu1 %v19264_v44  ;;  %v19349_v44 = vld [vmem:[#allocation17 + $0x88] sm:$0xff]  }
0x1467   :  { %13474 = vmatpush1.bf16.msra.mxu1 %v19262_v0  ;;  %v19350_v0 = vld [vmem:[#allocation17 + $0xd0] sm:$0xff]  }
0x1468   :  { %13475 = vmatprep.subr.bf16.mxu1 %v19267_v27  ;;  %v19351_v27 = vld [vmem:[#allocation17 + $0x90] sm:$0xff]  }
0x146b   :  { %13476 = vmatpush1.bf16.msra.mxu1 %v19265_v15  ;;  %v19352_v15 = vld [vmem:[#allocation17 + $0xd8] sm:$0xff]  }
0x146c   :  { %13477 = vmatprep.subr.bf16.mxu1 %v19270_v37  ;;  %v19353_v37 = vld [vmem:[#allocation17 + $0x98] sm:$0xff]  }
0x146f   :  { %13478 = vmatpush1.bf16.msra.mxu1 %v19268_v7  ;;  %v19354_v7 = vld [vmem:[#allocation17 + $0xe0] sm:$0xff]  }
0x1470   :  { %13479 = vmatprep.subr.bf16.mxu1 %v19273_v58  ;;  %v19355_v58 = vld [vmem:[#allocation17 + $0xa0] sm:$0xff]  }
0x1473   :  { %13480 = vmatpush1.bf16.msra.mxu1 %v19271_v39  ;;  %v19356_v39 = vld [vmem:[#allocation17 + $0xe8] sm:$0xff]  }
0x1474   :  { %13481 = vmatprep.subr.bf16.mxu1 %v19276_v8  ;;  %v19357_v8 = vld [vmem:[#allocation17 + $0xa8] sm:$0xff]  }
0x1477   :  { %13482 = vmatpush1.bf16.msra.mxu1 %v19274_v42  ;;  %v19358_v42 = vld [vmem:[#allocation17 + $0xf0] sm:$0xff]  }
0x1478   :  { %13483 = vmatprep.subr.bf16.mxu1 %v19279_v56  ;;  %v19360_v56 = vld [vmem:[#allocation17 + $0xf8] sm:$0xff]  }
0x147b   :  { %13484 = vmatpush1.bf16.msra.mxu1 %v19277_v46  ;;  %v19361_v46 = vld [vmem:[#allocation17 + $0xb8] sm:$0xff]  }
0x147c   :  { %13485 = vmatprep.subr.bf16.mxu1 %v19282_v40  ;;  %v19362_v40 = vld [vmem:[#allocation17 + $0x140] sm:$0xff]  }
0x147f   :  { %13486 = vmatpush1.bf16.msra.mxu1 %v19280_v10  ;;  %v19363_v10 = vld [vmem:[#allocation17 + $0x100] sm:$0xff]  }
0x1480   :  { %13487 = vmatprep.subr.bf16.mxu1 %v19285_v20  ;;  %v19364_v20 = vld [vmem:[#allocation17 + $0x148] sm:$0xff]  }
0x1483   :  { %13488 = vmatpush1.bf16.msra.mxu1 %v19283_v13  ;;  %v19365_v13 = vld [vmem:[#allocation17 + $0x108] sm:$0xff]  }
0x1484   :  { %13489 = vmatprep.subr.bf16.mxu1 %v19288_v47  ;;  %v19366_v47 = vld [vmem:[#allocation17 + $0x150] sm:$0xff]  }
0x1487   :  { %13490 = vmatpush1.bf16.msra.mxu1 %v19286_v36  ;;  %v19367_v36 = vld [vmem:[#allocation17 + $0x110] sm:$0xff]  }
0x1488   :  { %13491 = vmatprep.subr.bf16.mxu1 %v19291_v28  ;;  %v19368_v28 = vld [vmem:[#allocation17 + $0x158] sm:$0xff]  }
0x148b   :  { %13492 = vmatpush1.bf16.msra.mxu1 %v19289_v31  ;;  %v19369_v31 = vld [vmem:[#allocation17 + $0x118] sm:$0xff]  }
0x148c   :  { %13493 = vmatprep.subr.bf16.mxu1 %v19294_v6  ;;  %v19370_v6 = vld [vmem:[#allocation17 + $0x160] sm:$0xff]  }
0x148f   :  { %13494 = vmatpush1.bf16.msra.mxu1 %v19292_v17  ;;  %v19371_v17 = vld [vmem:[#allocation17 + $0x120] sm:$0xff]  }
0x1490   :  { %13495 = vmatprep.subr.bf16.mxu1 %v19297_v5  ;;  %v19374_v5 = vld [vmem:[#allocation17 + $0x170] sm:$0xff]  }
0x1493   :  { %13496 = vmatpush1.bf16.msra.mxu1 %v19295_v49  ;;  %v19376_v49 = vld [vmem:[#allocation17 + $0x178] sm:$0xff]  }
0x1494   :  { %16994 = vmatprep.subr.bf16.mxu1 %v19378_v57  ;;  %v13548_v57 = vrot.slane %v13543_v21, %v22030_v22 }
0x1496   :  { %13498 = vmatmul.mubr.bf16.vlgmr.msra.gmra.mrb[176].mxu1 %v22086_v9 }
0x1497   :  { %16995 = vmatpush3.bf16.msra.mxu1 %v19379_v2  ;;  %v13552_v2 = vrot.slane %v13543_v21, %v22035_v53 }
0x1498   :  { %16996 = vmatprep.subr.bf16.mxu1 %v19380_v61 }
0x149b   :  { %16997 = vmatpush3.bf16.msra.mxu1 %v19381_v52 }
0x149c   :  { %16998 = vmatprep.subr.bf16.mxu1 %v19382_v51 }
0x149f   :  { %16999 = vmatpush3.bf16.msra.mxu1 %v19383_v63 }
0x14a0   :  { %17000 = vmatprep.subr.bf16.mxu1 %v19384_v54 }
0x14a3   :  { %17001 = vmatpush3.bf16.msra.mxu1 %v19385_v3 }
0x14a4   :  { %17002 = vmatprep.subr.bf16.mxu1 %v19386_v48 }
0x14a7   :  { %17003 = vmatpush3.bf16.msra.mxu1 %v19387_v33 }
0x14a8   :  { %17004 = vmatprep.subr.bf16.mxu1 %v19388_v55 }
0x14ab   :  { %17005 = vmatpush3.bf16.msra.mxu1 %v19389_v16 }
0x14ac   :  { %17006 = vmatprep.subr.bf16.mxu1 %v19390_v34 }
0x14af   :  { %17007 = vmatpush3.bf16.msra.mxu1 %v19391_v43 }
0x14b0   :  { %17008 = vmatprep.subr.bf16.mxu1 %v19392_v29 }
0x14b3   :  { %17009 = vmatpush3.bf16.msra.mxu1 %v19393_v11 }
0x1569   :  { %v13499_v12 = vpop.f32.mrb[176].mxu1 }
0x156a   :  { %v17634_v50 = vadd.f32 %v13499_v12, %v13097_v23  ;;  %v13501_v4 = vpop.f32.mrb[177].mxu1 }
0x156b   :  { %v17635_v60 = vadd.f32 %v13501_v4, %v13101_v14  ;;  %v13503_v30 = vpop.f32.mrb[178].mxu1 }
0x156c   :  { %v13506_v24 = vmax.f32 %v17634_v50, 0.0  ;;  %v13504_v25 = vpop.f32.mrb[179].mxu1 }
0x156d   :  { %v13507_v18 = vmax.f32 %v17635_v60, 0.0 }
0x156e   :  { %v13508_v41 = vpack.c.bf16 %v13506_v24, %v13506_v24 }
0x156f   :  { %v13509_v38 = vpack.c.bf16 %v13507_v18, %v13507_v18 }
0x1571   :  { %13747 = vmatprep.mubr.bf16.mxu0 %v13509_v38 }
0x1572   :  { %13748 = vmatmul.mubr.bf16.vlgmr.msra.gmra.mrb[144].mxu0 %v13508_v41 }
0x1573   :  { %16951 = vmatpush3.bf16.msra.mxu0 %v19347_v26  ;;  %14080 = vmatprep.mubr.bf16.mxu0 %v22074_v62  ;;  %v19359_v62 = vld [vmem:[#allocation17 + $0xb0] sm:$0xff]   ;;  %v14264_v26 = vld [vmem:[#allocation19 + $0x20] ss:$0 sm:$0xff] }
0x1574   :  { %16952 = vmatprep.subr.bf16.mxu0 %v19348_v32 }
0x1577   :  { %16953 = vmatpush3.bf16.msra.mxu0 %v19349_v44 }
0x1578   :  { %16954 = vmatprep.subr.bf16.mxu0 %v19350_v0 }
0x157b   :  { %16955 = vmatpush3.bf16.msra.mxu0 %v19351_v27 }
0x157c   :  { %16956 = vmatprep.subr.bf16.mxu0 %v19352_v15 }
0x157f   :  { %16957 = vmatpush3.bf16.msra.mxu0 %v19353_v37 }
0x1580   :  { %16958 = vmatprep.subr.bf16.mxu0 %v19354_v7 }
0x1583   :  { %16959 = vmatpush3.bf16.msra.mxu0 %v19355_v58 }
0x1584   :  { %16960 = vmatprep.subr.bf16.mxu0 %v19356_v39 }
0x1587   :  { %16961 = vmatpush3.bf16.msra.mxu0 %v19357_v8 }
0x1588   :  { %16962 = vmatprep.subr.bf16.mxu0 %v19358_v42 }
0x158b   :  { %16963 = vmatpush3.bf16.msra.mxu0 %v19359_v62 }
0x158c   :  { %16964 = vmatprep.subr.bf16.mxu0 %v19360_v56 }
0x158f   :  { %16965 = vmatpush3.bf16.msra.mxu0 %v19361_v46 }
0x1590   :  { %16972 = vmatprep.subr.bf16.mxu0 %v19362_v40 }
0x1592   :  { %14081 = vmatmul.mubr.bf16.vlgmr.msra.gmra.mrb[148].mxu0 %v22076_v59  ;;  %v19373_v59 = vld [vmem:[#allocation17 + $0x128] sm:$0xff]  }
0x1593   :  { %16973 = vmatpush3.bf16.msra.mxu0 %v19363_v10  ;;  %14120 = vmatprep.mubr.bf16.mxu0 %v22078_v35  ;;  %v19375_v35 = vld [vmem:[#allocation17 + $0x130] sm:$0xff]  }
0x1594   :  { %16974 = vmatprep.subr.bf16.mxu0 %v19364_v20 }
0x1597   :  { %16975 = vmatpush3.bf16.msra.mxu0 %v19365_v13 }
0x1598   :  { %16976 = vmatprep.subr.bf16.mxu0 %v19366_v47 }
0x159b   :  { %16977 = vmatpush3.bf16.msra.mxu0 %v19367_v36 }
0x159c   :  { %16978 = vmatprep.subr.bf16.mxu0 %v19368_v28 }
0x159f   :  { %16979 = vmatpush3.bf16.msra.mxu0 %v19369_v31 }
0x15a0   :  { %16980 = vmatprep.subr.bf16.mxu0 %v19370_v6 }
0x15a3   :  { %16981 = vmatpush3.bf16.msra.mxu0 %v19371_v17 }
0x15a4   :  { %16982 = vmatprep.subr.bf16.mxu0 %v19372_v19 }
0x15a7   :  { %16983 = vmatpush3.bf16.msra.mxu0 %v19373_v59 }
0x15a8   :  { %16984 = vmatprep.subr.bf16.mxu0 %v19374_v5 }
0x15ab   :  { %16985 = vmatpush3.bf16.msra.mxu0 %v19375_v35 }
0x15ac   :  { %16986 = vmatprep.subr.bf16.mxu0 %v19376_v49 }
0x15af   :  { %16987 = vmatpush3.bf16.msra.mxu0 %v19377_v45 }
0x15b2   :  { %14121 = vmatmul.mubr.bf16.vlgmr.msra.gmra.mrb[152].mxu0 %v22086_v9 }
0x1645   :  { %v13749_v61 = vpop.f32.mrb[144].mxu0 }
0x1646   :  { %v13750_v52 = vadd.f32 %v13749_v61, %v13548_v57  ;;  %v13751_v51 = vpop.f32.mrb[145].mxu0 }
0x1647   :  { %v13752_v63 = vadd.f32 %v13751_v51, %v13552_v2  ;;  %v13753_v54 = vpop.f32.mrb[146].mxu0 }
0x1648   :  { %v13756_v3 = vmax.f32 %v13750_v52, 0.0  ;;  %v13754_v9 = vpop.f32.mrb[147].mxu0 }
0x1649   :  { %v13757_v48 = vmax.f32 %v13752_v63, 0.0 }
0x164a   :  { %v13758_v55 = vpack.c.bf16 %v13756_v3, %v13756_v3 }
0x164b   :  { %v13759_v33 = vpack.c.bf16 %v13757_v48, %v13757_v48 }
0x164d   :  { %14256 = vmatprep.mubr.bf16.mxu1 %v13759_v33 }
0x164e   :  { %14257 = vmatmul.mubr.bf16.vlgmr.msra.gmra.mrb[180].mxu1 %v13758_v55 }
0x1665   :  { %v16966_v16 = vpop.f32.mrb[148].mxu0 }
0x1666   :  { %v16967_v1 = vpop.f32.mrb[149].mxu0 }
0x1667   :  { %v16968_v23 = vadd.f32 %v16967_v1, %v16966_v16  ;;  %v16969_v14 = vpop.f32.mrb[150].mxu0 }
0x1668   :  { %v16970_v12 = vpop.f32.mrb[151].mxu0 }
0x1685   :  { %v16988_v22 = vpop.f32.mrb[152].mxu0 }
0x1686   :  { %v16989_v50 = vpop.f32.mrb[153].mxu0 }
0x1687   :  { %v16990_v53 = vadd.f32 %v16989_v50, %v16988_v22  ;;  %v16991_v4 = vpop.f32.mrb[154].mxu0 }
0x1688   :  { %v16992_v60 = vpop.f32.mrb[155].mxu0 }
0x1689   :  { %v14123_v30 = vadd.f32 %v16990_v53, %v16968_v23 }
0x1721   :  { %v17010_v24 = vpop.f32.mrb[180].mxu1 }
0x1722   :  { %v17011_v25 = vpop.f32.mrb[181].mxu1 }
0x1723   :  { %v17012_v18 = vadd.f32 %v17011_v25, %v17010_v24  ;;  %v17013_v38 = vpop.f32.mrb[182].mxu1 }
0x1724   :  { %v17014_v41 = vpop.f32.mrb[183].mxu1 }
0x1725   :  { %v14259_v32 = vadd.f32 %v17012_v18, %v14123_v30 }
0x1727   :  { %v14265_v44 = vadd.f32 %v14264_v26, %v14259_v32 }
0x1729   :  { %14266 = vst [vmem:[%s22112_s12] sm:$0x3] %v14265_v44 }
0x172a   :  { %14271 = vsyncpa [#allocation4], 1 }
0x172b   :  { %14272 = vsyncpa [#allocation6], 1 }
0x172c   :  { %14273 = vsyncpa [#allocation9], 1 }
0x172d   :  { %14274 = vsyncpa [#allocation12], 1 }
0x172e   :  { %14275 = vsyncpa [#allocation15], 1 }
0x172f   :  { %14276 = vsyncpa [#allocation18], 1 }

</bundles_post_ra>
